<compile_context>
chip_gen: v6e
topology: v6e:2x2x1
jax: 0.10.0
libtpu: 0.0.40
codegen_flags: <defaults>
</compile_context>

<pallas_src>
import functools

import jax
import jax.numpy as jnp
from jax import lax
from jax.experimental import pallas as pl
from jax.experimental.pallas import tpu as pltpu


# Network constants fixed by the PyTorch module (fc1 expects 32*81 features,
# which pins the input to the classic Atari 84x84 -> 20x20 -> 9x9).
IN_HW = 84
K1, S1, OC1, OHW1 = 8, 4, 16, 20
K2, S2, OC2, OHW2 = 4, 2, 32, 9
FC1 = 256
N1 = OHW1 * OC1          # 320: conv1 row width, column index = ow*16 + oc
N2 = OHW2 * OC2          # 288: conv2 row width, column index = j*32  + oc


# ----------------------------------------------------------------------------
# Fused kernel: conv1 + conv2 + fc1 + fc2 for `imgs` images per grid step.
# ----------------------------------------------------------------------------
def _dqn_fused_kernel(x_ref, w1x_ref, b1t_ref, w2x_ref, b2t_ref,
                      wf1_ref, bf1_ref, wf2_ref, bf2_ref, o_ref, *, imgs):
    b1t = b1t_ref[...]            # (1, 320) f32
    b2t = b2t_ref[...]            # (1, 288) f32
    bf1 = bf1_ref[...]            # (1, 256) f32
    bf2 = bf2_ref[...]            # (1, n_pad) f32

    y2_imgs = []                  # per-image conv2 output, (9, 288) bf16
    for img in range(imgs):
        # ---- conv1: output rows split by parity, oh = 2*m + p, m = 0..9 ----
        # Input layout: x_ref[img, h % 8, h // 8, w*C + c]; needed rows for
        # (parity p, kernel row di) are h = 8*m + (4*p + di), a unit-stride
        # slice along the h//8 axis.  The W/channel window lives inside the
        # banded expanded weight w1x[di] of shape (84*C, 320).
        y1 = []
        for p in range(2):
            acc = jnp.zeros((10, N1), jnp.float32)
            for di in range(K1):
                q = 4 * p + di
                if q < 8:
                    rows = x_ref[img, q, 0:10, :]          # (10, 84*C) bf16
                else:
                    rows = x_ref[img, q - 8, 1:11, :]
                acc = acc + jnp.dot(rows, w1x_ref[di],
                                    preferred_element_type=jnp.float32)
            y1.append(jnp.maximum(acc + b1t, 0.0).astype(jnp.bfloat16))

        # ---- conv2: rows 2*i + di2 are unit-stride slices of y1[parity] ----
        acc2 = jnp.zeros((9, N2), jnp.float32)
        for di2 in range(K2):
            par, blk = di2 % 2, di2 // 2
            acc2 = acc2 + jnp.dot(y1[par][blk:blk + 9, :], w2x_ref[di2],
                                  preferred_element_type=jnp.float32)
        y2_imgs.append(jnp.maximum(acc2 + b2t, 0.0).astype(jnp.bfloat16))

    # ---- fc1 (+ReLU) and fc2, batched over the images of this block -------
    # fc1 is consumed row-chunk by row-chunk (9 aligned K=288 matmuls), so the
    # (9, 288) conv2 output never needs an in-kernel flatten/reshape.
    h = jnp.zeros((imgs, FC1), jnp.float32)
    for i in range(OHW2):
        ri = jnp.concatenate([y2[i:i + 1, :] for y2 in y2_imgs], axis=0)
        h = h + jnp.dot(ri, wf1_ref[i * N2:(i + 1) * N2, :],
                        preferred_element_type=jnp.float32)
    h = jnp.maximum(h + bf1, 0.0).astype(jnp.bfloat16)
    out = jnp.dot(h, wf2_ref[...], preferred_element_type=jnp.float32) + bf2
    for img in range(imgs):
        o_ref[img] = out[img:img + 1, :]                   # (1, n_pad) store


# ----------------------------------------------------------------------------
# Parameter preparation (one-time layout / dtype transforms, host-side)
# ----------------------------------------------------------------------------
def _expand_conv_weight(w, in_w, out_w, stride):
    """w: [OC, IC, K, K] -> banded matmul weights [K, in_w*IC, out_w*OC].

    out[di, wp*IC + ic, ow*OC + oc] = w[oc, ic, di, wp - stride*ow] (0 outside
    the kernel window), so for a fixed kernel row di a dense (M, in_w*IC) @
    out[di] matmul performs the convolution over the W and channel dims.
    """
    oc_n, ic_n, kh, kw = w.shape
    wp = jnp.arange(in_w)[:, None]
    ow = jnp.arange(out_w)[None, :]
    dj = wp - stride * ow                                  # (in_w, out_w)
    valid = (dj >= 0) & (dj < kw)
    wt = jnp.transpose(w, (2, 3, 1, 0))                    # (kh, kw, ic, oc)
    wx = wt[:, jnp.clip(dj, 0, kw - 1)]                    # (kh,in_w,out_w,ic,oc)
    wx = wx * valid[None, :, :, None, None]
    wx = jnp.transpose(wx, (0, 1, 3, 2, 4))                # (kh,in_w,ic,out_w,oc)
    return wx.reshape(kh, in_w * ic_n, out_w * oc_n).astype(jnp.bfloat16)


def prepare_params(p):
    n_actions = p["wf2"].shape[1]
    n_pad = max(128, ((n_actions + 127) // 128) * 128)     # lane-dense fc2 out
    c_in = p["w1"].shape[1]

    # fc1 rows permuted from torch's NCHW flatten (c*81 + i*9 + j) to the
    # kernel's (i*288 + j*32 + c) order.
    wf1 = p["wf1"].reshape(OC2, OHW2, OHW2, FC1).transpose(1, 2, 0, 3)
    wf1 = wf1.reshape(OC2 * OHW2 * OHW2, FC1).astype(jnp.bfloat16)

    wf2 = jnp.zeros((FC1, n_pad), jnp.bfloat16)
    wf2 = wf2.at[:, :n_actions].set(p["wf2"].astype(jnp.bfloat16))
    bf2 = jnp.zeros((1, n_pad), jnp.float32)
    bf2 = bf2.at[0, :n_actions].set(p["bf2"].astype(jnp.float32))

    return {
        "w1x": _expand_conv_weight(p["w1"], IN_HW, OHW1, S1),   # (8, 84*C, 320)
        "b1t": jnp.tile(p["b1"].astype(jnp.float32), OHW1).reshape(1, N1),
        "w2x": _expand_conv_weight(p["w2"], OHW1, OHW2, S2),    # (4, 320, 288)
        "b2t": jnp.tile(p["b2"].astype(jnp.float32), OHW2).reshape(1, N2),
        "wf1": wf1,                                             # (2592, 256)
        "bf1": p["bf1"].astype(jnp.float32).reshape(1, FC1),
        "wf2": wf2,                                             # (256, n_pad)
        "bf2": bf2,
        "n_actions": n_actions,
        "c_in": c_in,
    }


# ----------------------------------------------------------------------------
# DQN forward (single fused pallas_call, grid over the batch)
# ----------------------------------------------------------------------------
def dqn_forward(prepared, x, *, images_per_block=None):
    B, C, H, W = x.shape
    assert (H, W) == (IN_HW, IN_HW), "fc1 (32*81 features) pins input to 84x84"
    assert C == prepared["c_in"]
    wc = IN_HW * C

    # One-time input re-layout (1x traffic, no patch replication):
    #   x8[b, h % 8, h // 8, w*C + c] = x[b, c, h, w], H zero-padded 84 -> 88.
    xh = jnp.transpose(x, (0, 2, 3, 1)).astype(jnp.bfloat16).reshape(B, IN_HW, wc)
    xh = jnp.pad(xh, ((0, 0), (0, 4), (0, 0)))
    x8 = xh.reshape(B, 11, 8, wc).transpose(0, 2, 1, 3)     # (B, 8, 11, 84*C)

    if images_per_block is None:
        target = min(8, max(1, B // 2))         # >=2 grid steps whenever B >= 2
        images_per_block = max(d for d in range(1, target + 1) if B % d == 0)
    imgs = images_per_block
    assert B % imgs == 0
    grid = (B // imgs,)
    n_pad = prepared["wf2"].shape[1]

    out = pl.pallas_call(
        functools.partial(_dqn_fused_kernel, imgs=imgs),
        out_shape=jax.ShapeDtypeStruct((B, 1, n_pad), jnp.float32),
        grid=grid,
        in_specs=[
            pl.BlockSpec((imgs, 8, 11, wc), lambda i: (i, 0, 0, 0)),
            pl.BlockSpec((K1, wc, N1), lambda i: (0, 0, 0)),
            pl.BlockSpec((1, N1), lambda i: (0, 0)),
            pl.BlockSpec((K2, OHW1 * OC1, N2), lambda i: (0, 0, 0)),
            pl.BlockSpec((1, N2), lambda i: (0, 0)),
            pl.BlockSpec((OC2 * OHW2 * OHW2, FC1), lambda i: (0, 0)),
            pl.BlockSpec((1, FC1), lambda i: (0, 0)),
            pl.BlockSpec((FC1, n_pad), lambda i: (0, 0)),
            pl.BlockSpec((1, n_pad), lambda i: (0, 0)),
        ],
        out_specs=pl.BlockSpec((imgs, 1, n_pad), lambda i: (i, 0, 0)),
        compiler_params=pltpu.CompilerParams(
            dimension_semantics=("parallel",)),
    )(x8, prepared["w1x"], prepared["b1t"], prepared["w2x"], prepared["b2t"],
      prepared["wf1"], prepared["bf1"], prepared["wf2"], prepared["bf2"])
    return out.reshape(B, n_pad)[:, :prepared["n_actions"]]


# ----------------------------------------------------------------------------
# Pure-JAX f32 reference (PyTorch semantics) for a correctness sanity check
# ----------------------------------------------------------------------------
def dqn_reference(p, x):
    dn = ("NCHW", "OIHW", "NCHW")
    y = lax.conv_general_dilated(x, p["w1"], (4, 4), "VALID", dimension_numbers=dn)
    y = jnp.maximum(y + p["b1"][None, :, None, None], 0.0)
    y = lax.conv_general_dilated(y, p["w2"], (2, 2), "VALID", dimension_numbers=dn)
    y = jnp.maximum(y + p["b2"][None, :, None, None], 0.0)
    y = y.reshape(y.shape[0], -1)                           # NCHW flatten
    y = jnp.maximum(y @ p["wf1"] + p["bf1"], 0.0)
    return y @ p["wf2"] + p["bf2"]


def init_params(key, in_channels, n_actions):
    ks = jax.random.split(key, 8)
    scale = 0.05
    return {
        "w1": scale * jax.random.normal(ks[0], (16, in_channels, 8, 8), jnp.float32),
        "b1": scale * jax.random.normal(ks[1], (16,), jnp.float32),
        "w2": scale * jax.random.normal(ks[2], (32, 16, 4, 4), jnp.float32),
        "b2": scale * jax.random.normal(ks[3], (32,), jnp.float32),
        "wf1": scale * jax.random.normal(ks[4], (32 * 81, 256), jnp.float32),
        "bf1": scale * jax.random.normal(ks[5], (256,), jnp.float32),
        "wf2": scale * jax.random.normal(ks[6], (256, n_actions), jnp.float32),
        "bf2": scale * jax.random.normal(ks[7], (n_actions,), jnp.float32),
    }


if __name__ == "__main__":
    # fc1 expects 32 * 81 flattened features => classic Atari 84x84 input.
    B, C, H, W = 2, 4, 84, 84
    N_ACTIONS = 4

    key = jax.random.PRNGKey(0)
    kx, kp = jax.random.split(key)
    x = jax.random.normal(kx, (B, C, H, W), jnp.float32)
    params = init_params(kp, C, N_ACTIONS)
    prepared = prepare_params(params)

    out = jax.block_until_ready(dqn_forward(prepared, x))
    assert out.shape == (B, N_ACTIONS), out.shape

    ref = jax.block_until_ready(dqn_reference(params, x))
    assert bool(jnp.all(jnp.isfinite(out)))
    assert jnp.allclose(out, ref, atol=5e-2, rtol=5e-2), (
        "max abs diff %f" % float(jnp.max(jnp.abs(out - ref))))

    print("KERNEL_OK")
</pallas_src>

<mosaic_0001>
module attributes {stable_mosaic.version = 11 : i64} {
  func.func @_dqn_fused_kernel(%arg0: i32, %arg1: memref<1x8x11x336xbf16, #tpu.memory_space<vmem>>, %arg2: memref<8x336x320xbf16, #tpu.memory_space<vmem>>, %arg3: memref<1x320xf32, #tpu.memory_space<vmem>>, %arg4: memref<4x320x288xbf16, #tpu.memory_space<vmem>>, %arg5: memref<1x288xf32, #tpu.memory_space<vmem>>, %arg6: memref<2592x256xbf16, #tpu.memory_space<vmem>>, %arg7: memref<1x256xf32, #tpu.memory_space<vmem>>, %arg8: memref<256x128xbf16, #tpu.memory_space<vmem>>, %arg9: memref<1x128xf32, #tpu.memory_space<vmem>>, %arg10: memref<1x1x128xf32, #tpu.memory_space<vmem>>) attributes {dimension_semantics = [#tpu.dimension_semantics<parallel>], iteration_bounds = array<i64: 2>, scalar_prefetch = 0 : i64, scratch_operands = 0 : i64, tpu.core_type = #tpu.core_type<tc>, window_params = [{transform_indices = @transform_0, window_bounds = array<i64: 1, 8, 11, 336>}, {pipeline_mode = #tpu.pipeline_mode<synchronous>, transform_indices = @transform_1, window_bounds = array<i64: 8, 336, 320>}, {pipeline_mode = #tpu.pipeline_mode<synchronous>, transform_indices = @transform_2, window_bounds = array<i64: 1, 320>}, {pipeline_mode = #tpu.pipeline_mode<synchronous>, transform_indices = @transform_3, window_bounds = array<i64: 4, 320, 288>}, {pipeline_mode = #tpu.pipeline_mode<synchronous>, transform_indices = @transform_4, window_bounds = array<i64: 1, 288>}, {pipeline_mode = #tpu.pipeline_mode<synchronous>, transform_indices = @transform_5, window_bounds = array<i64: 2592, 256>}, {pipeline_mode = #tpu.pipeline_mode<synchronous>, transform_indices = @transform_6, window_bounds = array<i64: 1, 256>}, {pipeline_mode = #tpu.pipeline_mode<synchronous>, transform_indices = @transform_7, window_bounds = array<i64: 256, 128>}, {pipeline_mode = #tpu.pipeline_mode<synchronous>, transform_indices = @transform_8, window_bounds = array<i64: 1, 128>}, {transform_indices = @transform_9, window_bounds = array<i64: 1, 1, 128>}]} {
    %c0 = arith.constant 0 : index
    %c0_0 = arith.constant 0 : index
    %0 = vector.load %arg3[%c0, %c0_0] : memref<1x320xf32, #tpu.memory_space<vmem>>, vector<1x320xf32>
    %c0_1 = arith.constant 0 : index
    %c0_2 = arith.constant 0 : index
    %1 = vector.load %arg5[%c0_1, %c0_2] : memref<1x288xf32, #tpu.memory_space<vmem>>, vector<1x288xf32>
    %c0_3 = arith.constant 0 : index
    %c0_4 = arith.constant 0 : index
    %2 = vector.load %arg7[%c0_3, %c0_4] : memref<1x256xf32, #tpu.memory_space<vmem>>, vector<1x256xf32>
    %c0_5 = arith.constant 0 : index
    %c0_6 = arith.constant 0 : index
    %3 = vector.load %arg9[%c0_5, %c0_6] : memref<1x128xf32, #tpu.memory_space<vmem>>, vector<1x128xf32>
    %cst = arith.constant 0.000000e+00 : f32
    %4 = vector.broadcast %cst : f32 to vector<10x320xf32>
    %c0_7 = arith.constant 0 : index
    %c0_8 = arith.constant 0 : index
    %c0_9 = arith.constant 0 : index
    %c0_10 = arith.constant 0 : index
    %5 = vector.load %arg1[%c0_7, %c0_8, %c0_9, %c0_10] : memref<1x8x11x336xbf16, #tpu.memory_space<vmem>>, vector<1x1x10x336xbf16>
    %6 = vector.shape_cast %5 : vector<1x1x10x336xbf16> to vector<10x336xbf16>
    %c0_11 = arith.constant 0 : index
    %c0_12 = arith.constant 0 : index
    %c0_13 = arith.constant 0 : index
    %7 = vector.load %arg2[%c0_11, %c0_12, %c0_13] : memref<8x336x320xbf16, #tpu.memory_space<vmem>>, vector<1x336x320xbf16>
    %8 = vector.shape_cast %7 : vector<1x336x320xbf16> to vector<336x320xbf16>
    %cst_14 = arith.constant dense<0.000000e+00> : vector<10x320xf32>
    %9 = tpu.matmul %6, %8, %cst_14 {dimension_numbers = #tpu.dot_dimension_numbers<[1], [0], [0], [1], [0, 0, 1, 1], [], []>} : vector<10x336xbf16>, vector<336x320xbf16>, vector<10x320xf32> -> vector<10x320xf32>
    %10 = arith.addf %4, %9 : vector<10x320xf32>
    %c0_15 = arith.constant 0 : index
    %c1 = arith.constant 1 : index
    %c0_16 = arith.constant 0 : index
    %c0_17 = arith.constant 0 : index
    %11 = vector.load %arg1[%c0_15, %c1, %c0_16, %c0_17] : memref<1x8x11x336xbf16, #tpu.memory_space<vmem>>, vector<1x1x10x336xbf16>
    %12 = vector.shape_cast %11 : vector<1x1x10x336xbf16> to vector<10x336xbf16>
    %c1_18 = arith.constant 1 : index
    %c0_19 = arith.constant 0 : index
    %c0_20 = arith.constant 0 : index
    %13 = vector.load %arg2[%c1_18, %c0_19, %c0_20] : memref<8x336x320xbf16, #tpu.memory_space<vmem>>, vector<1x336x320xbf16>
    %14 = vector.shape_cast %13 : vector<1x336x320xbf16> to vector<336x320xbf16>
    %cst_21 = arith.constant dense<0.000000e+00> : vector<10x320xf32>
    %15 = tpu.matmul %12, %14, %cst_21 {dimension_numbers = #tpu.dot_dimension_numbers<[1], [0], [0], [1], [0, 0, 1, 1], [], []>} : vector<10x336xbf16>, vector<336x320xbf16>, vector<10x320xf32> -> vector<10x320xf32>
    %16 = arith.addf %10, %15 : vector<10x320xf32>
    %c0_22 = arith.constant 0 : index
    %c2 = arith.constant 2 : index
    %c0_23 = arith.constant 0 : index
    %c0_24 = arith.constant 0 : index
    %17 = vector.load %arg1[%c0_22, %c2, %c0_23, %c0_24] : memref<1x8x11x336xbf16, #tpu.memory_space<vmem>>, vector<1x1x10x336xbf16>
    %18 = vector.shape_cast %17 : vector<1x1x10x336xbf16> to vector<10x336xbf16>
    %c2_25 = arith.constant 2 : index
    %c0_26 = arith.constant 0 : index
    %c0_27 = arith.constant 0 : index
    %19 = vector.load %arg2[%c2_25, %c0_26, %c0_27] : memref<8x336x320xbf16, #tpu.memory_space<vmem>>, vector<1x336x320xbf16>
    %20 = vector.shape_cast %19 : vector<1x336x320xbf16> to vector<336x320xbf16>
    %cst_28 = arith.constant dense<0.000000e+00> : vector<10x320xf32>
    %21 = tpu.matmul %18, %20, %cst_28 {dimension_numbers = #tpu.dot_dimension_numbers<[1], [0], [0], [1], [0, 0, 1, 1], [], []>} : vector<10x336xbf16>, vector<336x320xbf16>, vector<10x320xf32> -> vector<10x320xf32>
    %22 = arith.addf %16, %21 : vector<10x320xf32>
    %c0_29 = arith.constant 0 : index
    %c3 = arith.constant 3 : index
    %c0_30 = arith.constant 0 : index
    %c0_31 = arith.constant 0 : index
    %23 = vector.load %arg1[%c0_29, %c3, %c0_30, %c0_31] : memref<1x8x11x336xbf16, #tpu.memory_space<vmem>>, vector<1x1x10x336xbf16>
    %24 = vector.shape_cast %23 : vector<1x1x10x336xbf16> to vector<10x336xbf16>
    %c3_32 = arith.constant 3 : index
    %c0_33 = arith.constant 0 : index
    %c0_34 = arith.constant 0 : index
    %25 = vector.load %arg2[%c3_32, %c0_33, %c0_34] : memref<8x336x320xbf16, #tpu.memory_space<vmem>>, vector<1x336x320xbf16>
    %26 = vector.shape_cast %25 : vector<1x336x320xbf16> to vector<336x320xbf16>
    %cst_35 = arith.constant dense<0.000000e+00> : vector<10x320xf32>
    %27 = tpu.matmul %24, %26, %cst_35 {dimension_numbers = #tpu.dot_dimension_numbers<[1], [0], [0], [1], [0, 0, 1, 1], [], []>} : vector<10x336xbf16>, vector<336x320xbf16>, vector<10x320xf32> -> vector<10x320xf32>
    %28 = arith.addf %22, %27 : vector<10x320xf32>
    %c0_36 = arith.constant 0 : index
    %c4 = arith.constant 4 : index
    %c0_37 = arith.constant 0 : index
    %c0_38 = arith.constant 0 : index
    %29 = vector.load %arg1[%c0_36, %c4, %c0_37, %c0_38] : memref<1x8x11x336xbf16, #tpu.memory_space<vmem>>, vector<1x1x10x336xbf16>
    %30 = vector.shape_cast %29 : vector<1x1x10x336xbf16> to vector<10x336xbf16>
    %c4_39 = arith.constant 4 : index
    %c0_40 = arith.constant 0 : index
    %c0_41 = arith.constant 0 : index
    %31 = vector.load %arg2[%c4_39, %c0_40, %c0_41] : memref<8x336x320xbf16, #tpu.memory_space<vmem>>, vector<1x336x320xbf16>
    %32 = vector.shape_cast %31 : vector<1x336x320xbf16> to vector<336x320xbf16>
    %cst_42 = arith.constant dense<0.000000e+00> : vector<10x320xf32>
    %33 = tpu.matmul %30, %32, %cst_42 {dimension_numbers = #tpu.dot_dimension_numbers<[1], [0], [0], [1], [0, 0, 1, 1], [], []>} : vector<10x336xbf16>, vector<336x320xbf16>, vector<10x320xf32> -> vector<10x320xf32>
    %34 = arith.addf %28, %33 : vector<10x320xf32>
    %c0_43 = arith.constant 0 : index
    %c5 = arith.constant 5 : index
    %c0_44 = arith.constant 0 : index
    %c0_45 = arith.constant 0 : index
    %35 = vector.load %arg1[%c0_43, %c5, %c0_44, %c0_45] : memref<1x8x11x336xbf16, #tpu.memory_space<vmem>>, vector<1x1x10x336xbf16>
    %36 = vector.shape_cast %35 : vector<1x1x10x336xbf16> to vector<10x336xbf16>
    %c5_46 = arith.constant 5 : index
    %c0_47 = arith.constant 0 : index
    %c0_48 = arith.constant 0 : index
    %37 = vector.load %arg2[%c5_46, %c0_47, %c0_48] : memref<8x336x320xbf16, #tpu.memory_space<vmem>>, vector<1x336x320xbf16>
    %38 = vector.shape_cast %37 : vector<1x336x320xbf16> to vector<336x320xbf16>
    %cst_49 = arith.constant dense<0.000000e+00> : vector<10x320xf32>
    %39 = tpu.matmul %36, %38, %cst_49 {dimension_numbers = #tpu.dot_dimension_numbers<[1], [0], [0], [1], [0, 0, 1, 1], [], []>} : vector<10x336xbf16>, vector<336x320xbf16>, vector<10x320xf32> -> vector<10x320xf32>
    %40 = arith.addf %34, %39 : vector<10x320xf32>
    %c0_50 = arith.constant 0 : index
    %c6 = arith.constant 6 : index
    %c0_51 = arith.constant 0 : index
    %c0_52 = arith.constant 0 : index
    %41 = vector.load %arg1[%c0_50, %c6, %c0_51, %c0_52] : memref<1x8x11x336xbf16, #tpu.memory_space<vmem>>, vector<1x1x10x336xbf16>
    %42 = vector.shape_cast %41 : vector<1x1x10x336xbf16> to vector<10x336xbf16>
    %c6_53 = arith.constant 6 : index
    %c0_54 = arith.constant 0 : index
    %c0_55 = arith.constant 0 : index
    %43 = vector.load %arg2[%c6_53, %c0_54, %c0_55] : memref<8x336x320xbf16, #tpu.memory_space<vmem>>, vector<1x336x320xbf16>
    %44 = vector.shape_cast %43 : vector<1x336x320xbf16> to vector<336x320xbf16>
    %cst_56 = arith.constant dense<0.000000e+00> : vector<10x320xf32>
    %45 = tpu.matmul %42, %44, %cst_56 {dimension_numbers = #tpu.dot_dimension_numbers<[1], [0], [0], [1], [0, 0, 1, 1], [], []>} : vector<10x336xbf16>, vector<336x320xbf16>, vector<10x320xf32> -> vector<10x320xf32>
    %46 = arith.addf %40, %45 : vector<10x320xf32>
    %c0_57 = arith.constant 0 : index
    %c7 = arith.constant 7 : index
    %c0_58 = arith.constant 0 : index
    %c0_59 = arith.constant 0 : index
    %47 = vector.load %arg1[%c0_57, %c7, %c0_58, %c0_59] : memref<1x8x11x336xbf16, #tpu.memory_space<vmem>>, vector<1x1x10x336xbf16>
    %48 = vector.shape_cast %47 : vector<1x1x10x336xbf16> to vector<10x336xbf16>
    %c7_60 = arith.constant 7 : index
    %c0_61 = arith.constant 0 : index
    %c0_62 = arith.constant 0 : index
    %49 = vector.load %arg2[%c7_60, %c0_61, %c0_62] : memref<8x336x320xbf16, #tpu.memory_space<vmem>>, vector<1x336x320xbf16>
    %50 = vector.shape_cast %49 : vector<1x336x320xbf16> to vector<336x320xbf16>
    %cst_63 = arith.constant dense<0.000000e+00> : vector<10x320xf32>
    %51 = tpu.matmul %48, %50, %cst_63 {dimension_numbers = #tpu.dot_dimension_numbers<[1], [0], [0], [1], [0, 0, 1, 1], [], []>} : vector<10x336xbf16>, vector<336x320xbf16>, vector<10x320xf32> -> vector<10x320xf32>
    %52 = arith.addf %46, %51 : vector<10x320xf32>
    %53 = vector.broadcast %0 : vector<1x320xf32> to vector<10x320xf32>
    %54 = arith.addf %52, %53 : vector<10x320xf32>
    %cst_64 = arith.constant 0.000000e+00 : f32
    %55 = vector.broadcast %cst_64 : f32 to vector<10x320xf32>
    %56 = arith.maximumf %54, %55 : vector<10x320xf32>
    %57 = arith.truncf %56 : vector<10x320xf32> to vector<10x320xbf16>
    %cst_65 = arith.constant 0.000000e+00 : f32
    %58 = vector.broadcast %cst_65 : f32 to vector<10x320xf32>
    %c0_66 = arith.constant 0 : index
    %c4_67 = arith.constant 4 : index
    %c0_68 = arith.constant 0 : index
    %c0_69 = arith.constant 0 : index
    %59 = vector.load %arg1[%c0_66, %c4_67, %c0_68, %c0_69] : memref<1x8x11x336xbf16, #tpu.memory_space<vmem>>, vector<1x1x10x336xbf16>
    %60 = vector.shape_cast %59 : vector<1x1x10x336xbf16> to vector<10x336xbf16>
    %c0_70 = arith.constant 0 : index
    %c0_71 = arith.constant 0 : index
    %c0_72 = arith.constant 0 : index
    %61 = vector.load %arg2[%c0_70, %c0_71, %c0_72] : memref<8x336x320xbf16, #tpu.memory_space<vmem>>, vector<1x336x320xbf16>
    %62 = vector.shape_cast %61 : vector<1x336x320xbf16> to vector<336x320xbf16>
    %cst_73 = arith.constant dense<0.000000e+00> : vector<10x320xf32>
    %63 = tpu.matmul %60, %62, %cst_73 {dimension_numbers = #tpu.dot_dimension_numbers<[1], [0], [0], [1], [0, 0, 1, 1], [], []>} : vector<10x336xbf16>, vector<336x320xbf16>, vector<10x320xf32> -> vector<10x320xf32>
    %64 = arith.addf %58, %63 : vector<10x320xf32>
    %c0_74 = arith.constant 0 : index
    %c5_75 = arith.constant 5 : index
    %c0_76 = arith.constant 0 : index
    %c0_77 = arith.constant 0 : index
    %65 = vector.load %arg1[%c0_74, %c5_75, %c0_76, %c0_77] : memref<1x8x11x336xbf16, #tpu.memory_space<vmem>>, vector<1x1x10x336xbf16>
    %66 = vector.shape_cast %65 : vector<1x1x10x336xbf16> to vector<10x336xbf16>
    %c1_78 = arith.constant 1 : index
    %c0_79 = arith.constant 0 : index
    %c0_80 = arith.constant 0 : index
    %67 = vector.load %arg2[%c1_78, %c0_79, %c0_80] : memref<8x336x320xbf16, #tpu.memory_space<vmem>>, vector<1x336x320xbf16>
    %68 = vector.shape_cast %67 : vector<1x336x320xbf16> to vector<336x320xbf16>
    %cst_81 = arith.constant dense<0.000000e+00> : vector<10x320xf32>
    %69 = tpu.matmul %66, %68, %cst_81 {dimension_numbers = #tpu.dot_dimension_numbers<[1], [0], [0], [1], [0, 0, 1, 1], [], []>} : vector<10x336xbf16>, vector<336x320xbf16>, vector<10x320xf32> -> vector<10x320xf32>
    %70 = arith.addf %64, %69 : vector<10x320xf32>
    %c0_82 = arith.constant 0 : index
    %c6_83 = arith.constant 6 : index
    %c0_84 = arith.constant 0 : index
    %c0_85 = arith.constant 0 : index
    %71 = vector.load %arg1[%c0_82, %c6_83, %c0_84, %c0_85] : memref<1x8x11x336xbf16, #tpu.memory_space<vmem>>, vector<1x1x10x336xbf16>
    %72 = vector.shape_cast %71 : vector<1x1x10x336xbf16> to vector<10x336xbf16>
    %c2_86 = arith.constant 2 : index
    %c0_87 = arith.constant 0 : index
    %c0_88 = arith.constant 0 : index
    %73 = vector.load %arg2[%c2_86, %c0_87, %c0_88] : memref<8x336x320xbf16, #tpu.memory_space<vmem>>, vector<1x336x320xbf16>
    %74 = vector.shape_cast %73 : vector<1x336x320xbf16> to vector<336x320xbf16>
    %cst_89 = arith.constant dense<0.000000e+00> : vector<10x320xf32>
    %75 = tpu.matmul %72, %74, %cst_89 {dimension_numbers = #tpu.dot_dimension_numbers<[1], [0], [0], [1], [0, 0, 1, 1], [], []>} : vector<10x336xbf16>, vector<336x320xbf16>, vector<10x320xf32> -> vector<10x320xf32>
    %76 = arith.addf %70, %75 : vector<10x320xf32>
    %c0_90 = arith.constant 0 : index
    %c7_91 = arith.constant 7 : index
    %c0_92 = arith.constant 0 : index
    %c0_93 = arith.constant 0 : index
    %77 = vector.load %arg1[%c0_90, %c7_91, %c0_92, %c0_93] : memref<1x8x11x336xbf16, #tpu.memory_space<vmem>>, vector<1x1x10x336xbf16>
    %78 = vector.shape_cast %77 : vector<1x1x10x336xbf16> to vector<10x336xbf16>
    %c3_94 = arith.constant 3 : index
    %c0_95 = arith.constant 0 : index
    %c0_96 = arith.constant 0 : index
    %79 = vector.load %arg2[%c3_94, %c0_95, %c0_96] : memref<8x336x320xbf16, #tpu.memory_space<vmem>>, vector<1x336x320xbf16>
    %80 = vector.shape_cast %79 : vector<1x336x320xbf16> to vector<336x320xbf16>
    %cst_97 = arith.constant dense<0.000000e+00> : vector<10x320xf32>
    %81 = tpu.matmul %78, %80, %cst_97 {dimension_numbers = #tpu.dot_dimension_numbers<[1], [0], [0], [1], [0, 0, 1, 1], [], []>} : vector<10x336xbf16>, vector<336x320xbf16>, vector<10x320xf32> -> vector<10x320xf32>
    %82 = arith.addf %76, %81 : vector<10x320xf32>
    %c0_98 = arith.constant 0 : index
    %c0_99 = arith.constant 0 : index
    %c1_100 = arith.constant 1 : index
    %c0_101 = arith.constant 0 : index
    %83 = vector.load %arg1[%c0_98, %c0_99, %c1_100, %c0_101] : memref<1x8x11x336xbf16, #tpu.memory_space<vmem>>, vector<1x1x10x336xbf16>
    %84 = vector.shape_cast %83 : vector<1x1x10x336xbf16> to vector<10x336xbf16>
    %c4_102 = arith.constant 4 : index
    %c0_103 = arith.constant 0 : index
    %c0_104 = arith.constant 0 : index
    %85 = vector.load %arg2[%c4_102, %c0_103, %c0_104] : memref<8x336x320xbf16, #tpu.memory_space<vmem>>, vector<1x336x320xbf16>
    %86 = vector.shape_cast %85 : vector<1x336x320xbf16> to vector<336x320xbf16>
    %cst_105 = arith.constant dense<0.000000e+00> : vector<10x320xf32>
    %87 = tpu.matmul %84, %86, %cst_105 {dimension_numbers = #tpu.dot_dimension_numbers<[1], [0], [0], [1], [0, 0, 1, 1], [], []>} : vector<10x336xbf16>, vector<336x320xbf16>, vector<10x320xf32> -> vector<10x320xf32>
    %88 = arith.addf %82, %87 : vector<10x320xf32>
    %c0_106 = arith.constant 0 : index
    %c1_107 = arith.constant 1 : index
    %c1_108 = arith.constant 1 : index
    %c0_109 = arith.constant 0 : index
    %89 = vector.load %arg1[%c0_106, %c1_107, %c1_108, %c0_109] : memref<1x8x11x336xbf16, #tpu.memory_space<vmem>>, vector<1x1x10x336xbf16>
    %90 = vector.shape_cast %89 : vector<1x1x10x336xbf16> to vector<10x336xbf16>
    %c5_110 = arith.constant 5 : index
    %c0_111 = arith.constant 0 : index
    %c0_112 = arith.constant 0 : index
    %91 = vector.load %arg2[%c5_110, %c0_111, %c0_112] : memref<8x336x320xbf16, #tpu.memory_space<vmem>>, vector<1x336x320xbf16>
    %92 = vector.shape_cast %91 : vector<1x336x320xbf16> to vector<336x320xbf16>
    %cst_113 = arith.constant dense<0.000000e+00> : vector<10x320xf32>
    %93 = tpu.matmul %90, %92, %cst_113 {dimension_numbers = #tpu.dot_dimension_numbers<[1], [0], [0], [1], [0, 0, 1, 1], [], []>} : vector<10x336xbf16>, vector<336x320xbf16>, vector<10x320xf32> -> vector<10x320xf32>
    %94 = arith.addf %88, %93 : vector<10x320xf32>
    %c0_114 = arith.constant 0 : index
    %c2_115 = arith.constant 2 : index
    %c1_116 = arith.constant 1 : index
    %c0_117 = arith.constant 0 : index
    %95 = vector.load %arg1[%c0_114, %c2_115, %c1_116, %c0_117] : memref<1x8x11x336xbf16, #tpu.memory_space<vmem>>, vector<1x1x10x336xbf16>
    %96 = vector.shape_cast %95 : vector<1x1x10x336xbf16> to vector<10x336xbf16>
    %c6_118 = arith.constant 6 : index
    %c0_119 = arith.constant 0 : index
    %c0_120 = arith.constant 0 : index
    %97 = vector.load %arg2[%c6_118, %c0_119, %c0_120] : memref<8x336x320xbf16, #tpu.memory_space<vmem>>, vector<1x336x320xbf16>
    %98 = vector.shape_cast %97 : vector<1x336x320xbf16> to vector<336x320xbf16>
    %cst_121 = arith.constant dense<0.000000e+00> : vector<10x320xf32>
    %99 = tpu.matmul %96, %98, %cst_121 {dimension_numbers = #tpu.dot_dimension_numbers<[1], [0], [0], [1], [0, 0, 1, 1], [], []>} : vector<10x336xbf16>, vector<336x320xbf16>, vector<10x320xf32> -> vector<10x320xf32>
    %100 = arith.addf %94, %99 : vector<10x320xf32>
    %c0_122 = arith.constant 0 : index
    %c3_123 = arith.constant 3 : index
    %c1_124 = arith.constant 1 : index
    %c0_125 = arith.constant 0 : index
    %101 = vector.load %arg1[%c0_122, %c3_123, %c1_124, %c0_125] : memref<1x8x11x336xbf16, #tpu.memory_space<vmem>>, vector<1x1x10x336xbf16>
    %102 = vector.shape_cast %101 : vector<1x1x10x336xbf16> to vector<10x336xbf16>
    %c7_126 = arith.constant 7 : index
    %c0_127 = arith.constant 0 : index
    %c0_128 = arith.constant 0 : index
    %103 = vector.load %arg2[%c7_126, %c0_127, %c0_128] : memref<8x336x320xbf16, #tpu.memory_space<vmem>>, vector<1x336x320xbf16>
    %104 = vector.shape_cast %103 : vector<1x336x320xbf16> to vector<336x320xbf16>
    %cst_129 = arith.constant dense<0.000000e+00> : vector<10x320xf32>
    %105 = tpu.matmul %102, %104, %cst_129 {dimension_numbers = #tpu.dot_dimension_numbers<[1], [0], [0], [1], [0, 0, 1, 1], [], []>} : vector<10x336xbf16>, vector<336x320xbf16>, vector<10x320xf32> -> vector<10x320xf32>
    %106 = arith.addf %100, %105 : vector<10x320xf32>
    %107 = vector.broadcast %0 : vector<1x320xf32> to vector<10x320xf32>
    %108 = arith.addf %106, %107 : vector<10x320xf32>
    %cst_130 = arith.constant 0.000000e+00 : f32
    %109 = vector.broadcast %cst_130 : f32 to vector<10x320xf32>
    %110 = arith.maximumf %108, %109 : vector<10x320xf32>
    %111 = arith.truncf %110 : vector<10x320xf32> to vector<10x320xbf16>
    %cst_131 = arith.constant 0.000000e+00 : f32
    %112 = vector.broadcast %cst_131 : f32 to vector<9x288xf32>
    %113 = vector.extract_strided_slice %57 {offsets = [0, 0], sizes = [9, 320], strides = [1, 1]} : vector<10x320xbf16> to vector<9x320xbf16>
    %c0_132 = arith.constant 0 : index
    %c0_133 = arith.constant 0 : index
    %c0_134 = arith.constant 0 : index
    %114 = vector.load %arg4[%c0_132, %c0_133, %c0_134] : memref<4x320x288xbf16, #tpu.memory_space<vmem>>, vector<1x320x288xbf16>
    %115 = vector.shape_cast %114 : vector<1x320x288xbf16> to vector<320x288xbf16>
    %cst_135 = arith.constant dense<0.000000e+00> : vector<9x288xf32>
    %116 = tpu.matmul %113, %115, %cst_135 {dimension_numbers = #tpu.dot_dimension_numbers<[1], [0], [0], [1], [0, 0, 1, 1], [], []>} : vector<9x320xbf16>, vector<320x288xbf16>, vector<9x288xf32> -> vector<9x288xf32>
    %117 = arith.addf %112, %116 : vector<9x288xf32>
    %118 = vector.extract_strided_slice %111 {offsets = [0, 0], sizes = [9, 320], strides = [1, 1]} : vector<10x320xbf16> to vector<9x320xbf16>
    %c1_136 = arith.constant 1 : index
    %c0_137 = arith.constant 0 : index
    %c0_138 = arith.constant 0 : index
    %119 = vector.load %arg4[%c1_136, %c0_137, %c0_138] : memref<4x320x288xbf16, #tpu.memory_space<vmem>>, vector<1x320x288xbf16>
    %120 = vector.shape_cast %119 : vector<1x320x288xbf16> to vector<320x288xbf16>
    %cst_139 = arith.constant dense<0.000000e+00> : vector<9x288xf32>
    %121 = tpu.matmul %118, %120, %cst_139 {dimension_numbers = #tpu.dot_dimension_numbers<[1], [0], [0], [1], [0, 0, 1, 1], [], []>} : vector<9x320xbf16>, vector<320x288xbf16>, vector<9x288xf32> -> vector<9x288xf32>
    %122 = arith.addf %117, %121 : vector<9x288xf32>
    %123 = vector.extract_strided_slice %57 {offsets = [1, 0], sizes = [9, 320], strides = [1, 1]} : vector<10x320xbf16> to vector<9x320xbf16>
    %c2_140 = arith.constant 2 : index
    %c0_141 = arith.constant 0 : index
    %c0_142 = arith.constant 0 : index
    %124 = vector.load %arg4[%c2_140, %c0_141, %c0_142] : memref<4x320x288xbf16, #tpu.memory_space<vmem>>, vector<1x320x288xbf16>
    %125 = vector.shape_cast %124 : vector<1x320x288xbf16> to vector<320x288xbf16>
    %cst_143 = arith.constant dense<0.000000e+00> : vector<9x288xf32>
    %126 = tpu.matmul %123, %125, %cst_143 {dimension_numbers = #tpu.dot_dimension_numbers<[1], [0], [0], [1], [0, 0, 1, 1], [], []>} : vector<9x320xbf16>, vector<320x288xbf16>, vector<9x288xf32> -> vector<9x288xf32>
    %127 = arith.addf %122, %126 : vector<9x288xf32>
    %128 = vector.extract_strided_slice %111 {offsets = [1, 0], sizes = [9, 320], strides = [1, 1]} : vector<10x320xbf16> to vector<9x320xbf16>
    %c3_144 = arith.constant 3 : index
    %c0_145 = arith.constant 0 : index
    %c0_146 = arith.constant 0 : index
    %129 = vector.load %arg4[%c3_144, %c0_145, %c0_146] : memref<4x320x288xbf16, #tpu.memory_space<vmem>>, vector<1x320x288xbf16>
    %130 = vector.shape_cast %129 : vector<1x320x288xbf16> to vector<320x288xbf16>
    %cst_147 = arith.constant dense<0.000000e+00> : vector<9x288xf32>
    %131 = tpu.matmul %128, %130, %cst_147 {dimension_numbers = #tpu.dot_dimension_numbers<[1], [0], [0], [1], [0, 0, 1, 1], [], []>} : vector<9x320xbf16>, vector<320x288xbf16>, vector<9x288xf32> -> vector<9x288xf32>
    %132 = arith.addf %127, %131 : vector<9x288xf32>
    %133 = vector.broadcast %1 : vector<1x288xf32> to vector<9x288xf32>
    %134 = arith.addf %132, %133 : vector<9x288xf32>
    %cst_148 = arith.constant 0.000000e+00 : f32
    %135 = vector.broadcast %cst_148 : f32 to vector<9x288xf32>
    %136 = arith.maximumf %134, %135 : vector<9x288xf32>
    %137 = arith.truncf %136 : vector<9x288xf32> to vector<9x288xbf16>
    %cst_149 = arith.constant 0.000000e+00 : f32
    %138 = vector.broadcast %cst_149 : f32 to vector<1x256xf32>
    %139 = vector.extract_strided_slice %137 {offsets = [0, 0], sizes = [1, 288], strides = [1, 1]} : vector<9x288xbf16> to vector<1x288xbf16>
    %c0_150 = arith.constant 0 : index
    %c0_151 = arith.constant 0 : index
    %140 = vector.load %arg6[%c0_150, %c0_151] : memref<2592x256xbf16, #tpu.memory_space<vmem>>, vector<288x256xbf16>
    %cst_152 = arith.constant dense<0.000000e+00> : vector<1x256xf32>
    %141 = tpu.matmul %139, %140, %cst_152 {dimension_numbers = #tpu.dot_dimension_numbers<[1], [0], [0], [1], [0, 0, 1, 1], [], []>} : vector<1x288xbf16>, vector<288x256xbf16>, vector<1x256xf32> -> vector<1x256xf32>
    %142 = arith.addf %138, %141 : vector<1x256xf32>
    %143 = vector.extract_strided_slice %137 {offsets = [1, 0], sizes = [1, 288], strides = [1, 1]} : vector<9x288xbf16> to vector<1x288xbf16>
    %c288 = arith.constant 288 : index
    %c0_153 = arith.constant 0 : index
    %144 = vector.load %arg6[%c288, %c0_153] : memref<2592x256xbf16, #tpu.memory_space<vmem>>, vector<288x256xbf16>
    %cst_154 = arith.constant dense<0.000000e+00> : vector<1x256xf32>
    %145 = tpu.matmul %143, %144, %cst_154 {dimension_numbers = #tpu.dot_dimension_numbers<[1], [0], [0], [1], [0, 0, 1, 1], [], []>} : vector<1x288xbf16>, vector<288x256xbf16>, vector<1x256xf32> -> vector<1x256xf32>
    %146 = arith.addf %142, %145 : vector<1x256xf32>
    %147 = vector.extract_strided_slice %137 {offsets = [2, 0], sizes = [1, 288], strides = [1, 1]} : vector<9x288xbf16> to vector<1x288xbf16>
    %c576 = arith.constant 576 : index
    %c0_155 = arith.constant 0 : index
    %148 = vector.load %arg6[%c576, %c0_155] : memref<2592x256xbf16, #tpu.memory_space<vmem>>, vector<288x256xbf16>
    %cst_156 = arith.constant dense<0.000000e+00> : vector<1x256xf32>
    %149 = tpu.matmul %147, %148, %cst_156 {dimension_numbers = #tpu.dot_dimension_numbers<[1], [0], [0], [1], [0, 0, 1, 1], [], []>} : vector<1x288xbf16>, vector<288x256xbf16>, vector<1x256xf32> -> vector<1x256xf32>
    %150 = arith.addf %146, %149 : vector<1x256xf32>
    %151 = vector.extract_strided_slice %137 {offsets = [3, 0], sizes = [1, 288], strides = [1, 1]} : vector<9x288xbf16> to vector<1x288xbf16>
    %c864 = arith.constant 864 : index
    %c0_157 = arith.constant 0 : index
    %152 = vector.load %arg6[%c864, %c0_157] : memref<2592x256xbf16, #tpu.memory_space<vmem>>, vector<288x256xbf16>
    %cst_158 = arith.constant dense<0.000000e+00> : vector<1x256xf32>
    %153 = tpu.matmul %151, %152, %cst_158 {dimension_numbers = #tpu.dot_dimension_numbers<[1], [0], [0], [1], [0, 0, 1, 1], [], []>} : vector<1x288xbf16>, vector<288x256xbf16>, vector<1x256xf32> -> vector<1x256xf32>
    %154 = arith.addf %150, %153 : vector<1x256xf32>
    %155 = vector.extract_strided_slice %137 {offsets = [4, 0], sizes = [1, 288], strides = [1, 1]} : vector<9x288xbf16> to vector<1x288xbf16>
    %c1152 = arith.constant 1152 : index
    %c0_159 = arith.constant 0 : index
    %156 = vector.load %arg6[%c1152, %c0_159] : memref<2592x256xbf16, #tpu.memory_space<vmem>>, vector<288x256xbf16>
    %cst_160 = arith.constant dense<0.000000e+00> : vector<1x256xf32>
    %157 = tpu.matmul %155, %156, %cst_160 {dimension_numbers = #tpu.dot_dimension_numbers<[1], [0], [0], [1], [0, 0, 1, 1], [], []>} : vector<1x288xbf16>, vector<288x256xbf16>, vector<1x256xf32> -> vector<1x256xf32>
    %158 = arith.addf %154, %157 : vector<1x256xf32>
    %159 = vector.extract_strided_slice %137 {offsets = [5, 0], sizes = [1, 288], strides = [1, 1]} : vector<9x288xbf16> to vector<1x288xbf16>
    %c1440 = arith.constant 1440 : index
    %c0_161 = arith.constant 0 : index
    %160 = vector.load %arg6[%c1440, %c0_161] : memref<2592x256xbf16, #tpu.memory_space<vmem>>, vector<288x256xbf16>
    %cst_162 = arith.constant dense<0.000000e+00> : vector<1x256xf32>
    %161 = tpu.matmul %159, %160, %cst_162 {dimension_numbers = #tpu.dot_dimension_numbers<[1], [0], [0], [1], [0, 0, 1, 1], [], []>} : vector<1x288xbf16>, vector<288x256xbf16>, vector<1x256xf32> -> vector<1x256xf32>
    %162 = arith.addf %158, %161 : vector<1x256xf32>
    %163 = vector.extract_strided_slice %137 {offsets = [6, 0], sizes = [1, 288], strides = [1, 1]} : vector<9x288xbf16> to vector<1x288xbf16>
    %c1728 = arith.constant 1728 : index
    %c0_163 = arith.constant 0 : index
    %164 = vector.load %arg6[%c1728, %c0_163] : memref<2592x256xbf16, #tpu.memory_space<vmem>>, vector<288x256xbf16>
    %cst_164 = arith.constant dense<0.000000e+00> : vector<1x256xf32>
    %165 = tpu.matmul %163, %164, %cst_164 {dimension_numbers = #tpu.dot_dimension_numbers<[1], [0], [0], [1], [0, 0, 1, 1], [], []>} : vector<1x288xbf16>, vector<288x256xbf16>, vector<1x256xf32> -> vector<1x256xf32>
    %166 = arith.addf %162, %165 : vector<1x256xf32>
    %167 = vector.extract_strided_slice %137 {offsets = [7, 0], sizes = [1, 288], strides = [1, 1]} : vector<9x288xbf16> to vector<1x288xbf16>
    %c2016 = arith.constant 2016 : index
    %c0_165 = arith.constant 0 : index
    %168 = vector.load %arg6[%c2016, %c0_165] : memref<2592x256xbf16, #tpu.memory_space<vmem>>, vector<288x256xbf16>
    %cst_166 = arith.constant dense<0.000000e+00> : vector<1x256xf32>
    %169 = tpu.matmul %167, %168, %cst_166 {dimension_numbers = #tpu.dot_dimension_numbers<[1], [0], [0], [1], [0, 0, 1, 1], [], []>} : vector<1x288xbf16>, vector<288x256xbf16>, vector<1x256xf32> -> vector<1x256xf32>
    %170 = arith.addf %166, %169 : vector<1x256xf32>
    %171 = vector.extract_strided_slice %137 {offsets = [8, 0], sizes = [1, 288], strides = [1, 1]} : vector<9x288xbf16> to vector<1x288xbf16>
    %c2304 = arith.constant 2304 : index
    %c0_167 = arith.constant 0 : index
    %172 = vector.load %arg6[%c2304, %c0_167] : memref<2592x256xbf16, #tpu.memory_space<vmem>>, vector<288x256xbf16>
    %cst_168 = arith.constant dense<0.000000e+00> : vector<1x256xf32>
    %173 = tpu.matmul %171, %172, %cst_168 {dimension_numbers = #tpu.dot_dimension_numbers<[1], [0], [0], [1], [0, 0, 1, 1], [], []>} : vector<1x288xbf16>, vector<288x256xbf16>, vector<1x256xf32> -> vector<1x256xf32>
    %174 = arith.addf %170, %173 : vector<1x256xf32>
    %175 = arith.addf %174, %2 : vector<1x256xf32>
    %cst_169 = arith.constant 0.000000e+00 : f32
    %176 = vector.broadcast %cst_169 : f32 to vector<1x256xf32>
    %177 = arith.maximumf %175, %176 : vector<1x256xf32>
    %178 = arith.truncf %177 : vector<1x256xf32> to vector<1x256xbf16>
    %c0_170 = arith.constant 0 : index
    %c0_171 = arith.constant 0 : index
    %179 = vector.load %arg8[%c0_170, %c0_171] : memref<256x128xbf16, #tpu.memory_space<vmem>>, vector<256x128xbf16>
    %cst_172 = arith.constant dense<0.000000e+00> : vector<1x128xf32>
    %180 = tpu.matmul %178, %179, %cst_172 {dimension_numbers = #tpu.dot_dimension_numbers<[1], [0], [0], [1], [0, 0, 1, 1], [], []>} : vector<1x256xbf16>, vector<256x128xbf16>, vector<1x128xf32> -> vector<1x128xf32>
    %181 = arith.addf %180, %3 : vector<1x128xf32>
    %c0_173 = arith.constant 0 : index
    %c0_174 = arith.constant 0 : index
    %c0_175 = arith.constant 0 : index
    %182 = vector.load %arg10[%c0_173, %c0_174, %c0_175] : memref<1x1x128xf32, #tpu.memory_space<vmem>>, vector<1x1x128xf32>
    %183 = vector.shape_cast %182 : vector<1x1x128xf32> to vector<1x128xf32>
    %184 = vector.shape_cast %181 : vector<1x128xf32> to vector<1x1x128xf32>
    tpu.vector_store %arg10[%c0_173, %c0_174, %c0_175], %184 {strides = array<i32>} : memref<1x1x128xf32, #tpu.memory_space<vmem>>, vector<1x1x128xf32>,
    return
  }
  func.func @transform_0(%arg0: i32) -> (i32, i32, i32, i32) {
    %c0_i32 = arith.constant 0 : i32
    %c0_i32_0 = arith.constant 0 : i32
    %c0_i32_1 = arith.constant 0 : i32
    %c0_i32_2 = arith.constant 0 : i32
    return %arg0, %c0_i32, %c0_i32_0, %c0_i32_1 : i32, i32, i32, i32
  }
  func.func @transform_1(%arg0: i32) -> (i32, i32, i32) {
    %c0_i32 = arith.constant 0 : i32
    %c0_i32_0 = arith.constant 0 : i32
    %c0_i32_1 = arith.constant 0 : i32
    %c0_i32_2 = arith.constant 0 : i32
    return %c0_i32, %c0_i32_0, %c0_i32_1 : i32, i32, i32
  }
  func.func @transform_2(%arg0: i32) -> (i32, i32) {
    %c0_i32 = arith.constant 0 : i32
    %c0_i32_0 = arith.constant 0 : i32
    %c0_i32_1 = arith.constant 0 : i32
    return %c0_i32, %c0_i32_0 : i32, i32
  }
  func.func @transform_3(%arg0: i32) -> (i32, i32, i32) {
    %c0_i32 = arith.constant 0 : i32
    %c0_i32_0 = arith.constant 0 : i32
    %c0_i32_1 = arith.constant 0 : i32
    %c0_i32_2 = arith.constant 0 : i32
    return %c0_i32, %c0_i32_0, %c0_i32_1 : i32, i32, i32
  }
  func.func @transform_4(%arg0: i32) -> (i32, i32) {
    %c0_i32 = arith.constant 0 : i32
    %c0_i32_0 = arith.constant 0 : i32
    %c0_i32_1 = arith.constant 0 : i32
    return %c0_i32, %c0_i32_0 : i32, i32
  }
  func.func @transform_5(%arg0: i32) -> (i32, i32) {
    %c0_i32 = arith.constant 0 : i32
    %c0_i32_0 = arith.constant 0 : i32
    %c0_i32_1 = arith.constant 0 : i32
    return %c0_i32, %c0_i32_0 : i32, i32
  }
  func.func @transform_6(%arg0: i32) -> (i32, i32) {
    %c0_i32 = arith.constant 0 : i32
    %c0_i32_0 = arith.constant 0 : i32
    %c0_i32_1 = arith.constant 0 : i32
    return %c0_i32, %c0_i32_0 : i32, i32
  }
  func.func @transform_7(%arg0: i32) -> (i32, i32) {
    %c0_i32 = arith.constant 0 : i32
    %c0_i32_0 = arith.constant 0 : i32
    %c0_i32_1 = arith.constant 0 : i32
    return %c0_i32, %c0_i32_0 : i32, i32
  }
  func.func @transform_8(%arg0: i32) -> (i32, i32) {
    %c0_i32 = arith.constant 0 : i32
    %c0_i32_0 = arith.constant 0 : i32
    %c0_i32_1 = arith.constant 0 : i32
    return %c0_i32, %c0_i32_0 : i32, i32
  }
  func.func @transform_9(%arg0: i32) -> (i32, i32, i32) {
    %c0_i32 = arith.constant 0 : i32
    %c0_i32_0 = arith.constant 0 : i32
    %c0_i32_1 = arith.constant 0 : i32
    return %arg0, %c0_i32, %c0_i32_0 : i32, i32, i32
  }
}

</mosaic_0001>

<bundles_post_ra>
// kernel: tpu_custom_call.1
= control target key start
LH: loop header
LB: loop body
LE: loop exit
PB: predicated region body
PF: predicated region fallthrough
CT: control target
= control target key end

     0   :  { %14 = vsyncpa [#allocation3], 0  ;;  %s23161_s0 = inlined_call_operand.vmem [shape: bf16[2,8,11,336], index: 0, kind: input, shape index: {}]   ;;  %s23162_s1 = inlined_call_operand.vmem [shape: bf16[8,336,320], index: 1, kind: input, shape index: {}]   ;;  %s23163_s2 = inlined_call_operand.vmem [shape: f32[1,320], index: 2, kind: input, shape index: {}]   ;;  %s23164_s3 = inlined_call_operand.vmem [shape: bf16[4,320,288], index: 3, kind: input, shape index: {}]   ;;  %s23165_s4 = inlined_call_operand.vmem [shape: f32[1,288], index: 4, kind: input, shape index: {}]   ;;  %s23166_s5 = inlined_call_operand.vmem [shape: bf16[2592,256], index: 5, kind: input, shape index: {}]   ;;  %s23167_s6 = inlined_call_operand.vmem [shape: f32[1,256], index: 6, kind: input, shape index: {}]   ;;  %s23168_s7 = inlined_call_operand.vmem [shape: bf16[256,128], index: 7, kind: input, shape index: {}]   ;;  %s23169_s8 = inlined_call_operand.vmem [shape: f32[1,128], index: 8, kind: input, shape index: {}]   ;;  %s23170_s9 = inlined_call_operand.hbm [shape: f32[2,1,128], index: 9, kind: output, shape index: {}]  }
   0x1   :  { %16 = vsyncpa [#allocation3 + $0x1], 0  ;;  %s17344_s30 = smov 0   ;;  %s17346_s10 = smov 0  }
   0x2   :  { %s17348_s11 = smov 0   ;;  %s17350_s12 = smov 0  }
   0x3 LB: > { %s17365_s13 = sadd.s32 4294967295, %s17288_s12   ;;  %s12237_s14 = sadd.s32 4294967294, %s17288_s12   ;;  %s17288_s12 = sphi %s17350_s12, %s23176_s12   ;;  %s17284_s11 = sphi %s17348_s11, %s23175_s11   ;;  %s17280_s10 = sphi %s17346_s10, %s23174_s10   ;;  %s17276_s30 = sphi %s17344_s30, %s23173_s30  }
   0x4   : > { %s17369_s15 = sadd.s32 1, %s17288_s12   ;;  %s223_s16 = sadd.s32 1, %s17284_s11 }
   0x5   : > { %s220_s17 = ssub.s32 %s17288_s12, %s17369_s15  ;;  %p233_p0 = scmp.ne.s32.totalorder %s17284_s11, %s17280_s10 }
   0x6   : > { %p221_p1 = scmp.eq.s32.totalorder %s220_s17, 0  ;;  %p234_p2 = scmp.eq.s32.totalorder %s17365_s13, 1 }
   0x7   : > { %p239_p3 = scmp.ne.s32.totalorder %s17280_s10, %s17276_s30  ;;  %p240_p4 = scmp.eq.s32.totalorder %s12237_s14, 1 }
   0x8   : > { %s17380_s18 = scalar_select %p221_p1, %s17284_s11, %s223_s16  }
   0x9   : > { %p17382_p5 = por %p234_p2, %p233_p0  ;;  %p17386_p6 = por %p240_p4, %p239_p3 }
   0xa   : > { %p12240_p7 = scmp.ge.s32.totalorder %s17288_s12, 1  ;;  %p290_p8 = scmp.lt.s32.totalorder %s17288_s12, 3 }
   0xc   : > { %p291_p9 = pnand %p12240_p7, %p290_p8 }
   0xd   : > { %p325_p10 = scmp.lt.s32.totalorder (!%p291_p9), %s17365_s13, 1  ;;  %s323_s22 = sand.u32 (!%p291_p9), 1, %s17280_s10  }
   0xe   : > { %294 = sbr.rel (%p291_p9) target bundleno = 2466 (0x9a2), region = 56  ;;  %s14273_s24 = sshll.u32 (!%p291_p9), %s17365_s13, 4 }
   0xf   : > { %s23126_s16 = scalar_lea.hbm (!%p291_p9), %s23170_s9, %s14273_s24  ;;  %s12170_s17 = scalar_lea.sflag (!%p291_p9), [#allocation3], %s323_s22 }
  0x13   : > { %v15169_v0 = vld [vmem:[%s23162_s1 + $0x2a4] ss:$12 sps:$4 sm:$0xff]   ;;  %v15171_v1 = vld [vmem:[%s23162_s1 + $0x3dc] ss:$12 sps:$4 sm:$0xff]   ;;  %v17290_v2 = vmov 0   ;;  %s326_s25 = scalar_select %p325_p10, %s17365_s13, 1 }
  0x14   : > { %943 = vmatprep.mubr.bf16.mxu1 %v17290_v2  ;;  %868 = vmatprep.subr.bf16.mxu0 %v15169_v0  ;;  %v15173_v3 = vld [vmem:[%s23162_s1 + $0x2a0] ss:$12 sps:$4 sm:$0xff]   ;;  %v15174_v4 = vld [vmem:[%s23162_s1 + $0x3d8] ss:$12 sps:$4 sm:$0xff]   ;;  %v15179_v7 = vld [vmem:[%s23162_s1 + $0x288] ss:$12 sps:$4 sm:$0xff]  }
  0x15   : > { %917 = vmatprep.subr.bf16.mxu1 %v15171_v1  ;;  %v15175_v5 = vld [vmem:[%s23162_s1 + $0x28c] ss:$12 sps:$4 sm:$0xff]   ;;  %869 = vmatpush1.bf16.msra.mxu0 %v15173_v3  ;;  %v15177_v6 = vld [vmem:[%s23162_s1 + $0x3c4] ss:$12 sps:$4 sm:$0xff]   ;;  %v15181_v9 = vld [vmem:[%s23162_s1 + $0x274] ss:$12 sps:$4 sm:$0xff]  }
  0x16   : > { %918 = vmatpush1.bf16.msra.mxu1 %v15174_v4  ;;  %870 = vmatprep.subr.bf16.mxu0 %v15175_v5  ;;  %v15180_v8 = vld [vmem:[%s23162_s1 + $0x3c0] ss:$12 sps:$4 sm:$0xff]   ;;  %v15185_v11 = vld [vmem:[%s23162_s1 + $0x270] ss:$12 sps:$4 sm:$0xff]   ;;  %v15186_v12 = vld [vmem:[%s23162_s1 + $0x3a8] ss:$12 sps:$4 sm:$0xff]  }
  0x17   : > { %919 = vmatprep.subr.bf16.mxu1 %v15177_v6  ;;  %v15183_v10 = vld [vmem:[%s23162_s1 + $0x3ac] ss:$12 sps:$4 sm:$0xff]   ;;  %v15187_v13 = vld [vmem:[%s23162_s1 + $0x25c] ss:$12 sps:$4 sm:$0xff]   ;;  %v15189_v14 = vld [vmem:[%s23162_s1 + $0x394] ss:$12 sps:$4 sm:$0xff]  }
  0x18   : > { %s15126_s27 = smul.u32 192, %s326_s25  ;;  %v15191_v15 = vld [vmem:[%s23162_s1 + $0x258] ss:$12 sps:$4 sm:$0xff]   ;;  %v15192_v16 = vld [vmem:[%s23162_s1 + $0x390] ss:$12 sps:$4 sm:$0xff]   ;;  %vm864_vm0 = vcmask 654336  }
  0x19   : > { %871 = vmatpush1.bf16.msra.mxu0 %v15179_v7  ;;  %v15193_v17 = vld [vmem:[%s23162_s1 + $0x244] ss:$12 sps:$4 sm:$0xff]   ;;  %v15195_v18 = vld [vmem:[%s23162_s1 + $0x37c] ss:$12 sps:$4 sm:$0xff]   ;;  %v15197_v19 = vld [vmem:[%s23162_s1 + $0x240] ss:$12 sps:$4 sm:$0xff]  }
  0x1a   : > { %920 = vmatpush1.bf16.msra.mxu1 %v15180_v8  ;;  %872 = vmatprep.subr.bf16.mxu0 %v15181_v9  ;;  %s17452_s26 = scalar_lea.vmem %s23161_s0, %s15126_s27  ;;  %v15198_v20 = vld [vmem:[%s23162_s1 + $0x378] ss:$12 sps:$4 sm:$0xff]   ;;  %v15203_v24 = vld [vmem:[%s23162_s1 + $0x368] ss:$12 sps:$4 sm:$0xff]   ;;  %v15208_v29 = vld [vmem:[%s23162_s1 + $0x350] ss:$12 sps:$4 sm:$0xff]  }
  0x1b   : > { %921 = vmatprep.subr.bf16.mxu1 %v15183_v10  ;;  %v15199_v21 = vld [vmem:[%s23162_s1 + $0x22c] ss:$12 sps:$4 sm:$0xff]   ;;  %v12243_v22 = vld [vmem:[%s17452_s26 + $0x20] sm:$0xf]  ;;  %v15204_v26 = vld [vmem:[%s23162_s1 + $0x228] ss:$12 sps:$4 sm:$0xff]  }
  0x1c   : > { %v12245_v23 = vld [vmem:[%s17452_s26 + $0x2c] sm:$0x1]  ;;  %v15205_v27 = vld [vmem:[%s23162_s1 + $0x2a8] ss:$12 sps:$4 sm:$0xff]   ;;  %v15209_v30 = vld [vmem:[%s23162_s1 + $0x210] ss:$12 sps:$4 sm:$0xff]  }
  0x1d   : > { %873 = vmatpush1.bf16.msra.mxu0 %v15185_v11  ;;  %v17468_v25 = vcombine.low %v12243_v22, %v12245_v23  ;;  %v15206_v28 = vld [vmem:[%s23162_s1 + $0x214] ss:$12 sps:$4 sm:$0xff]   ;;  %v15210_v31 = vld [vmem:[%s23162_s1 + $0x290] ss:$12 sps:$4 sm:$0xff]   ;;  %v15213_v33 = vld [vmem:[%s23162_s1 + $0x338] ss:$12 sps:$4 sm:$0xff]  }
  0x1e   : > { %922 = vmatpush1.bf16.msra.mxu1 %v15186_v12  ;;  %874 = vmatprep.subr.bf16.mxu0 %v15187_v13  ;;  %v15211_v32 = vld [vmem:[%s23162_s1 + $0x1fc] ss:$12 sps:$4 sm:$0xff]   ;;  %v15214_v34 = vld [vmem:[%s23162_s1 + $0x1f8] ss:$12 sps:$4 sm:$0xff]   ;;  %v15218_v37 = vld [vmem:[%s23162_s1 + $0x320] ss:$12 sps:$4 sm:$0xff]  }
  0x1f   : > { %923 = vmatprep.subr.bf16.mxu1 %v15189_v14  ;;  %v15215_v35 = vld [vmem:[%s23162_s1 + $0x278] ss:$12 sps:$4 sm:$0xff]   ;;  %v15219_v38 = vld [vmem:[%s23162_s1 + $0x360] ss:$12 sps:$4 sm:$0xff]   ;;  %v15223_v41 = vld [vmem:[%s23162_s1 + $0x308] ss:$12 sps:$4 sm:$0xff]  }
  0x20   : > { %v15216_v36 = vld [vmem:[%s23162_s1 + $0x364] ss:$12 sps:$4 sm:$0xff]   ;;  %v15220_v39 = vld [vmem:[%s23162_s1 + $0x260] ss:$12 sps:$4 sm:$0xff]   ;;  %v15224_v42 = vld [vmem:[%s23162_s1 + $0x348] ss:$12 sps:$4 sm:$0xff]  }
  0x21   : > { %875 = vmatpush1.bf16.msra.mxu0 %v15191_v15  ;;  %v15221_v40 = vld [vmem:[%s23162_s1 + $0x34c] ss:$12 sps:$4 sm:$0xff]   ;;  %v15225_v43 = vld [vmem:[%s23162_s1 + $0x248] ss:$12 sps:$4 sm:$0xff]   ;;  %v15228_v45 = vld [vmem:[%s23162_s1 + $0x2f0] ss:$12 sps:$4 sm:$0xff]  }
  0x22   : > { %924 = vmatpush1.bf16.msra.mxu1 %v15192_v16  ;;  %876 = vmatprep.subr.bf16.mxu0 %v15193_v17  ;;  %v15226_v44 = vld [vmem:[%s23162_s1 + $0x334] ss:$12 sps:$4 sm:$0xff]   ;;  %v15229_v46 = vld [vmem:[%s23162_s1 + $0x330] ss:$12 sps:$4 sm:$0xff]   ;;  %v15233_v49 = vld [vmem:[%s23162_s1 + $0x2d8] ss:$12 sps:$4 sm:$0xff]  }
  0x23   : > { %925 = vmatprep.subr.bf16.mxu1 %v15195_v18  ;;  %v15230_v47 = vld [vmem:[%s23162_s1 + $0x230] ss:$12 sps:$4 sm:$0xff]   ;;  %v12244_v51 = vld [vmem:[%s17452_s26 + $0x24] sm:$0x11]  ;;  %v15238_v56 = vld [vmem:[%s23162_s1 + $0x2c0] ss:$12 sps:$4 sm:$0xff]  }
  0x24   : > { %v15231_v48 = vld [vmem:[%s23162_s1 + $0x31c] ss:$12 sps:$4 sm:$0xff]   ;;  %v15234_v52 = vld [vmem:[%s23162_s1 + $0x318] ss:$12 sps:$4 sm:$0xff]   ;;  %v15239_v57 = vld [vmem:[%s23162_s1 + $0x300] ss:$12 sps:$4 sm:$0xff]  }
  0x25   : > { %877 = vmatpush1.bf16.msra.mxu0 %v15197_v19  ;;  %v12242_v50 = vld [vmem:[%s17452_s26 + $0x18] sm:$0xff]  ;;  %v15236_v55 = vld [vmem:[%s23162_s1 + $0x304] ss:$12 sps:$4 sm:$0xff]   ;;  %v15240_v58 = vld [vmem:[%s23162_s1 + $0x200] ss:$12 sps:$4 sm:$0xff]   ;;  %v17291_v63 = vmov 0.0  }
  0x26   : > { %926 = vmatpush1.bf16.msra.mxu1 %v15198_v20  ;;  %878 = vmatprep.subr.bf16.mxu0 %v15199_v21  ;;  %v12331_v53 = vcombine.high %v12242_v50, %v12244_v51  ;;  %v15235_v54 = vld [vmem:[%s23162_s1 + $0x218] ss:$12 sps:$4 sm:$0xff]   ;;  %v12330_v60 = vcombine.low %v12242_v50, %v12244_v51  ;;  %v15245_v61 = vld [vmem:[%s23162_s1 + $0x2e8] ss:$12 sps:$4 sm:$0xff]   ;;  %v15246_v62 = vld [vmem:[%s23162_s1 + $0x3e0] ss:$12 sps:$4 sm:$0xff]  }
  0x27   : > { %14276 = vmatprep.subr.bf16.mxu1 %v15203_v24  ;;  %v15243_v59 = vld [vmem:[%s23162_s1 + $0x2ec] ss:$12 sps:$4 sm:$0xff]   ;;  %v15247_v0 = vld [vmem:[%s23162_s1 + $0x2d4] ss:$12 sps:$4 sm:$0xff]   ;;  %v15249_v1 = vld [vmem:[%s23162_s1 + $0x2d0] ss:$12 sps:$4 sm:$0xff]  }
  0x28   : > { %900 = vmatprep.mubr.bf16.mxu0 %v12331_v53  ;;  %v15250_v3 = vld [vmem:[%s23162_s1 + $0x3c8] ss:$12 sps:$4 sm:$0xff]   ;;  %vm17292_vm1 = vmmov 0   ;;  %v15253_v5 = vld [vmem:[%s23162_s1 + $0x2b8] ss:$12 sps:$4 sm:$0xff]   ;;  %vm7317_vm2 = vcmask 523264  }
  0x29   : > { %12396 = vmatmul.mubr.msk.bf16.vlgmr.msra.gmra.mxu1 %vm864_vm0, %v17468_v25  ;;  %879 = vmatpush1.bf16.msra.mxu0 %v15204_v26  ;;  %v15251_v4 = vld [vmem:[%s23162_s1 + $0x2bc] ss:$12 sps:$4 sm:$0xff]   ;;  %v15257_v7 = vld [vmem:[%s23162_s1 + $0xac] ss:$12 sps:$4 sm:$0xff]   ;;  %v15261_v10 = vld [vmem:[%s23162_s1 + $0x94] ss:$12 sps:$4 sm:$0xff]  }
  0x2a   : > { %14277 = vmatpush3.bf16.msra.mxu1 %v15205_v27  ;;  %880 = vmatprep.subr.bf16.mxu0 %v15206_v28  ;;  %v15254_v6 = vld [vmem:[%s23162_s1 + $0x3b0] ss:$12 sps:$4 sm:$0xff]   ;;  %v15255_v8 = vld [vmem:[%s23162_s1 + $0xa8] ss:$12 sps:$4 sm:$0xff]   ;;  %v15258_v9 = vld [vmem:[%s23162_s1 + $0x398] ss:$12 sps:$4 sm:$0xff]  }
  0x2b   : > { %14278 = vmatprep.subr.bf16.mxu1 %v15208_v29  ;;  %986 = vmatprep.mubr.bf16.mxu1 %v12331_v53  ;;  %v15259_v11 = vld [vmem:[%s23162_s1 + $0x90] ss:$12 sps:$4 sm:$0xff]   ;;  %v15262_v12 = vld [vmem:[%s23162_s1 + $0x380] ss:$12 sps:$4 sm:$0xff]   ;;  %v15263_v15 = vld [vmem:[%s23162_s1 + $0x78] ss:$12 sps:$4 sm:$0xff]  }
  0x2c   : > { %v15265_v13 = vld [vmem:[%s23162_s1 + $0x7c] ss:$12 sps:$4 sm:$0xff]   ;;  %v15268_v14 = vld [vmem:[%s23162_s1 + $0x1e4] ss:$12 sps:$4 sm:$0xff]   ;;  %v15266_v16 = vld [vmem:[%s23162_s1 + $0x1e0] ss:$12 sps:$4 sm:$0xff]  }
  0x2d   : > { %881 = vmatpush1.bf16.msra.mxu0 %v15209_v30  ;;  %v15271_v17 = vld [vmem:[%s23162_s1 + $0x64] ss:$12 sps:$4 sm:$0xff]   ;;  %v15274_v18 = vld [vmem:[%s23162_s1 + $0x1cc] ss:$12 sps:$4 sm:$0xff]   ;;  %v15272_v20 = vld [vmem:[%s23162_s1 + $0x1c8] ss:$12 sps:$4 sm:$0xff]  }
  0x2e   : > { %14279 = vmatpush3.bf16.msra.mxu1 %v15210_v31  ;;  %882 = vmatprep.subr.bf16.mxu0 %v15211_v32  ;;  %v15269_v19 = vld [vmem:[%s23162_s1 + $0x60] ss:$12 sps:$4 sm:$0xff]   ;;  %v15275_v23 = vld [vmem:[%s23162_s1 + $0x48] ss:$12 sps:$4 sm:$0xff]   ;;  %v15278_v24 = vld [vmem:[%s23162_s1 + $0x1b0] ss:$12 sps:$4 sm:$0xff]  }
  0x2f   : > { %14280 = vmatprep.subr.bf16.mxu1 %v15213_v33  ;;  %v15277_v21 = vld [vmem:[%s23162_s1 + $0x4c] ss:$12 sps:$4 sm:$0xff]   ;;  %v15280_v22 = vld [vmem:[%s23162_s1 + $0x1b4] ss:$12 sps:$4 sm:$0xff]   ;;  %v15286_v26 = vld [vmem:[%s23162_s1 + $0x19c] ss:$12 sps:$4 sm:$0xff]  }
  0x30   : > { %v15281_v27 = vld [vmem:[%s23162_s1 + $0x30] ss:$12 sps:$4 sm:$0xff]   ;;  %v15284_v28 = vld [vmem:[%s23162_s1 + $0x198] ss:$12 sps:$4 sm:$0xff]   ;;  %v15290_v32 = vld [vmem:[%s23162_s1 + $0x180] ss:$12 sps:$4 sm:$0xff]  }
  0x31   : > { %883 = vmatpush1.bf16.msra.mxu0 %v15214_v34  ;;  %v15289_v29 = vld [vmem:[%s23162_s1 + $0x1c] ss:$12 sps:$4 sm:$0xff]   ;;  %v15292_v30 = vld [vmem:[%s23162_s1 + $0x184] ss:$12 sps:$4 sm:$0xff]   ;;  %v15309_v50 = vld [vmem:[%s23162_s1 + $0x80] ss:$12 sps:$4 sm:$0xff]  }
  0x32   : > { %14281 = vmatpush3.bf16.msra.mxu1 %v15215_v35  ;;  %884 = vmatprep.subr.bf16.mxu0 %v15216_v36  ;;  %v15287_v31 = vld [vmem:[%s23162_s1 + $0x18] ss:$12 sps:$4 sm:$0xff]   ;;  %v336_v34 = vld [vmem:[%s17452_s26 + $0x8] sm:$0xf]  ;;  %v338_v35 = vld [vmem:[%s17452_s26 + $0x14] sm:$0x1] }
  0x33   : > { %14282 = vmatprep.subr.bf16.mxu1 %v15218_v37  ;;  %v15295_v33 = vld [vmem:[%s23162_s1 + $0x4] ss:$12 sps:$4 sm:$0xff]   ;;  %v15293_v37 = vld [vmem:[%s23162_s1] ss:$12 sps:$4 sm:$0xff]   ;;  %v15312_v51 = vld [vmem:[%s23162_s1 + $0x13c] ss:$12 sps:$4 sm:$0xff]  }
  0x34   : > { %v15298_v36 = vld [vmem:[%s23162_s1 + $0x170] ss:$12 sps:$4 sm:$0xff]   ;;  %v15310_v53 = vld [vmem:[%s23162_s1 + $0x138] ss:$12 sps:$4 sm:$0xff]   ;;  %vm9474_vm3 = vcmask 261120   ;;  %s17293_s13 = smov [#allocation2]  }
  0x35   : > { %885 = vmatpush2.bf16.msra.mxu0 %v15219_v38  ;;  %v17690_v38 = vcombine.low %v336_v34, %v338_v35  ;;  %v15363_v34 = vld [vmem:[%s23162_s1 + $0x420] ss:$12 sps:$4 sm:$0xff]   ;;  %v15366_v35 = vld [vmem:[%s23162_s1 + $0x5b8] ss:$12 sps:$4 sm:$0xff]   ;;  %s17232_s27 = sshll.u32 %s17293_s13, 4  ;;  %s17233_s27 = int_to_ptr.vmem [resolvable:$false] %s17232_s27 }
  0x36   : > { %14283 = vmatpush3.bf16.msra.mxu1 %v15220_v39  ;;  %886 = vmatprep.subr.bf16.mxu0 %v15221_v40  ;;  %v15299_v39 = vld [vmem:[%s23162_s1 + $0xb0] ss:$12 sps:$4 sm:$0xff]   ;;  %v15302_v40 = vld [vmem:[%s23162_s1 + $0x16c] ss:$12 sps:$4 sm:$0xff]   ;;  %s17234_s23 = scalar_lea.vmem %s17233_s27, 32 }
  0x37   : > { %14284 = vmatprep.subr.bf16.mxu1 %v15223_v41  ;;  %v15303_v41 = vld [vmem:[%s23162_s1 + $0x158] ss:$12 sps:$4 sm:$0xff]  }
  0x39   : > { %887 = vmatpush2.bf16.msra.mxu0 %v15224_v42  ;;  %v15300_v42 = vld [vmem:[%s23162_s1 + $0x168] ss:$12 sps:$4 sm:$0xff]  }
  0x3a   : > { %14285 = vmatpush3.bf16.msra.mxu1 %v15225_v43  ;;  %888 = vmatprep.subr.bf16.mxu0 %v15226_v44  ;;  %v335_v43 = vld [vmem:[%s17452_s26] sm:$0xff]  ;;  %v337_v44 = vld [vmem:[%s17452_s26 + $0xc] sm:$0x11] }
  0x3b   : > { %14286 = vmatprep.subr.bf16.mxu1 %v15228_v45  ;;  %v15304_v45 = vld [vmem:[%s23162_s1 + $0x98] ss:$12 sps:$4 sm:$0xff]  }
  0x3d   : > { %889 = vmatpush2.bf16.msra.mxu0 %v15229_v46  ;;  %v12399_v46 = vcombine.high %v335_v43, %v337_v44 }
  0x3e   : > { %14287 = vmatpush3.bf16.msra.mxu1 %v15230_v47  ;;  %890 = vmatprep.subr.bf16.mxu0 %v15231_v48  ;;  %v15307_v47 = vld [vmem:[%s23162_s1 + $0x154] ss:$12 sps:$4 sm:$0xff]  }
  0x3f   : > { %14288 = vmatprep.subr.bf16.mxu1 %v15233_v49  ;;  %v15308_v48 = vld [vmem:[%s23162_s1 + $0x140] ss:$12 sps:$4 sm:$0xff]   ;;  %v15305_v49 = vld [vmem:[%s23162_s1 + $0x150] ss:$12 sps:$4 sm:$0xff]  }
  0x41   : > { %891 = vmatpush2.bf16.msra.mxu0 %v15234_v52  ;;  %v15313_v52 = vld [vmem:[%s23162_s1 + $0x128] ss:$12 sps:$4 sm:$0xff]  }
  0x42   : > { %14289 = vmatpush3.bf16.msra.mxu1 %v15235_v54  ;;  %892 = vmatprep.subr.bf16.mxu0 %v15236_v55  ;;  %v15314_v54 = vld [vmem:[%s23162_s1 + $0x68] ss:$12 sps:$4 sm:$0xff]   ;;  %v15317_v55 = vld [vmem:[%s23162_s1 + $0x124] ss:$12 sps:$4 sm:$0xff]  }
  0x43   : > { %14290 = vmatprep.subr.bf16.mxu1 %v15238_v56  ;;  %v15318_v56 = vld [vmem:[%s23162_s1 + $0x110] ss:$12 sps:$4 sm:$0xff]  }
  0x45   : > { %893 = vmatpush2.bf16.msra.mxu0 %v15239_v57  ;;  %v15315_v57 = vld [vmem:[%s23162_s1 + $0x120] ss:$12 sps:$4 sm:$0xff]  }
  0x46   : > { %14291 = vmatpush3.bf16.msra.mxu1 %v15240_v58  ;;  %894 = vmatprep.subr.bf16.mxu0 %v15243_v59  ;;  %v15319_v58 = vld [vmem:[%s23162_s1 + $0x50] ss:$12 sps:$4 sm:$0xff]   ;;  %v15322_v59 = vld [vmem:[%s23162_s1 + $0x10c] ss:$12 sps:$4 sm:$0xff]  }
  0x47   : > { %14854 = vmatprep.subr.bf16.mxu1 %v17291_v63 }
  0x49   : > { %987 = vmatmul.mubr.bf16.vlgmr.msra.gmra.mxu1 %v12330_v60  ;;  %895 = vmatpush2.bf16.msra.mxu0 %v15245_v61  ;;  %v15320_v61 = vld [vmem:[%s23162_s1 + $0x108] ss:$12 sps:$4 sm:$0xff]  }
  0x4a   : > { %14855 = vmatpush3.bf16.msra.mxu1 %v15246_v62  ;;  %896 = vmatprep.subr.bf16.mxu0 %v15247_v0  ;;  %v15324_v62 = vld [vmem:[%s23162_s1 + $0x38] ss:$12 sps:$4 sm:$0xff]   ;;  %v15327_v0 = vld [vmem:[%s23162_s1 + $0xf4] ss:$12 sps:$4 sm:$0xff]  }
  0x4b   : > { %14856 = vmatprep.subr.bf16.mxu1 %v17291_v63  ;;  %14864 = vmatprep.mubr.msk.bf16.mxu1 %vm17292_vm1, %v17291_v63 }
  0x4d   : > { %897 = vmatpush2.bf16.msra.mxu0 %v15249_v1  ;;  %v15328_v1 = vld [vmem:[%s23162_s1 + $0xe0] ss:$12 sps:$4 sm:$0xff]  }
  0x4e   : > { %14857 = vmatpush3.bf16.msra.mxu1 %v15250_v3  ;;  %898 = vmatprep.subr.bf16.mxu0 %v15251_v4  ;;  %v15325_v3 = vld [vmem:[%s23162_s1 + $0xf0] ss:$12 sps:$4 sm:$0xff]   ;;  %v15329_v4 = vld [vmem:[%s23162_s1 + $0x20] ss:$12 sps:$4 sm:$0xff]  }
  0x4f   : > { %14858 = vmatprep.subr.bf16.mxu1 %v17291_v63 }
  0x51   : > { %899 = vmatpush2.bf16.msra.mxu0 %v15253_v5  ;;  %v15332_v5 = vld [vmem:[%s23162_s1 + $0xdc] ss:$12 sps:$4 sm:$0xff]  }
  0x52   : > { %14859 = vmatpush3.bf16.msra.mxu1 %v15254_v6  ;;  %1390 = vmatprep.subr.bf16.mxu0 %v15257_v7  ;;  %v15333_v6 = vld [vmem:[%s23162_s1 + $0xc8] ss:$12 sps:$4 sm:$0xff]   ;;  %v15330_v7 = vld [vmem:[%s23162_s1 + $0xd8] ss:$12 sps:$4 sm:$0xff]  }
  0x53   : > { %14860 = vmatprep.subr.bf16.mxu1 %v17291_v63 }
  0x54   : > { %901 = vmatmul.mubr.bf16.vlgmr.msra.gmra.mxu0 %v12330_v60  ;;  %v15323_v60 = vld [vmem:[%s23162_s1 + $0xf8] ss:$12 sps:$4 sm:$0xff]  }
  0x55   : > { %1391 = vmatpush1.bf16.msra.mxu0 %v15255_v8  ;;  %1422 = vmatprep.mubr.bf16.mxu0 %v12399_v46  ;;  %v15334_v8 = vld [vmem:[%s23162_s1 + $0x8] ss:$12 sps:$4 sm:$0xff]  }
  0x56   : > { %14861 = vmatpush3.bf16.msra.mxu1 %v15258_v9  ;;  %1392 = vmatprep.subr.bf16.mxu0 %v15261_v10  ;;  %v15339_v9 = vld [vmem:[%s23162_s1 + $0xc4] ss:$12 sps:$4 sm:$0xff]   ;;  %v12398_v10 = vcombine.low %v335_v43, %v337_v44  ;;  %v15378_v43 = vld [vmem:[%s23162_s1 + $0x588] ss:$12 sps:$4 sm:$0xff]  }
  0x57   : > { %14862 = vmatprep.subr.bf16.mxu1 %v17291_v63  ;;  %v15383_v44 = vld [vmem:[%s23162_s1 + $0x55c] ss:$12 sps:$4 sm:$0xff]  }
  0x59   : > { %1393 = vmatpush1.bf16.msra.mxu0 %v15259_v11  ;;  %v15337_v11 = vld [vmem:[%s23162_s1 + $0xc0] ss:$12 sps:$4 sm:$0xff]  }
  0x5a   : > { %14863 = vmatpush3.bf16.msra.mxu1 %v15262_v12  ;;  %1394 = vmatprep.subr.bf16.mxu0 %v15265_v13  ;;  %v15340_v12 = vld [vmem:[%s23162_s1 + $0x1e8] ss:$12 sps:$4 sm:$0xff]  }
  0x5b   : > { %1439 = vmatprep.subr.bf16.mxu1 %v15268_v14  ;;  %v15343_v13 = vld [vmem:[%s23162_s1 + $0x49c] ss:$12 sps:$4 sm:$0xff]   ;;  %v15341_v14 = vld [vmem:[%s23162_s1 + $0x498] ss:$12 sps:$4 sm:$0xff]  }
  0x5d   : > { %14865 = vmatmul.mubr.msk.bf16.vlgmr.msra.gmra.mxu1 %vm864_vm0, %v17468_v25  ;;  %1395 = vmatpush1.bf16.msra.mxu0 %v15263_v15  ;;  %v15283_v25 = vld [vmem:[%s23162_s1 + $0x34] ss:$12 sps:$4 sm:$0xff]   ;;  %v15344_v15 = vld [vmem:[%s23162_s1 + $0x1d0] ss:$12 sps:$4 sm:$0xff]  }
  0x5e   : > { %1440 = vmatpush1.bf16.msra.mxu1 %v15266_v16  ;;  %1396 = vmatprep.subr.bf16.mxu0 %v15271_v17  ;;  %v15347_v16 = vld [vmem:[%s23162_s1 + $0x484] ss:$12 sps:$4 sm:$0xff]   ;;  %v15345_v17 = vld [vmem:[%s23162_s1 + $0x480] ss:$12 sps:$4 sm:$0xff]  }
  0x5f   : > { %1441 = vmatprep.subr.bf16.mxu1 %v15274_v18  ;;  %1465 = vmatprep.mubr.bf16.mxu1 %v17290_v2  ;;  %v15348_v18 = vld [vmem:[%s23162_s1 + $0x1b8] ss:$12 sps:$4 sm:$0xff]  }
  0x61   : > { %1397 = vmatpush1.bf16.msra.mxu0 %v15269_v19  ;;  %v15351_v19 = vld [vmem:[%s23162_s1 + $0x46c] ss:$12 sps:$4 sm:$0xff]  }
  0x62   : > { %1442 = vmatpush1.bf16.msra.mxu1 %v15272_v20  ;;  %1398 = vmatprep.subr.bf16.mxu0 %v15277_v21  ;;  %v15349_v20 = vld [vmem:[%s23162_s1 + $0x468] ss:$12 sps:$4 sm:$0xff]   ;;  %v15352_v21 = vld [vmem:[%s23162_s1 + $0x1a0] ss:$12 sps:$4 sm:$0xff]  }
  0x63   : > { %1443 = vmatprep.subr.bf16.mxu1 %v15280_v22  ;;  %v15355_v22 = vld [vmem:[%s23162_s1 + $0x454] ss:$12 sps:$4 sm:$0xff]  }
  0x65   : > { %1399 = vmatpush1.bf16.msra.mxu0 %v15275_v23  ;;  %v15353_v23 = vld [vmem:[%s23162_s1 + $0x450] ss:$12 sps:$4 sm:$0xff]  }
  0x66   : > { %1444 = vmatpush1.bf16.msra.mxu1 %v15278_v24  ;;  %1400 = vmatprep.subr.bf16.mxu0 %v15283_v25  ;;  %v15356_v24 = vld [vmem:[%s23162_s1 + $0x188] ss:$12 sps:$4 sm:$0xff]  }
  0x67   : > { %1445 = vmatprep.subr.bf16.mxu1 %v15286_v26  ;;  %v15359_v25 = vld [vmem:[%s23162_s1 + $0x43c] ss:$12 sps:$4 sm:$0xff]   ;;  %v15362_v26 = vld [vmem:[%s23162_s1 + $0x5d4] ss:$12 sps:$4 sm:$0xff]  }
  0x69   : > { %1401 = vmatpush1.bf16.msra.mxu0 %v15281_v27  ;;  %v15357_v27 = vld [vmem:[%s23162_s1 + $0x438] ss:$12 sps:$4 sm:$0xff]  }
  0x6a   : > { %1446 = vmatpush1.bf16.msra.mxu1 %v15284_v28  ;;  %1402 = vmatprep.subr.bf16.mxu0 %v15289_v29  ;;  %v15360_v28 = vld [vmem:[%s23162_s1 + $0x5d0] ss:$12 sps:$4 sm:$0xff]  }
  0x6b   : > { %1447 = vmatprep.subr.bf16.mxu1 %v15292_v30  ;;  %v15365_v29 = vld [vmem:[%s23162_s1 + $0x424] ss:$12 sps:$4 sm:$0xff]   ;;  %v15368_v30 = vld [vmem:[%s23162_s1 + $0x5bc] ss:$12 sps:$4 sm:$0xff]  }
  0x6d   : > { %1403 = vmatpush1.bf16.msra.mxu0 %v15287_v31  ;;  %v17854_v31 = vld [vmem:[%s17452_s26 + $0x30] sm:$0xff] }
  0x6e   : > { %1448 = vmatpush1.bf16.msra.mxu1 %v15290_v32  ;;  %1404 = vmatprep.subr.bf16.mxu0 %v15295_v33  ;;  %v17857_v32 = vld [vmem:[%s17452_s26 + $0x3c] sm:$0x11] }
  0x6f   : > { %14304 = vmatprep.subr.bf16.mxu1 %v15298_v36  ;;  %v12555_v33 = vcombine.high %v17854_v31, %v17857_v32  ;;  %v15371_v36 = vld [vmem:[%s23162_s1 + $0x40c] ss:$12 sps:$4 sm:$0xff]  }
  0x71   : > { %12464 = vmatmul.mubr.msk.bf16.vlgmr.msra.gmra.mxu1 %vm864_vm0, %v17690_v38  ;;  %1405 = vmatpush1.bf16.msra.mxu0 %v15293_v37  ;;  %v15374_v37 = vld [vmem:[%s23162_s1 + $0x5a4] ss:$12 sps:$4 sm:$0xff]  }
  0x72   : > { %14305 = vmatpush3.bf16.msra.mxu1 %v15299_v39  ;;  %1406 = vmatprep.subr.bf16.mxu0 %v15302_v40  ;;  %v15372_v39 = vld [vmem:[%s23162_s1 + $0x5a0] ss:$12 sps:$4 sm:$0xff]  }
  0x73   : > { %14306 = vmatprep.subr.bf16.mxu1 %v15303_v41  ;;  %1508 = vmatprep.mubr.bf16.mxu1 %v12399_v46  ;;  %v15377_v40 = vld [vmem:[%s23162_s1 + $0x3f4] ss:$12 sps:$4 sm:$0xff]   ;;  %v15380_v41 = vld [vmem:[%s23162_s1 + $0x58c] ss:$12 sps:$4 sm:$0xff]  }
  0x74   : > { %v15381_v46 = vld [vmem:[%s23162_s1 + $0x558] ss:$12 sps:$4 sm:$0xff]  }
  0x75   : > { %1407 = vmatpush2.bf16.msra.mxu0 %v15300_v42  ;;  %v15375_v42 = vld [vmem:[%s23162_s1 + $0x3f0] ss:$12 sps:$4 sm:$0xff]  }
  0x76   : > { %14307 = vmatpush3.bf16.msra.mxu1 %v15304_v45  ;;  %1408 = vmatprep.subr.bf16.mxu0 %v15307_v47  ;;  %v15386_v45 = vld [vmem:[%s23162_s1 + $0x574] ss:$12 sps:$4 sm:$0xff]   ;;  %v15384_v47 = vld [vmem:[%s23162_s1 + $0x570] ss:$12 sps:$4 sm:$0xff]  }
  0x77   : > { %14308 = vmatprep.subr.bf16.mxu1 %v15308_v48  ;;  %v12467_v48 = vld [vmem:[%s17452_s26 + $0x38] sm:$0xf] }
  0x79   : > { %1409 = vmatpush2.bf16.msra.mxu0 %v15305_v49  ;;  %v12469_v49 = vld [vmem:[%s17452_s26 + $0x44] sm:$0x1] }
  0x7a   : > { %14309 = vmatpush3.bf16.msra.mxu1 %v15309_v50  ;;  %1410 = vmatprep.subr.bf16.mxu0 %v15312_v51  ;;  %v15389_v50 = vld [vmem:[%s23162_s1 + $0x544] ss:$12 sps:$4 sm:$0xff]   ;;  %v15392_v51 = vld [vmem:[%s23162_s1 + $0x560] ss:$12 sps:$4 sm:$0xff]  }
  0x7b   : > { %14310 = vmatprep.subr.bf16.mxu1 %v15313_v52  ;;  %v15387_v52 = vld [vmem:[%s23162_s1 + $0x540] ss:$12 sps:$4 sm:$0xff]  }
  0x7d   : > { %1411 = vmatpush2.bf16.msra.mxu0 %v15310_v53  ;;  %v17917_v53 = vcombine.low %v12467_v48, %v12469_v49  ;;  %v15465_v48 = vld [vmem:[%s23162_s1 + $0x5ec] ss:$12 sps:$4 sm:$0xff]   ;;  %v15468_v49 = vld [vmem:[%s23162_s1 + $0x784] ss:$12 sps:$4 sm:$0xff]  }
  0x7e   : > { %14311 = vmatpush3.bf16.msra.mxu1 %v15314_v54  ;;  %1412 = vmatprep.subr.bf16.mxu0 %v15317_v55  ;;  %v15393_v54 = vld [vmem:[%s23162_s1 + $0x4a0] ss:$12 sps:$4 sm:$0xff]  }
  0x7f   : > { %14312 = vmatprep.subr.bf16.mxu1 %v15318_v56  ;;  %v15396_v55 = vld [vmem:[%s23162_s1 + $0x52c] ss:$12 sps:$4 sm:$0xff]   ;;  %v15397_v56 = vld [vmem:[%s23162_s1 + $0x548] ss:$12 sps:$4 sm:$0xff]  }
  0x81   : > { %1413 = vmatpush2.bf16.msra.mxu0 %v15315_v57  ;;  %v15394_v57 = vld [vmem:[%s23162_s1 + $0x528] ss:$12 sps:$4 sm:$0xff]  }
  0x82   : > { %14313 = vmatpush3.bf16.msra.mxu1 %v15319_v58  ;;  %1414 = vmatprep.subr.bf16.mxu0 %v15322_v59  ;;  %v15398_v58 = vld [vmem:[%s23162_s1 + $0x488] ss:$12 sps:$4 sm:$0xff]  }
  0x83   : > { %14314 = vmatprep.subr.bf16.mxu1 %v15323_v60  ;;  %v15401_v59 = vld [vmem:[%s23162_s1 + $0x514] ss:$12 sps:$4 sm:$0xff]   ;;  %v15402_v60 = vld [vmem:[%s23162_s1 + $0x530] ss:$12 sps:$4 sm:$0xff]  }
  0x85   : > { %1415 = vmatpush2.bf16.msra.mxu0 %v15320_v61  ;;  %v15399_v61 = vld [vmem:[%s23162_s1 + $0x510] ss:$12 sps:$4 sm:$0xff]  }
  0x86   : > { %14315 = vmatpush3.bf16.msra.mxu1 %v15324_v62  ;;  %1416 = vmatprep.subr.bf16.mxu0 %v15327_v0  ;;  %v15403_v62 = vld [vmem:[%s23162_s1 + $0x470] ss:$12 sps:$4 sm:$0xff]  }
  0x87   : > { %14316 = vmatprep.subr.bf16.mxu1 %v15328_v1  ;;  %v15406_v0 = vld [vmem:[%s23162_s1 + $0x4fc] ss:$12 sps:$4 sm:$0xff]   ;;  %v15407_v1 = vld [vmem:[%s23162_s1 + $0x518] ss:$12 sps:$4 sm:$0xff]  }
  0x89   : > { %1417 = vmatpush2.bf16.msra.mxu0 %v15325_v3  ;;  %v15404_v3 = vld [vmem:[%s23162_s1 + $0x4f8] ss:$12 sps:$4 sm:$0xff]  }
  0x8a   : > { %14317 = vmatpush3.bf16.msra.mxu1 %v15329_v4  ;;  %1418 = vmatprep.subr.bf16.mxu0 %v15332_v5  ;;  %v15408_v4 = vld [vmem:[%s23162_s1 + $0x458] ss:$12 sps:$4 sm:$0xff]  }
  0x8b   : > { %14318 = vmatprep.subr.bf16.mxu1 %v15333_v6  ;;  %v15411_v5 = vld [vmem:[%s23162_s1 + $0x4e4] ss:$12 sps:$4 sm:$0xff]   ;;  %v15412_v6 = vld [vmem:[%s23162_s1 + $0x500] ss:$12 sps:$4 sm:$0xff]  }
  0x8d   : > { %1419 = vmatpush2.bf16.msra.mxu0 %v15330_v7  ;;  %v15409_v7 = vld [vmem:[%s23162_s1 + $0x4e0] ss:$12 sps:$4 sm:$0xff]  }
  0x8e   : > { %14319 = vmatpush3.bf16.msra.mxu1 %v15334_v8  ;;  %1420 = vmatprep.subr.bf16.mxu0 %v15339_v9  ;;  %v15413_v8 = vld [vmem:[%s23162_s1 + $0x440] ss:$12 sps:$4 sm:$0xff]  }
  0x8f   : > { %14868 = vmatprep.subr.bf16.mxu1 %v17291_v63  ;;  %v15416_v9 = vld [vmem:[%s23162_s1 + $0x4cc] ss:$12 sps:$4 sm:$0xff]  }
  0x91   : > { %1509 = vmatmul.mubr.bf16.vlgmr.msra.gmra.mxu1 %v12398_v10  ;;  %1421 = vmatpush2.bf16.msra.mxu0 %v15337_v11  ;;  %v15414_v11 = vld [vmem:[%s23162_s1 + $0x4c8] ss:$12 sps:$4 sm:$0xff]  }
  0x92   : > { %14869 = vmatpush3.bf16.msra.mxu1 %v15340_v12  ;;  %2002 = vmatprep.subr.bf16.mxu0 %v15343_v13  ;;  %v15418_v12 = vld [vmem:[%s23162_s1 + $0x428] ss:$12 sps:$4 sm:$0xff]  }
  0x93   : > { %14870 = vmatprep.subr.bf16.mxu1 %v17291_v63  ;;  %14878 = vmatprep.mubr.msk.bf16.mxu1 %vm17292_vm1, %v17291_v63  ;;  %v15421_v13 = vld [vmem:[%s23162_s1 + $0x4b4] ss:$12 sps:$4 sm:$0xff]  }
  0x94   : > { %1423 = vmatmul.mubr.bf16.vlgmr.msra.gmra.mxu0 %v12398_v10  ;;  %v15417_v10 = vld [vmem:[%s23162_s1 + $0x4e8] ss:$12 sps:$4 sm:$0xff]  }
  0x95   : > { %2003 = vmatpush1.bf16.msra.mxu0 %v15341_v14  ;;  %2034 = vmatprep.mubr.bf16.mxu0 %v12555_v33  ;;  %v15422_v14 = vld [vmem:[%s23162_s1 + $0x4d0] ss:$12 sps:$4 sm:$0xff]  }
  0x96   : > { %14871 = vmatpush3.bf16.msra.mxu1 %v15344_v15  ;;  %2004 = vmatprep.subr.bf16.mxu0 %v15347_v16  ;;  %v15419_v15 = vld [vmem:[%s23162_s1 + $0x4b0] ss:$12 sps:$4 sm:$0xff]  }
  0x97   : > { %14872 = vmatprep.subr.bf16.mxu1 %v17291_v63  ;;  %v15423_v16 = vld [vmem:[%s23162_s1 + $0x410] ss:$12 sps:$4 sm:$0xff]  }
  0x99   : > { %2005 = vmatpush1.bf16.msra.mxu0 %v15345_v17  ;;  %v15426_v17 = vld [vmem:[%s23162_s1 + $0x4b8] ss:$12 sps:$4 sm:$0xff]  }
  0x9a   : > { %14873 = vmatpush3.bf16.msra.mxu1 %v15348_v18  ;;  %2006 = vmatprep.subr.bf16.mxu0 %v15351_v19  ;;  %v12554_v18 = vcombine.low %v17854_v31, %v17857_v32  ;;  %v15427_v19 = vld [vmem:[%s23162_s1 + $0x3f8] ss:$12 sps:$4 sm:$0xff]   ;;  %v15437_v31 = vld [vmem:[%s23162_s1 + $0x660] ss:$12 sps:$4 sm:$0xff]   ;;  %v15440_v32 = vld [vmem:[%s23162_s1 + $0x590] ss:$12 sps:$4 sm:$0xff]  }
  0x9b   : > { %14874 = vmatprep.subr.bf16.mxu1 %v17291_v63 }
  0x9d   : > { %2007 = vmatpush1.bf16.msra.mxu0 %v15349_v20  ;;  %v15428_v20 = vld [vmem:[%s23162_s1 + $0x5d8] ss:$12 sps:$4 sm:$0xff]  }
  0x9e   : > { %14875 = vmatpush3.bf16.msra.mxu1 %v15352_v21  ;;  %2008 = vmatprep.subr.bf16.mxu0 %v15355_v22  ;;  %v15431_v21 = vld [vmem:[%s23162_s1 + $0x694] ss:$12 sps:$4 sm:$0xff]   ;;  %v15429_v22 = vld [vmem:[%s23162_s1 + $0x690] ss:$12 sps:$4 sm:$0xff]  }
  0x9f   : > { %14876 = vmatprep.subr.bf16.mxu1 %v17291_v63 }
  0xa1   : > { %2009 = vmatpush1.bf16.msra.mxu0 %v15353_v23  ;;  %v15432_v23 = vld [vmem:[%s23162_s1 + $0x5c0] ss:$12 sps:$4 sm:$0xff]  }
  0xa2   : > { %14877 = vmatpush3.bf16.msra.mxu1 %v15356_v24  ;;  %2010 = vmatprep.subr.bf16.mxu0 %v15359_v25  ;;  %v18018_v24 = vld [vmem:[%s17452_s26 + $0x48] sm:$0xff]  ;;  %v18021_v25 = vld [vmem:[%s17452_s26 + $0x54] sm:$0x11] }
  0xa3   : > { %2051 = vmatprep.subr.bf16.mxu1 %v15362_v26  ;;  %v15435_v26 = vld [vmem:[%s23162_s1 + $0x67c] ss:$12 sps:$4 sm:$0xff]  }
  0xa5   : > { %14879 = vmatmul.mubr.msk.bf16.vlgmr.msra.gmra.mxu1 %vm864_vm0, %v17690_v38  ;;  %2011 = vmatpush1.bf16.msra.mxu0 %v15357_v27  ;;  %v15369_v38 = vld [vmem:[%s23162_s1 + $0x408] ss:$12 sps:$4 sm:$0xff]   ;;  %v18031_v27 = vcombine.high %v18018_v24, %v18021_v25 }
  0xa6   : > { %2052 = vmatpush1.bf16.msra.mxu1 %v15360_v28  ;;  %2012 = vmatprep.subr.bf16.mxu0 %v15365_v29  ;;  %v15433_v28 = vld [vmem:[%s23162_s1 + $0x678] ss:$12 sps:$4 sm:$0xff]   ;;  %v15436_v29 = vld [vmem:[%s23162_s1 + $0x5a8] ss:$12 sps:$4 sm:$0xff]  }
  0xa7   : > { %2053 = vmatprep.subr.bf16.mxu1 %v15368_v30  ;;  %2077 = vmatprep.mubr.bf16.mxu1 %v17290_v2  ;;  %v15439_v30 = vld [vmem:[%s23162_s1 + $0x664] ss:$12 sps:$4 sm:$0xff]  }
  0xa9   : > { %2013 = vmatpush1.bf16.msra.mxu0 %v15363_v34  ;;  %v15441_v34 = vld [vmem:[%s23162_s1 + $0x648] ss:$12 sps:$4 sm:$0xff]  }
  0xaa   : > { %2054 = vmatpush1.bf16.msra.mxu1 %v15366_v35  ;;  %2014 = vmatprep.subr.bf16.mxu0 %v15371_v36  ;;  %v15444_v35 = vld [vmem:[%s23162_s1 + $0x578] ss:$12 sps:$4 sm:$0xff]   ;;  %v15447_v36 = vld [vmem:[%s23162_s1 + $0x634] ss:$12 sps:$4 sm:$0xff]  }
  0xab   : > { %2055 = vmatprep.subr.bf16.mxu1 %v15374_v37  ;;  %v15450_v37 = vld [vmem:[%s23162_s1 + $0x7cc] ss:$12 sps:$4 sm:$0xff]  }
  0xad   : > { %2015 = vmatpush1.bf16.msra.mxu0 %v15369_v38  ;;  %v15445_v38 = vld [vmem:[%s23162_s1 + $0x630] ss:$12 sps:$4 sm:$0xff]  }
  0xae   : > { %2056 = vmatpush1.bf16.msra.mxu1 %v15372_v39  ;;  %2016 = vmatprep.subr.bf16.mxu0 %v15377_v40  ;;  %v15448_v39 = vld [vmem:[%s23162_s1 + $0x7c8] ss:$12 sps:$4 sm:$0xff]  }
  0xaf   : > { %2057 = vmatprep.subr.bf16.mxu1 %v15380_v41  ;;  %v15453_v40 = vld [vmem:[%s23162_s1 + $0x61c] ss:$12 sps:$4 sm:$0xff]   ;;  %v15456_v41 = vld [vmem:[%s23162_s1 + $0x7b4] ss:$12 sps:$4 sm:$0xff]  }
  0xb1   : > { %2017 = vmatpush1.bf16.msra.mxu0 %v15375_v42  ;;  %v15451_v42 = vld [vmem:[%s23162_s1 + $0x618] ss:$12 sps:$4 sm:$0xff]  }
  0xb2   : > { %2058 = vmatpush1.bf16.msra.mxu1 %v15378_v43  ;;  %2018 = vmatprep.subr.bf16.mxu0 %v15383_v44  ;;  %v15454_v43 = vld [vmem:[%s23162_s1 + $0x7b0] ss:$12 sps:$4 sm:$0xff]  }
  0xb3   : > { %2059 = vmatprep.subr.bf16.mxu1 %v15386_v45  ;;  %v15459_v44 = vld [vmem:[%s23162_s1 + $0x604] ss:$12 sps:$4 sm:$0xff]   ;;  %v15462_v45 = vld [vmem:[%s23162_s1 + $0x79c] ss:$12 sps:$4 sm:$0xff]  }
  0xb5   : > { %2019 = vmatpush2.bf16.msra.mxu0 %v15381_v46  ;;  %v15457_v46 = vld [vmem:[%s23162_s1 + $0x600] ss:$12 sps:$4 sm:$0xff]  }
  0xb6   : > { %2060 = vmatpush1.bf16.msra.mxu1 %v15384_v47  ;;  %2020 = vmatprep.subr.bf16.mxu0 %v15389_v50  ;;  %v15460_v47 = vld [vmem:[%s23162_s1 + $0x798] ss:$12 sps:$4 sm:$0xff]   ;;  %v15463_v50 = vld [vmem:[%s23162_s1 + $0x5e8] ss:$12 sps:$4 sm:$0xff]  }
  0xb7   : > { %14332 = vmatprep.subr.bf16.mxu1 %v15392_v51  ;;  %v15466_v51 = vld [vmem:[%s23162_s1 + $0x780] ss:$12 sps:$4 sm:$0xff]  }
  0xb9   : > { %12620 = vmatmul.mubr.msk.bf16.vlgmr.msra.gmra.mxu1 %vm864_vm0, %v17917_v53  ;;  %2021 = vmatpush2.bf16.msra.mxu0 %v15387_v52  ;;  %v15471_v52 = vld [vmem:[%s23162_s1 + $0x754] ss:$12 sps:$4 sm:$0xff]  }
  0xba   : > { %14333 = vmatpush3.bf16.msra.mxu1 %v15393_v54  ;;  %2022 = vmatprep.subr.bf16.mxu0 %v15396_v55  ;;  %v15469_v54 = vld [vmem:[%s23162_s1 + $0x750] ss:$12 sps:$4 sm:$0xff]   ;;  %v15472_v55 = vld [vmem:[%s23162_s1 + $0x768] ss:$12 sps:$4 sm:$0xff]  }
  0xbb   : > { %14334 = vmatprep.subr.bf16.mxu1 %v15397_v56  ;;  %2120 = vmatprep.mubr.bf16.mxu1 %v12555_v33  ;;  %v15443_v33 = vld [vmem:[%s23162_s1 + $0x64c] ss:$12 sps:$4 sm:$0xff]   ;;  %v15477_v56 = vld [vmem:[%s23162_s1 + $0x73c] ss:$12 sps:$4 sm:$0xff]  }
  0xbd   : > { %2023 = vmatpush2.bf16.msra.mxu0 %v15394_v57  ;;  %v12623_v57 = vld [vmem:[%s17452_s26 + $0x50] sm:$0xf] }
  0xbe   : > { %14335 = vmatpush3.bf16.msra.mxu1 %v15398_v58  ;;  %2024 = vmatprep.subr.bf16.mxu0 %v15401_v59  ;;  %v12625_v58 = vld [vmem:[%s17452_s26 + $0x5c] sm:$0x1]  ;;  %v15478_v59 = vld [vmem:[%s23162_s1 + $0x758] ss:$12 sps:$4 sm:$0xff]  }
  0xbf   : > { %14336 = vmatprep.subr.bf16.mxu1 %v15402_v60  ;;  %v15475_v60 = vld [vmem:[%s23162_s1 + $0x738] ss:$12 sps:$4 sm:$0xff]  }
  0xc1   : > { %2025 = vmatpush2.bf16.msra.mxu0 %v15399_v61  ;;  %v18135_v61 = vcombine.low %v12623_v57, %v12625_v58  ;;  %v15525_v57 = vld [vmem:[%s23162_s1 + $0x858] ss:$12 sps:$4 sm:$0xff]  }
  0xc2   : > { %14337 = vmatpush3.bf16.msra.mxu1 %v15403_v62  ;;  %2026 = vmatprep.subr.bf16.mxu0 %v15406_v0  ;;  %v15481_v62 = vld [vmem:[%s23162_s1 + $0x698] ss:$12 sps:$4 sm:$0xff]  }
  0xc3   : > { %14338 = vmatprep.subr.bf16.mxu1 %v15407_v1  ;;  %v15484_v0 = vld [vmem:[%s23162_s1 + $0x724] ss:$12 sps:$4 sm:$0xff]  }
  0xc5   : > { %2027 = vmatpush2.bf16.msra.mxu0 %v15404_v3  ;;  %v15485_v3 = vld [vmem:[%s23162_s1 + $0x740] ss:$12 sps:$4 sm:$0xff]  }
  0xc6   : > { %14339 = vmatpush3.bf16.msra.mxu1 %v15408_v4  ;;  %2028 = vmatprep.subr.bf16.mxu0 %v15411_v5  ;;  %v15482_v4 = vld [vmem:[%s23162_s1 + $0x720] ss:$12 sps:$4 sm:$0xff]  }
  0xc7   : > { %14340 = vmatprep.subr.bf16.mxu1 %v15412_v6  ;;  %v15486_v5 = vld [vmem:[%s23162_s1 + $0x680] ss:$12 sps:$4 sm:$0xff]  }
  0xc9   : > { %2029 = vmatpush2.bf16.msra.mxu0 %v15409_v7  ;;  %v15489_v7 = vld [vmem:[%s23162_s1 + $0x70c] ss:$12 sps:$4 sm:$0xff]  }
  0xca   : > { %14341 = vmatpush3.bf16.msra.mxu1 %v15413_v8  ;;  %2030 = vmatprep.subr.bf16.mxu0 %v15416_v9  ;;  %v15490_v8 = vld [vmem:[%s23162_s1 + $0x728] ss:$12 sps:$4 sm:$0xff]  }
  0xcb   : > { %14342 = vmatprep.subr.bf16.mxu1 %v15417_v10  ;;  %v15487_v9 = vld [vmem:[%s23162_s1 + $0x708] ss:$12 sps:$4 sm:$0xff]  }
  0xcc   : > { %v15491_v10 = vld [vmem:[%s23162_s1 + $0x668] ss:$12 sps:$4 sm:$0xff]  }
  0xcd   : > { %2031 = vmatpush2.bf16.msra.mxu0 %v15414_v11  ;;  %v15494_v11 = vld [vmem:[%s23162_s1 + $0x6f4] ss:$12 sps:$4 sm:$0xff]  }
  0xce   : > { %14343 = vmatpush3.bf16.msra.mxu1 %v15418_v12  ;;  %2032 = vmatprep.subr.bf16.mxu0 %v15421_v13  ;;  %v15495_v13 = vld [vmem:[%s23162_s1 + $0x710] ss:$12 sps:$4 sm:$0xff]  }
  0xcf   : > { %14344 = vmatprep.subr.bf16.mxu1 %v15422_v14  ;;  %v15492_v14 = vld [vmem:[%s23162_s1 + $0x6f0] ss:$12 sps:$4 sm:$0xff]  }
  0xd1   : > { %2033 = vmatpush2.bf16.msra.mxu0 %v15419_v15  ;;  %v15496_v15 = vld [vmem:[%s23162_s1 + $0x650] ss:$12 sps:$4 sm:$0xff]  }
  0xd2   : > { %14345 = vmatpush3.bf16.msra.mxu1 %v15423_v16  ;;  %14882 = vmatprep.subr.bf16.mxu0 %v17291_v63  ;;  %v15499_v16 = vld [vmem:[%s23162_s1 + $0x6dc] ss:$12 sps:$4 sm:$0xff]  }
  0xd3   : > { %14346 = vmatprep.subr.bf16.mxu1 %v15426_v17 }
  0xd4   : > { %2035 = vmatmul.mubr.bf16.vlgmr.msra.gmra.mxu0 %v12554_v18 }
  0xd5   : > { %14883 = vmatpush3.bf16.msra.mxu0 %v15428_v20  ;;  %14892 = vmatprep.mubr.msk.bf16.mxu0 %vm17292_vm1, %v17291_v63  ;;  %v15497_v20 = vld [vmem:[%s23162_s1 + $0x6d8] ss:$12 sps:$4 sm:$0xff]  }
  0xd6   : > { %14347 = vmatpush3.bf16.msra.mxu1 %v15427_v19  ;;  %14884 = vmatprep.subr.bf16.mxu0 %v17291_v63 }
  0xd7   : > { %2620 = vmatprep.subr.bf16.mxu1 %v15431_v21  ;;  %v15501_v21 = vld [vmem:[%s23162_s1 + $0x638] ss:$12 sps:$4 sm:$0xff]  }
  0xd9   : > { %2121 = vmatmul.mubr.bf16.vlgmr.msra.gmra.mxu1 %v12554_v18  ;;  %14885 = vmatpush3.bf16.msra.mxu0 %v15432_v23  ;;  %v15500_v18 = vld [vmem:[%s23162_s1 + $0x6f8] ss:$12 sps:$4 sm:$0xff]  }
  0xda   : > { %2621 = vmatpush1.bf16.msra.mxu1 %v15429_v22  ;;  %14886 = vmatprep.subr.bf16.mxu0 %v17291_v63  ;;  %v15504_v22 = vld [vmem:[%s23162_s1 + $0x6c4] ss:$12 sps:$4 sm:$0xff]  }
  0xdb   : > { %2622 = vmatprep.subr.bf16.mxu1 %v15435_v26  ;;  %2652 = vmatprep.mubr.bf16.mxu1 %v18031_v27  ;;  %v15505_v26 = vld [vmem:[%s23162_s1 + $0x6e0] ss:$12 sps:$4 sm:$0xff]  }
  0xdd   : > { %14887 = vmatpush3.bf16.msra.mxu0 %v15436_v29  ;;  %v15506_v29 = vld [vmem:[%s23162_s1 + $0x620] ss:$12 sps:$4 sm:$0xff]  }
  0xde   : > { %2623 = vmatpush1.bf16.msra.mxu1 %v15433_v28  ;;  %14888 = vmatprep.subr.bf16.mxu0 %v17291_v63  ;;  %v15502_v28 = vld [vmem:[%s23162_s1 + $0x6c0] ss:$12 sps:$4 sm:$0xff]  }
  0xdf   : > { %2624 = vmatprep.subr.bf16.mxu1 %v15439_v30  ;;  %v15509_v30 = vld [vmem:[%s23162_s1 + $0x6ac] ss:$12 sps:$4 sm:$0xff]  }
  0xe1   : > { %14889 = vmatpush3.bf16.msra.mxu0 %v15440_v32  ;;  %v15507_v32 = vld [vmem:[%s23162_s1 + $0x6a8] ss:$12 sps:$4 sm:$0xff]  }
  0xe2   : > { %2625 = vmatpush1.bf16.msra.mxu1 %v15437_v31  ;;  %14890 = vmatprep.subr.bf16.mxu0 %v17291_v63  ;;  %v15510_v31 = vld [vmem:[%s23162_s1 + $0x6c8] ss:$12 sps:$4 sm:$0xff]  }
  0xe3   : > { %2626 = vmatprep.subr.bf16.mxu1 %v15443_v33  ;;  %v15511_v33 = vld [vmem:[%s23162_s1 + $0x608] ss:$12 sps:$4 sm:$0xff]  }
  0xe5   : > { %14891 = vmatpush3.bf16.msra.mxu0 %v15444_v35 }
  0xe6   : > { %2627 = vmatpush1.bf16.msra.mxu1 %v15441_v34  ;;  %2669 = vmatprep.subr.bf16.mxu0 %v15450_v37  ;;  %v15514_v34 = vld [vmem:[%s23162_s1 + $0x6b0] ss:$12 sps:$4 sm:$0xff]  }
  0xe7   : > { %2628 = vmatprep.subr.bf16.mxu1 %v15447_v36  ;;  %v12710_v36 = vcombine.low %v18018_v24, %v18021_v25  ;;  %v15515_v37 = vld [vmem:[%s23162_s1 + $0x5f0] ss:$12 sps:$4 sm:$0xff]   ;;  %v15519_v24 = vld [vmem:[%s23162_s1 + $0x88c] ss:$12 sps:$4 sm:$0xff]  }
  0xe8   : > { %14893 = vmatmul.mubr.msk.bf16.vlgmr.msra.gmra.mxu0 %vm864_vm0, %v17917_v53  ;;  %v15474_v53 = vld [vmem:[%s23162_s1 + $0x76c] ss:$12 sps:$4 sm:$0xff]  }
  0xe9   : > { %2670 = vmatpush1.bf16.msra.mxu0 %v15448_v39  ;;  %2695 = vmatprep.mubr.bf16.mxu0 %v17290_v2  ;;  %v945_v1 = vpop.f32.mrf.mxu1  ;;  %v15516_v39 = vld [vmem:[%s23162_s1 + $0x7d0] ss:$12 sps:$4 sm:$0xff]  }
  0xea   : > { %2629 = vmatpush1.bf16.msra.mxu1 %v15445_v38  ;;  %2671 = vmatprep.subr.bf16.mxu0 %v15456_v41 }
  0xeb   : > { %2630 = vmatprep.subr.bf16.mxu1 %v15453_v40  ;;  %v947_v6 = vpop.f32.mrf.mxu1 }
  0xed   : > { %2672 = vmatpush1.bf16.msra.mxu0 %v15454_v43  ;;  %v949_v12 = vpop.f32.mrf.mxu1  ;;  %v15517_v43 = vld [vmem:[%s23162_s1 + $0x888] ss:$12 sps:$4 sm:$0xff]  }
  0xee   : > { %2631 = vmatpush1.bf16.msra.mxu1 %v15451_v42  ;;  %2673 = vmatprep.subr.bf16.mxu0 %v15462_v45  ;;  %v15520_v45 = vld [vmem:[%s23162_s1 + $0x7b8] ss:$12 sps:$4 sm:$0xff]  }
  0xef   : > { %2632 = vmatprep.subr.bf16.mxu1 %v15459_v44  ;;  %v18182_v17 = vpop.f32.mrf.mxu1 }
  0xf1   : > { %2674 = vmatpush1.bf16.msra.mxu0 %v15460_v47  ;;  %v15523_v47 = vld [vmem:[%s23162_s1 + $0x874] ss:$12 sps:$4 sm:$0xff]  }
  0xf2   : > { %2633 = vmatpush1.bf16.msra.mxu1 %v15457_v46  ;;  %2675 = vmatprep.subr.bf16.mxu0 %v15468_v49 }
  0xf3   : > { %2634 = vmatprep.subr.bf16.mxu1 %v15465_v48  ;;  %v18251_v48 = vld [vmem:[%s17452_s26 + $0x64] ss:$12 sps:$4 sm:$0x1f]  }
  0xf5   : > { %2676 = vmatpush1.bf16.msra.mxu0 %v15466_v51 }
  0xf6   : > { %2635 = vmatpush1.bf16.msra.mxu1 %v15463_v50  ;;  %2677 = vmatprep.subr.bf16.mxu0 %v15474_v53  ;;  %v15521_v50 = vld [vmem:[%s23162_s1 + $0x870] ss:$12 sps:$4 sm:$0xff]  }
  0xf7   : > { %2636 = vmatprep.subr.bf16.mxu1 %v15471_v52  ;;  %v15524_v52 = vld [vmem:[%s23162_s1 + $0x7a0] ss:$12 sps:$4 sm:$0xff]  }
  0xf9   : > { %2678 = vmatpush1.bf16.msra.mxu0 %v15472_v55 }
  0xfa   : > { %2637 = vmatpush2.bf16.msra.mxu1 %v15469_v54  ;;  %14360 = vmatprep.subr.bf16.mxu0 %v15478_v59  ;;  %v15527_v54 = vld [vmem:[%s23162_s1 + $0x85c] ss:$12 sps:$4 sm:$0xff]  }
  0xfb   : > { %2638 = vmatprep.subr.bf16.mxu1 %v15477_v56  ;;  %v15528_v59 = vld [vmem:[%s23162_s1 + $0x788] ss:$12 sps:$4 sm:$0xff]  }
  0xfc   : > { %12776 = vmatmul.mubr.msk.bf16.vlgmr.msra.gmra.mxu0 %vm864_vm0, %v18135_v61 }
  0xfd   : > { %14361 = vmatpush3.bf16.msra.mxu0 %v15481_v62  ;;  %2738 = vmatprep.mubr.bf16.mxu0 %v18031_v27  ;;  %v15531_v62 = vld [vmem:[%s23162_s1 + $0x844] ss:$12 sps:$4 sm:$0xff]  }
  0xfe   : > { %2639 = vmatpush2.bf16.msra.mxu1 %v15475_v60  ;;  %14362 = vmatprep.subr.bf16.mxu0 %v15485_v3  ;;  %v15535_v3 = vld [vmem:[%s23162_s1 + $0x82c] ss:$12 sps:$4 sm:$0xff]  }
  0xff   : > { %2640 = vmatprep.subr.bf16.mxu1 %v15484_v0  ;;  %v15529_v0 = vld [vmem:[%s23162_s1 + $0x840] ss:$12 sps:$4 sm:$0xff]  }
 0x101   : > { %14363 = vmatpush3.bf16.msra.mxu0 %v15486_v5  ;;  %v15533_v5 = vld [vmem:[%s23162_s1 + $0x828] ss:$12 sps:$4 sm:$0xff]  }
 0x102   : > { %2641 = vmatpush2.bf16.msra.mxu1 %v15482_v4  ;;  %14364 = vmatprep.subr.bf16.mxu0 %v15490_v8  ;;  %v15538_v4 = vld [vmem:[%s23162_s1 + $0x9c4] ss:$12 sps:$4 sm:$0xff]   ;;  %v15544_v8 = vld [vmem:[%s23162_s1 + $0x9ac] ss:$12 sps:$4 sm:$0xff]  }
 0x103   : > { %2642 = vmatprep.subr.bf16.mxu1 %v15489_v7  ;;  %v15541_v7 = vld [vmem:[%s23162_s1 + $0x814] ss:$12 sps:$4 sm:$0xff]  }
 0x105   : > { %14365 = vmatpush3.bf16.msra.mxu0 %v15491_v10  ;;  %v15542_v10 = vld [vmem:[%s23162_s1 + $0x9a8] ss:$12 sps:$4 sm:$0xff]  }
 0x106   : > { %2643 = vmatpush2.bf16.msra.mxu1 %v15487_v9  ;;  %14366 = vmatprep.subr.bf16.mxu0 %v15495_v13  ;;  %v15539_v9 = vld [vmem:[%s23162_s1 + $0x810] ss:$12 sps:$4 sm:$0xff]  }
 0x107   : > { %2644 = vmatprep.subr.bf16.mxu1 %v15494_v11  ;;  %v15547_v11 = vld [vmem:[%s23162_s1 + $0x7fc] ss:$12 sps:$4 sm:$0xff]  }
 0x108   : > { %v15548_v13 = vld [vmem:[%s23162_s1 + $0x990] ss:$12 sps:$4 sm:$0xff]  }
 0x109   : > { %v14292_v19 = vpop.f32.mrf.mxu1  ;;  %14367 = vmatpush3.bf16.msra.mxu0 %v15496_v15  ;;  %v15556_v15 = vld [vmem:[%s23162_s1 + $0x97c] ss:$12 sps:$4 sm:$0xff]  }
 0x10a   : > { %2645 = vmatpush2.bf16.msra.mxu1 %v15492_v14  ;;  %14368 = vmatprep.subr.bf16.mxu0 %v15500_v18  ;;  %v15553_v14 = vld [vmem:[%s23162_s1 + $0x7e4] ss:$12 sps:$4 sm:$0xff]  }
 0x10b   : > { %v14293_v23 = vpop.f32.mrf.mxu1  ;;  %2646 = vmatprep.subr.bf16.mxu1 %v15499_v16  ;;  %v15551_v16 = vld [vmem:[%s23162_s1 + $0x7e0] ss:$12 sps:$4 sm:$0xff]   ;;  %v15554_v18 = vld [vmem:[%s23162_s1 + $0x978] ss:$12 sps:$4 sm:$0xff]  }
 0x10c   : > { %v14294_v27 = vadd.f32 %v14293_v23, %v14292_v19  ;;  %v15559_v19 = vld [vmem:[%s23162_s1 + $0x94c] ss:$12 sps:$4 sm:$0xff]   ;;  %v15565_v23 = vld [vmem:[%s23162_s1 + $0x934] ss:$12 sps:$4 sm:$0xff]  }
 0x10d   : > { %14369 = vmatpush3.bf16.msra.mxu0 %v15501_v21  ;;  %v14295_v40 = vpop.f32.mrf.mxu1  ;;  %v15557_v21 = vld [vmem:[%s23162_s1 + $0x948] ss:$12 sps:$4 sm:$0xff]  }
 0x10e   : > { %2647 = vmatpush2.bf16.msra.mxu1 %v15497_v20  ;;  %14370 = vmatprep.subr.bf16.mxu0 %v15505_v26  ;;  %v15562_v20 = vld [vmem:[%s23162_s1 + $0x964] ss:$12 sps:$4 sm:$0xff]  }
 0x10f   : > { %2648 = vmatprep.subr.bf16.mxu1 %v15504_v22  ;;  %v14296_v46 = vpop.f32.mrf.mxu1  ;;  %v15560_v22 = vld [vmem:[%s23162_s1 + $0x960] ss:$12 sps:$4 sm:$0xff]   ;;  %v15567_v26 = vld [vmem:[%s23162_s1 + $0x950] ss:$12 sps:$4 sm:$0xff]  }
 0x110   : > { %v14297_v55 = vadd.f32 %v14296_v46, %v14295_v40  ;;  %v15581_v40 = vld [vmem:[%s23162_s1 + $0x8ec] ss:$12 sps:$4 sm:$0xff]  }
 0x111   : > { %14371 = vmatpush3.bf16.msra.mxu0 %v15506_v29  ;;  %v15568_v29 = vld [vmem:[%s23162_s1 + $0x890] ss:$12 sps:$4 sm:$0xff]  }
 0x112   : > { %2649 = vmatpush2.bf16.msra.mxu1 %v15502_v28  ;;  %14372 = vmatprep.subr.bf16.mxu0 %v15510_v31  ;;  %v18358_v28 = vld [vmem:[%s17452_s26 + $0x68] ss:$12 sps:$4 sm:$0x1f]   ;;  %v15572_v31 = vld [vmem:[%s23162_s1 + $0x938] ss:$12 sps:$4 sm:$0xff]  }
 0x113   : > { %2650 = vmatprep.subr.bf16.mxu1 %v15509_v30  ;;  %v15571_v30 = vld [vmem:[%s23162_s1 + $0x91c] ss:$12 sps:$4 sm:$0xff]  }
 0x114   : > { %v902_v35 = vpop.f32.mrf.mxu0 }
 0x115   : > { %v18225_v38 = vadd.f32 %v945_v1, %v902_v35  ;;  %14373 = vmatpush3.bf16.msra.mxu0 %v15511_v33  ;;  %v15532_v1 = vld [vmem:[%s23162_s1 + $0x770] ss:$12 sps:$4 sm:$0xff]   ;;  %v15573_v33 = vld [vmem:[%s23162_s1 + $0x878] ss:$12 sps:$4 sm:$0xff]  }
 0x116   : > { %2651 = vmatpush2.bf16.msra.mxu1 %v15507_v32  ;;  %v904_v41 = vpop.f32.mrf.mxu0  ;;  %14374 = vmatprep.subr.bf16.mxu0 %v15514_v34  ;;  %v15569_v32 = vld [vmem:[%s23162_s1 + $0x918] ss:$12 sps:$4 sm:$0xff]  }
 0x117   : > { %14896 = vmatprep.subr.bf16.mxu1 %v17291_v63  ;;  %v18234_v25 = vadd.f32 %v947_v6, %v904_v41  ;;  %v15536_v6 = vld [vmem:[%s23162_s1 + $0x9c0] ss:$12 sps:$4 sm:$0xff]   ;;  %v15576_v35 = vld [vmem:[%s23162_s1 + $0x904] ss:$12 sps:$4 sm:$0xff]  }
 0x118   : > { %v906_v42 = vpop.f32.mrf.mxu0 }
 0x119   : > { %2653 = vmatmul.mubr.bf16.vlgmr.msra.gmra.mxu1 %v12710_v36  ;;  %v18239_v44 = vadd.f32 %v949_v12, %v906_v42  ;;  %14375 = vmatpush3.bf16.msra.mxu0 %v15515_v37  ;;  %v15545_v12 = vld [vmem:[%s23162_s1 + $0x7f8] ss:$12 sps:$4 sm:$0xff]   ;;  %v15574_v37 = vld [vmem:[%s23162_s1 + $0x900] ss:$12 sps:$4 sm:$0xff]   ;;  %v15579_v42 = vld [vmem:[%s23162_s1 + $0x8e8] ss:$12 sps:$4 sm:$0xff]  }
 0x11a   : > { %14897 = vmatpush3.bf16.msra.mxu1 %v15516_v39  ;;  %3238 = vmatprep.subr.bf16.mxu0 %v15519_v24  ;;  %v15578_v39 = vld [vmem:[%s23162_s1 + $0x860] ss:$12 sps:$4 sm:$0xff]   ;;  %v15582_v24 = vld [vmem:[%s23162_s1 + $0x908] ss:$12 sps:$4 sm:$0xff]  }
 0x11b   : > { %14898 = vmatprep.subr.bf16.mxu1 %v17291_v63  ;;  %14906 = vmatprep.mubr.msk.bf16.mxu1 %vm17292_vm1, %v17291_v63 }
 0x11c   : > { %2739 = vmatmul.mubr.bf16.vlgmr.msra.gmra.mxu0 %v12710_v36  ;;  %v15577_v36 = vld [vmem:[%s23162_s1 + $0x920] ss:$12 sps:$4 sm:$0xff]  }
 0x11d   : > { %v1029_v49 = vpop.f32.mrf.mxu1  ;;  %3239 = vmatpush1.bf16.msra.mxu0 %v15517_v43  ;;  %3270 = vmatprep.mubr.bf16.mxu0 %v18251_v48  ;;  %v15583_v43 = vld [vmem:[%s23162_s1 + $0x848] ss:$12 sps:$4 sm:$0xff]  }
 0x11e   : > { %v18256_v51 = vadd.f32 %v14294_v27, %v1029_v49  ;;  %14899 = vmatpush3.bf16.msra.mxu1 %v15520_v45  ;;  %3240 = vmatprep.subr.bf16.mxu0 %v15523_v47  ;;  %v15563_v27 = vld [vmem:[%s23162_s1 + $0x930] ss:$12 sps:$4 sm:$0xff]   ;;  %v15586_v45 = vld [vmem:[%s23162_s1 + $0x8d4] ss:$12 sps:$4 sm:$0xff]  }
 0x11f   : > { %v14866_v53 = vpop.f32.mrf.mxu1  ;;  %14900 = vmatprep.subr.bf16.mxu1 %v17291_v63  ;;  %v15587_v47 = vld [vmem:[%s23162_s1 + $0x8f0] ss:$12 sps:$4 sm:$0xff]  }
 0x120   : > { %v15588_v49 = vld [vmem:[%s23162_s1 + $0x830] ss:$12 sps:$4 sm:$0xff]   ;;  %v15592_v53 = vld [vmem:[%s23162_s1 + $0x8d8] ss:$12 sps:$4 sm:$0xff]  }
 0x121   : > { %v1032_v56 = vpop.f32.mrf.mxu1  ;;  %3241 = vmatpush1.bf16.msra.mxu0 %v15521_v50  ;;  %v15591_v50 = vld [vmem:[%s23162_s1 + $0x8bc] ss:$12 sps:$4 sm:$0xff]  }
 0x122   : > { %v18269_v58 = vadd.f32 %v14297_v55, %v1032_v56  ;;  %14901 = vmatpush3.bf16.msra.mxu1 %v15524_v52  ;;  %3242 = vmatprep.subr.bf16.mxu0 %v15527_v54  ;;  %v15589_v55 = vld [vmem:[%s23162_s1 + $0x8b8] ss:$12 sps:$4 sm:$0xff]  }
 0x123   : > { %v14867_v60 = vpop.f32.mrf.mxu1  ;;  %14902 = vmatprep.subr.bf16.mxu1 %v17291_v63  ;;  %v15593_v56 = vld [vmem:[%s23162_s1 + $0x818] ss:$12 sps:$4 sm:$0xff]  }
 0x125   : > { %3243 = vmatpush1.bf16.msra.mxu0 %v15525_v57  ;;  %v15596_v57 = vld [vmem:[%s23162_s1 + $0x8a4] ss:$12 sps:$4 sm:$0xff]  }
 0x126   : > { %14903 = vmatpush3.bf16.msra.mxu1 %v15528_v59  ;;  %3244 = vmatprep.subr.bf16.mxu0 %v15531_v62  ;;  %v18431_v59 = vpop.f32.mrf.mxu0  ;;  %v15597_v62 = vld [vmem:[%s23162_s1 + $0x8c0] ss:$12 sps:$4 sm:$0xff]  }
 0x127   : > { %14904 = vmatprep.subr.bf16.mxu1 %v17291_v63 }
 0x129   : > { %3245 = vmatpush1.bf16.msra.mxu0 %v15529_v0 }
 0x12a   : > { %14905 = vmatpush3.bf16.msra.mxu1 %v15532_v1  ;;  %3246 = vmatprep.subr.bf16.mxu0 %v15535_v3 }
 0x12b   : > { %3287 = vmatprep.subr.bf16.mxu1 %v15538_v4 }
 0x12d   : > { %14907 = vmatmul.mubr.msk.bf16.vlgmr.msra.gmra.mxu1 %vm864_vm0, %v18135_v61  ;;  %3247 = vmatpush1.bf16.msra.mxu0 %v15533_v5  ;;  %v15550_v61 = vld [vmem:[%s23162_s1 + $0x994] ss:$12 sps:$4 sm:$0xff]  }
 0x12e   : > { %3288 = vmatpush1.bf16.msra.mxu1 %v15536_v6  ;;  %3248 = vmatprep.subr.bf16.mxu0 %v15541_v7  ;;  %v15594_v5 = vld [vmem:[%s23162_s1 + $0x8a0] ss:$12 sps:$4 sm:$0xff]  }
 0x12f   : > { %3289 = vmatprep.subr.bf16.mxu1 %v15544_v8  ;;  %3313 = vmatprep.mubr.bf16.mxu1 %v17290_v2  ;;  %v15598_v6 = vld [vmem:[%s23162_s1 + $0x800] ss:$12 sps:$4 sm:$0xff]  }
 0x131   : > { %3249 = vmatpush1.bf16.msra.mxu0 %v15539_v9  ;;  %v1467_v34 = vpop.f32.mrf.mxu1 }
 0x132   : > { %3290 = vmatpush1.bf16.msra.mxu1 %v15542_v10  ;;  %3250 = vmatprep.subr.bf16.mxu0 %v15547_v11  ;;  %v15601_v10 = vld [vmem:[%s17452_s26 + $0x60] ss:$12 sps:$4 sm:$0x1f]  }
 0x133   : > { %3291 = vmatprep.subr.bf16.mxu1 %v15550_v61  ;;  %v1469_v41 = vpop.f32.mrf.mxu1 }
 0x135   : > { %3251 = vmatpush1.bf16.msra.mxu0 %v15545_v12  ;;  %v1471_v46 = vpop.f32.mrf.mxu1 }
 0x136   : > { %3292 = vmatpush1.bf16.msra.mxu1 %v15548_v13  ;;  %3252 = vmatprep.subr.bf16.mxu0 %v15553_v14  ;;  %v15603_v14 = vld [vmem:[%s23162_s1 + $0x7e8] ss:$12 sps:$4 sm:$0xff]  }
 0x137   : > { %3293 = vmatprep.subr.bf16.mxu1 %v15556_v15  ;;  %v18417_v52 = vpop.f32.mrf.mxu1 }
 0x139   : > { %3253 = vmatpush1.bf16.msra.mxu0 %v15551_v16  ;;  %v15604_v16 = vld [vmem:[%s23162_s1 + $0x9c8] ss:$12 sps:$4 sm:$0xff]  }
 0x13a   : > { %3294 = vmatpush1.bf16.msra.mxu1 %v15554_v18  ;;  %3254 = vmatprep.subr.bf16.mxu0 %v15559_v19 }
 0x13b   : > { %3295 = vmatprep.subr.bf16.mxu1 %v15562_v20  ;;  %v15611_v20 = vld [vmem:[%s23162_s1 + $0xa6c] ss:$12 sps:$4 sm:$0xff]  }
 0x13d   : > { %3255 = vmatpush2.bf16.msra.mxu0 %v15557_v21  ;;  %v18478_v21 = vld [vmem:[%s17452_s26 + $0x7c] ss:$12 sps:$4 sm:$0x1f]  }
 0x13e   : > { %3296 = vmatpush1.bf16.msra.mxu1 %v15560_v22  ;;  %3256 = vmatprep.subr.bf16.mxu0 %v15565_v23  ;;  %v15609_v22 = vld [vmem:[%s23162_s1 + $0xa68] ss:$12 sps:$4 sm:$0xff]   ;;  %v15612_v23 = vld [vmem:[%s23162_s1 + $0x998] ss:$12 sps:$4 sm:$0xff]  }
 0x13f   : > { %14388 = vmatprep.subr.bf16.mxu1 %v15567_v26  ;;  %v15615_v26 = vld [vmem:[%s23162_s1 + $0xa54] ss:$12 sps:$4 sm:$0xff]  }
 0x141   : > { %12932 = vmatmul.mubr.msk.bf16.vlgmr.msra.gmra.mxu1 %vm864_vm0, %v18358_v28  ;;  %3257 = vmatpush2.bf16.msra.mxu0 %v15563_v27 }
 0x142   : > { %14389 = vmatpush3.bf16.msra.mxu1 %v15568_v29  ;;  %3258 = vmatprep.subr.bf16.mxu0 %v15571_v30  ;;  %v15613_v30 = vld [vmem:[%s23162_s1 + $0xa50] ss:$12 sps:$4 sm:$0xff]  }
 0x143   : > { %14390 = vmatprep.subr.bf16.mxu1 %v15572_v31  ;;  %3356 = vmatprep.mubr.bf16.mxu1 %v18251_v48  ;;  %v15584_v48 = vld [vmem:[%s23162_s1 + $0x8d0] ss:$12 sps:$4 sm:$0xff]   ;;  %v15616_v31 = vld [vmem:[%s23162_s1 + $0x980] ss:$12 sps:$4 sm:$0xff]  }
 0x145   : > { %3259 = vmatpush2.bf16.msra.mxu0 %v15569_v32 }
 0x146   : > { %14391 = vmatpush3.bf16.msra.mxu1 %v15573_v33  ;;  %3260 = vmatprep.subr.bf16.mxu0 %v15576_v35  ;;  %v15619_v33 = vld [vmem:[%s23162_s1 + $0xa3c] ss:$12 sps:$4 sm:$0xff]   ;;  %v15617_v35 = vld [vmem:[%s23162_s1 + $0xa38] ss:$12 sps:$4 sm:$0xff]  }
 0x147   : > { %14392 = vmatprep.subr.bf16.mxu1 %v15577_v36  ;;  %v15620_v36 = vld [vmem:[%s23162_s1 + $0x968] ss:$12 sps:$4 sm:$0xff]  }
 0x149   : > { %3261 = vmatpush2.bf16.msra.mxu0 %v15574_v37 }
 0x14a   : > { %14393 = vmatpush3.bf16.msra.mxu1 %v15578_v39  ;;  %3262 = vmatprep.subr.bf16.mxu0 %v15581_v40  ;;  %v15623_v39 = vld [vmem:[%s23162_s1 + $0xa24] ss:$12 sps:$4 sm:$0xff]  }
 0x14b   : > { %14394 = vmatprep.subr.bf16.mxu1 %v15582_v24  ;;  %v15621_v24 = vld [vmem:[%s23162_s1 + $0xa20] ss:$12 sps:$4 sm:$0xff]  }
 0x14d   : > { %3263 = vmatpush2.bf16.msra.mxu0 %v15579_v42  ;;  %v15624_v42 = vld [vmem:[%s23162_s1 + $0xbb8] ss:$12 sps:$4 sm:$0xff]  }
 0x14e   : > { %14395 = vmatpush3.bf16.msra.mxu1 %v15583_v43  ;;  %3264 = vmatprep.subr.bf16.mxu0 %v15586_v45  ;;  %v15629_v43 = vld [vmem:[%s23162_s1 + $0xa0c] ss:$12 sps:$4 sm:$0xff]   ;;  %v15632_v45 = vld [vmem:[%s23162_s1 + $0xba4] ss:$12 sps:$4 sm:$0xff]  }
 0x14f   : > { %14396 = vmatprep.subr.bf16.mxu1 %v15587_v47  ;;  %v15630_v47 = vld [vmem:[%s23162_s1 + $0xba0] ss:$12 sps:$4 sm:$0xff]  }
 0x151   : > { %v14320_v54 = vpop.f32.mrf.mxu1  ;;  %3265 = vmatpush2.bf16.msra.mxu0 %v15584_v48  ;;  %v15635_v48 = vld [vmem:[%s23162_s1 + $0x9f4] ss:$12 sps:$4 sm:$0xff]  }
 0x152   : > { %14397 = vmatpush3.bf16.msra.mxu1 %v15588_v49  ;;  %3266 = vmatprep.subr.bf16.mxu0 %v15591_v50  ;;  %v15638_v49 = vld [vmem:[%s23162_s1 + $0xb8c] ss:$12 sps:$4 sm:$0xff]   ;;  %v15636_v50 = vld [vmem:[%s23162_s1 + $0xb88] ss:$12 sps:$4 sm:$0xff]  }
 0x153   : > { %v14321_v60 = vpop.f32.mrf.mxu1  ;;  %14398 = vmatprep.subr.bf16.mxu1 %v15592_v53  ;;  %v15641_v53 = vld [vmem:[%s23162_s1 + $0x9dc] ss:$12 sps:$4 sm:$0xff]  }
 0x154   : > { %v14322_v0 = vadd.f32 %v14321_v60, %v14320_v54  ;;  %v1424_v1 = vpop.f32.mrf.mxu0  ;;  %v15644_v54 = vld [vmem:[%s23162_s1 + $0xb74] ss:$12 sps:$4 sm:$0xff]   ;;  %v15650_v60 = vld [vmem:[%s23162_s1 + $0xb5c] ss:$12 sps:$4 sm:$0xff]  }
 0x155   : > { %v14323_v3 = vpop.f32.mrf.mxu1  ;;  %v1425_v4 = vadd.f32 %v1424_v1, %v18225_v38  ;;  %3267 = vmatpush2.bf16.msra.mxu0 %v15589_v55  ;;  %v15602_v38 = vld [vmem:[%s23162_s1 + $0x8a8] ss:$12 sps:$4 sm:$0xff]   ;;  %v15639_v55 = vld [vmem:[%s23162_s1 + $0x9d8] ss:$12 sps:$4 sm:$0xff]  }
 0x156   : > { %14399 = vmatpush3.bf16.msra.mxu1 %v15593_v56  ;;  %v1511_v7 = vadd.f32 %v14322_v0, %v18256_v51  ;;  %v1426_v8 = vpop.f32.mrf.mxu0  ;;  %3268 = vmatprep.subr.bf16.mxu0 %v15596_v57  ;;  %v15642_v56 = vld [vmem:[%s23162_s1 + $0xb70] ss:$12 sps:$4 sm:$0xff]   ;;  %v15648_v0 = vld [vmem:[%s23162_s1 + $0xb58] ss:$12 sps:$4 sm:$0xff]  }
 0x157   : > { %v14324_v9 = vpop.f32.mrf.mxu1  ;;  %14400 = vmatprep.subr.bf16.mxu1 %v15597_v62  ;;  %v18448_v11 = vadd.f32 %v1467_v34, %v1425_v4  ;;  %v1427_v61 = vadd.f32 %v1426_v8, %v18234_v25  ;;  %v15607_v25 = vld [vmem:[%s23162_s1 + $0xa84] ss:$12 sps:$4 sm:$0xff]   ;;  %v15645_v62 = vld [vmem:[%s23162_s1 + $0xb40] ss:$12 sps:$4 sm:$0xff]  }
 0x158   : > { %v14325_v12 = vadd.f32 %v14324_v9, %v14323_v3  ;;  %v1428_v13 = vpop.f32.mrf.mxu0  ;;  %v15647_v57 = vld [vmem:[%s23162_s1 + $0xb44] ss:$12 sps:$4 sm:$0xff]   ;;  %v15653_v1 = vld [vmem:[%s23162_s1 + $0xb2c] ss:$12 sps:$4 sm:$0xff]   ;;  %v15654_v3 = vld [vmem:[%s23162_s1 + $0xb48] ss:$12 sps:$4 sm:$0xff]  }
 0x159   : > { %v18454_v51 = vadd.f32 %v1469_v41, %v1427_v61  ;;  %v1429_v15 = vadd.f32 %v1428_v13, %v18239_v44  ;;  %3269 = vmatpush2.bf16.msra.mxu0 %v15594_v5  ;;  %v15605_v44 = vld [vmem:[%s23162_s1 + $0xa80] ss:$12 sps:$4 sm:$0xff]   ;;  %v15626_v41 = vld [vmem:[%s23162_s1 + $0xbbc] ss:$12 sps:$4 sm:$0xff]   ;;  %v15665_v61 = vld [vmem:[%s23162_s1 + $0xb18] ss:$12 sps:$4 sm:$0xff]  }
 0x15a   : > { %14401 = vmatpush3.bf16.msra.mxu1 %v15598_v6  ;;  %v1514_v18 = vadd.f32 %v14325_v12, %v18269_v58  ;;  %14910 = vmatprep.subr.bf16.mxu0 %v17291_v63  ;;  %v15608_v58 = vld [vmem:[%s23162_s1 + $0x9b0] ss:$12 sps:$4 sm:$0xff]   ;;  %v18584_v4 = vld [vmem:[%s17452_s26 + $0x80] ss:$12 sps:$4 sm:$0x1f]  }
 0x15b   : > { %14402 = vmatprep.subr.bf16.mxu1 %v15602_v38  ;;  %v18465_v19 = vadd.f32 %v1471_v46, %v1429_v15  ;;  %v15627_v46 = vld [vmem:[%s23162_s1 + $0xa08] ss:$12 sps:$4 sm:$0xff]   ;;  %v15660_v8 = vld [vmem:[%s23162_s1 + $0xb30] ss:$12 sps:$4 sm:$0xff]   ;;  %v15662_v12 = vld [vmem:[%s23162_s1 + $0xaf8] ss:$12 sps:$4 sm:$0xff]  }
 0x15c   : > { %3271 = vmatmul.mubr.bf16.vlgmr.msra.gmra.mxu0 %v15601_v10  ;;  %v15651_v5 = vld [vmem:[%s23162_s1 + $0xb28] ss:$12 sps:$4 sm:$0xff]   ;;  %v15657_v9 = vld [vmem:[%s23162_s1 + $0xb10] ss:$12 sps:$4 sm:$0xff]   ;;  %v15666_v13 = vld [vmem:[%s23162_s1 + $0xa58] ss:$12 sps:$4 sm:$0xff]  }
 0x15d   : > { %14911 = vmatpush3.bf16.msra.mxu0 %v15604_v16  ;;  %14920 = vmatprep.mubr.msk.bf16.mxu0 %vm17292_vm1, %v17291_v63  ;;  %v15656_v6 = vld [vmem:[%s23162_s1 + $0xa88] ss:$12 sps:$4 sm:$0xff]   ;;  %v15669_v15 = vld [vmem:[%s23162_s1 + $0xae4] ss:$12 sps:$4 sm:$0xff]   ;;  %v15670_v16 = vld [vmem:[%s23162_s1 + $0xb00] ss:$12 sps:$4 sm:$0xff]  }
 0x15e   : > { %14403 = vmatpush3.bf16.msra.mxu1 %v15603_v14  ;;  %14912 = vmatprep.subr.bf16.mxu0 %v17291_v63  ;;  %v15664_v38 = vld [vmem:[%s23162_s1 + $0xafc] ss:$12 sps:$4 sm:$0xff]  }
 0x15f   : > { %3856 = vmatprep.subr.bf16.mxu1 %v15607_v25  ;;  %v15671_v25 = vld [vmem:[%s23162_s1 + $0xa40] ss:$12 sps:$4 sm:$0xff]  }
 0x161   : > { %3357 = vmatmul.mubr.bf16.vlgmr.msra.gmra.mxu1 %v15601_v10  ;;  %14913 = vmatpush3.bf16.msra.mxu0 %v15608_v58  ;;  %v15661_v10 = vld [vmem:[%s23162_s1 + $0xa70] ss:$12 sps:$4 sm:$0xff]   ;;  %v15674_v58 = vld [vmem:[%s23162_s1 + $0xacc] ss:$12 sps:$4 sm:$0xff]  }
 0x162   : > { %3857 = vmatpush1.bf16.msra.mxu1 %v15605_v44  ;;  %14914 = vmatprep.subr.bf16.mxu0 %v17291_v63 }
 0x163   : > { %3858 = vmatprep.subr.bf16.mxu1 %v15611_v20  ;;  %3888 = vmatprep.mubr.bf16.mxu1 %v18478_v21  ;;  %v15675_v20 = vld [vmem:[%s23162_s1 + $0xae8] ss:$12 sps:$4 sm:$0xff]  }
 0x165   : > { %v1551_v27 = vpop.f32.mrf.mxu1  ;;  %14915 = vmatpush3.bf16.msra.mxu0 %v15612_v23  ;;  %v18643_v23 = vpop.f32.mrf.mxu0 }
 0x166   : > { %v18493_v29 = vadd.f32 %v1551_v27, %v1511_v7  ;;  %3859 = vmatpush1.bf16.msra.mxu1 %v15609_v22  ;;  %14916 = vmatprep.subr.bf16.mxu0 %v17291_v63  ;;  %v15659_v7 = vld [vmem:[%s23162_s1 + $0xb14] ss:$12 sps:$4 sm:$0xff]  }
 0x167   : > { %v14880_v32 = vpop.f32.mrf.mxu1  ;;  %3860 = vmatprep.subr.bf16.mxu1 %v15615_v26  ;;  %v15676_v22 = vld [vmem:[%s23162_s1 + $0xa28] ss:$12 sps:$4 sm:$0xff]  }
 0x168   : > { %v15679_v27 = vld [vmem:[%s23162_s1 + $0xab4] ss:$12 sps:$4 sm:$0xff]   ;;  %v15677_v32 = vld [vmem:[%s23162_s1 + $0xab0] ss:$12 sps:$4 sm:$0xff]  }
 0x169   : > { %v1554_v34 = vpop.f32.mrf.mxu1  ;;  %14917 = vmatpush3.bf16.msra.mxu0 %v15616_v31 }
 0x16a   : > { %v18511_v37 = vadd.f32 %v1554_v34, %v1514_v18  ;;  %3861 = vmatpush1.bf16.msra.mxu1 %v15613_v30  ;;  %14918 = vmatprep.subr.bf16.mxu0 %v17291_v63  ;;  %v15667_v18 = vld [vmem:[%s23162_s1 + $0xae0] ss:$12 sps:$4 sm:$0xff]   ;;  %v15680_v30 = vld [vmem:[%s23162_s1 + $0xad0] ss:$12 sps:$4 sm:$0xff]  }
 0x16b   : > { %v14881_v40 = vpop.f32.mrf.mxu1  ;;  %3862 = vmatprep.subr.bf16.mxu1 %v15619_v33  ;;  %v15681_v34 = vld [vmem:[%s23162_s1 + $0xa10] ss:$12 sps:$4 sm:$0xff]  }
 0x16c   : > { %v15685_v40 = vld [vmem:[%s23162_s1 + $0xab8] ss:$12 sps:$4 sm:$0xff]  }
 0x16d   : > { %14919 = vmatpush3.bf16.msra.mxu0 %v15620_v36 }
 0x16e   : > { %3863 = vmatpush1.bf16.msra.mxu1 %v15617_v35  ;;  %3905 = vmatprep.subr.bf16.mxu0 %v15626_v41  ;;  %v15684_v35 = vld [vmem:[%s23162_s1 + $0xa9c] ss:$12 sps:$4 sm:$0xff]  }
 0x16f   : > { %3864 = vmatprep.subr.bf16.mxu1 %v15623_v39 }
 0x170   : > { %14921 = vmatmul.mubr.msk.bf16.vlgmr.msra.gmra.mxu0 %vm864_vm0, %v18358_v28  ;;  %v15633_v28 = vld [vmem:[%s23162_s1 + $0x9f0] ss:$12 sps:$4 sm:$0xff]  }
 0x171   : > { %3906 = vmatpush1.bf16.msra.mxu0 %v15624_v42  ;;  %3931 = vmatprep.mubr.bf16.mxu0 %v17290_v2  ;;  %v15682_v42 = vld [vmem:[%s23162_s1 + $0xa98] ss:$12 sps:$4 sm:$0xff]  }
 0x172   : > { %3865 = vmatpush1.bf16.msra.mxu1 %v15621_v24  ;;  %3907 = vmatprep.subr.bf16.mxu0 %v15632_v45 }
 0x173   : > { %3866 = vmatprep.subr.bf16.mxu1 %v15629_v43  ;;  %v15686_v43 = vld [vmem:[%s23162_s1 + $0x9f8] ss:$12 sps:$4 sm:$0xff]  }
 0x175   : > { %3908 = vmatpush1.bf16.msra.mxu0 %v15630_v47 }
 0x176   : > { %3867 = vmatpush1.bf16.msra.mxu1 %v15627_v46  ;;  %3909 = vmatprep.subr.bf16.mxu0 %v15638_v49 }
 0x177   : > { %3868 = vmatprep.subr.bf16.mxu1 %v15635_v48 }
 0x179   : > { %3910 = vmatpush1.bf16.msra.mxu0 %v15636_v50  ;;  %v2079_v14 = vpop.f32.mrf.mxu1 }
 0x17a   : > { %3869 = vmatpush1.bf16.msra.mxu1 %v15633_v28  ;;  %3911 = vmatprep.subr.bf16.mxu0 %v15644_v54  ;;  %v15690_v28 = vld [vmem:[%s23162_s1 + $0xaa0] ss:$12 sps:$4 sm:$0xff]  }
 0x17b   : > { %3870 = vmatprep.subr.bf16.mxu1 %v15641_v53  ;;  %v2081_v44 = vpop.f32.mrf.mxu1  ;;  %v15692_v54 = vld [vmem:[%s23162_s1 + $0xbc0] ss:$12 sps:$4 sm:$0xff]  }
 0x17d   : > { %3912 = vmatpush1.bf16.msra.mxu0 %v15642_v56  ;;  %v2083_v26 = vpop.f32.mrf.mxu1  ;;  %v15696_v56 = vld [vmem:[%s23162_s1 + $0xba8] ss:$12 sps:$4 sm:$0xff]  }
 0x17e   : > { %3871 = vmatpush1.bf16.msra.mxu1 %v15639_v55  ;;  %3913 = vmatprep.subr.bf16.mxu0 %v15650_v60  ;;  %v15693_v55 = vld [vmem:[%s23162_s1 + $0xc78] ss:$12 sps:$4 sm:$0xff]   ;;  %v15697_v60 = vld [vmem:[%s23162_s1 + $0xc60] ss:$12 sps:$4 sm:$0xff]  }
 0x17f   : > { %3872 = vmatprep.subr.bf16.mxu1 %v15647_v57  ;;  %v18660_v36 = vpop.f32.mrf.mxu1  ;;  %v15699_v57 = vld [vmem:[%s23162_s1 + $0xc64] ss:$12 sps:$4 sm:$0xff]  }
 0x181   : > { %3914 = vmatpush1.bf16.msra.mxu0 %v15648_v0 }
 0x182   : > { %3873 = vmatpush2.bf16.msra.mxu1 %v15645_v62  ;;  %14416 = vmatprep.subr.bf16.mxu0 %v15654_v3  ;;  %v18710_v62 = vld [vmem:[%s17452_s26 + $0x94] ss:$12 sps:$4 sm:$0x1f]  }
 0x183   : > { %3874 = vmatprep.subr.bf16.mxu1 %v15653_v1  ;;  %v15700_v1 = vld [vmem:[%s23162_s1 + $0xb90] ss:$12 sps:$4 sm:$0xff]  }
 0x184   : > { %13088 = vmatmul.mubr.msk.bf16.vlgmr.msra.gmra.mxu0 %vm864_vm0, %v18584_v4 }
 0x185   : > { %14417 = vmatpush3.bf16.msra.mxu0 %v15656_v6  ;;  %3974 = vmatprep.mubr.bf16.mxu0 %v18478_v21  ;;  %v15672_v21 = vld [vmem:[%s23162_s1 + $0xac8] ss:$12 sps:$4 sm:$0xff]  }
 0x186   : > { %3875 = vmatpush2.bf16.msra.mxu1 %v15651_v5  ;;  %14418 = vmatprep.subr.bf16.mxu0 %v15660_v8  ;;  %v15703_v5 = vld [vmem:[%s23162_s1 + $0xc4c] ss:$12 sps:$4 sm:$0xff]   ;;  %v15701_v6 = vld [vmem:[%s23162_s1 + $0xc48] ss:$12 sps:$4 sm:$0xff]  }
 0x187   : > { %3876 = vmatprep.subr.bf16.mxu1 %v15659_v7  ;;  %v15704_v7 = vld [vmem:[%s23162_s1 + $0xb78] ss:$12 sps:$4 sm:$0xff]  }
 0x189   : > { %14419 = vmatpush3.bf16.msra.mxu0 %v15661_v10  ;;  %v15707_v10 = vld [vmem:[%s23162_s1 + $0xc34] ss:$12 sps:$4 sm:$0xff]  }
 0x18a   : > { %3877 = vmatpush2.bf16.msra.mxu1 %v15657_v9  ;;  %14420 = vmatprep.subr.bf16.mxu0 %v15665_v61 }
 0x18b   : > { %3878 = vmatprep.subr.bf16.mxu1 %v15664_v38 }
 0x18d   : > { %14421 = vmatpush3.bf16.msra.mxu0 %v15666_v13 }
 0x18e   : > { %3879 = vmatpush2.bf16.msra.mxu1 %v15662_v12  ;;  %14422 = vmatprep.subr.bf16.mxu0 %v15670_v16 }
 0x18f   : > { %3880 = vmatprep.subr.bf16.mxu1 %v15669_v15  ;;  %v15708_v15 = vld [vmem:[%s23162_s1 + $0xb60] ss:$12 sps:$4 sm:$0xff]  }
 0x191   : > { %14423 = vmatpush3.bf16.msra.mxu0 %v15671_v25  ;;  %v15714_v25 = vld [vmem:[%s23162_s1 + $0xdb4] ss:$12 sps:$4 sm:$0xff]  }
 0x192   : > { %3881 = vmatpush2.bf16.msra.mxu1 %v15667_v18  ;;  %14424 = vmatprep.subr.bf16.mxu0 %v15675_v20  ;;  %v15711_v18 = vld [vmem:[%s23162_s1 + $0xc1c] ss:$12 sps:$4 sm:$0xff]   ;;  %v15709_v20 = vld [vmem:[%s23162_s1 + $0xc18] ss:$12 sps:$4 sm:$0xff]  }
 0x193   : > { %3882 = vmatprep.subr.bf16.mxu1 %v15674_v58 }
 0x194   : > { %v2036_v31 = vpop.f32.mrf.mxu0 }
 0x195   : > { %v2080_v33 = vadd.f32 %v2079_v14, %v2036_v31  ;;  %14425 = vmatpush3.bf16.msra.mxu0 %v15676_v22  ;;  %v15705_v14 = vld [vmem:[%s23162_s1 + $0xc30] ss:$12 sps:$4 sm:$0xff]  }
 0x196   : > { %3883 = vmatpush2.bf16.msra.mxu1 %v15672_v21  ;;  %v2038_v39 = vpop.f32.mrf.mxu0  ;;  %14426 = vmatprep.subr.bf16.mxu0 %v15680_v30  ;;  %v15712_v21 = vld [vmem:[%s23162_s1 + $0xdb0] ss:$12 sps:$4 sm:$0xff]   ;;  %v15723_v30 = vld [vmem:[%s23162_s1 + $0xbec] ss:$12 sps:$4 sm:$0xff]  }
 0x197   : > { %3884 = vmatprep.subr.bf16.mxu1 %v15679_v27  ;;  %v18666_v41 = vadd.f32 %v2080_v33, %v18448_v11  ;;  %v2082_v24 = vadd.f32 %v2081_v44, %v2038_v39  ;;  %v15689_v11 = vld [vmem:[%s17452_s26 + $0x78] ss:$12 sps:$4 sm:$0x1f]   ;;  %v15729_v33 = vld [vmem:[%s23162_s1 + $0xbd4] ss:$12 sps:$4 sm:$0xff]  }
 0x198   : > { %v2040_v45 = vpop.f32.mrf.mxu0  ;;  %v15717_v22 = vld [vmem:[%s23162_s1 + $0xc04] ss:$12 sps:$4 sm:$0xff]   ;;  %v15730_v39 = vld [vmem:[%s23162_s1 + $0xd68] ss:$12 sps:$4 sm:$0xff]  }
 0x199   : > { %v14348_v46 = vpop.f32.mrf.mxu1  ;;  %v18675_v47 = vadd.f32 %v2082_v24, %v18454_v51  ;;  %v2084_v48 = vadd.f32 %v2083_v26, %v2040_v45  ;;  %14427 = vmatpush3.bf16.msra.mxu0 %v15681_v34  ;;  %v15691_v51 = vld [vmem:[%s23162_s1 + $0x9e0] ss:$12 sps:$4 sm:$0xff]   ;;  %v15720_v26 = vld [vmem:[%s23162_s1 + $0xd9c] ss:$12 sps:$4 sm:$0xff]   ;;  %v15718_v27 = vld [vmem:[%s23162_s1 + $0xd98] ss:$12 sps:$4 sm:$0xff]  }
 0x19a   : > { %3885 = vmatpush2.bf16.msra.mxu1 %v15677_v32  ;;  %14428 = vmatprep.subr.bf16.mxu0 %v15685_v40  ;;  %v18715_v3 = vpop.f32.mrf.mxu0  ;;  %v15726_v31 = vld [vmem:[%s23162_s1 + $0xd84] ss:$12 sps:$4 sm:$0xff]   ;;  %v15721_v32 = vld [vmem:[%s23162_s1 + $0xbe8] ss:$12 sps:$4 sm:$0xff]   ;;  %v15732_v34 = vld [vmem:[%s23162_s1 + $0xd6c] ss:$12 sps:$4 sm:$0xff]  }
 0x19b   : > { %v14349_v49 = vpop.f32.mrf.mxu1  ;;  %3886 = vmatprep.subr.bf16.mxu1 %v15684_v35  ;;  %v18682_v50 = vadd.f32 %v2084_v48, %v18465_v19  ;;  %v15695_v19 = vld [vmem:[%s23162_s1 + $0xc7c] ss:$12 sps:$4 sm:$0xff]   ;;  %v15738_v24 = vld [vmem:[%s23162_s1 + $0xd54] ss:$12 sps:$4 sm:$0xff]   ;;  %v15741_v45 = vld [vmem:[%s23162_s1 + $0xd24] ss:$12 sps:$4 sm:$0xff]  }
 0x19c   : > { %v14350_v53 = vadd.f32 %v14349_v49, %v14348_v46  ;;  %v15727_v35 = vld [vmem:[%s23162_s1 + $0xbd0] ss:$12 sps:$4 sm:$0xff]   ;;  %v15743_v46 = vld [vmem:[%s23162_s1 + $0xd40] ss:$12 sps:$4 sm:$0xff]  }
 0x19d   : > { %14429 = vmatpush3.bf16.msra.mxu0 %v15686_v43  ;;  %v14351_v0 = vpop.f32.mrf.mxu1  ;;  %v15735_v40 = vld [vmem:[%s23162_s1 + $0xd3c] ss:$12 sps:$4 sm:$0xff]   ;;  %v18815_v48 = vld [vmem:[%s17452_s26 + $0x98] ss:$12 sps:$4 sm:$0x1f]  }
 0x19e   : > { %3887 = vmatpush2.bf16.msra.mxu1 %v15682_v42  ;;  %14430 = vmatprep.subr.bf16.mxu0 %v15690_v28  ;;  %v15733_v42 = vld [vmem:[%s23162_s1 + $0xd38] ss:$12 sps:$4 sm:$0xff]   ;;  %v15736_v43 = vld [vmem:[%s23162_s1 + $0xd50] ss:$12 sps:$4 sm:$0xff]   ;;  %v15739_v49 = vld [vmem:[%s23162_s1 + $0xd20] ss:$12 sps:$4 sm:$0xff]  }
 0x19f   : > { %14924 = vmatprep.subr.bf16.mxu1 %v17291_v63  ;;  %v14352_v8 = vpop.f32.mrf.mxu1  ;;  %v15747_v28 = vld [vmem:[%s23162_s1 + $0xd0c] ss:$12 sps:$4 sm:$0xff]  }
 0x1a0   : > { %v14353_v12 = vadd.f32 %v14352_v8, %v14351_v0  ;;  %v15758_v0 = vld [vmem:[%s23162_s1 + $0xcf8] ss:$12 sps:$4 sm:$0xff]  }
 0x1a1   : > { %3889 = vmatmul.mubr.bf16.vlgmr.msra.gmra.mxu1 %v15689_v11  ;;  %14431 = vmatpush3.bf16.msra.mxu0 %v15691_v51  ;;  %v15745_v51 = vld [vmem:[%s23162_s1 + $0xd08] ss:$12 sps:$4 sm:$0xff]  }
 0x1a2   : > { %14925 = vmatpush3.bf16.msra.mxu1 %v15692_v54  ;;  %4474 = vmatprep.subr.bf16.mxu0 %v15695_v19  ;;  %v15749_v54 = vld [vmem:[%s23162_s1 + $0xc68] ss:$12 sps:$4 sm:$0xff]  }
 0x1a3   : > { %14926 = vmatprep.subr.bf16.mxu1 %v17291_v63  ;;  %14934 = vmatprep.mubr.msk.bf16.mxu1 %vm17292_vm1, %v17291_v63  ;;  %v15752_v19 = vld [vmem:[%s23162_s1 + $0xcf4] ss:$12 sps:$4 sm:$0xff]  }
 0x1a4   : > { %3975 = vmatmul.mubr.bf16.vlgmr.msra.gmra.mxu0 %v15689_v11  ;;  %v15744_v11 = vld [vmem:[%s23162_s1 + $0xc80] ss:$12 sps:$4 sm:$0xff]  }
 0x1a5   : > { %4475 = vmatpush1.bf16.msra.mxu0 %v15693_v55  ;;  %4506 = vmatprep.mubr.bf16.mxu0 %v18710_v62  ;;  %v15753_v55 = vld [vmem:[%s23162_s1 + $0xd10] ss:$12 sps:$4 sm:$0xff]  }
 0x1a6   : > { %14927 = vmatpush3.bf16.msra.mxu1 %v15696_v56  ;;  %4476 = vmatprep.subr.bf16.mxu0 %v15699_v57  ;;  %v15750_v56 = vld [vmem:[%s23162_s1 + $0xcf0] ss:$12 sps:$4 sm:$0xff]  }
 0x1a7   : > { %14928 = vmatprep.subr.bf16.mxu1 %v17291_v63  ;;  %v15754_v57 = vld [vmem:[%s23162_s1 + $0xc50] ss:$12 sps:$4 sm:$0xff]  }
 0x1a8   : > { %v2163_v9 = vpop.f32.mrf.mxu0 }
 0x1a9   : > { %v2164_v38 = vadd.f32 %v14350_v53, %v2163_v9  ;;  %4477 = vmatpush1.bf16.msra.mxu0 %v15697_v60  ;;  %v15748_v53 = vld [vmem:[%s23162_s1 + $0xd28] ss:$12 sps:$4 sm:$0xff]   ;;  %v15760_v9 = vld [vmem:[%s23162_s1 + $0xcc0] ss:$12 sps:$4 sm:$0xff]  }
 0x1aa   : > { %14929 = vmatpush3.bf16.msra.mxu1 %v15700_v1  ;;  %v14894_v61 = vpop.f32.mrf.mxu0  ;;  %4478 = vmatprep.subr.bf16.mxu0 %v15703_v5  ;;  %v15757_v60 = vld [vmem:[%s23162_s1 + $0xcdc] ss:$12 sps:$4 sm:$0xff]   ;;  %v15755_v5 = vld [vmem:[%s23162_s1 + $0xcd8] ss:$12 sps:$4 sm:$0xff]  }
 0x1ab   : > { %14930 = vmatprep.subr.bf16.mxu1 %v17291_v63  ;;  %v18733_v13 = vadd.f32 %v2164_v38, %v18493_v29  ;;  %v15767_v38 = vld [vmem:[%s23162_s1 + $0xcac] ss:$12 sps:$4 sm:$0xff]   ;;  %v15768_v61 = vld [vmem:[%s23162_s1 + $0xcc8] ss:$12 sps:$4 sm:$0xff]  }
 0x1ac   : > { %v2166_v16 = vpop.f32.mrf.mxu0 }
 0x1ad   : > { %v2167_v44 = vadd.f32 %v14353_v12, %v2166_v16  ;;  %4479 = vmatpush1.bf16.msra.mxu0 %v15701_v6  ;;  %v15762_v6 = vld [vmem:[%s23162_s1 + $0xcc4] ss:$12 sps:$4 sm:$0xff]  }
 0x1ae   : > { %14931 = vmatpush3.bf16.msra.mxu1 %v15704_v7  ;;  %4480 = vmatprep.subr.bf16.mxu0 %v15707_v10  ;;  %v14895_v29 = vpop.f32.mrf.mxu0  ;;  %v15763_v7 = vld [vmem:[%s23162_s1 + $0xce0] ss:$12 sps:$4 sm:$0xff]  }
 0x1af   : > { %14932 = vmatprep.subr.bf16.mxu1 %v17291_v63  ;;  %v18749_v58 = vadd.f32 %v2167_v44, %v18511_v37  ;;  %v15715_v37 = vld [vmem:[%s23162_s1 + $0xc00] ss:$12 sps:$4 sm:$0xff]  }
 0x1b0   : > { %v15764_v10 = vld [vmem:[%s23162_s1 + $0xc20] ss:$12 sps:$4 sm:$0xff]  }
 0x1b1   : > { %4481 = vmatpush1.bf16.msra.mxu0 %v15705_v14  ;;  %v15765_v14 = vld [vmem:[%s23162_s1 + $0xca8] ss:$12 sps:$4 sm:$0xff]  }
 0x1b2   : > { %14933 = vmatpush3.bf16.msra.mxu1 %v15708_v15  ;;  %4482 = vmatprep.subr.bf16.mxu0 %v15711_v18  ;;  %v15769_v15 = vld [vmem:[%s23162_s1 + $0xc08] ss:$12 sps:$4 sm:$0xff]  }
 0x1b3   : > { %4523 = vmatprep.subr.bf16.mxu1 %v15714_v25  ;;  %v15772_v18 = vld [vmem:[%s23162_s1 + $0xc94] ss:$12 sps:$4 sm:$0xff]   ;;  %v15773_v25 = vld [vmem:[%s23162_s1 + $0xcb0] ss:$12 sps:$4 sm:$0xff]  }
 0x1b5   : > { %14935 = vmatmul.mubr.msk.bf16.vlgmr.msra.gmra.mxu1 %vm864_vm0, %v18584_v4  ;;  %4483 = vmatpush1.bf16.msra.mxu0 %v15709_v20  ;;  %v15724_v4 = vld [vmem:[%s23162_s1 + $0xd80] ss:$12 sps:$4 sm:$0xff]  }
 0x1b6   : > { %4524 = vmatpush1.bf16.msra.mxu1 %v15712_v21  ;;  %4484 = vmatprep.subr.bf16.mxu0 %v15717_v22 }
 0x1b7   : > { %4525 = vmatprep.subr.bf16.mxu1 %v15720_v26  ;;  %4549 = vmatprep.mubr.bf16.mxu1 %v17290_v2  ;;  %v15770_v26 = vld [vmem:[%s23162_s1 + $0xc90] ss:$12 sps:$4 sm:$0xff]  }
 0x1b9   : > { %4485 = vmatpush1.bf16.msra.mxu0 %v15715_v37  ;;  %v15774_v37 = vld [vmem:[%s23162_s1 + $0xbf0] ss:$12 sps:$4 sm:$0xff]  }
 0x1ba   : > { %4526 = vmatpush1.bf16.msra.mxu1 %v15718_v27  ;;  %4486 = vmatprep.subr.bf16.mxu0 %v15723_v30 }
 0x1bb   : > { %4527 = vmatprep.subr.bf16.mxu1 %v15726_v31  ;;  %v15778_v31 = vld [vmem:[%s23162_s1 + $0xc98] ss:$12 sps:$4 sm:$0xff]  }
 0x1bc   : > { %v2697_v1 = vpop.f32.mrf.mxu0 }
 0x1bd   : > { %4487 = vmatpush1.bf16.msra.mxu0 %v15721_v32 }
 0x1be   : > { %4528 = vmatpush1.bf16.msra.mxu1 %v15724_v4  ;;  %4488 = vmatprep.subr.bf16.mxu0 %v15729_v33  ;;  %v2699_v8 = vpop.f32.mrf.mxu0  ;;  %v15777_v4 = vld [vmem:[%s17452_s26 + $0x90] ss:$12 sps:$4 sm:$0x1f]  }
 0x1bf   : > { %4529 = vmatprep.subr.bf16.mxu1 %v15732_v34 }
 0x1c0   : > { %v2701_v12 = vpop.f32.mrf.mxu0 }
 0x1c1   : > { %4489 = vmatpush1.bf16.msra.mxu0 %v15727_v35 }
 0x1c2   : > { %4530 = vmatpush1.bf16.msra.mxu1 %v15730_v39  ;;  %4490 = vmatprep.subr.bf16.mxu0 %v15735_v40  ;;  %v18892_v29 = vpop.f32.mrf.mxu0  ;;  %v15779_v39 = vld [vmem:[%s23162_s1 + $0xbd8] ss:$12 sps:$4 sm:$0xff]   ;;  %v15783_v40 = vld [vmem:[%s23162_s1 + $0xe74] ss:$12 sps:$4 sm:$0xff]  }
 0x1c3   : > { %4531 = vmatprep.subr.bf16.mxu1 %v15738_v24  ;;  %v15784_v24 = vld [vmem:[%s23162_s1 + $0xda0] ss:$12 sps:$4 sm:$0xff]  }
 0x1c5   : > { %4491 = vmatpush2.bf16.msra.mxu0 %v15733_v42  ;;  %v15787_v42 = vld [vmem:[%s23162_s1 + $0xe5c] ss:$12 sps:$4 sm:$0xff]  }
 0x1c6   : > { %4532 = vmatpush1.bf16.msra.mxu1 %v15736_v43  ;;  %4492 = vmatprep.subr.bf16.mxu0 %v15741_v45  ;;  %v18933_v43 = vld [vmem:[%s17452_s26 + $0xac] ss:$12 sps:$4 sm:$0x1f]  }
 0x1c7   : > { %14444 = vmatprep.subr.bf16.mxu1 %v15743_v46  ;;  %v15785_v45 = vld [vmem:[%s23162_s1 + $0xe58] ss:$12 sps:$4 sm:$0xff]   ;;  %v15788_v46 = vld [vmem:[%s23162_s1 + $0xd88] ss:$12 sps:$4 sm:$0xff]  }
 0x1c9   : > { %13244 = vmatmul.mubr.msk.bf16.vlgmr.msra.gmra.mxu1 %vm864_vm0, %v18815_v48  ;;  %4493 = vmatpush2.bf16.msra.mxu0 %v15739_v49 }
 0x1ca   : > { %14445 = vmatpush3.bf16.msra.mxu1 %v15744_v11  ;;  %4494 = vmatprep.subr.bf16.mxu0 %v15747_v28  ;;  %v15791_v11 = vld [vmem:[%s23162_s1 + $0xe44] ss:$12 sps:$4 sm:$0xff]  }
 0x1cb   : > { %14446 = vmatprep.subr.bf16.mxu1 %v15748_v53  ;;  %4592 = vmatprep.mubr.bf16.mxu1 %v18710_v62  ;;  %v15759_v62 = vld [vmem:[%s23162_s1 + $0xc38] ss:$12 sps:$4 sm:$0xff]   ;;  %v15789_v53 = vld [vmem:[%s23162_s1 + $0xe40] ss:$12 sps:$4 sm:$0xff]  }
 0x1cd   : > { %4495 = vmatpush2.bf16.msra.mxu0 %v15745_v51  ;;  %v15792_v51 = vld [vmem:[%s23162_s1 + $0xd70] ss:$12 sps:$4 sm:$0xff]  }
 0x1ce   : > { %14447 = vmatpush3.bf16.msra.mxu1 %v15749_v54  ;;  %4496 = vmatprep.subr.bf16.mxu0 %v15752_v19 }
 0x1cf   : > { %14448 = vmatprep.subr.bf16.mxu1 %v15753_v55  ;;  %v15795_v55 = vld [vmem:[%s23162_s1 + $0xe2c] ss:$12 sps:$4 sm:$0xff]  }
 0x1d1   : > { %4497 = vmatpush2.bf16.msra.mxu0 %v15750_v56 }
 0x1d2   : > { %14449 = vmatpush3.bf16.msra.mxu1 %v15754_v57  ;;  %4498 = vmatprep.subr.bf16.mxu0 %v15757_v60 }
 0x1d3   : > { %14450 = vmatprep.subr.bf16.mxu1 %v15758_v0 }
 0x1d5   : > { %4499 = vmatpush2.bf16.msra.mxu0 %v15755_v5  ;;  %v15796_v5 = vld [vmem:[%s23162_s1 + $0xd58] ss:$12 sps:$4 sm:$0xff]  }
 0x1d6   : > { %14451 = vmatpush3.bf16.msra.mxu1 %v15759_v62  ;;  %4500 = vmatprep.subr.bf16.mxu0 %v15762_v6  ;;  %v15799_v6 = vld [vmem:[%s23162_s1 + $0xe14] ss:$12 sps:$4 sm:$0xff]  }
 0x1d7   : > { %14452 = vmatprep.subr.bf16.mxu1 %v15763_v7  ;;  %v15802_v7 = vld [vmem:[%s23162_s1 + $0xfac] ss:$12 sps:$4 sm:$0xff]  }
 0x1d9   : > { %v2654_v16 = vpop.f32.mrf.mxu1  ;;  %4501 = vmatpush2.bf16.msra.mxu0 %v15760_v9 }
 0x1da   : > { %v2698_v44 = vadd.f32 %v2697_v1, %v2654_v16  ;;  %14453 = vmatpush3.bf16.msra.mxu1 %v15764_v10  ;;  %4502 = vmatprep.subr.bf16.mxu0 %v15767_v38  ;;  %v15793_v1 = vld [vmem:[%s23162_s1 + $0xe28] ss:$12 sps:$4 sm:$0xff]   ;;  %v15797_v10 = vld [vmem:[%s23162_s1 + $0xe10] ss:$12 sps:$4 sm:$0xff]  }
 0x1db   : > { %v2656_v20 = vpop.f32.mrf.mxu1  ;;  %14454 = vmatprep.subr.bf16.mxu1 %v15768_v61  ;;  %v15800_v38 = vld [vmem:[%s23162_s1 + $0xfa8] ss:$12 sps:$4 sm:$0xff]  }
 0x1dc   : > { %v18895_v21 = vadd.f32 %v2698_v44, %v18666_v41  ;;  %v2700_v22 = vadd.f32 %v2699_v8, %v2656_v20  ;;  %v14376_v30 = vpop.f32.mrf.mxu0  ;;  %v15805_v61 = vld [vmem:[%s23162_s1 + $0xdfc] ss:$12 sps:$4 sm:$0xff]   ;;  %v15820_v44 = vld [vmem:[%s23162_s1 + $0xf64] ss:$12 sps:$4 sm:$0xff]  }
 0x1dd   : > { %v2658_v27 = vpop.f32.mrf.mxu1  ;;  %4503 = vmatpush2.bf16.msra.mxu0 %v15765_v14  ;;  %v15806_v14 = vld [vmem:[%s23162_s1 + $0xf90] ss:$12 sps:$4 sm:$0xff]   ;;  %v15815_v20 = vld [vmem:[%s23162_s1 + $0xdc8] ss:$12 sps:$4 sm:$0xff]  }
 0x1de   : > { %v18907_v32 = vadd.f32 %v2700_v22, %v18675_v47  ;;  %v2702_v41 = vadd.f32 %v2701_v12, %v2658_v27  ;;  %14455 = vmatpush3.bf16.msra.mxu1 %v15769_v15  ;;  %4504 = vmatprep.subr.bf16.mxu0 %v15772_v18  ;;  %v14377_v33 = vpop.f32.mrf.mxu0  ;;  %v15780_v47 = vld [vmem:[%s23162_s1 + $0xdb8] ss:$12 sps:$4 sm:$0xff]   ;;  %v15808_v12 = vld [vmem:[%s23162_s1 + $0xf94] ss:$12 sps:$4 sm:$0xff]   ;;  %v15814_v16 = vld [vmem:[%s23162_s1 + $0xf7c] ss:$12 sps:$4 sm:$0xff]  }
 0x1df   : > { %14456 = vmatprep.subr.bf16.mxu1 %v15773_v25  ;;  %v14378_v35 = vadd.f32 %v14377_v33, %v14376_v30  ;;  %v18947_v28 = vpop.f32.mrf.mxu1  ;;  %v15811_v15 = vld [vmem:[%s23162_s1 + $0xde4] ss:$12 sps:$4 sm:$0xff]   ;;  %v15809_v18 = vld [vmem:[%s23162_s1 + $0xde0] ss:$12 sps:$4 sm:$0xff]   ;;  %v15824_v30 = vld [vmem:[%s23162_s1 + $0xf48] ss:$12 sps:$4 sm:$0xff]  }
 0x1e0   : > { %v18911_v34 = vadd.f32 %v2702_v41, %v18682_v50  ;;  %v15781_v50 = vld [vmem:[%s23162_s1 + $0xe70] ss:$12 sps:$4 sm:$0xff]   ;;  %v14379_v49 = vpop.f32.mrf.mxu0  ;;  %v15817_v25 = vld [vmem:[%s23162_s1 + $0xdcc] ss:$12 sps:$4 sm:$0xff]  }
 0x1e1   : > { %4505 = vmatpush2.bf16.msra.mxu0 %v15770_v26  ;;  %v15818_v22 = vld [vmem:[%s23162_s1 + $0xf60] ss:$12 sps:$4 sm:$0xff]   ;;  %v15821_v27 = vld [vmem:[%s23162_s1 + $0xf30] ss:$12 sps:$4 sm:$0xff]   ;;  %v15830_v41 = vld [vmem:[%s23162_s1 + $0xf38] ss:$12 sps:$4 sm:$0xff]  }
 0x1e2   : > { %14457 = vmatpush3.bf16.msra.mxu1 %v15774_v37  ;;  %14938 = vmatprep.subr.bf16.mxu0 %v17291_v63  ;;  %v14380_v54 = vpop.f32.mrf.mxu0  ;;  %v15823_v26 = vld [vmem:[%s23162_s1 + $0xf34] ss:$12 sps:$4 sm:$0xff]   ;;  %v15826_v37 = vld [vmem:[%s23162_s1 + $0xf4c] ss:$12 sps:$4 sm:$0xff]  }
 0x1e3   : > { %14458 = vmatprep.subr.bf16.mxu1 %v15778_v31  ;;  %v14381_v60 = vadd.f32 %v14380_v54, %v14379_v49  ;;  %v15829_v31 = vld [vmem:[%s23162_s1 + $0xf1c] ss:$12 sps:$4 sm:$0xff]   ;;  %v15827_v33 = vld [vmem:[%s23162_s1 + $0xf18] ss:$12 sps:$4 sm:$0xff]   ;;  %v15845_v49 = vld [vmem:[%s23162_s1 + $0xed4] ss:$12 sps:$4 sm:$0xff]  }
 0x1e4   : > { %4507 = vmatmul.mubr.bf16.vlgmr.msra.gmra.mxu0 %v15777_v4  ;;  %v15850_v54 = vld [vmem:[%s23162_s1 + $0xebc] ss:$12 sps:$4 sm:$0xff]  }
 0x1e5   : > { %14939 = vmatpush3.bf16.msra.mxu0 %v15780_v47  ;;  %14948 = vmatprep.mubr.msk.bf16.mxu0 %vm17292_vm1, %v17291_v63  ;;  %v15836_v47 = vld [vmem:[%s23162_s1 + $0xf20] ss:$12 sps:$4 sm:$0xff]  }
 0x1e6   : > { %14459 = vmatpush3.bf16.msra.mxu1 %v15779_v39  ;;  %14940 = vmatprep.subr.bf16.mxu0 %v17291_v63  ;;  %v15835_v39 = vld [vmem:[%s23162_s1 + $0xf04] ss:$12 sps:$4 sm:$0xff]  }
 0x1e7   : > { %5092 = vmatprep.subr.bf16.mxu1 %v15783_v40  ;;  %v15833_v40 = vld [vmem:[%s23162_s1 + $0xf00] ss:$12 sps:$4 sm:$0xff]  }
 0x1e9   : > { %4593 = vmatmul.mubr.bf16.vlgmr.msra.gmra.mxu1 %v15777_v4  ;;  %14941 = vmatpush3.bf16.msra.mxu0 %v15784_v24  ;;  %v19044_v4 = vld [vmem:[%s17452_s26 + $0xb0] ss:$12 sps:$4 sm:$0x1f]   ;;  %v15840_v24 = vld [vmem:[%s23162_s1 + $0xeec] ss:$12 sps:$4 sm:$0xff]  }
 0x1ea   : > { %5093 = vmatpush1.bf16.msra.mxu1 %v15781_v50  ;;  %14942 = vmatprep.subr.bf16.mxu0 %v17291_v63  ;;  %v15837_v50 = vld [vmem:[%s23162_s1 + $0xe60] ss:$12 sps:$4 sm:$0xff]  }
 0x1eb   : > { %5094 = vmatprep.subr.bf16.mxu1 %v15787_v42  ;;  %5124 = vmatprep.mubr.bf16.mxu1 %v18933_v43  ;;  %v15841_v42 = vld [vmem:[%s23162_s1 + $0xf08] ss:$12 sps:$4 sm:$0xff]  }
 0x1ed   : > { %v2781_v19 = vpop.f32.mrf.mxu1  ;;  %14943 = vmatpush3.bf16.msra.mxu0 %v15788_v46  ;;  %v15842_v46 = vld [vmem:[%s23162_s1 + $0xe48] ss:$12 sps:$4 sm:$0xff]  }
 0x1ee   : > { %v2782_v56 = vadd.f32 %v14378_v35, %v2781_v19  ;;  %5095 = vmatpush1.bf16.msra.mxu1 %v15785_v45  ;;  %14944 = vmatprep.subr.bf16.mxu0 %v17291_v63  ;;  %v15832_v35 = vld [vmem:[%s23162_s1 + $0xe78] ss:$12 sps:$4 sm:$0xff]   ;;  %v15838_v45 = vld [vmem:[%s23162_s1 + $0xee8] ss:$12 sps:$4 sm:$0xff]  }
 0x1ef   : > { %v14908_v57 = vpop.f32.mrf.mxu1  ;;  %5096 = vmatprep.subr.bf16.mxu1 %v15791_v11  ;;  %v15846_v11 = vld [vmem:[%s23162_s1 + $0xef0] ss:$12 sps:$4 sm:$0xff]   ;;  %v15851_v19 = vld [vmem:[%s23162_s1 + $0xed8] ss:$12 sps:$4 sm:$0xff]  }
 0x1f0   : > { %v18962_v0 = vadd.f32 %v2782_v56, %v18733_v13  ;;  %v15848_v56 = vld [vmem:[%s23162_s1 + $0xeb8] ss:$12 sps:$4 sm:$0xff]  }
 0x1f1   : > { %v2784_v62 = vpop.f32.mrf.mxu1  ;;  %14945 = vmatpush3.bf16.msra.mxu0 %v15792_v51  ;;  %v15843_v51 = vld [vmem:[%s23162_s1 + $0xed0] ss:$12 sps:$4 sm:$0xff]   ;;  %v15852_v57 = vld [vmem:[%s23162_s1 + $0xe18] ss:$12 sps:$4 sm:$0xff]  }
 0x1f2   : > { %v2785_v8 = vadd.f32 %v14381_v60, %v2784_v62  ;;  %5097 = vmatpush1.bf16.msra.mxu1 %v15789_v53  ;;  %14946 = vmatprep.subr.bf16.mxu0 %v17291_v63  ;;  %v15855_v60 = vld [vmem:[%s23162_s1 + $0xea4] ss:$12 sps:$4 sm:$0xff]   ;;  %v15853_v62 = vld [vmem:[%s23162_s1 + $0xea0] ss:$12 sps:$4 sm:$0xff]  }
 0x1f3   : > { %v14909_v13 = vpop.f32.mrf.mxu1  ;;  %5098 = vmatprep.subr.bf16.mxu1 %v15795_v55 }
 0x1f4   : > { %v18978_v9 = vadd.f32 %v2785_v8, %v18749_v58  ;;  %v15803_v58 = vld [vmem:[%s23162_s1 + $0xdf8] ss:$12 sps:$4 sm:$0xff]   ;;  %v15861_v13 = vld [vmem:[%s23162_s1 + $0xea8] ss:$12 sps:$4 sm:$0xff]  }
 0x1f5   : > { %14947 = vmatpush3.bf16.msra.mxu0 %v15796_v5  ;;  %v15860_v8 = vld [vmem:[%s23162_s1 + $0xe8c] ss:$12 sps:$4 sm:$0xff]  }
 0x1f6   : > { %5099 = vmatpush1.bf16.msra.mxu1 %v15793_v1  ;;  %5141 = vmatprep.subr.bf16.mxu0 %v15802_v7  ;;  %v15856_v1 = vld [vmem:[%s23162_s1 + $0xec0] ss:$12 sps:$4 sm:$0xff]  }
 0x1f7   : > { %5100 = vmatprep.subr.bf16.mxu1 %v15799_v6  ;;  %v15857_v6 = vld [vmem:[%s23162_s1 + $0xe00] ss:$12 sps:$4 sm:$0xff]  }
 0x1f8   : > { %14949 = vmatmul.mubr.msk.bf16.vlgmr.msra.gmra.mxu0 %vm864_vm0, %v18815_v48  ;;  %v15812_v48 = vld [vmem:[%s23162_s1 + $0xf78] ss:$12 sps:$4 sm:$0xff]  }
 0x1f9   : > { %5142 = vmatpush1.bf16.msra.mxu0 %v15800_v38  ;;  %5167 = vmatprep.mubr.bf16.mxu0 %v17290_v2 }
 0x1fa   : > { %5101 = vmatpush1.bf16.msra.mxu1 %v15797_v10  ;;  %5143 = vmatprep.subr.bf16.mxu0 %v15808_v12 }
 0x1fb   : > { %5102 = vmatprep.subr.bf16.mxu1 %v15805_v61 }
 0x1fd   : > { %5144 = vmatpush1.bf16.msra.mxu0 %v15806_v14  ;;  %v15858_v14 = vld [vmem:[%s23162_s1 + $0xe88] ss:$12 sps:$4 sm:$0xff]  }
 0x1fe   : > { %5103 = vmatpush1.bf16.msra.mxu1 %v15803_v58  ;;  %5145 = vmatprep.subr.bf16.mxu0 %v15814_v16 }
 0x1ff   : > { %5104 = vmatprep.subr.bf16.mxu1 %v15811_v15  ;;  %v15862_v15 = vld [vmem:[%s23162_s1 + $0xde8] ss:$12 sps:$4 sm:$0xff]  }
 0x201   : > { %5146 = vmatpush1.bf16.msra.mxu0 %v15812_v48  ;;  %v3315_v53 = vpop.f32.mrf.mxu1  ;;  %v15866_v48 = vld [vmem:[%s23162_s1 + $0xe90] ss:$12 sps:$4 sm:$0xff]  }
 0x202   : > { %5105 = vmatpush1.bf16.msra.mxu1 %v15809_v18  ;;  %5147 = vmatprep.subr.bf16.mxu0 %v15820_v44 }
 0x203   : > { %5106 = vmatprep.subr.bf16.mxu1 %v15817_v25  ;;  %v3317_v55 = vpop.f32.mrf.mxu1 }
 0x205   : > { %5148 = vmatpush1.bf16.msra.mxu0 %v15818_v22  ;;  %v3319_v5 = vpop.f32.mrf.mxu1 }
 0x206   : > { %5107 = vmatpush1.bf16.msra.mxu1 %v15815_v20  ;;  %5149 = vmatprep.subr.bf16.mxu0 %v15826_v37  ;;  %v15865_v20 = vld [vmem:[%s17452_s26 + $0xa8] ss:$12 sps:$4 sm:$0x1f]   ;;  %v15867_v37 = vld [vmem:[%s23162_s1 + $0xdd0] ss:$12 sps:$4 sm:$0xff]  }
 0x207   : > { %5108 = vmatprep.subr.bf16.mxu1 %v15823_v26  ;;  %v19121_v38 = vpop.f32.mrf.mxu1 }
 0x209   : > { %5150 = vmatpush1.bf16.msra.mxu0 %v15824_v30  ;;  %v15870_v30 = vld [vmem:[%s23162_s1 + $0xf80] ss:$12 sps:$4 sm:$0xff]  }
 0x20a   : > { %5109 = vmatpush2.bf16.msra.mxu1 %v15821_v27  ;;  %14472 = vmatprep.subr.bf16.mxu0 %v15830_v41  ;;  %v15869_v27 = vld [vmem:[%s23162_s1 + $0xf98] ss:$12 sps:$4 sm:$0xff]   ;;  %v16704_v41 = vld [vmem:[%s23162_s1 + $0x2a0] ss:$12 sps:$4 sm:$0xff]  }
 0x20b   : > { %5110 = vmatprep.subr.bf16.mxu1 %v15829_v31 }
 0x20c   : > { %13400 = vmatmul.mubr.msk.bf16.vlgmr.msra.gmra.mxu0 %vm864_vm0, %v19044_v4 }
 0x20d   : > { %14473 = vmatpush3.bf16.msra.mxu0 %v15832_v35  ;;  %5210 = vmatprep.mubr.bf16.mxu0 %v18933_v43  ;;  %v15847_v43 = vld [vmem:[%s23162_s1 + $0xe30] ss:$12 sps:$4 sm:$0xff]   ;;  %v16705_v35 = vld [vmem:[%s23162_s1 + $0x28c] ss:$12 sps:$4 sm:$0xff]  }
 0x20e   : > { %5111 = vmatpush2.bf16.msra.mxu1 %v15827_v33  ;;  %14474 = vmatprep.subr.bf16.mxu0 %v15836_v47  ;;  %v19174_v47 = vld [vmem:[%s17452_s26 + $0x7c] ss:$12 sps:$4 sm:$0x1f]  }
 0x20f   : > { %5112 = vmatprep.subr.bf16.mxu1 %v15835_v39  ;;  %v15871_v39 = vld [vmem:[%s23162_s1 + $0xf68] ss:$12 sps:$4 sm:$0xff]  }
 0x211   : > { %14475 = vmatpush3.bf16.msra.mxu0 %v15837_v50 }
 0x212   : > { %5113 = vmatpush2.bf16.msra.mxu1 %v15833_v40  ;;  %14476 = vmatprep.subr.bf16.mxu0 %v15841_v42  ;;  %v16707_v42 = vld [vmem:[%s23162_s1 + $0x288] ss:$12 sps:$4 sm:$0xff]  }
 0x213   : > { %5114 = vmatprep.subr.bf16.mxu1 %v15840_v24 }
 0x215   : > { %14477 = vmatpush3.bf16.msra.mxu0 %v15842_v46  ;;  %v16708_v46 = vld [vmem:[%s23162_s1 + $0x274] ss:$12 sps:$4 sm:$0xff]  }
 0x216   : > { %5115 = vmatpush2.bf16.msra.mxu1 %v15838_v45  ;;  %14478 = vmatprep.subr.bf16.mxu0 %v15846_v11 }
 0x217   : > { %5116 = vmatprep.subr.bf16.mxu1 %v15845_v49 }
 0x219   : > { %14479 = vmatpush3.bf16.msra.mxu0 %v15847_v43 }
 0x21a   : > { %5117 = vmatpush2.bf16.msra.mxu1 %v15843_v51  ;;  %14480 = vmatprep.subr.bf16.mxu0 %v15851_v19  ;;  %v16710_v19 = vld [vmem:[%s23162_s1 + $0x25c] ss:$12 sps:$4 sm:$0xff]  }
 0x21b   : > { %5118 = vmatprep.subr.bf16.mxu1 %v15850_v54  ;;  %v16709_v54 = vld [vmem:[%s23162_s1 + $0x270] ss:$12 sps:$4 sm:$0xff]  }
 0x21c   : > { %v3272_v7 = vpop.f32.mrf.mxu0 }
 0x21d   : > { %v3316_v10 = vadd.f32 %v3315_v53, %v3272_v7  ;;  %14481 = vmatpush3.bf16.msra.mxu0 %v15852_v57  ;;  %v15872_v53 = vld [vmem:[%s23162_s1 + $0xf50] ss:$12 sps:$4 sm:$0xff]   ;;  %v16720_v7 = vld [vmem:[%s23162_s1 + $0x214] ss:$12 sps:$4 sm:$0xff]  }
 0x21e   : > { %5119 = vmatpush2.bf16.msra.mxu1 %v15848_v56  ;;  %v3274_v61 = vpop.f32.mrf.mxu0  ;;  %14482 = vmatprep.subr.bf16.mxu0 %v15856_v1  ;;  %v16711_v56 = vld [vmem:[%s23162_s1 + $0x258] ss:$12 sps:$4 sm:$0xff]  }
 0x21f   : > { %5120 = vmatprep.subr.bf16.mxu1 %v15855_v60  ;;  %v19124_v12 = vadd.f32 %v3316_v10, %v18895_v21  ;;  %v3318_v58 = vadd.f32 %v3317_v55, %v3274_v61  ;;  %v16712_v57 = vld [vmem:[%s23162_s1 + $0x244] ss:$12 sps:$4 sm:$0xff]   ;;  %v16713_v60 = vld [vmem:[%s23162_s1 + $0x3dc] ss:$12 sps:$4 sm:$0xff]  }
 0x220   : > { %v3276_v16 = vpop.f32.mrf.mxu0  ;;  %v16715_v1 = vld [vmem:[%s23162_s1 + $0x3d8] ss:$12 sps:$4 sm:$0xff]   ;;  %v16723_v10 = vld [vmem:[%s23162_s1 + $0x3a8] ss:$12 sps:$4 sm:$0xff]  }
 0x221   : > { %v14404_v18 = vpop.f32.mrf.mxu1  ;;  %v19136_v25 = vadd.f32 %v3318_v58, %v18907_v32  ;;  %v3320_v21 = vadd.f32 %v3319_v5, %v3276_v16  ;;  %14483 = vmatpush3.bf16.msra.mxu0 %v15857_v6  ;;  %v15868_v32 = vld [vmem:[%s23162_s1 + $0xfb0] ss:$12 sps:$4 sm:$0xff]   ;;  %v16716_v5 = vld [vmem:[%s23162_s1 + $0x22c] ss:$12 sps:$4 sm:$0xff]   ;;  %v16725_v58 = vld [vmem:[%s23162_s1 + $0x394] ss:$12 sps:$4 sm:$0xff]  }
 0x222   : > { %5121 = vmatpush2.bf16.msra.mxu1 %v15853_v62  ;;  %14484 = vmatprep.subr.bf16.mxu0 %v15861_v13  ;;  %v19164_v33 = vpop.f32.mrf.mxu0  ;;  %v16717_v62 = vld [vmem:[%s23162_s1 + $0x3c4] ss:$12 sps:$4 sm:$0xff]   ;;  %v16719_v6 = vld [vmem:[%s23162_s1 + $0x3c0] ss:$12 sps:$4 sm:$0xff]   ;;  %v16724_v61 = vld [vmem:[%s23162_s1 + $0x1fc] ss:$12 sps:$4 sm:$0xff]  }
 0x223   : > { %v14405_v44 = vpop.f32.mrf.mxu1  ;;  %5122 = vmatprep.subr.bf16.mxu1 %v15860_v8  ;;  %v19140_v22 = vadd.f32 %v3320_v21, %v18911_v34  ;;  %v16703_v34 = vld [vmem:[%s23162_s1 + $0x2a4] ss:$12 sps:$4 sm:$0xff]   ;;  %v16721_v8 = vld [vmem:[%s23162_s1 + $0x3ac] ss:$12 sps:$4 sm:$0xff]  }
 0x224   : > { %v14406_v26 = vadd.f32 %v14405_v44, %v14404_v18  ;;  %v16722_v13 = vld [vmem:[%s23162_s1 + $0x210] ss:$12 sps:$4 sm:$0xff]   ;;  %v16731_v21 = vld [vmem:[%s23162_s1 + $0x378] ss:$12 sps:$4 sm:$0xff]  }
 0x225   : > { %14485 = vmatpush3.bf16.msra.mxu0 %v15862_v15  ;;  %v14407_v31 = vpop.f32.mrf.mxu1  ;;  %v16727_v15 = vld [vmem:[%s23162_s1 + $0x390] ss:$12 sps:$4 sm:$0xff]   ;;  %v16732_v44 = vld [vmem:[%s23162_s1 + $0x34c] ss:$12 sps:$4 sm:$0xff]  }
 0x226   : > { %5123 = vmatpush2.bf16.msra.mxu1 %v15858_v14  ;;  %14486 = vmatprep.subr.bf16.mxu0 %v15866_v48  ;;  %v16726_v14 = vld [vmem:[%s23162_s1 + $0x1f8] ss:$12 sps:$4 sm:$0xff]   ;;  %v16729_v18 = vld [vmem:[%s23162_s1 + $0x37c] ss:$12 sps:$4 sm:$0xff]   ;;  %v16730_v48 = vld [vmem:[%s23162_s1 + $0x360] ss:$12 sps:$4 sm:$0xff]  }
 0x227   : > { %14952 = vmatprep.subr.bf16.mxu1 %v17291_v63  ;;  %v14408_v40 = vpop.f32.mrf.mxu1  ;;  %v16728_v16 = vld [vmem:[%s23162_s1 + $0x364] ss:$12 sps:$4 sm:$0xff]  }
 0x228   : > { %v14409_v49 = vadd.f32 %v14408_v40, %v14407_v31  ;;  %v16740_v31 = vld [vmem:[%s23162_s1 + $0x290] ss:$12 sps:$4 sm:$0xff]   ;;  %v16744_v40 = vld [vmem:[%s23162_s1 + $0x278] ss:$12 sps:$4 sm:$0xff]  }
 0x229   : > { %5125 = vmatmul.mubr.bf16.vlgmr.msra.gmra.mxu1 %v15865_v20  ;;  %14487 = vmatpush3.bf16.msra.mxu0 %v15867_v37  ;;  %v16735_v37 = vld [vmem:[%s23162_s1 + $0x348] ss:$12 sps:$4 sm:$0xff]  }
 0x22a   : > { %14953 = vmatpush3.bf16.msra.mxu1 %v15868_v32  ;;  %5297 = vmatprep.subr.bf16.mxu0 %v16703_v34  ;;  %v16736_v32 = vld [vmem:[%s23162_s1 + $0x2a8] ss:$12 sps:$4 sm:$0xff]   ;;  %v16738_v34 = vld [vmem:[%s23162_s1 + $0x350] ss:$12 sps:$4 sm:$0xff]  }
 0x22b   : > { %14954 = vmatprep.subr.bf16.mxu1 %v17291_v63  ;;  %14962 = vmatprep.mubr.msk.bf16.mxu1 %vm17292_vm1, %v17291_v63 }
 0x22c   : > { %5211 = vmatmul.mubr.bf16.vlgmr.msra.gmra.mxu0 %v15865_v20  ;;  %v16733_v20 = vld [vmem:[%s23162_s1 + $0x368] ss:$12 sps:$4 sm:$0xff]  }
 0x22d   : > { %5298 = vmatpush1.bf16.msra.mxu0 %v16704_v41  ;;  %5329 = vmatprep.mubr.bf16.mxu0 %v19174_v47 }
 0x22e   : > { %14955 = vmatpush3.bf16.msra.mxu1 %v15869_v27  ;;  %5299 = vmatprep.subr.bf16.mxu0 %v16705_v35  ;;  %v16737_v27 = vld [vmem:[%s23162_s1 + $0x334] ss:$12 sps:$4 sm:$0xff]   ;;  %v16741_v35 = vld [vmem:[%s23162_s1 + $0x31c] ss:$12 sps:$4 sm:$0xff]  }
 0x22f   : > { %14956 = vmatprep.subr.bf16.mxu1 %v17291_v63 }
 0x230   : > { %v3399_v50 = vpop.f32.mrf.mxu0 }
 0x231   : > { %v3400_v24 = vadd.f32 %v14406_v26, %v3399_v50  ;;  %5300 = vmatpush1.bf16.msra.mxu0 %v16707_v42  ;;  %v19273_v26 = vld [vmem:[%s17452_s26 + $0x80] ss:$12 sps:$4 sm:$0x1f]  }
 0x232   : > { %14957 = vmatpush3.bf16.msra.mxu1 %v15870_v30  ;;  %v14922_v45 = vpop.f32.mrf.mxu0  ;;  %5301 = vmatprep.subr.bf16.mxu0 %v16708_v46  ;;  %v16739_v30 = vld [vmem:[%s23162_s1 + $0x330] ss:$12 sps:$4 sm:$0xff]   ;;  %v16746_v42 = vld [vmem:[%s23162_s1 + $0x320] ss:$12 sps:$4 sm:$0xff]  }
 0x233   : > { %14958 = vmatprep.subr.bf16.mxu1 %v17291_v63  ;;  %v19185_v11 = vadd.f32 %v3400_v24, %v18962_v0  ;;  %v16745_v24 = vld [vmem:[%s23162_s1 + $0x304] ss:$12 sps:$4 sm:$0xff]   ;;  %v16747_v45 = vld [vmem:[%s23162_s1 + $0x300] ss:$12 sps:$4 sm:$0xff]  }
 0x234   : > { %v3402_v51 = vpop.f32.mrf.mxu0  ;;  %v16748_v46 = vld [vmem:[%s23162_s1 + $0x260] ss:$12 sps:$4 sm:$0xff]  }
 0x235   : > { %v3403_v43 = vadd.f32 %v14409_v49, %v3402_v51  ;;  %5302 = vmatpush1.bf16.msra.mxu0 %v16709_v54  ;;  %v16750_v51 = vld [vmem:[%s23162_s1 + $0x308] ss:$12 sps:$4 sm:$0xff]  }
 0x236   : > { %14959 = vmatpush3.bf16.msra.mxu1 %v15871_v39  ;;  %5303 = vmatprep.subr.bf16.mxu0 %v16710_v19  ;;  %v14923_v0 = vpop.f32.mrf.mxu0  ;;  %v16742_v39 = vld [vmem:[%s23162_s1 + $0x338] ss:$12 sps:$4 sm:$0xff]   ;;  %v16751_v19 = vld [vmem:[%s23162_s1 + $0x2e8] ss:$12 sps:$4 sm:$0xff]  }
 0x237   : > { %14960 = vmatprep.subr.bf16.mxu1 %v17291_v63  ;;  %v19198_v55 = vadd.f32 %v3403_v43, %v18978_v9  ;;  %v16714_v9 = vld [vmem:[%s23162_s1 + $0x240] ss:$12 sps:$4 sm:$0xff]   ;;  %v16752_v0 = vld [vmem:[%s23162_s1 + $0x248] ss:$12 sps:$4 sm:$0xff]  }
 0x239   : > { %5304 = vmatpush1.bf16.msra.mxu0 %v16711_v56 }
 0x23a   : > { %14961 = vmatpush3.bf16.msra.mxu1 %v15872_v53  ;;  %5305 = vmatprep.subr.bf16.mxu0 %v16712_v57  ;;  %v16749_v53 = vld [vmem:[%s23162_s1 + $0x2ec] ss:$12 sps:$4 sm:$0xff]  }
 0x23b   : > { %5346 = vmatprep.subr.bf16.mxu1 %v16713_v60  ;;  %v16753_v60 = vld [vmem:[%s23162_s1 + $0x2d4] ss:$12 sps:$4 sm:$0xff]  }
 0x23d   : > { %14963 = vmatmul.mubr.msk.bf16.vlgmr.msra.gmra.mxu1 %vm864_vm0, %v19044_v4  ;;  %5306 = vmatpush1.bf16.msra.mxu0 %v16714_v9  ;;  %v16718_v4 = vld [vmem:[%s23162_s1 + $0x228] ss:$12 sps:$4 sm:$0xff]   ;;  %v16754_v9 = vld [vmem:[%s23162_s1 + $0x2f0] ss:$12 sps:$4 sm:$0xff]  }
 0x23e   : > { %5347 = vmatpush1.bf16.msra.mxu1 %v16715_v1  ;;  %5307 = vmatprep.subr.bf16.mxu0 %v16716_v5 }
 0x23f   : > { %5348 = vmatprep.subr.bf16.mxu1 %v16717_v62  ;;  %5372 = vmatprep.mubr.bf16.mxu1 %v17290_v2 }
 0x241   : > { %5308 = vmatpush1.bf16.msra.mxu0 %v16718_v4 }
 0x242   : > { %5349 = vmatpush1.bf16.msra.mxu1 %v16719_v6  ;;  %5309 = vmatprep.subr.bf16.mxu0 %v16720_v7 }
 0x243   : > { %5350 = vmatprep.subr.bf16.mxu1 %v16721_v8  ;;  %v16755_v8 = vld [vmem:[%s23162_s1 + $0x2d0] ss:$12 sps:$4 sm:$0xff]  }
 0x244   : > { %v3933_v41 = vpop.f32.mrf.mxu0 }
 0x245   : > { %5310 = vmatpush1.bf16.msra.mxu0 %v16722_v13  ;;  %v16756_v13 = vld [vmem:[%s23162_s1 + $0x230] ss:$12 sps:$4 sm:$0xff]  }
 0x246   : > { %5351 = vmatpush1.bf16.msra.mxu1 %v16723_v10  ;;  %5311 = vmatprep.subr.bf16.mxu0 %v16724_v61  ;;  %v3935_v50 = vpop.f32.mrf.mxu0 }
 0x247   : > { %5352 = vmatprep.subr.bf16.mxu1 %v16725_v58 }
 0x248   : > { %v3937_v49 = vpop.f32.mrf.mxu0 }
 0x249   : > { %5312 = vmatpush1.bf16.msra.mxu0 %v16726_v14  ;;  %v16759_v14 = vld [vmem:[%s23162_s1 + $0x2b8] ss:$12 sps:$4 sm:$0xff]  }
 0x24a   : > { %5353 = vmatpush1.bf16.msra.mxu1 %v16727_v15  ;;  %5313 = vmatprep.subr.bf16.mxu0 %v16728_v16  ;;  %v19332_v56 = vpop.f32.mrf.mxu0  ;;  %v16760_v15 = vld [vmem:[%s23162_s1 + $0x218] ss:$12 sps:$4 sm:$0xff]   ;;  %v16761_v16 = vld [vmem:[%s23162_s1 + $0x2c0] ss:$12 sps:$4 sm:$0xff]  }
 0x24b   : > { %5354 = vmatprep.subr.bf16.mxu1 %v16729_v18  ;;  %v16763_v18 = vld [vmem:[%s23162_s1 + $0x200] ss:$12 sps:$4 sm:$0xff]  }
 0x24d   : > { %5314 = vmatpush2.bf16.msra.mxu0 %v16730_v48  ;;  %v16764_v48 = vld [vmem:[%s23162_s1 + $0x3e0] ss:$12 sps:$4 sm:$0xff]  }
 0x24e   : > { %5355 = vmatpush1.bf16.msra.mxu1 %v16731_v21  ;;  %5315 = vmatprep.subr.bf16.mxu0 %v16732_v44  ;;  %v16765_v21 = vld [vmem:[%s23162_s1 + $0xac] ss:$12 sps:$4 sm:$0xff]  }
 0x24f   : > { %14500 = vmatprep.subr.bf16.mxu1 %v16733_v20  ;;  %v16766_v20 = vld [vmem:[%s23162_s1 + $0x3c8] ss:$12 sps:$4 sm:$0xff]  }
 0x251   : > { %13402 = vmatmul.mubr.msk.bf16.vlgmr.msra.gmra.mxu1 %vm864_vm0, %v19273_v26  ;;  %5316 = vmatpush2.bf16.msra.mxu0 %v16735_v37  ;;  %v16767_v37 = vld [vmem:[%s23162_s1 + $0xa8] ss:$12 sps:$4 sm:$0xff]  }
 0x252   : > { %14501 = vmatpush3.bf16.msra.mxu1 %v16736_v32  ;;  %5317 = vmatprep.subr.bf16.mxu0 %v16737_v27  ;;  %v16768_v27 = vld [vmem:[%s23162_s1 + $0x94] ss:$12 sps:$4 sm:$0xff]  }
 0x253   : > { %14502 = vmatprep.subr.bf16.mxu1 %v16738_v34  ;;  %5415 = vmatprep.mubr.bf16.mxu1 %v19174_v47  ;;  %v16743_v47 = vld [vmem:[%s23162_s1 + $0x318] ss:$12 sps:$4 sm:$0xff]  }
 0x254   : > { %v19397_v34 = vld [vmem:[%s17452_s26 + $0x64] ss:$12 sps:$4 sm:$0x1f]  }
 0x255   : > { %5318 = vmatpush2.bf16.msra.mxu0 %v16739_v30 }
 0x256   : > { %14503 = vmatpush3.bf16.msra.mxu1 %v16740_v31  ;;  %5319 = vmatprep.subr.bf16.mxu0 %v16741_v35  ;;  %v16770_v35 = vld [vmem:[%s23162_s1 + $0x3b0] ss:$12 sps:$4 sm:$0xff]  }
 0x257   : > { %14504 = vmatprep.subr.bf16.mxu1 %v16742_v39  ;;  %v16771_v39 = vld [vmem:[%s23162_s1 + $0x90] ss:$12 sps:$4 sm:$0xff]  }
 0x259   : > { %5320 = vmatpush2.bf16.msra.mxu0 %v16743_v47 }
 0x25a   : > { %14505 = vmatpush3.bf16.msra.mxu1 %v16744_v40  ;;  %5321 = vmatprep.subr.bf16.mxu0 %v16745_v24  ;;  %v16772_v40 = vld [vmem:[%s23162_s1 + $0x7c] ss:$12 sps:$4 sm:$0xff]  }
 0x25b   : > { %14506 = vmatprep.subr.bf16.mxu1 %v16746_v42 }
 0x25d   : > { %5322 = vmatpush2.bf16.msra.mxu0 %v16747_v45 }
 0x25e   : > { %14507 = vmatpush3.bf16.msra.mxu1 %v16748_v46  ;;  %5323 = vmatprep.subr.bf16.mxu0 %v16749_v53  ;;  %v16773_v46 = vld [vmem:[%s23162_s1 + $0x398] ss:$12 sps:$4 sm:$0xff]  }
 0x25f   : > { %14508 = vmatprep.subr.bf16.mxu1 %v16750_v51 }
 0x261   : > { %v3890_v43 = vpop.f32.mrf.mxu1  ;;  %5324 = vmatpush2.bf16.msra.mxu0 %v16751_v19  ;;  %v16778_v19 = vld [vmem:[%s23162_s1 + $0x4c] ss:$12 sps:$4 sm:$0xff]  }
 0x262   : > { %v3934_v54 = vadd.f32 %v3933_v41, %v3890_v43  ;;  %14509 = vmatpush3.bf16.msra.mxu1 %v16752_v0  ;;  %5325 = vmatprep.subr.bf16.mxu0 %v16753_v60  ;;  %v16776_v43 = vld [vmem:[%s23162_s1 + $0x380] ss:$12 sps:$4 sm:$0xff]   ;;  %v16780_v0 = vld [vmem:[%s23162_s1 + $0x48] ss:$12 sps:$4 sm:$0xff]  }
 0x263   : > { %v3892_v57 = vpop.f32.mrf.mxu1  ;;  %14510 = vmatprep.subr.bf16.mxu1 %v16754_v9  ;;  %v16782_v60 = vld [vmem:[%s23162_s1 + $0x34] ss:$12 sps:$4 sm:$0xff]   ;;  %v16783_v9 = vld [vmem:[%s23162_s1 + $0x1cc] ss:$12 sps:$4 sm:$0xff]  }
 0x264   : > { %v19341_v1 = vadd.f32 %v3934_v54, %v19124_v12  ;;  %v3936_v5 = vadd.f32 %v3935_v50, %v3892_v57  ;;  %v14432_v4 = vpop.f32.mrf.mxu0  ;;  %v16757_v12 = vld [vmem:[%s23162_s1 + $0x2bc] ss:$12 sps:$4 sm:$0xff]   ;;  %v16777_v54 = vld [vmem:[%s23162_s1 + $0x60] ss:$12 sps:$4 sm:$0xff]  }
 0x265   : > { %v3894_v62 = vpop.f32.mrf.mxu1  ;;  %5326 = vmatpush2.bf16.msra.mxu0 %v16755_v8  ;;  %v16781_v57 = vld [vmem:[%s23162_s1 + $0x1e0] ss:$12 sps:$4 sm:$0xff]   ;;  %v16789_v8 = vld [vmem:[%s23162_s1 + $0x1b0] ss:$12 sps:$4 sm:$0xff]  }
 0x266   : > { %v19344_v6 = vadd.f32 %v3936_v5, %v19136_v25  ;;  %v3938_v7 = vadd.f32 %v3937_v49, %v3894_v62  ;;  %14511 = vmatpush3.bf16.msra.mxu1 %v16756_v13  ;;  %5327 = vmatprep.subr.bf16.mxu0 %v16757_v12  ;;  %v16758_v25 = vld [vmem:[%s23162_s1 + $0x2d8] ss:$12 sps:$4 sm:$0xff]   ;;  %v14433_v10 = vpop.f32.mrf.mxu0  ;;  %v16785_v5 = vld [vmem:[%s23162_s1 + $0x1c8] ss:$12 sps:$4 sm:$0xff]  }
 0x267   : > { %14512 = vmatprep.subr.bf16.mxu1 %v16758_v25  ;;  %v14434_v58 = vadd.f32 %v14433_v10, %v14432_v4  ;;  %v19390_v32 = vpop.f32.mrf.mxu1  ;;  %v16774_v49 = vld [vmem:[%s23162_s1 + $0x78] ss:$12 sps:$4 sm:$0xff]   ;;  %v16786_v62 = vld [vmem:[%s23162_s1 + $0x1c] ss:$12 sps:$4 sm:$0xff]   ;;  %v16787_v4 = vld [vmem:[%s23162_s1 + $0x1b4] ss:$12 sps:$4 sm:$0xff]  }
 0x268   : > { %v19359_v61 = vadd.f32 %v3938_v7, %v19140_v22  ;;  %v16762_v22 = vld [vmem:[%s17452_s26 + $0x78] ss:$12 sps:$4 sm:$0x1f]   ;;  %v14435_v44 = vpop.f32.mrf.mxu0  ;;  %v16791_v12 = vld [vmem:[%s23162_s1 + $0x19c] ss:$12 sps:$4 sm:$0xff]  }
 0x269   : > { %5328 = vmatpush2.bf16.msra.mxu0 %v16759_v14  ;;  %v16788_v7 = vld [vmem:[%s23162_s1 + $0x18] ss:$12 sps:$4 sm:$0xff]   ;;  %v16792_v25 = vld [vmem:[%s23162_s1] ss:$12 sps:$4 sm:$0xff]  }
 0x26a   : > { %14513 = vmatpush3.bf16.msra.mxu1 %v16760_v15  ;;  %14966 = vmatprep.subr.bf16.mxu0 %v17291_v63  ;;  %v14436_v30 = vpop.f32.mrf.mxu0  ;;  %v16790_v13 = vld [vmem:[%s23162_s1 + $0x4] ss:$12 sps:$4 sm:$0xff]   ;;  %v16796_v15 = vld [vmem:[%s23162_s1 + $0x168] ss:$12 sps:$4 sm:$0xff]  }
 0x26b   : > { %14514 = vmatprep.subr.bf16.mxu1 %v16761_v16  ;;  %v14437_v50 = vadd.f32 %v14436_v30, %v14435_v44  ;;  %v16793_v10 = vld [vmem:[%s23162_s1 + $0x198] ss:$12 sps:$4 sm:$0xff]   ;;  %v16797_v16 = vld [vmem:[%s23162_s1 + $0x180] ss:$12 sps:$4 sm:$0xff]   ;;  %v16802_v44 = vld [vmem:[%s23162_s1 + $0xb0] ss:$12 sps:$4 sm:$0xff]  }
 0x26c   : > { %5330 = vmatmul.mubr.bf16.vlgmr.msra.gmra.mxu0 %v16762_v22  ;;  %v16795_v14 = vld [vmem:[%s23162_s1 + $0x184] ss:$12 sps:$4 sm:$0xff]  }
 0x26d   : > { %14967 = vmatpush3.bf16.msra.mxu0 %v16764_v48  ;;  %14976 = vmatprep.mubr.msk.bf16.mxu0 %vm17292_vm1, %v17291_v63  ;;  %v19502_v48 = vld [vmem:[%s17452_s26 + $0x68] ss:$12 sps:$4 sm:$0x1f]   ;;  %v16806_v30 = vld [vmem:[%s23162_s1 + $0x98] ss:$12 sps:$4 sm:$0xff]  }
 0x26e   : > { %14515 = vmatpush3.bf16.msra.mxu1 %v16763_v18  ;;  %14968 = vmatprep.subr.bf16.mxu0 %v17291_v63  ;;  %v16799_v18 = vld [vmem:[%s23162_s1 + $0x170] ss:$12 sps:$4 sm:$0xff]  }
 0x26f   : > { %5465 = vmatprep.subr.bf16.mxu1 %v16765_v21  ;;  %v16801_v21 = vld [vmem:[%s23162_s1 + $0x150] ss:$12 sps:$4 sm:$0xff]  }
 0x271   : > { %5416 = vmatmul.mubr.bf16.vlgmr.msra.gmra.mxu1 %v16762_v22  ;;  %14969 = vmatpush3.bf16.msra.mxu0 %v16766_v20  ;;  %v16798_v22 = vld [vmem:[%s23162_s1 + $0x154] ss:$12 sps:$4 sm:$0xff]   ;;  %v16803_v20 = vld [vmem:[%s23162_s1 + $0x13c] ss:$12 sps:$4 sm:$0xff]  }
 0x272   : > { %5466 = vmatpush1.bf16.msra.mxu1 %v16767_v37  ;;  %14970 = vmatprep.subr.bf16.mxu0 %v17291_v63  ;;  %v16804_v37 = vld [vmem:[%s23162_s1 + $0x158] ss:$12 sps:$4 sm:$0xff]  }
 0x273   : > { %5467 = vmatprep.subr.bf16.mxu1 %v16768_v27  ;;  %5497 = vmatprep.mubr.bf16.mxu1 %v19397_v34  ;;  %v16805_v27 = vld [vmem:[%s23162_s1 + $0x138] ss:$12 sps:$4 sm:$0xff]  }
 0x275   : > { %v4017_v31 = vpop.f32.mrf.mxu1  ;;  %14971 = vmatpush3.bf16.msra.mxu0 %v16770_v35  ;;  %v16809_v35 = vld [vmem:[%s23162_s1 + $0x120] ss:$12 sps:$4 sm:$0xff]  }
 0x276   : > { %v4018_v41 = vadd.f32 %v14434_v58, %v4017_v31  ;;  %5468 = vmatpush1.bf16.msra.mxu1 %v16771_v39  ;;  %14972 = vmatprep.subr.bf16.mxu0 %v17291_v63  ;;  %v16794_v58 = vld [vmem:[%s23162_s1 + $0x16c] ss:$12 sps:$4 sm:$0xff]  }
 0x277   : > { %v14936_v47 = vpop.f32.mrf.mxu1  ;;  %5469 = vmatprep.subr.bf16.mxu1 %v16772_v40  ;;  %v16810_v39 = vld [vmem:[%s23162_s1 + $0x80] ss:$12 sps:$4 sm:$0xff]  }
 0x278   : > { %v19411_v24 = vadd.f32 %v4018_v41, %v19185_v11  ;;  %v16775_v11 = vld [vmem:[%s23162_s1 + $0x64] ss:$12 sps:$4 sm:$0xff]   ;;  %v16811_v40 = vld [vmem:[%s23162_s1 + $0x10c] ss:$12 sps:$4 sm:$0xff]  }
 0x279   : > { %v4020_v42 = vpop.f32.mrf.mxu1  ;;  %14973 = vmatpush3.bf16.msra.mxu0 %v16773_v46  ;;  %v16807_v41 = vld [vmem:[%s23162_s1 + $0x124] ss:$12 sps:$4 sm:$0xff]  }
 0x27a   : > { %v4021_v45 = vadd.f32 %v14437_v50, %v4020_v42  ;;  %5470 = vmatpush1.bf16.msra.mxu1 %v16774_v49  ;;  %14974 = vmatprep.subr.bf16.mxu0 %v17291_v63  ;;  %v16812_v50 = vld [vmem:[%s23162_s1 + $0x128] ss:$12 sps:$4 sm:$0xff]  }
 0x27b   : > { %v14937_v53 = vpop.f32.mrf.mxu1  ;;  %5471 = vmatprep.subr.bf16.mxu1 %v16775_v11  ;;  %v16813_v42 = vld [vmem:[%s23162_s1 + $0x108] ss:$12 sps:$4 sm:$0xff]  }
 0x27c   : > { %v19424_v51 = vadd.f32 %v4021_v45, %v19198_v55  ;;  %v16779_v55 = vld [vmem:[%s23162_s1 + $0x1e4] ss:$12 sps:$4 sm:$0xff]   ;;  %v16814_v45 = vld [vmem:[%s23162_s1 + $0x68] ss:$12 sps:$4 sm:$0xff]  }
 0x27d   : > { %14975 = vmatpush3.bf16.msra.mxu0 %v16776_v43  ;;  %v16815_v49 = vld [vmem:[%s23162_s1 + $0xf4] ss:$12 sps:$4 sm:$0xff]   ;;  %v16816_v53 = vld [vmem:[%s23162_s1 + $0x110] ss:$12 sps:$4 sm:$0xff]  }
 0x27e   : > { %5472 = vmatpush1.bf16.msra.mxu1 %v16777_v54  ;;  %5514 = vmatprep.subr.bf16.mxu0 %v16779_v55  ;;  %v16817_v54 = vld [vmem:[%s23162_s1 + $0xf0] ss:$12 sps:$4 sm:$0xff]  }
 0x27f   : > { %5473 = vmatprep.subr.bf16.mxu1 %v16778_v19  ;;  %v16818_v19 = vld [vmem:[%s23162_s1 + $0x50] ss:$12 sps:$4 sm:$0xff]  }
 0x280   : > { %14977 = vmatmul.mubr.msk.bf16.vlgmr.msra.gmra.mxu0 %vm864_vm0, %v19273_v26  ;;  %v16784_v26 = vld [vmem:[%s23162_s1 + $0x30] ss:$12 sps:$4 sm:$0xff]  }
 0x281   : > { %5515 = vmatpush1.bf16.msra.mxu0 %v16781_v57  ;;  %5540 = vmatprep.mubr.bf16.mxu0 %v17290_v2  ;;  %v16819_v57 = vld [vmem:[%s23162_s1 + $0xdc] ss:$12 sps:$4 sm:$0xff]  }
 0x282   : > { %5474 = vmatpush1.bf16.msra.mxu1 %v16780_v0  ;;  %5516 = vmatprep.subr.bf16.mxu0 %v16783_v9 }
 0x283   : > { %5475 = vmatprep.subr.bf16.mxu1 %v16782_v60  ;;  %v16820_v60 = vld [vmem:[%s23162_s1 + $0xf8] ss:$12 sps:$4 sm:$0xff]  }
 0x285   : > { %5517 = vmatpush1.bf16.msra.mxu0 %v16785_v5 }
 0x286   : > { %5476 = vmatpush1.bf16.msra.mxu1 %v16784_v26  ;;  %5518 = vmatprep.subr.bf16.mxu0 %v16787_v4 }
 0x287   : > { %5477 = vmatprep.subr.bf16.mxu1 %v16786_v62 }
 0x289   : > { %5519 = vmatpush1.bf16.msra.mxu0 %v16789_v8  ;;  %v4551_v31 = vpop.f32.mrf.mxu1  ;;  %v16821_v8 = vld [vmem:[%s23162_s1 + $0xd8] ss:$12 sps:$4 sm:$0xff]  }
 0x28a   : > { %5478 = vmatpush1.bf16.msra.mxu1 %v16788_v7  ;;  %5520 = vmatprep.subr.bf16.mxu0 %v16791_v12  ;;  %v16823_v12 = vld [vmem:[%s23162_s1 + $0xc4] ss:$12 sps:$4 sm:$0xff]  }
 0x28b   : > { %5479 = vmatprep.subr.bf16.mxu1 %v16790_v13  ;;  %v4553_v47 = vpop.f32.mrf.mxu1  ;;  %v16822_v13 = vld [vmem:[%s23162_s1 + $0x38] ss:$12 sps:$4 sm:$0xff]  }
 0x28d   : > { %5521 = vmatpush1.bf16.msra.mxu0 %v16793_v10  ;;  %v4555_v46 = vpop.f32.mrf.mxu1 }
 0x28e   : > { %5480 = vmatpush1.bf16.msra.mxu1 %v16792_v25  ;;  %5522 = vmatprep.subr.bf16.mxu0 %v16795_v14  ;;  %v16826_v14 = vld [vmem:[%s23162_s1 + $0x20] ss:$12 sps:$4 sm:$0xff]  }
 0x28f   : > { %5481 = vmatprep.subr.bf16.mxu1 %v16794_v58  ;;  %v19561_v55 = vpop.f32.mrf.mxu1  ;;  %v16825_v58 = vld [vmem:[%s23162_s1 + $0xc0] ss:$12 sps:$4 sm:$0xff]  }
 0x291   : > { %5523 = vmatpush1.bf16.msra.mxu0 %v16797_v16  ;;  %v16829_v16 = vld [vmem:[%s23162_s1 + $0x8] ss:$12 sps:$4 sm:$0xff]  }
 0x292   : > { %5482 = vmatpush2.bf16.msra.mxu1 %v16796_v15  ;;  %14528 = vmatprep.subr.bf16.mxu0 %v16799_v18  ;;  %v16827_v15 = vld [vmem:[%s23162_s1 + $0xc8] ss:$12 sps:$4 sm:$0xff]  }
 0x293   : > { %5483 = vmatprep.subr.bf16.mxu1 %v16798_v22  ;;  %v16830_v22 = vld [vmem:[%s23162_s1 + $0x1e8] ss:$12 sps:$4 sm:$0xff]  }
 0x294   : > { %13404 = vmatmul.mubr.msk.bf16.vlgmr.msra.gmra.mxu0 %vm864_vm0, %v19502_v48  ;;  %v16831_v18 = vld [vmem:[%s23162_s1 + $0x49c] ss:$12 sps:$4 sm:$0xff]  }
 0x295   : > { %14529 = vmatpush3.bf16.msra.mxu0 %v16802_v44  ;;  %5583 = vmatprep.mubr.bf16.mxu0 %v19397_v34  ;;  %v16808_v34 = vld [vmem:[%s23162_s1 + $0x140] ss:$12 sps:$4 sm:$0xff]   ;;  %v16832_v44 = vld [vmem:[%s23162_s1 + $0x1d0] ss:$12 sps:$4 sm:$0xff]  }
 0x296   : > { %5484 = vmatpush2.bf16.msra.mxu1 %v16801_v21  ;;  %14530 = vmatprep.subr.bf16.mxu0 %v16804_v37 }
 0x297   : > { %5485 = vmatprep.subr.bf16.mxu1 %v16803_v20  ;;  %v16833_v20 = vld [vmem:[%s23162_s1 + $0x498] ss:$12 sps:$4 sm:$0xff]  }
 0x299   : > { %14531 = vmatpush3.bf16.msra.mxu0 %v16806_v30  ;;  %v19626_v30 = vld [vmem:[%s17452_s26 + $0x94] ss:$12 sps:$4 sm:$0x1f]  }
 0x29a   : > { %5486 = vmatpush2.bf16.msra.mxu1 %v16805_v27  ;;  %14532 = vmatprep.subr.bf16.mxu0 %v16808_v34  ;;  %v16834_v27 = vld [vmem:[%s23162_s1 + $0x484] ss:$12 sps:$4 sm:$0xff]  }
 0x29b   : > { %5487 = vmatprep.subr.bf16.mxu1 %v16807_v41 }
 0x29d   : > { %14533 = vmatpush3.bf16.msra.mxu0 %v16810_v39  ;;  %v16837_v39 = vld [vmem:[%s23162_s1 + $0x480] ss:$12 sps:$4 sm:$0xff]  }
 0x29e   : > { %5488 = vmatpush2.bf16.msra.mxu1 %v16809_v35  ;;  %14534 = vmatprep.subr.bf16.mxu0 %v16812_v50  ;;  %v16836_v35 = vld [vmem:[%s23162_s1 + $0x1b8] ss:$12 sps:$4 sm:$0xff]  }
 0x29f   : > { %5489 = vmatprep.subr.bf16.mxu1 %v16811_v40  ;;  %v16838_v40 = vld [vmem:[%s23162_s1 + $0x46c] ss:$12 sps:$4 sm:$0xff]  }
 0x2a1   : > { %14535 = vmatpush3.bf16.msra.mxu0 %v16814_v45 }
 0x2a2   : > { %5490 = vmatpush2.bf16.msra.mxu1 %v16813_v42  ;;  %14536 = vmatprep.subr.bf16.mxu0 %v16816_v53  ;;  %v16840_v53 = vld [vmem:[%s23162_s1 + $0x468] ss:$12 sps:$4 sm:$0xff]  }
 0x2a3   : > { %5491 = vmatprep.subr.bf16.mxu1 %v16815_v49  ;;  %v16839_v49 = vld [vmem:[%s23162_s1 + $0x1a0] ss:$12 sps:$4 sm:$0xff]  }
 0x2a4   : > { %v4508_v11 = vpop.f32.mrf.mxu0 }
 0x2a5   : > { %v4552_v43 = vadd.f32 %v4551_v31, %v4508_v11  ;;  %14537 = vmatpush3.bf16.msra.mxu0 %v16818_v19  ;;  %v16841_v11 = vld [vmem:[%s23162_s1 + $0x454] ss:$12 sps:$4 sm:$0xff]   ;;  %v16843_v19 = vld [vmem:[%s23162_s1 + $0x450] ss:$12 sps:$4 sm:$0xff]  }
 0x2a6   : > { %5492 = vmatpush2.bf16.msra.mxu1 %v16817_v54  ;;  %v4510_v0 = vpop.f32.mrf.mxu0  ;;  %14538 = vmatprep.subr.bf16.mxu0 %v16820_v60  ;;  %v16842_v54 = vld [vmem:[%s23162_s1 + $0x188] ss:$12 sps:$4 sm:$0xff]   ;;  %v16847_v60 = vld [vmem:[%s23162_s1 + $0x5d0] ss:$12 sps:$4 sm:$0xff]  }
 0x2a7   : > { %5493 = vmatprep.subr.bf16.mxu1 %v16819_v57  ;;  %v19570_v9 = vadd.f32 %v4552_v43, %v19341_v1  ;;  %v4554_v26 = vadd.f32 %v4553_v47, %v4510_v0  ;;  %v16844_v0 = vld [vmem:[%s23162_s1 + $0x43c] ss:$12 sps:$4 sm:$0xff]   ;;  %v16846_v57 = vld [vmem:[%s23162_s1 + $0x438] ss:$12 sps:$4 sm:$0xff]  }
 0x2a8   : > { %v4512_v5 = vpop.f32.mrf.mxu0 }
 0x2a9   : > { %v14460_v62 = vpop.f32.mrf.mxu1  ;;  %v19573_v4 = vadd.f32 %v4554_v26, %v19344_v6  ;;  %v4556_v7 = vadd.f32 %v4555_v46, %v4512_v5  ;;  %14539 = vmatpush3.bf16.msra.mxu0 %v16822_v13  ;;  %v16824_v6 = vld [vmem:[%s23162_s1 + $0xe0] ss:$12 sps:$4 sm:$0xff]   ;;  %v16848_v26 = vld [vmem:[%s23162_s1 + $0x424] ss:$12 sps:$4 sm:$0xff]   ;;  %v16849_v5 = vld [vmem:[%s23162_s1 + $0x5bc] ss:$12 sps:$4 sm:$0xff]  }
 0x2aa   : > { %5494 = vmatpush2.bf16.msra.mxu1 %v16821_v8  ;;  %14540 = vmatprep.subr.bf16.mxu0 %v16824_v6  ;;  %v19619_v37 = vpop.f32.mrf.mxu0  ;;  %v16853_v8 = vld [vmem:[%s23162_s1 + $0x5a4] ss:$12 sps:$4 sm:$0xff]   ;;  %v16854_v13 = vld [vmem:[%s23162_s1 + $0x408] ss:$12 sps:$4 sm:$0xff]   ;;  %v16857_v6 = vld [vmem:[%s23162_s1 + $0x58c] ss:$12 sps:$4 sm:$0xff]  }
 0x2ab   : > { %v14461_v1 = vpop.f32.mrf.mxu1  ;;  %5495 = vmatprep.subr.bf16.mxu1 %v16823_v12  ;;  %v19588_v25 = vadd.f32 %v4556_v7, %v19359_v61  ;;  %v16828_v61 = vld [vmem:[%s17452_s26 + $0x60] ss:$12 sps:$4 sm:$0x1f]  }
 0x2ac   : > { %v14462_v10 = vadd.f32 %v14461_v1, %v14460_v62  ;;  %v16851_v62 = vld [vmem:[%s23162_s1 + $0x5b8] ss:$12 sps:$4 sm:$0xff]   ;;  %v16855_v1 = vld [vmem:[%s23162_s1 + $0x5a0] ss:$12 sps:$4 sm:$0xff]  }
 0x2ad   : > { %14541 = vmatpush3.bf16.msra.mxu0 %v16826_v14  ;;  %v14463_v21 = vpop.f32.mrf.mxu1  ;;  %v16852_v7 = vld [vmem:[%s23162_s1 + $0x40c] ss:$12 sps:$4 sm:$0xff]   ;;  %v16856_v12 = vld [vmem:[%s23162_s1 + $0x3f4] ss:$12 sps:$4 sm:$0xff]   ;;  %v16860_v14 = vld [vmem:[%s23162_s1 + $0x55c] ss:$12 sps:$4 sm:$0xff]  }
 0x2ae   : > { %5496 = vmatpush2.bf16.msra.mxu1 %v16825_v58  ;;  %14542 = vmatprep.subr.bf16.mxu0 %v16827_v15  ;;  %v16859_v58 = vld [vmem:[%s23162_s1 + $0x588] ss:$12 sps:$4 sm:$0xff]  }
 0x2af   : > { %14980 = vmatprep.subr.bf16.mxu1 %v17291_v63  ;;  %v14464_v31 = vpop.f32.mrf.mxu1  ;;  %v16861_v15 = vld [vmem:[%s23162_s1 + $0x574] ss:$12 sps:$4 sm:$0xff]  }
 0x2b0   : > { %v14465_v50 = vadd.f32 %v14464_v31, %v14463_v21  ;;  %v19731_v21 = vld [vmem:[%s17452_s26 + $0x98] ss:$12 sps:$4 sm:$0x1f]   ;;  %v16870_v31 = vld [vmem:[%s23162_s1 + $0x548] ss:$12 sps:$4 sm:$0xff]  }
 0x2b1   : > { %5498 = vmatmul.mubr.bf16.vlgmr.msra.gmra.mxu1 %v16828_v61  ;;  %14543 = vmatpush3.bf16.msra.mxu0 %v16829_v16  ;;  %v16863_v16 = vld [vmem:[%s23162_s1 + $0x570] ss:$12 sps:$4 sm:$0xff]  }
 0x2b2   : > { %14981 = vmatpush3.bf16.msra.mxu1 %v16830_v22  ;;  %5633 = vmatprep.subr.bf16.mxu0 %v16831_v18  ;;  %v16864_v22 = vld [vmem:[%s23162_s1 + $0x544] ss:$12 sps:$4 sm:$0xff]   ;;  %v16865_v18 = vld [vmem:[%s23162_s1 + $0x560] ss:$12 sps:$4 sm:$0xff]  }
 0x2b3   : > { %14982 = vmatprep.subr.bf16.mxu1 %v17291_v63  ;;  %14990 = vmatprep.mubr.msk.bf16.mxu1 %vm17292_vm1, %v17291_v63 }
 0x2b4   : > { %5584 = vmatmul.mubr.bf16.vlgmr.msra.gmra.mxu0 %v16828_v61  ;;  %v16862_v61 = vld [vmem:[%s23162_s1 + $0x558] ss:$12 sps:$4 sm:$0xff]  }
 0x2b5   : > { %5634 = vmatpush1.bf16.msra.mxu0 %v16833_v20  ;;  %5665 = vmatprep.mubr.bf16.mxu0 %v19626_v30  ;;  %v16868_v20 = vld [vmem:[%s23162_s1 + $0x4a0] ss:$12 sps:$4 sm:$0xff]  }
 0x2b6   : > { %14983 = vmatpush3.bf16.msra.mxu1 %v16832_v44  ;;  %5635 = vmatprep.subr.bf16.mxu0 %v16834_v27  ;;  %v16867_v44 = vld [vmem:[%s23162_s1 + $0x540] ss:$12 sps:$4 sm:$0xff]  }
 0x2b7   : > { %14984 = vmatprep.subr.bf16.mxu1 %v17291_v63  ;;  %v16869_v27 = vld [vmem:[%s23162_s1 + $0x52c] ss:$12 sps:$4 sm:$0xff]  }
 0x2b8   : > { %v4635_v41 = vpop.f32.mrf.mxu0 }
 0x2b9   : > { %v4636_v34 = vadd.f32 %v14462_v10, %v4635_v41  ;;  %5636 = vmatpush1.bf16.msra.mxu0 %v16837_v39  ;;  %v16858_v10 = vld [vmem:[%s23162_s1 + $0x3f0] ss:$12 sps:$4 sm:$0xff]   ;;  %v16871_v41 = vld [vmem:[%s23162_s1 + $0x528] ss:$12 sps:$4 sm:$0xff]  }
 0x2ba   : > { %14985 = vmatpush3.bf16.msra.mxu1 %v16836_v35  ;;  %v14950_v47 = vpop.f32.mrf.mxu0  ;;  %5637 = vmatprep.subr.bf16.mxu0 %v16838_v40  ;;  %v16873_v39 = vld [vmem:[%s23162_s1 + $0x514] ss:$12 sps:$4 sm:$0xff]   ;;  %v16875_v40 = vld [vmem:[%s23162_s1 + $0x510] ss:$12 sps:$4 sm:$0xff]  }
 0x2bb   : > { %14986 = vmatprep.subr.bf16.mxu1 %v17291_v63  ;;  %v19640_v42 = vadd.f32 %v4636_v34, %v19411_v24  ;;  %v16872_v34 = vld [vmem:[%s23162_s1 + $0x488] ss:$12 sps:$4 sm:$0xff]   ;;  %v5267_v47 = vlaneseq }
 0x2bc   : > { %v4638_v45 = vpop.f32.mrf.mxu0 }
 0x2bd   : > { %v4639_v46 = vadd.f32 %v14465_v50, %v4638_v45  ;;  %5638 = vmatpush1.bf16.msra.mxu0 %v16840_v53  ;;  %v16876_v50 = vld [vmem:[%s23162_s1 + $0x470] ss:$12 sps:$4 sm:$0xff]   ;;  %v19772_v53 = vshrl.u32 %v5267_v47, 7  ;;  %v16895_v47 = vld [vmem:[%s23162_s1 + $0x3f8] ss:$12 sps:$4 sm:$0xff]  }
 0x2be   : > { %14987 = vmatpush3.bf16.msra.mxu1 %v16839_v49  ;;  %5639 = vmatprep.subr.bf16.mxu0 %v16841_v11  ;;  %v14951_v24 = vpop.f32.mrf.mxu0  ;;  %v16878_v49 = vld [vmem:[%s23162_s1 + $0x518] ss:$12 sps:$4 sm:$0xff]  }
 0x2bf   : > { %14988 = vmatprep.subr.bf16.mxu1 %v17291_v63  ;;  %v19653_v43 = vadd.f32 %v4639_v46, %v19424_v51  ;;  %v16845_v51 = vld [vmem:[%s23162_s1 + $0x5d4] ss:$12 sps:$4 sm:$0xff]   ;;  %v16877_v46 = vld [vmem:[%s23162_s1 + $0x4fc] ss:$12 sps:$4 sm:$0xff]   ;;  %v16879_v11 = vld [vmem:[%s23162_s1 + $0x4f8] ss:$12 sps:$4 sm:$0xff]  }
 0x2c0   : > { %v16880_v24 = vld [vmem:[%s23162_s1 + $0x458] ss:$12 sps:$4 sm:$0xff]  }
 0x2c1   : > { %5640 = vmatpush1.bf16.msra.mxu0 %v16843_v19  ;;  %v16881_v19 = vld [vmem:[%s23162_s1 + $0x4e4] ss:$12 sps:$4 sm:$0xff]  }
 0x2c2   : > { %14989 = vmatpush3.bf16.msra.mxu1 %v16842_v54  ;;  %5641 = vmatprep.subr.bf16.mxu0 %v16844_v0  ;;  %v16882_v0 = vld [vmem:[%s23162_s1 + $0x500] ss:$12 sps:$4 sm:$0xff]  }
 0x2c3   : > { %5682 = vmatprep.subr.bf16.mxu1 %v16845_v51  ;;  %v19787_v51 = vsub.s32 0, %v19772_v53 }
 0x2c5   : > { %14991 = vmatmul.mubr.msk.bf16.vlgmr.msra.gmra.mxu1 %vm864_vm0, %v19502_v48  ;;  %5642 = vmatpush1.bf16.msra.mxu0 %v16846_v57  ;;  %v16850_v48 = vld [vmem:[%s23162_s1 + $0x420] ss:$12 sps:$4 sm:$0xff]  }
 0x2c6   : > { %5683 = vmatpush1.bf16.msra.mxu1 %v16847_v60  ;;  %5643 = vmatprep.subr.bf16.mxu0 %v16848_v26  ;;  %v19792_v57 = vld [vmem:[%s23163_s2] sm:$0x7] }
 0x2c7   : > { %5684 = vmatprep.subr.bf16.mxu1 %v16849_v5  ;;  %5708 = vmatprep.mubr.bf16.mxu1 %v17290_v2  ;;  %v16883_v5 = vld [vmem:[%s23162_s1 + $0x4e0] ss:$12 sps:$4 sm:$0xff]  }
 0x2c9   : > { %5644 = vmatpush1.bf16.msra.mxu0 %v16850_v48  ;;  %v16884_v48 = vld [vmem:[%s23162_s1 + $0x440] ss:$12 sps:$4 sm:$0xff]  }
 0x2ca   : > { %5685 = vmatpush1.bf16.msra.mxu1 %v16851_v62  ;;  %5645 = vmatprep.subr.bf16.mxu0 %v16852_v7 }
 0x2cb   : > { %5686 = vmatprep.subr.bf16.mxu1 %v16853_v8  ;;  %v16885_v8 = vld [vmem:[%s23162_s1 + $0x4cc] ss:$12 sps:$4 sm:$0xff]  }
 0x2cc   : > { %v5169_v35 = vpop.f32.mrf.mxu0 }
 0x2cd   : > { %5646 = vmatpush1.bf16.msra.mxu0 %v16854_v13  ;;  %v16886_v13 = vld [vmem:[%s23162_s1 + $0x4e8] ss:$12 sps:$4 sm:$0xff]  }
 0x2ce   : > { %5687 = vmatpush1.bf16.msra.mxu1 %v16855_v1  ;;  %5647 = vmatprep.subr.bf16.mxu0 %v16856_v12  ;;  %v5171_v45 = vpop.f32.mrf.mxu0  ;;  %v19811_v12 = vrot.slane %v19792_v57, %v19787_v51 }
 0x2cf   : > { %5688 = vmatprep.subr.bf16.mxu1 %v16857_v6 }
 0x2d0   : > { %v5173_v54 = vpop.f32.mrf.mxu0 }
 0x2d1   : > { %5648 = vmatpush1.bf16.msra.mxu0 %v16858_v10 }
 0x2d2   : > { %5689 = vmatpush1.bf16.msra.mxu1 %v16859_v58  ;;  %5649 = vmatprep.subr.bf16.mxu0 %v16860_v14  ;;  %v19800_v62 = vpop.f32.mrf.mxu0 }
 0x2d3   : > { %5690 = vmatprep.subr.bf16.mxu1 %v16861_v15 }
 0x2d5   : > { %5650 = vmatpush2.bf16.msra.mxu0 %v16862_v61  ;;  %v16887_v61 = vld [vmem:[%s23162_s1 + $0x4c8] ss:$12 sps:$4 sm:$0xff]  }
 0x2d6   : > { %5691 = vmatpush1.bf16.msra.mxu1 %v16863_v16  ;;  %5651 = vmatprep.subr.bf16.mxu0 %v16864_v22  ;;  %v16889_v16 = vld [vmem:[%s23162_s1 + $0x4b4] ss:$12 sps:$4 sm:$0xff]  }
 0x2d7   : > { %14556 = vmatprep.subr.bf16.mxu1 %v16865_v18 }
 0x2d9   : > { %13406 = vmatmul.mubr.msk.bf16.vlgmr.msra.gmra.mxu1 %vm864_vm0, %v19731_v21  ;;  %5652 = vmatpush2.bf16.msra.mxu0 %v16867_v44 }
 0x2da   : > { %14557 = vmatpush3.bf16.msra.mxu1 %v16868_v20  ;;  %5653 = vmatprep.subr.bf16.mxu0 %v16869_v27 }
 0x2db   : > { %14558 = vmatprep.subr.bf16.mxu1 %v16870_v31  ;;  %5751 = vmatprep.mubr.bf16.mxu1 %v19626_v30  ;;  %v16874_v30 = vld [vmem:[%s23162_s1 + $0x530] ss:$12 sps:$4 sm:$0xff]  }
 0x2dc   : > { %v16891_v31 = vld [vmem:[%s23162_s1 + $0x4b0] ss:$12 sps:$4 sm:$0xff]  }
 0x2dd   : > { %5654 = vmatpush2.bf16.msra.mxu0 %v16871_v41  ;;  %v16892_v41 = vld [vmem:[%s23162_s1 + $0x410] ss:$12 sps:$4 sm:$0xff]  }
 0x2de   : > { %14559 = vmatpush3.bf16.msra.mxu1 %v16872_v34  ;;  %5655 = vmatprep.subr.bf16.mxu0 %v16873_v39  ;;  %v16893_v34 = vld [vmem:[%s23162_s1 + $0x4b8] ss:$12 sps:$4 sm:$0xff]   ;;  %v16894_v39 = vld [vmem:[%s17452_s26 + $0x90] ss:$12 sps:$4 sm:$0x1f]  }
 0x2df   : > { %14560 = vmatprep.subr.bf16.mxu1 %v16874_v30 }
 0x2e1   : > { %5656 = vmatpush2.bf16.msra.mxu0 %v16875_v40  ;;  %v16896_v40 = vld [vmem:[%s23162_s1 + $0x5d8] ss:$12 sps:$4 sm:$0xff]  }
 0x2e2   : > { %14561 = vmatpush3.bf16.msra.mxu1 %v16876_v50  ;;  %5657 = vmatprep.subr.bf16.mxu0 %v16877_v46  ;;  %v16897_v50 = vld [vmem:[%s23162_s1 + $0x694] ss:$12 sps:$4 sm:$0xff]  }
 0x2e3   : > { %14562 = vmatprep.subr.bf16.mxu1 %v16878_v49  ;;  %v16898_v46 = vld [vmem:[%s23162_s1 + $0x5c0] ss:$12 sps:$4 sm:$0xff]   ;;  %v16899_v49 = vld [vmem:[%s23162_s1 + $0x690] ss:$12 sps:$4 sm:$0xff]  }
 0x2e5   : > { %5658 = vmatpush2.bf16.msra.mxu0 %v16879_v11 }
 0x2e6   : > { %14563 = vmatpush3.bf16.msra.mxu1 %v16880_v24  ;;  %5659 = vmatprep.subr.bf16.mxu0 %v16881_v19  ;;  %v16900_v24 = vld [vmem:[%s23162_s1 + $0x67c] ss:$12 sps:$4 sm:$0xff]   ;;  %v19870_v19 = vld [vmem:[%s17452_s26 + $0xac] ss:$12 sps:$4 sm:$0x1f]  }
 0x2e7   : > { %14564 = vmatprep.subr.bf16.mxu1 %v16882_v0 }
 0x2e9   : > { %v5126_v60 = vpop.f32.mrf.mxu1  ;;  %5660 = vmatpush2.bf16.msra.mxu0 %v16883_v5  ;;  %v16902_v5 = vld [vmem:[%s23162_s1 + $0x5a8] ss:$12 sps:$4 sm:$0xff]  }
 0x2ea   : > { %v5170_v26 = vadd.f32 %v5169_v35, %v5126_v60  ;;  %14565 = vmatpush3.bf16.msra.mxu1 %v16884_v48  ;;  %5661 = vmatprep.subr.bf16.mxu0 %v16885_v8  ;;  %v16903_v48 = vld [vmem:[%s23162_s1 + $0x678] ss:$12 sps:$4 sm:$0xff]  }
 0x2eb   : > { %v5128_v7 = vpop.f32.mrf.mxu1  ;;  %14566 = vmatprep.subr.bf16.mxu1 %v16886_v13  ;;  %v16904_v8 = vld [vmem:[%s23162_s1 + $0x664] ss:$12 sps:$4 sm:$0xff]  }
 0x2ec   : > { %v5260_v1 = vadd.f32 %v5170_v26, %v19570_v9  ;;  %v5172_v6 = vadd.f32 %v5171_v45, %v5128_v7  ;;  %v14488_v58 = vpop.f32.mrf.mxu0  ;;  %v16888_v9 = vld [vmem:[%s23162_s1 + $0x428] ss:$12 sps:$4 sm:$0xff]  }
 0x2ed   : > { %v5130_v10 = vpop.f32.mrf.mxu1  ;;  %5662 = vmatpush2.bf16.msra.mxu0 %v16887_v61  ;;  %v16906_v61 = vld [vmem:[%s23162_s1 + $0x660] ss:$12 sps:$4 sm:$0xff]  }
 0x2ee   : > { %v19814_v14 = vadd.f32 %v5172_v6, %v19573_v4  ;;  %v5174_v15 = vadd.f32 %v5173_v54, %v5130_v10  ;;  %14567 = vmatpush3.bf16.msra.mxu1 %v16888_v9  ;;  %5663 = vmatprep.subr.bf16.mxu0 %v16889_v16  ;;  %v16890_v4 = vld [vmem:[%s23162_s1 + $0x4d0] ss:$12 sps:$4 sm:$0xff]   ;;  %v5282_v22 = vadd.f32 %v19811_v12, %v5260_v1  ;;  %v14489_v44 = vpop.f32.mrf.mxu0  ;;  %v5277_v54 = vsub.s32 2, %v19772_v53 }
 0x2ef   : > { %14568 = vmatprep.subr.bf16.mxu1 %v16890_v4  ;;  %v14490_v20 = vadd.f32 %v14489_v44, %v14488_v58  ;;  %v19862_v11 = vpop.f32.mrf.mxu1  ;;  %v16910_v44 = vld [vmem:[%s23162_s1 + $0x634] ss:$12 sps:$4 sm:$0xff]  }
 0x2f0   : > { %v5263_v18 = vadd.f32 %v5174_v15, %v19588_v25  ;;  %v5288_v25 = vmax.f32 %v5282_v22, 0.0  ;;  %v14491_v45 = vpop.f32.mrf.mxu0  ;;  %v19887_v6 = vrot.slane %v19792_v57, %v5277_v54  ;;  %v16905_v15 = vld [vmem:[%s23162_s1 + $0x590] ss:$12 sps:$4 sm:$0xff]   ;;  %v16908_v22 = vld [vmem:[%s23162_s1 + $0x578] ss:$12 sps:$4 sm:$0xff]  }
 0x2f1   : > { %5664 = vmatpush2.bf16.msra.mxu0 %v16891_v31 }
 0x2f2   : > { %v5285_v27 = vadd.f32 %v19811_v12, %v5263_v18  ;;  %14569 = vmatpush3.bf16.msra.mxu1 %v16892_v41  ;;  %14994 = vmatprep.subr.bf16.mxu0 %v17291_v63  ;;  %v14492_v0 = vpop.f32.mrf.mxu0  ;;  %v16909_v18 = vld [vmem:[%s23162_s1 + $0x648] ss:$12 sps:$4 sm:$0xff]   ;;  %v16912_v41 = vld [vmem:[%s23162_s1 + $0x630] ss:$12 sps:$4 sm:$0xff]  }
 0x2f3   : > { %14570 = vmatprep.subr.bf16.mxu1 %v16893_v34  ;;  %v14493_v13 = vadd.f32 %v14492_v0, %v14491_v45  ;;  %v16913_v34 = vld [vmem:[%s23162_s1 + $0x7c8] ss:$12 sps:$4 sm:$0xff]   ;;  %v16921_v45 = vld [vmem:[%s23162_s1 + $0x798] ss:$12 sps:$4 sm:$0xff]   ;;  %v16925_v0 = vld [vmem:[%s23162_s1 + $0x780] ss:$12 sps:$4 sm:$0xff]  }
 0x2f4   : > { %v5291_v35 = vmax.f32 %v5285_v27, 0.0  ;;  %5666 = vmatmul.mubr.bf16.vlgmr.msra.gmra.mxu0 %v16894_v39 }
 0x2f5   : > { %14995 = vmatpush3.bf16.msra.mxu0 %v16896_v40  ;;  %15004 = vmatprep.mubr.msk.bf16.mxu0 %vm17292_vm1, %v17291_v63  ;;  %v16919_v40 = vld [vmem:[%s23162_s1 + $0x79c] ss:$12 sps:$4 sm:$0xff]  }
 0x2f6   : > { %v19842_v30 = vpack.c.bf16 %v5291_v35, %v5288_v25  ;;  %14571 = vmatpush3.bf16.msra.mxu1 %v16895_v47  ;;  %14996 = vmatprep.subr.bf16.mxu0 %v17291_v63  ;;  %v16914_v25 = vld [vmem:[%s23162_s1 + $0x61c] ss:$12 sps:$4 sm:$0xff]   ;;  %v16916_v35 = vld [vmem:[%s23162_s1 + $0x618] ss:$12 sps:$4 sm:$0xff]  }
 0x2f7   : > { %5807 = vmatprep.subr.bf16.mxu1 %v16897_v50  ;;  %v16918_v47 = vld [vmem:[%s23162_s1 + $0x604] ss:$12 sps:$4 sm:$0xff]   ;;  %v16920_v50 = vld [vmem:[%s23162_s1 + $0x600] ss:$12 sps:$4 sm:$0xff]  }
 0x2f9   : > { %5752 = vmatmul.mubr.bf16.vlgmr.msra.gmra.mxu1 %v16894_v39  ;;  %14997 = vmatpush3.bf16.msra.mxu0 %v16898_v46  ;;  %v16917_v39 = vld [vmem:[%s23162_s1 + $0x7b0] ss:$12 sps:$4 sm:$0xff]   ;;  %v16922_v46 = vld [vmem:[%s23162_s1 + $0x5ec] ss:$12 sps:$4 sm:$0xff]  }
 0x2fa   : > { %5808 = vmatpush1.bf16.msra.mxu1 %v16899_v49  ;;  %14998 = vmatprep.subr.bf16.mxu0 %v17291_v63  ;;  %v16923_v49 = vld [vmem:[%s23162_s1 + $0x784] ss:$12 sps:$4 sm:$0xff]  }
 0x2fb   : > { %5809 = vmatprep.subr.bf16.mxu1 %v16900_v24  ;;  %5839 = vmatprep.mubr.bf16.mxu1 %v19870_v19  ;;  %v16924_v24 = vld [vmem:[%s23162_s1 + $0x5e8] ss:$12 sps:$4 sm:$0xff]  }
 0x2fd   : > { %v5253_v60 = vpop.f32.mrf.mxu1  ;;  %14999 = vmatpush3.bf16.msra.mxu0 %v16902_v5  ;;  %v16928_v5 = vld [vmem:[%s23162_s1 + $0x750] ss:$12 sps:$4 sm:$0xff]  }
 0x2fe   : > { %v5254_v26 = vadd.f32 %v14490_v20, %v5253_v60  ;;  %5810 = vmatpush1.bf16.msra.mxu1 %v16903_v48  ;;  %15000 = vmatprep.subr.bf16.mxu0 %v17291_v63  ;;  %v16926_v60 = vld [vmem:[%s23162_s1 + $0x754] ss:$12 sps:$4 sm:$0xff]  }
 0x2ff   : > { %v14964_v7 = vpop.f32.mrf.mxu1  ;;  %5811 = vmatprep.subr.bf16.mxu1 %v16904_v8  ;;  %v16929_v48 = vld [vmem:[%s23162_s1 + $0x768] ss:$12 sps:$4 sm:$0xff]   ;;  %v16931_v8 = vld [vmem:[%s23162_s1 + $0x758] ss:$12 sps:$4 sm:$0xff]  }
 0x300   : > { %v5262_v1 = vadd.f32 %v5254_v26, %v19640_v42  ;;  %v16907_v42 = vld [vmem:[%s23162_s1 + $0x64c] ss:$12 sps:$4 sm:$0xff]   ;;  %v16930_v7 = vld [vmem:[%s23162_s1 + $0x73c] ss:$12 sps:$4 sm:$0xff]  }
 0x301   : > { %v5256_v10 = vpop.f32.mrf.mxu1  ;;  %15001 = vmatpush3.bf16.msra.mxu0 %v16905_v15  ;;  %v16927_v26 = vld [vmem:[%s23162_s1 + $0x76c] ss:$12 sps:$4 sm:$0xff]  }
 0x302   : > { %v5257_v58 = vadd.f32 %v14493_v13, %v5256_v10  ;;  %5812 = vmatpush1.bf16.msra.mxu1 %v16906_v61  ;;  %15002 = vmatprep.subr.bf16.mxu0 %v17291_v63  ;;  %v5284_v57 = vadd.f32 %v19887_v6, %v5262_v1  ;;  %v19980_v13 = vld [vmem:[%s17452_s26 + $0xb0] ss:$12 sps:$4 sm:$0x1f]   ;;  %v16933_v1 = vld [vmem:[%s23162_s1 + $0x738] ss:$12 sps:$4 sm:$0xff]  }
 0x303   : > { %v14965_v9 = vpop.f32.mrf.mxu1  ;;  %5813 = vmatprep.subr.bf16.mxu1 %v16907_v42  ;;  %v16934_v10 = vld [vmem:[%s23162_s1 + $0x698] ss:$12 sps:$4 sm:$0xff]   ;;  %v16936_v15 = vld [vmem:[%s23162_s1 + $0x740] ss:$12 sps:$4 sm:$0xff]  }
 0x304   : > { %v5265_v16 = vadd.f32 %v5257_v58, %v19653_v43  ;;  %v16911_v43 = vld [vmem:[%s23162_s1 + $0x7cc] ss:$12 sps:$4 sm:$0xff]   ;;  %v5290_v20 = vmax.f32 %v5284_v57, 0.0  ;;  %v16935_v58 = vld [vmem:[%s23162_s1 + $0x724] ss:$12 sps:$4 sm:$0xff]  }
 0x305   : > { %15003 = vmatpush3.bf16.msra.mxu0 %v16908_v22  ;;  %v16937_v61 = vld [vmem:[%s23162_s1 + $0x720] ss:$12 sps:$4 sm:$0xff]  }
 0x306   : > { %v5287_v4 = vadd.f32 %v19887_v6, %v5265_v16  ;;  %5814 = vmatpush1.bf16.msra.mxu1 %v16909_v18  ;;  %5856 = vmatprep.subr.bf16.mxu0 %v16911_v43  ;;  %v16938_v9 = vld [vmem:[%s23162_s1 + $0x680] ss:$12 sps:$4 sm:$0xff]   ;;  %v16941_v16 = vld [vmem:[%s23162_s1 + $0x708] ss:$12 sps:$4 sm:$0xff]   ;;  %v16945_v43 = vld [vmem:[%s23162_s1 + $0x6f0] ss:$12 sps:$4 sm:$0xff]  }
 0x307   : > { %5815 = vmatprep.subr.bf16.mxu1 %v16910_v44  ;;  %v16939_v57 = vld [vmem:[%s23162_s1 + $0x70c] ss:$12 sps:$4 sm:$0xff]   ;;  %v16943_v18 = vld [vmem:[%s23162_s1 + $0x6f4] ss:$12 sps:$4 sm:$0xff]   ;;  %v16944_v44 = vld [vmem:[%s23162_s1 + $0x710] ss:$12 sps:$4 sm:$0xff]  }
 0x308   : > { %v5293_v27 = vmax.f32 %v5287_v4, 0.0  ;;  %15005 = vmatmul.mubr.msk.bf16.vlgmr.msra.gmra.mxu0 %vm864_vm0, %v19731_v21  ;;  %v16915_v21 = vld [vmem:[%s23162_s1 + $0x7b4] ss:$12 sps:$4 sm:$0xff]  }
 0x309   : > { %5857 = vmatpush1.bf16.msra.mxu0 %v16913_v34  ;;  %5882 = vmatprep.mubr.bf16.mxu0 %v17290_v2  ;;  %v16942_v4 = vld [vmem:[%s23162_s1 + $0x668] ss:$12 sps:$4 sm:$0xff]   ;;  %v16948_v34 = vld [vmem:[%s23162_s1 + $0x6f8] ss:$12 sps:$4 sm:$0xff]  }
 0x30a   : > { %v19916_v31 = vpack.c.bf16 %v5293_v27, %v5290_v20  ;;  %5816 = vmatpush1.bf16.msra.mxu1 %v16912_v41  ;;  %5858 = vmatprep.subr.bf16.mxu0 %v16915_v21  ;;  %v16946_v20 = vld [vmem:[%s23162_s1 + $0x650] ss:$12 sps:$4 sm:$0xff]  }
 0x30b   : > { %5817 = vmatprep.subr.bf16.mxu1 %v16914_v25  ;;  %v16947_v41 = vld [vmem:[%s23162_s1 + $0x6dc] ss:$12 sps:$4 sm:$0xff]   ;;  %v20034_v21 = vld [vmem:[%s17452_s26 + $0xc] sm:$0x33] }
 0x30d   : > { %5859 = vmatpush1.bf16.msra.mxu0 %v16917_v39  ;;  %v16949_v39 = vld [vmem:[%s23162_s1 + $0x6d8] ss:$12 sps:$4 sm:$0xff]  }
 0x30e   : > { %5818 = vmatpush1.bf16.msra.mxu1 %v16916_v35  ;;  %5860 = vmatprep.subr.bf16.mxu0 %v16919_v40 }
 0x30f   : > { %5819 = vmatprep.subr.bf16.mxu1 %v16918_v47  ;;  %v16950_v47 = vld [vmem:[%s23162_s1 + $0x638] ss:$12 sps:$4 sm:$0xff]  }
 0x311   : > { %5861 = vmatpush1.bf16.msra.mxu0 %v16921_v45  ;;  %v5374_v42 = vpop.f32.mrf.mxu1  ;;  %v16951_v45 = vld [vmem:[%s23162_s1 + $0x6c4] ss:$12 sps:$4 sm:$0xff]  }
 0x312   : > { %5820 = vmatpush1.bf16.msra.mxu1 %v16920_v50  ;;  %5862 = vmatprep.subr.bf16.mxu0 %v16923_v49 }
 0x313   : > { %5821 = vmatprep.subr.bf16.mxu1 %v16922_v46  ;;  %v5376_v22 = vpop.f32.mrf.mxu1  ;;  %v16952_v46 = vld [vmem:[%s23162_s1 + $0x6e0] ss:$12 sps:$4 sm:$0xff]  }
 0x315   : > { %5863 = vmatpush1.bf16.msra.mxu0 %v16925_v0  ;;  %v5378_v27 = vpop.f32.mrf.mxu1 }
 0x316   : > { %5822 = vmatpush1.bf16.msra.mxu1 %v16924_v24  ;;  %5864 = vmatprep.subr.bf16.mxu0 %v16927_v26  ;;  %v20055_v24 = vld [vmem:[%s17452_s26] sm:$0xff] }
 0x317   : > { %5823 = vmatprep.subr.bf16.mxu1 %v16926_v60  ;;  %v20044_v40 = vpop.f32.mrf.mxu1  ;;  %v13411_v0 = vcombine.high %v20055_v24, %v20034_v21 }
 0x319   : > { %5865 = vmatpush1.bf16.msra.mxu0 %v16929_v48  ;;  %v16954_v48 = vld [vmem:[%s23162_s1 + $0x6c0] ss:$12 sps:$4 sm:$0xff]  }
 0x31a   : > { %5824 = vmatpush2.bf16.msra.mxu1 %v16928_v5  ;;  %14584 = vmatprep.subr.bf16.mxu0 %v16931_v8 }
 0x31b   : > { %5825 = vmatprep.subr.bf16.mxu1 %v16930_v7  ;;  %v16955_v7 = vld [vmem:[%s23162_s1 + $0x620] ss:$12 sps:$4 sm:$0xff]  }
 0x31c   : > { %13408 = vmatmul.mubr.msk.bf16.vlgmr.msra.gmra.mxu0 %vm864_vm0, %v19980_v13 }
 0x31d   : > { %14585 = vmatpush3.bf16.msra.mxu0 %v16934_v10  ;;  %5925 = vmatprep.mubr.bf16.mxu0 %v19870_v19  ;;  %v16940_v19 = vld [vmem:[%s23162_s1 + $0x728] ss:$12 sps:$4 sm:$0xff]  }
 0x31e   : > { %5826 = vmatpush2.bf16.msra.mxu1 %v16933_v1  ;;  %14586 = vmatprep.subr.bf16.mxu0 %v16936_v15  ;;  %v16956_v1 = vld [vmem:[%s23162_s1 + $0x6ac] ss:$12 sps:$4 sm:$0xff]   ;;  %v16957_v10 = vld [vmem:[%s23162_s1 + $0x6c8] ss:$12 sps:$4 sm:$0xff]   ;;  %v6001_v15 = vshll.u32 %v13411_v0, 16 }
 0x31f   : > { %5827 = vmatprep.subr.bf16.mxu1 %v16935_v58 }
 0x321   : > { %14587 = vmatpush3.bf16.msra.mxu0 %v16938_v9  ;;  %v16959_v9 = vld [vmem:[%s23162_s1 + $0x608] ss:$12 sps:$4 sm:$0xff]  }
 0x322   : > { %5828 = vmatpush2.bf16.msra.mxu1 %v16937_v61  ;;  %14588 = vmatprep.subr.bf16.mxu0 %v16940_v19  ;;  %v16958_v61 = vld [vmem:[%s23162_s1 + $0x6a8] ss:$12 sps:$4 sm:$0xff]   ;;  %v6003_v19 = vrot.slane %v6001_v15, 1  ;;  %v16975_v15 = vld [vmem:[%s23162_s1 + $0x840] ss:$12 sps:$4 sm:$0xff]  }
 0x323   : > { %5829 = vmatprep.subr.bf16.mxu1 %v16939_v57  ;;  %v5999_v57 = vshrl.u32 %v13411_v0, 16  ;;  %v16970_v0 = vld [vmem:[%s23162_s1 + $0x85c] ss:$12 sps:$4 sm:$0xff]  }
 0x325   : > { %14589 = vmatpush3.bf16.msra.mxu0 %v16942_v4  ;;  %v16962_v4 = vld [vmem:[%s23162_s1 + $0x5f0] ss:$12 sps:$4 sm:$0xff]  }
 0x326   : > { %5830 = vmatpush2.bf16.msra.mxu1 %v16941_v16  ;;  %14590 = vmatprep.subr.bf16.mxu0 %v16944_v44  ;;  %v16961_v16 = vld [vmem:[%s17452_s26 + $0xa8] ss:$12 sps:$4 sm:$0x1f]   ;;  %v20096_v44 = vor.u32 %v6003_v19, %v5999_v57  ;;  %v16979_v19 = vld [vmem:[%s23162_s1 + $0x9c0] ss:$12 sps:$4 sm:$0xff]  }
 0x327   : > { %5831 = vmatprep.subr.bf16.mxu1 %v16943_v18  ;;  %v16964_v18 = vld [vmem:[%s23162_s1 + $0x88c] ss:$12 sps:$4 sm:$0xff]   ;;  %v16978_v57 = vld [vmem:[%s23162_s1 + $0x828] ss:$12 sps:$4 sm:$0xff]  }
 0x329   : > { %14591 = vmatpush3.bf16.msra.mxu0 %v16946_v20  ;;  %v16965_v20 = vld [vmem:[%s23162_s1 + $0x7b8] ss:$12 sps:$4 sm:$0xff]  }
 0x32a   : > { %5832 = vmatpush2.bf16.msra.mxu1 %v16945_v43  ;;  %14592 = vmatprep.subr.bf16.mxu0 %v16948_v34  ;;  %v16967_v34 = vld [vmem:[%s23162_s1 + $0x874] ss:$12 sps:$4 sm:$0xff]  }
 0x32b   : > { %5833 = vmatprep.subr.bf16.mxu1 %v16947_v41 }
 0x32c   : > { %v5331_v25 = vpop.f32.mrf.mxu0 }
 0x32d   : > { %v20036_v35 = vadd.f32 %v5374_v42, %v5331_v25  ;;  %14593 = vmatpush3.bf16.msra.mxu0 %v16950_v47  ;;  %v16960_v42 = vld [vmem:[%s23162_s1 + $0x6b0] ss:$12 sps:$4 sm:$0xff]  }
 0x32e   : > { %5834 = vmatpush2.bf16.msra.mxu1 %v16949_v39  ;;  %v5333_v50 = vpop.f32.mrf.mxu0  ;;  %14594 = vmatprep.subr.bf16.mxu0 %v16952_v46 }
 0x32f   : > { %5835 = vmatprep.subr.bf16.mxu1 %v16951_v45  ;;  %v20052_v49 = vadd.f32 %v5376_v22, %v5333_v50  ;;  %v16963_v22 = vld [vmem:[%s23162_s1 + $0x7d0] ss:$12 sps:$4 sm:$0xff]   ;;  %v16968_v50 = vld [vmem:[%s23162_s1 + $0x7a0] ss:$12 sps:$4 sm:$0xff]  }
 0x330   : > { %v5335_v60 = vpop.f32.mrf.mxu0  ;;  %v16969_v45 = vld [vmem:[%s23162_s1 + $0x870] ss:$12 sps:$4 sm:$0xff]  }
 0x331   : > { %v14516_v26 = vpop.f32.mrf.mxu1  ;;  %v20059_v5 = vadd.f32 %v5378_v27, %v5335_v60  ;;  %14595 = vmatpush3.bf16.msra.mxu0 %v16955_v7  ;;  %v16966_v27 = vld [vmem:[%s23162_s1 + $0x888] ss:$12 sps:$4 sm:$0xff]  }
 0x332   : > { %5836 = vmatpush2.bf16.msra.mxu1 %v16954_v48  ;;  %14596 = vmatprep.subr.bf16.mxu0 %v16957_v10  ;;  %v20104_v41 = vpop.f32.mrf.mxu0  ;;  %v16971_v7 = vld [vmem:[%s23162_s1 + $0x788] ss:$12 sps:$4 sm:$0xff]  }
 0x333   : > { %v14517_v8 = vpop.f32.mrf.mxu1  ;;  %5837 = vmatprep.subr.bf16.mxu1 %v16956_v1  ;;  %v16973_v1 = vld [vmem:[%s23162_s1 + $0x844] ss:$12 sps:$4 sm:$0xff]  }
 0x334   : > { %v14518_v58 = vadd.f32 %v14517_v8, %v14516_v26  ;;  %v16972_v8 = vld [vmem:[%s23162_s1 + $0x858] ss:$12 sps:$4 sm:$0xff]  }
 0x335   : > { %14597 = vmatpush3.bf16.msra.mxu0 %v16959_v9  ;;  %v14519_v43 = vpop.f32.mrf.mxu1  ;;  %v16977_v9 = vld [vmem:[%s23162_s1 + $0x9c4] ss:$12 sps:$4 sm:$0xff]  }
 0x336   : > { %5838 = vmatpush2.bf16.msra.mxu1 %v16958_v61  ;;  %14598 = vmatprep.subr.bf16.mxu0 %v16960_v42  ;;  %v16976_v61 = vld [vmem:[%s23162_s1 + $0x82c] ss:$12 sps:$4 sm:$0xff]   ;;  %v5982_v42 = vld [vmem:[%s17452_s26 + $0x14] sm:$0x3] }
 0x337   : > { %15008 = vmatprep.subr.bf16.mxu1 %v17291_v63  ;;  %v14520_v25 = vpop.f32.mrf.mxu1 }
 0x338   : > { %v14521_v60 = vadd.f32 %v14520_v25, %v14519_v43  ;;  %v16984_v43 = vld [vmem:[%s23162_s1 + $0x9a8] ss:$12 sps:$4 sm:$0xff]   ;;  %v16987_v25 = vld [vmem:[%s23162_s1 + $0x7f8] ss:$12 sps:$4 sm:$0xff]  }
 0x339   : > { %5840 = vmatmul.mubr.bf16.vlgmr.msra.gmra.mxu1 %v16961_v16  ;;  %14599 = vmatpush3.bf16.msra.mxu0 %v16962_v4  ;;  %v16982_v4 = vld [vmem:[%s17452_s26 + $0x8] sm:$0xf] }
 0x33a   : > { %15009 = vmatpush3.bf16.msra.mxu1 %v16963_v22  ;;  %6017 = vmatprep.subr.bf16.mxu0 %v16964_v18  ;;  %v13412_v22 = vcombine.low %v16982_v4, %v5982_v42  ;;  %v16983_v18 = vld [vmem:[%s23162_s1 + $0x810] ss:$12 sps:$4 sm:$0xff]  }
 0x33b   : > { %15010 = vmatprep.subr.bf16.mxu1 %v17291_v63  ;;  %15018 = vmatprep.mubr.msk.bf16.mxu1 %vm17292_vm1, %v17291_v63  ;;  %v17000_v42 = vld [vmem:[%s23162_s1 + $0x890] ss:$12 sps:$4 sm:$0xff]  }
 0x33c   : > { %5926 = vmatmul.mubr.bf16.vlgmr.msra.gmra.mxu0 %v16961_v16  ;;  %v16980_v16 = vld [vmem:[%s23162_s1 + $0x814] ss:$12 sps:$4 sm:$0xff]  }
 0x33d   : > { %6018 = vmatpush1.bf16.msra.mxu0 %v16966_v27  ;;  %6049 = vmatprep.mubr.bf16.mxu0 %v20096_v44  ;;  %v16986_v27 = vld [vmem:[%s23162_s1 + $0x994] ss:$12 sps:$4 sm:$0xff]  }
 0x33e   : > { %15011 = vmatpush3.bf16.msra.mxu1 %v16965_v20  ;;  %6019 = vmatprep.subr.bf16.mxu0 %v16967_v34  ;;  %v16985_v20 = vld [vmem:[%s23162_s1 + $0x7fc] ss:$12 sps:$4 sm:$0xff]   ;;  %v6008_v34 = vshll.u32 %v13412_v22, 16 }
 0x33f   : > { %15012 = vmatprep.subr.bf16.mxu1 %v17291_v63 }
 0x340   : > { %v5458_v39 = vpop.f32.mrf.mxu0 }
 0x341   : > { %v20111_v47 = vadd.f32 %v14518_v58, %v5458_v39  ;;  %6020 = vmatpush1.bf16.msra.mxu0 %v16969_v45  ;;  %v16974_v58 = vld [vmem:[%s23162_s1 + $0x770] ss:$12 sps:$4 sm:$0xff]  }
 0x342   : > { %15013 = vmatpush3.bf16.msra.mxu1 %v16968_v50  ;;  %v14978_v46 = vpop.f32.mrf.mxu0  ;;  %6021 = vmatprep.subr.bf16.mxu0 %v16970_v0  ;;  %v16988_v39 = vld [vmem:[%s23162_s1 + $0x990] ss:$12 sps:$4 sm:$0xff]   ;;  %v6010_v0 = vrot.slane %v6008_v34, 1  ;;  %v17010_v34 = vld [vmem:[%s23162_s1 + $0x908] ss:$12 sps:$4 sm:$0xff]  }
 0x343   : > { %15014 = vmatprep.subr.bf16.mxu1 %v17291_v63  ;;  %v16989_v50 = vld [vmem:[%s23162_s1 + $0x7e4] ss:$12 sps:$4 sm:$0xff]   ;;  %v16990_v45 = vld [vmem:[%s23162_s1 + $0x97c] ss:$12 sps:$4 sm:$0xff]   ;;  %v6006_v46 = vshrl.u32 %v13412_v22, 16 }
 0x344   : > { %v5461_v26 = vpop.f32.mrf.mxu0  ;;  %v17005_v22 = vld [vmem:[%s23162_s1 + $0x904] ss:$12 sps:$4 sm:$0xff]  }
 0x345   : > { %v20123_v48 = vadd.f32 %v14521_v60, %v5461_v26  ;;  %6022 = vmatpush1.bf16.msra.mxu0 %v16972_v8  ;;  %v16991_v60 = vld [vmem:[%s23162_s1 + $0x7e0] ss:$12 sps:$4 sm:$0xff]   ;;  %v16992_v26 = vld [vmem:[%s23162_s1 + $0x978] ss:$12 sps:$4 sm:$0xff]  }
 0x346   : > { %15015 = vmatpush3.bf16.msra.mxu1 %v16971_v7  ;;  %6023 = vmatprep.subr.bf16.mxu0 %v16973_v1  ;;  %v14979_v10 = vpop.f32.mrf.mxu0  ;;  %v16993_v7 = vld [vmem:[%s23162_s1 + $0x94c] ss:$12 sps:$4 sm:$0xff]   ;;  %v16994_v8 = vld [vmem:[%s23162_s1 + $0x964] ss:$12 sps:$4 sm:$0xff]   ;;  %v20200_v1 = vor.u32 %v6010_v0, %v6006_v46  ;;  %v17013_v46 = vld [vmem:[%s23162_s1 + $0x8d4] ss:$12 sps:$4 sm:$0xff]  }
 0x347   : > { %15016 = vmatprep.subr.bf16.mxu1 %v17291_v63  ;;  %v16995_v10 = vld [vmem:[%s23162_s1 + $0x948] ss:$12 sps:$4 sm:$0xff]  }
 0x349   : > { %6024 = vmatpush1.bf16.msra.mxu0 %v16975_v15  ;;  %v16997_v15 = vld [vmem:[%s23162_s1 + $0x934] ss:$12 sps:$4 sm:$0xff]  }
 0x34a   : > { %15017 = vmatpush3.bf16.msra.mxu1 %v16974_v58  ;;  %6025 = vmatprep.subr.bf16.mxu0 %v16976_v61  ;;  %v16996_v58 = vld [vmem:[%s23162_s1 + $0x960] ss:$12 sps:$4 sm:$0xff]   ;;  %v16998_v61 = vld [vmem:[%s23162_s1 + $0x950] ss:$12 sps:$4 sm:$0xff]  }
 0x34b   : > { %6066 = vmatprep.subr.bf16.mxu1 %v16977_v9  ;;  %v16999_v9 = vld [vmem:[%s23162_s1 + $0x930] ss:$12 sps:$4 sm:$0xff]  }
 0x34d   : > { %15019 = vmatmul.mubr.msk.bf16.vlgmr.msra.gmra.mxu1 %vm864_vm0, %v19980_v13  ;;  %6026 = vmatpush1.bf16.msra.mxu0 %v16978_v57  ;;  %v16981_v13 = vld [vmem:[%s23162_s1 + $0x9ac] ss:$12 sps:$4 sm:$0xff]   ;;  %v17001_v57 = vld [vmem:[%s23162_s1 + $0x91c] ss:$12 sps:$4 sm:$0xff]  }
 0x34e   : > { %6067 = vmatpush1.bf16.msra.mxu1 %v16979_v19  ;;  %6027 = vmatprep.subr.bf16.mxu0 %v16980_v16  ;;  %v17002_v19 = vld [vmem:[%s23162_s1 + $0x938] ss:$12 sps:$4 sm:$0xff]  }
 0x34f   : > { %6068 = vmatprep.subr.bf16.mxu1 %v16981_v13  ;;  %6092 = vmatprep.mubr.bf16.mxu1 %v17290_v2  ;;  %v17003_v16 = vld [vmem:[%s23162_s1 + $0x918] ss:$12 sps:$4 sm:$0xff]  }
 0x350   : > { %v17004_v13 = vld [vmem:[%s23162_s1 + $0x878] ss:$12 sps:$4 sm:$0xff]  }
 0x351   : > { %6028 = vmatpush1.bf16.msra.mxu0 %v16983_v18  ;;  %v17007_v18 = vld [vmem:[%s23162_s1 + $0x900] ss:$12 sps:$4 sm:$0xff]  }
 0x352   : > { %6069 = vmatpush1.bf16.msra.mxu1 %v16984_v43  ;;  %6029 = vmatprep.subr.bf16.mxu0 %v16985_v20  ;;  %v17008_v43 = vld [vmem:[%s23162_s1 + $0x860] ss:$12 sps:$4 sm:$0xff]  }
 0x353   : > { %6070 = vmatprep.subr.bf16.mxu1 %v16986_v27  ;;  %v17009_v27 = vld [vmem:[%s23162_s1 + $0x8ec] ss:$12 sps:$4 sm:$0xff]  }
 0x354   : > { %v5542_v4 = vpop.f32.mrf.mxu0 }
 0x355   : > { %6030 = vmatpush1.bf16.msra.mxu0 %v16987_v25  ;;  %v13410_v25 = vcombine.low %v20055_v24, %v20034_v21  ;;  %v17014_v21 = vld [vmem:[%s23162_s1 + $0x8f0] ss:$12 sps:$4 sm:$0xff]  }
 0x356   : > { %6071 = vmatpush1.bf16.msra.mxu1 %v16988_v39  ;;  %6031 = vmatprep.subr.bf16.mxu0 %v16989_v50  ;;  %v5544_v20 = vpop.f32.mrf.mxu0  ;;  %v17011_v39 = vld [vmem:[%s23162_s1 + $0x8e8] ss:$12 sps:$4 sm:$0xff]  }
 0x357   : > { %6072 = vmatprep.subr.bf16.mxu1 %v16990_v45  ;;  %v17012_v50 = vld [vmem:[%s23162_s1 + $0x848] ss:$12 sps:$4 sm:$0xff]   ;;  %v5994_v0 = vshll.u32 %v13410_v25, 16 }
 0x358   : > { %v5546_v45 = vpop.f32.mrf.mxu0 }
 0x359   : > { %6032 = vmatpush1.bf16.msra.mxu0 %v16991_v60  ;;  %v20268_v60 = vld [vmem:[%s17452_s26 + $0x24] sm:$0x33] }
 0x35a   : > { %6073 = vmatpush1.bf16.msra.mxu1 %v16992_v26  ;;  %6033 = vmatprep.subr.bf16.mxu0 %v16993_v7  ;;  %v17015_v7 = vld [vmem:[%s23162_s1 + $0x8d0] ss:$12 sps:$4 sm:$0xff]  }
 0x35b   : > { %6074 = vmatprep.subr.bf16.mxu1 %v16994_v8  ;;  %v17016_v8 = vld [vmem:[%s23162_s1 + $0x830] ss:$12 sps:$4 sm:$0xff]  }
 0x35d   : > { %6034 = vmatpush2.bf16.msra.mxu0 %v16995_v10  ;;  %v20277_v10 = vpop.f32.mrf.mxu0 }
 0x35e   : > { %6075 = vmatpush1.bf16.msra.mxu1 %v16996_v58  ;;  %6035 = vmatprep.subr.bf16.mxu0 %v16997_v15  ;;  %v17017_v15 = vld [vmem:[%s23162_s1 + $0x8bc] ss:$12 sps:$4 sm:$0xff]  }
 0x35f   : > { %14612 = vmatprep.subr.bf16.mxu1 %v16998_v61 }
 0x361   : > { %13413 = vmatmul.mubr.msk.bf16.vlgmr.msra.gmra.mxu1 %vm864_vm0, %v20200_v1  ;;  %6036 = vmatpush2.bf16.msra.mxu0 %v16999_v9 }
 0x362   : > { %14613 = vmatpush3.bf16.msra.mxu1 %v17000_v42  ;;  %6037 = vmatprep.subr.bf16.mxu0 %v17001_v57  ;;  %v20289_v42 = vld [vmem:[%s17452_s26 + $0x18] sm:$0xff] }
 0x363   : > { %14614 = vmatprep.subr.bf16.mxu1 %v17002_v19  ;;  %6135 = vmatprep.mubr.bf16.mxu1 %v20096_v44  ;;  %v17006_v44 = vld [vmem:[%s23162_s1 + $0x920] ss:$12 sps:$4 sm:$0xff]   ;;  %v13418_v57 = vcombine.high %v20289_v42, %v20268_v60 }
 0x365   : > { %6038 = vmatpush2.bf16.msra.mxu0 %v17003_v16 }
 0x366   : > { %14615 = vmatpush3.bf16.msra.mxu1 %v17004_v13  ;;  %6039 = vmatprep.subr.bf16.mxu0 %v17005_v22  ;;  %v5992_v13 = vshrl.u32 %v13410_v25, 16  ;;  %v5996_v22 = vrot.slane %v5994_v0, 1  ;;  %v6211_v25 = vshll.u32 %v13418_v57, 16 }
 0x367   : > { %14616 = vmatprep.subr.bf16.mxu1 %v17006_v44 }
 0x369   : > { %6040 = vmatpush2.bf16.msra.mxu0 %v17007_v18 }
 0x36a   : > { %14617 = vmatpush3.bf16.msra.mxu1 %v17008_v43  ;;  %6041 = vmatprep.subr.bf16.mxu0 %v17009_v27  ;;  %v17022_v27 = vld [vmem:[%s23162_s1 + $0x8a4] ss:$12 sps:$4 sm:$0xff]  }
 0x36b   : > { %14618 = vmatprep.subr.bf16.mxu1 %v17010_v34 }
 0x36d   : > { %6042 = vmatpush2.bf16.msra.mxu0 %v17011_v39 }
 0x36e   : > { %14619 = vmatpush3.bf16.msra.mxu1 %v17012_v50  ;;  %6043 = vmatprep.subr.bf16.mxu0 %v17013_v46  ;;  %v5997_v50 = vor.u32 %v5996_v22, %v5992_v13  ;;  %v17024_v46 = vld [vmem:[%s23162_s1 + $0x8a0] ss:$12 sps:$4 sm:$0xff]  }
 0x36f   : > { %14620 = vmatprep.subr.bf16.mxu1 %v17014_v21  ;;  %v17025_v21 = vld [vmem:[%s23162_s1 + $0x800] ss:$12 sps:$4 sm:$0xff]  }
 0x371   : > { %v5499_v24 = vpop.f32.mrf.mxu1  ;;  %6044 = vmatpush2.bf16.msra.mxu0 %v17015_v7  ;;  %v6209_v7 = vshrl.u32 %v13418_v57, 16  ;;  %v17030_v57 = vld [vmem:[%s23162_s1 + $0x9b0] ss:$12 sps:$4 sm:$0xff]  }
 0x372   : > { %v5500_v26 = vadd.f32 %v5499_v24, %v20036_v35  ;;  %14621 = vmatpush3.bf16.msra.mxu1 %v17016_v8  ;;  %6045 = vmatprep.subr.bf16.mxu0 %v17017_v15  ;;  %v17018_v35 = vld [vmem:[%s23162_s1 + $0x8d8] ss:$12 sps:$4 sm:$0xff]   ;;  %v6213_v8 = vrot.slane %v6211_v25, 1  ;;  %v17037_v25 = vld [vmem:[%s23162_s1 + $0xa50] ss:$12 sps:$4 sm:$0xff]  }
 0x373   : > { %v5501_v58 = vpop.f32.mrf.mxu1  ;;  %14622 = vmatprep.subr.bf16.mxu1 %v17018_v35  ;;  %v17029_v35 = vld [vmem:[%s23162_s1 + $0xa84] ss:$12 sps:$4 sm:$0xff]  }
 0x374   : > { %v20285_v61 = vadd.f32 %v5542_v4, %v5500_v26  ;;  %v5502_v9 = vadd.f32 %v5501_v58, %v20052_v49  ;;  %v14544_v16 = vpop.f32.mrf.mxu0  ;;  %v17020_v4 = vld [vmem:[%s23162_s1 + $0x8b8] ss:$12 sps:$4 sm:$0xff]   ;;  %v17027_v58 = vld [vmem:[%s23162_s1 + $0x7e8] ss:$12 sps:$4 sm:$0xff]  }
 0x375   : > { %v5503_v19 = vpop.f32.mrf.mxu1  ;;  %6046 = vmatpush2.bf16.msra.mxu0 %v17020_v4  ;;  %v17021_v49 = vld [vmem:[%s23162_s1 + $0x818] ss:$12 sps:$4 sm:$0xff]   ;;  %v17034_v4 = vld [vmem:[%s23162_s1 + $0xa68] ss:$12 sps:$4 sm:$0xff]  }
 0x376   : > { %v20293_v44 = vadd.f32 %v5544_v20, %v5502_v9  ;;  %v5504_v18 = vadd.f32 %v5503_v19, %v20059_v5  ;;  %14623 = vmatpush3.bf16.msra.mxu1 %v17021_v49  ;;  %v14545_v43 = vpop.f32.mrf.mxu0  ;;  %6047 = vmatprep.subr.bf16.mxu0 %v17022_v27  ;;  %v17023_v5 = vld [vmem:[%s23162_s1 + $0x8c0] ss:$12 sps:$4 sm:$0xff]   ;;  %v20334_v9 = vor.u32 %v6213_v8, %v6209_v7  ;;  %v17044_v7 = vld [vmem:[%s23162_s1 + $0xbb8] ss:$12 sps:$4 sm:$0xff]  }
 0x377   : > { %14624 = vmatprep.subr.bf16.mxu1 %v17023_v5  ;;  %v14546_v34 = vadd.f32 %v14545_v43, %v14544_v16  ;;  %v20342_v19 = vpop.f32.mrf.mxu1  ;;  %v17032_v16 = vld [vmem:[%s23162_s1 + $0xa6c] ss:$12 sps:$4 sm:$0xff]   ;;  %v17035_v43 = vld [vmem:[%s23162_s1 + $0xa54] ss:$12 sps:$4 sm:$0xff]  }
 0x378   : > { %v20308_v20 = vadd.f32 %v5546_v45, %v5504_v18  ;;  %v14547_v39 = vpop.f32.mrf.mxu0  ;;  %v17026_v45 = vld [vmem:[%s23162_s1 + $0x8a8] ss:$12 sps:$4 sm:$0xff]   ;;  %v17033_v18 = vld [vmem:[%s23162_s1 + $0x998] ss:$12 sps:$4 sm:$0xff]  }
 0x379   : > { %6048 = vmatpush2.bf16.msra.mxu0 %v17024_v46  ;;  %v5586_v24 = vadd.f32 %v14546_v34, %v20111_v47  ;;  %v17028_v47 = vld [vmem:[%s23162_s1 + $0x9c8] ss:$12 sps:$4 sm:$0xff]   ;;  %v17036_v34 = vld [vmem:[%s23162_s1 + $0x980] ss:$12 sps:$4 sm:$0xff]  }
 0x37a   : > { %14625 = vmatpush3.bf16.msra.mxu1 %v17025_v21  ;;  %v14548_v0 = vpop.f32.mrf.mxu0  ;;  %15022 = vmatprep.subr.bf16.mxu0 %v17291_v63  ;;  %v17039_v46 = vld [vmem:[%s23162_s1 + $0x968] ss:$12 sps:$4 sm:$0xff]   ;;  %v17040_v21 = vld [vmem:[%s23162_s1 + $0xa38] ss:$12 sps:$4 sm:$0xff]  }
 0x37b   : > { %14626 = vmatprep.subr.bf16.mxu1 %v17026_v45  ;;  %v14549_v26 = vadd.f32 %v14548_v0, %v14547_v39  ;;  %v17042_v0 = vld [vmem:[%s23162_s1 + $0xbbc] ss:$12 sps:$4 sm:$0xff]   ;;  %v13416_v45 = vld [vmem:[%s17452_s26 + $0x2c] sm:$0x3] }
 0x37c   : > { %6050 = vmatmul.mubr.bf16.vlgmr.msra.gmra.mxu0 %v5997_v50  ;;  %v17045_v8 = vld [vmem:[%s23162_s1 + $0xa0c] ss:$12 sps:$4 sm:$0xff]  }
 0x37d   : > { %15023 = vmatpush3.bf16.msra.mxu0 %v17028_v47  ;;  %v5589_v15 = vadd.f32 %v14549_v26, %v20123_v48  ;;  %15032 = vmatprep.mubr.msk.bf16.mxu0 %vm17292_vm1, %v17291_v63  ;;  %v17031_v48 = vld [vmem:[%s23162_s1 + $0xa80] ss:$12 sps:$4 sm:$0xff]  }
 0x37e   : > { %14627 = vmatpush3.bf16.msra.mxu1 %v17027_v58  ;;  %15024 = vmatprep.subr.bf16.mxu0 %v17291_v63  ;;  %v17043_v26 = vld [vmem:[%s23162_s1 + $0xa20] ss:$12 sps:$4 sm:$0xff]  }
 0x37f   : > { %6227 = vmatprep.subr.bf16.mxu1 %v17029_v35  ;;  %v17047_v58 = vld [vmem:[%s17452_s26 + $0x20] sm:$0xf] }
 0x380   : > { %v13419_v47 = vcombine.low %v17047_v58, %v13416_v45  ;;  %v17049_v35 = vld [vmem:[%s23162_s1 + $0xba0] ss:$12 sps:$4 sm:$0xff]   ;;  %v17063_v45 = vld [vmem:[%s23162_s1 + $0xb48] ss:$12 sps:$4 sm:$0xff]   ;;  %v17068_v58 = vld [vmem:[%s23162_s1 + $0xb10] ss:$12 sps:$4 sm:$0xff]  }
 0x381   : > { %6136 = vmatmul.mubr.bf16.vlgmr.msra.gmra.mxu1 %v5997_v50  ;;  %15025 = vmatpush3.bf16.msra.mxu0 %v17030_v57  ;;  %v17038_v50 = vld [vmem:[%s23162_s1 + $0xa3c] ss:$12 sps:$4 sm:$0xff]   ;;  %v17050_v57 = vld [vmem:[%s23162_s1 + $0x9f4] ss:$12 sps:$4 sm:$0xff]  }
 0x382   : > { %6228 = vmatpush1.bf16.msra.mxu1 %v17031_v48  ;;  %15026 = vmatprep.subr.bf16.mxu0 %v17291_v63  ;;  %v17051_v48 = vld [vmem:[%s23162_s1 + $0xb8c] ss:$12 sps:$4 sm:$0xff]  }
 0x383   : > { %6229 = vmatprep.subr.bf16.mxu1 %v17032_v16  ;;  %6259 = vmatprep.mubr.bf16.mxu1 %v20334_v9  ;;  %v6218_v16 = vshll.u32 %v13419_v47, 16 }
 0x385   : > { %v5626_v13 = vpop.f32.mrf.mxu1  ;;  %15027 = vmatpush3.bf16.msra.mxu0 %v17033_v18  ;;  %v17053_v18 = vld [vmem:[%s23162_s1 + $0xb88] ss:$12 sps:$4 sm:$0xff]  }
 0x386   : > { %v20349_v22 = vadd.f32 %v5626_v13, %v5586_v24  ;;  %6230 = vmatpush1.bf16.msra.mxu1 %v17034_v4  ;;  %15028 = vmatprep.subr.bf16.mxu0 %v17291_v63  ;;  %v17041_v24 = vld [vmem:[%s23162_s1 + $0xa24] ss:$12 sps:$4 sm:$0xff]   ;;  %v17054_v4 = vld [vmem:[%s23162_s1 + $0x9dc] ss:$12 sps:$4 sm:$0xff]  }
 0x387   : > { %v14992_v49 = vpop.f32.mrf.mxu1  ;;  %6231 = vmatprep.subr.bf16.mxu1 %v17035_v43  ;;  %v17052_v13 = vld [vmem:[%s23162_s1 + $0x9f0] ss:$12 sps:$4 sm:$0xff]   ;;  %v6216_v43 = vshrl.u32 %v13419_v47, 16 }
 0x388   : > { %v17055_v49 = vld [vmem:[%s23162_s1 + $0xb74] ss:$12 sps:$4 sm:$0xff]   ;;  %v17069_v47 = vld [vmem:[%s23162_s1 + $0xa70] ss:$12 sps:$4 sm:$0xff]  }
 0x389   : > { %v5629_v27 = vpop.f32.mrf.mxu1  ;;  %15029 = vmatpush3.bf16.msra.mxu0 %v17036_v34  ;;  %v17056_v34 = vld [vmem:[%s23162_s1 + $0x9d8] ss:$12 sps:$4 sm:$0xff]  }
 0x38a   : > { %v20361_v5 = vadd.f32 %v5629_v27, %v5589_v15  ;;  %6232 = vmatpush1.bf16.msra.mxu1 %v17037_v25  ;;  %15030 = vmatprep.subr.bf16.mxu0 %v17291_v63  ;;  %v17048_v15 = vld [vmem:[%s23162_s1 + $0xa08] ss:$12 sps:$4 sm:$0xff]   ;;  %v6220_v27 = vrot.slane %v6218_v16, 1  ;;  %v17057_v25 = vld [vmem:[%s23162_s1 + $0xb70] ss:$12 sps:$4 sm:$0xff]  }
 0x38b   : > { %v14993_v39 = vpop.f32.mrf.mxu1  ;;  %6233 = vmatprep.subr.bf16.mxu1 %v17038_v50  ;;  %v17059_v50 = vld [vmem:[%s23162_s1 + $0xb5c] ss:$12 sps:$4 sm:$0xff]  }
 0x38c   : > { %v17058_v39 = vld [vmem:[%s23162_s1 + $0xb44] ss:$12 sps:$4 sm:$0xff]  }
 0x38d   : > { %15031 = vmatpush3.bf16.msra.mxu0 %v17039_v46  ;;  %v20438_v46 = vor.u32 %v6220_v27, %v6216_v43  ;;  %v17077_v43 = vld [vmem:[%s23162_s1 + $0xa40] ss:$12 sps:$4 sm:$0xff]  }
 0x38e   : > { %6234 = vmatpush1.bf16.msra.mxu1 %v17040_v21  ;;  %6276 = vmatprep.subr.bf16.mxu0 %v17042_v0  ;;  %v17060_v21 = vld [vmem:[%s23162_s1 + $0xb40] ss:$12 sps:$4 sm:$0xff]  }
 0x38f   : > { %6235 = vmatprep.subr.bf16.mxu1 %v17041_v24  ;;  %v17061_v24 = vld [vmem:[%s23162_s1 + $0xb58] ss:$12 sps:$4 sm:$0xff]  }
 0x390   : > { %15033 = vmatmul.mubr.msk.bf16.vlgmr.msra.gmra.mxu0 %vm864_vm0, %v20200_v1  ;;  %v17046_v1 = vld [vmem:[%s23162_s1 + $0xba4] ss:$12 sps:$4 sm:$0xff]   ;;  %v17062_v0 = vld [vmem:[%s23162_s1 + $0xb2c] ss:$12 sps:$4 sm:$0xff]  }
 0x391   : > { %6277 = vmatpush1.bf16.msra.mxu0 %v17044_v7  ;;  %6302 = vmatprep.mubr.bf16.mxu0 %v17290_v2  ;;  %v17065_v7 = vld [vmem:[%s23162_s1 + $0xa88] ss:$12 sps:$4 sm:$0xff]  }
 0x392   : > { %6236 = vmatpush1.bf16.msra.mxu1 %v17043_v26  ;;  %6278 = vmatprep.subr.bf16.mxu0 %v17046_v1  ;;  %v17064_v26 = vld [vmem:[%s23162_s1 + $0xb28] ss:$12 sps:$4 sm:$0xff]   ;;  %v17067_v1 = vld [vmem:[%s23162_s1 + $0xb30] ss:$12 sps:$4 sm:$0xff]  }
 0x393   : > { %6237 = vmatprep.subr.bf16.mxu1 %v17045_v8  ;;  %v17066_v8 = vld [vmem:[%s23162_s1 + $0xb14] ss:$12 sps:$4 sm:$0xff]  }
 0x395   : > { %6279 = vmatpush1.bf16.msra.mxu0 %v17049_v35  ;;  %v17070_v35 = vld [vmem:[%s23162_s1 + $0xafc] ss:$12 sps:$4 sm:$0xff]  }
 0x396   : > { %6238 = vmatpush1.bf16.msra.mxu1 %v17048_v15  ;;  %6280 = vmatprep.subr.bf16.mxu0 %v17051_v48  ;;  %v17073_v48 = vld [vmem:[%s23162_s1 + $0xa58] ss:$12 sps:$4 sm:$0xff]  }
 0x397   : > { %6239 = vmatprep.subr.bf16.mxu1 %v17050_v57  ;;  %v17072_v57 = vld [vmem:[%s23162_s1 + $0xaf8] ss:$12 sps:$4 sm:$0xff]  }
 0x399   : > { %6281 = vmatpush1.bf16.msra.mxu0 %v17053_v18  ;;  %v5710_v15 = vpop.f32.mrf.mxu1  ;;  %v17075_v18 = vld [vmem:[%s23162_s1 + $0xb00] ss:$12 sps:$4 sm:$0xff]  }
 0x39a   : > { %6240 = vmatpush1.bf16.msra.mxu1 %v17052_v13  ;;  %6282 = vmatprep.subr.bf16.mxu0 %v17055_v49  ;;  %v17074_v13 = vld [vmem:[%s23162_s1 + $0xae4] ss:$12 sps:$4 sm:$0xff]   ;;  %v17076_v49 = vld [vmem:[%s23162_s1 + $0xae0] ss:$12 sps:$4 sm:$0xff]  }
 0x39b   : > { %6241 = vmatprep.subr.bf16.mxu1 %v17054_v4  ;;  %v5712_v16 = vpop.f32.mrf.mxu1  ;;  %v13417_v4 = vcombine.low %v20289_v42, %v20268_v60  ;;  %v17079_v60 = vld [vmem:[%s23162_s1 + $0xae8] ss:$12 sps:$4 sm:$0xff]   ;;  %v5381_v42 = vadd.f32 %v20044_v40, %v20104_v41 }
 0x39c   : > { %v17082_v41 = vld [vmem:[%s23162_s1 + $0xab4] ss:$12 sps:$4 sm:$0xff]  }
 0x39d   : > { %6283 = vmatpush1.bf16.msra.mxu0 %v17057_v25  ;;  %v5714_v27 = vpop.f32.mrf.mxu1 }
 0x39e   : > { %6242 = vmatpush1.bf16.msra.mxu1 %v17056_v34  ;;  %6284 = vmatprep.subr.bf16.mxu0 %v17059_v50  ;;  %v17078_v34 = vld [vmem:[%s23162_s1 + $0xacc] ss:$12 sps:$4 sm:$0xff]   ;;  %v20508_v50 = vld [vmem:[%s17452_s26 + $0x3c] sm:$0x33] }
 0x39f   : > { %6243 = vmatprep.subr.bf16.mxu1 %v17058_v39  ;;  %v6204_v39 = vshll.u32 %v13417_v4, 16 }
 0x3a1   : > { %6285 = vmatpush1.bf16.msra.mxu0 %v17061_v24  ;;  %v17080_v24 = vld [vmem:[%s23162_s1 + $0xac8] ss:$12 sps:$4 sm:$0xff]  }
 0x3a2   : > { %6244 = vmatpush2.bf16.msra.mxu1 %v17060_v21  ;;  %14640 = vmatprep.subr.bf16.mxu0 %v17063_v45  ;;  %v5506_v45 = vadd.f32 %v20342_v19, %v5381_v42 }
 0x3a3   : > { %6245 = vmatprep.subr.bf16.mxu1 %v17062_v0  ;;  %v17081_v0 = vld [vmem:[%s23162_s1 + $0xa28] ss:$12 sps:$4 sm:$0xff]  }
 0x3a4   : > { %13420 = vmatmul.mubr.msk.bf16.vlgmr.msra.gmra.mxu0 %vm864_vm0, %v20438_v46 }
 0x3a5   : > { %14641 = vmatpush3.bf16.msra.mxu0 %v17065_v7  ;;  %6345 = vmatprep.mubr.bf16.mxu0 %v20334_v9  ;;  %v17071_v9 = vld [vmem:[%s23162_s1 + $0xb18] ss:$12 sps:$4 sm:$0xff]   ;;  %v17083_v7 = vld [vmem:[%s23162_s1 + $0xad0] ss:$12 sps:$4 sm:$0xff]  }
 0x3a6   : > { %6246 = vmatpush2.bf16.msra.mxu1 %v17064_v26  ;;  %14642 = vmatprep.subr.bf16.mxu0 %v17067_v1  ;;  %v5716_v26 = vpop.f32.mrf.mxu1 }
 0x3a7   : > { %6247 = vmatprep.subr.bf16.mxu1 %v17066_v8 }
 0x3a9   : > { %14643 = vmatpush3.bf16.msra.mxu0 %v17069_v47 }
 0x3aa   : > { %6248 = vmatpush2.bf16.msra.mxu1 %v17068_v58  ;;  %14644 = vmatprep.subr.bf16.mxu0 %v17071_v9  ;;  %v20527_v58 = vld [vmem:[%s17452_s26 + $0x30] sm:$0xff]  ;;  %v6206_v9 = vrot.slane %v6204_v39, 1  ;;  %v17089_v39 = vld [vmem:[%s23162_s1 + $0xa98] ss:$12 sps:$4 sm:$0xff]  }
 0x3ab   : > { %6249 = vmatprep.subr.bf16.mxu1 %v17070_v35  ;;  %v13425_v19 = vcombine.high %v20527_v58, %v20508_v50  ;;  %v6202_v35 = vshrl.u32 %v13417_v4, 16  ;;  %v17088_v4 = vld [vmem:[%s23162_s1 + $0xab8] ss:$12 sps:$4 sm:$0xff]  }
 0x3ad   : > { %14645 = vmatpush3.bf16.msra.mxu0 %v17073_v48 }
 0x3ae   : > { %6250 = vmatpush2.bf16.msra.mxu1 %v17072_v57  ;;  %14646 = vmatprep.subr.bf16.mxu0 %v17075_v18 }
 0x3af   : > { %6251 = vmatprep.subr.bf16.mxu1 %v17074_v13  ;;  %v17085_v13 = vld [vmem:[%s23162_s1 + $0xab0] ss:$12 sps:$4 sm:$0xff]  }
 0x3b1   : > { %14647 = vmatpush3.bf16.msra.mxu0 %v17077_v43 }
 0x3b2   : > { %6252 = vmatpush2.bf16.msra.mxu1 %v17076_v49  ;;  %14648 = vmatprep.subr.bf16.mxu0 %v17079_v60  ;;  %v6421_v60 = vshll.u32 %v13425_v19, 16 }
 0x3b3   : > { %6253 = vmatprep.subr.bf16.mxu1 %v17078_v34 }
 0x3b4   : > { %v5667_v25 = vpop.f32.mrf.mxu0 }
 0x3b5   : > { %v5711_v21 = vadd.f32 %v5710_v15, %v5667_v25  ;;  %14649 = vmatpush3.bf16.msra.mxu0 %v17081_v0 }
 0x3b6   : > { %6254 = vmatpush2.bf16.msra.mxu1 %v17080_v24  ;;  %v5669_v40 = vpop.f32.mrf.mxu0  ;;  %14650 = vmatprep.subr.bf16.mxu0 %v17083_v7  ;;  %v17094_v7 = vld [vmem:[%s23162_s1 + $0xc7c] ss:$12 sps:$4 sm:$0xff]  }
 0x3b7   : > { %6255 = vmatprep.subr.bf16.mxu1 %v17082_v41  ;;  %v20524_v8 = vadd.f32 %v5711_v21, %v20285_v61  ;;  %v5713_v1 = vadd.f32 %v5712_v16, %v5669_v40  ;;  %v17086_v61 = vld [vmem:[%s23162_s1 + $0xa10] ss:$12 sps:$4 sm:$0xff]   ;;  %v5549_v16 = vadd.f32 %v20277_v10, %v5506_v45  ;;  %v6207_v10 = vor.u32 %v6206_v9, %v6202_v35  ;;  %v17090_v21 = vld [vmem:[%s23162_s1 + $0x9f8] ss:$12 sps:$4 sm:$0xff]   ;;  %v17092_v40 = vld [vmem:[%s23162_s1 + $0x9e0] ss:$12 sps:$4 sm:$0xff]  }
 0x3b8   : > { %v5671_v47 = vpop.f32.mrf.mxu0  ;;  %v6419_v45 = vshrl.u32 %v13425_v19, 16  ;;  %v17093_v41 = vld [vmem:[%s23162_s1 + $0xbc0] ss:$12 sps:$4 sm:$0xff]   ;;  %v17095_v19 = vld [vmem:[%s23162_s1 + $0xba8] ss:$12 sps:$4 sm:$0xff]  }
 0x3b9   : > { %v14572_v15 = vpop.f32.mrf.mxu1  ;;  %v20532_v57 = vadd.f32 %v5713_v1, %v20293_v44  ;;  %v5715_v48 = vadd.f32 %v5714_v27, %v5671_v47  ;;  %14651 = vmatpush3.bf16.msra.mxu0 %v17086_v61  ;;  %v17087_v44 = vld [vmem:[%s23162_s1 + $0xa9c] ss:$12 sps:$4 sm:$0xff]   ;;  %v17096_v47 = vld [vmem:[%s23162_s1 + $0xc78] ss:$12 sps:$4 sm:$0xff]  }
 0x3ba   : > { %6256 = vmatpush2.bf16.msra.mxu1 %v17085_v13  ;;  %v5673_v18 = vpop.f32.mrf.mxu0  ;;  %14652 = vmatprep.subr.bf16.mxu0 %v17088_v4  ;;  %v17099_v13 = vld [vmem:[%s23162_s1 + $0xc60] ss:$12 sps:$4 sm:$0xff]   ;;  %v17101_v4 = vld [vmem:[%s23162_s1 + $0xb78] ss:$12 sps:$4 sm:$0xff]  }
 0x3bb   : > { %v14573_v49 = vpop.f32.mrf.mxu1  ;;  %6257 = vmatprep.subr.bf16.mxu1 %v17087_v44  ;;  %v20548_v43 = vadd.f32 %v5715_v48, %v20308_v20  ;;  %v5717_v27 = vadd.f32 %v5716_v26, %v5673_v18  ;;  %v17091_v20 = vld [vmem:[%s23162_s1 + $0xaa0] ss:$12 sps:$4 sm:$0xff]   ;;  %v6423_v26 = vrot.slane %v6421_v60, 1  ;;  %v17098_v48 = vld [vmem:[%s23162_s1 + $0xb90] ss:$12 sps:$4 sm:$0xff]  }
 0x3bc   : > { %v14574_v34 = vadd.f32 %v14573_v49, %v14572_v15  ;;  %v17097_v15 = vld [vmem:[%s23162_s1 + $0xc64] ss:$12 sps:$4 sm:$0xff]  }
 0x3bd   : > { %v14575_v42 = vpop.f32.mrf.mxu1  ;;  %v20550_v25 = vadd.f32 %v5717_v27, %v5549_v16  ;;  %14653 = vmatpush3.bf16.msra.mxu0 %v17090_v21  ;;  %v20574_v1 = vor.u32 %v6423_v26, %v6419_v45  ;;  %v17100_v16 = vld [vmem:[%s23162_s1 + $0xc4c] ss:$12 sps:$4 sm:$0xff]   ;;  %v17102_v27 = vld [vmem:[%s23162_s1 + $0xc48] ss:$12 sps:$4 sm:$0xff]   ;;  %v13423_v21 = vld [vmem:[%s17452_s26 + $0x44] sm:$0x3] }
 0x3be   : > { %6258 = vmatpush2.bf16.msra.mxu1 %v17089_v39  ;;  %14654 = vmatprep.subr.bf16.mxu0 %v17091_v20  ;;  %v17106_v39 = vld [vmem:[%s23162_s1 + $0xc1c] ss:$12 sps:$4 sm:$0xff]   ;;  %v17112_v45 = vld [vmem:[%s17452_s26 + $0x38] sm:$0xf] }
 0x3bf   : > { %v14576_v24 = vpop.f32.mrf.mxu1  ;;  %15036 = vmatprep.subr.bf16.mxu1 %v17291_v63  ;;  %v17109_v20 = vld [vmem:[%s23162_s1 + $0xdb0] ss:$12 sps:$4 sm:$0xff]   ;;  %v13426_v26 = vcombine.low %v17112_v45, %v13423_v21  ;;  %v17131_v21 = vld [vmem:[%s23162_s1 + $0xd0c] ss:$12 sps:$4 sm:$0xff]   ;;  %v17135_v45 = vld [vmem:[%s23162_s1 + $0xcf4] ss:$12 sps:$4 sm:$0xff]  }
 0x3c0   : > { %v14577_v0 = vadd.f32 %v14576_v24, %v14575_v42  ;;  %v17104_v42 = vld [vmem:[%s23162_s1 + $0xb60] ss:$12 sps:$4 sm:$0xff]   ;;  %v17108_v24 = vld [vmem:[%s23162_s1 + $0xc18] ss:$12 sps:$4 sm:$0xff]  }
 0x3c1   : > { %6260 = vmatmul.mubr.bf16.vlgmr.msra.gmra.mxu1 %v6207_v10  ;;  %14655 = vmatpush3.bf16.msra.mxu0 %v17092_v40  ;;  %v17113_v40 = vld [vmem:[%s23162_s1 + $0xc00] ss:$12 sps:$4 sm:$0xff]  }
 0x3c2   : > { %15037 = vmatpush3.bf16.msra.mxu1 %v17093_v41  ;;  %6437 = vmatprep.subr.bf16.mxu0 %v17094_v7  ;;  %v17114_v41 = vld [vmem:[%s23162_s1 + $0xd98] ss:$12 sps:$4 sm:$0xff]  }
 0x3c3   : > { %15038 = vmatprep.subr.bf16.mxu1 %v17291_v63  ;;  %15046 = vmatprep.mubr.msk.bf16.mxu1 %vm17292_vm1, %v17291_v63  ;;  %v17115_v7 = vld [vmem:[%s23162_s1 + $0xbec] ss:$12 sps:$4 sm:$0xff]  }
 0x3c4   : > { %6346 = vmatmul.mubr.bf16.vlgmr.msra.gmra.mxu0 %v6207_v10  ;;  %v17105_v10 = vld [vmem:[%s23162_s1 + $0xc30] ss:$12 sps:$4 sm:$0xff]  }
 0x3c5   : > { %6438 = vmatpush1.bf16.msra.mxu0 %v17096_v47  ;;  %6469 = vmatprep.mubr.bf16.mxu0 %v20574_v1  ;;  %v6428_v47 = vshll.u32 %v13426_v26, 16 }
 0x3c6   : > { %15039 = vmatpush3.bf16.msra.mxu1 %v17095_v19  ;;  %6439 = vmatprep.subr.bf16.mxu0 %v17097_v15  ;;  %v17116_v19 = vld [vmem:[%s23162_s1 + $0xd84] ss:$12 sps:$4 sm:$0xff]   ;;  %v17117_v15 = vld [vmem:[%s23162_s1 + $0xbe8] ss:$12 sps:$4 sm:$0xff]  }
 0x3c7   : > { %15040 = vmatprep.subr.bf16.mxu1 %v17291_v63 }
 0x3c8   : > { %v5794_v35 = vpop.f32.mrf.mxu0 }
 0x3c9   : > { %v5795_v9 = vadd.f32 %v14574_v34, %v5794_v35  ;;  %6440 = vmatpush1.bf16.msra.mxu0 %v17099_v13  ;;  %v17118_v35 = vld [vmem:[%s23162_s1 + $0xd80] ss:$12 sps:$4 sm:$0xff]   ;;  %v6426_v13 = vshrl.u32 %v13426_v26, 16  ;;  %v17137_v26 = vld [vmem:[%s23162_s1 + $0xcf0] ss:$12 sps:$4 sm:$0xff]  }
 0x3ca   : > { %15041 = vmatpush3.bf16.msra.mxu1 %v17098_v48  ;;  %v15006_v61 = vpop.f32.mrf.mxu0  ;;  %6441 = vmatprep.subr.bf16.mxu0 %v17100_v16  ;;  %v17120_v48 = vld [vmem:[%s23162_s1 + $0xd6c] ss:$12 sps:$4 sm:$0xff]   ;;  %v17121_v16 = vld [vmem:[%s23162_s1 + $0xbd0] ss:$12 sps:$4 sm:$0xff]  }
 0x3cb   : > { %15042 = vmatprep.subr.bf16.mxu1 %v17291_v63  ;;  %v20598_v18 = vadd.f32 %v5795_v9, %v20349_v22  ;;  %v17103_v22 = vld [vmem:[%s23162_s1 + $0xc34] ss:$12 sps:$4 sm:$0xff]   ;;  %v6430_v61 = vrot.slane %v6428_v47, 1  ;;  %v13424_v47 = vcombine.low %v20527_v58, %v20508_v50 }
 0x3cc   : > { %v5797_v49 = vpop.f32.mrf.mxu0  ;;  %v17119_v9 = vld [vmem:[%s23162_s1 + $0xbd4] ss:$12 sps:$4 sm:$0xff]  }
 0x3cd   : > { %v5798_v44 = vadd.f32 %v14577_v0, %v5797_v49  ;;  %6442 = vmatpush1.bf16.msra.mxu0 %v17102_v27  ;;  %v17110_v0 = vld [vmem:[%s23162_s1 + $0xc04] ss:$12 sps:$4 sm:$0xff]   ;;  %v17122_v49 = vld [vmem:[%s23162_s1 + $0xd68] ss:$12 sps:$4 sm:$0xff]   ;;  %v20678_v27 = vor.u32 %v6430_v61, %v6426_v13  ;;  %v17144_v50 = vld [vmem:[%s23162_s1 + $0xce0] ss:$12 sps:$4 sm:$0xff]  }
 0x3ce   : > { %15043 = vmatpush3.bf16.msra.mxu1 %v17101_v4  ;;  %6443 = vmatprep.subr.bf16.mxu0 %v17103_v22  ;;  %v15007_v34 = vpop.f32.mrf.mxu0  ;;  %v17124_v4 = vld [vmem:[%s23162_s1 + $0xd54] ss:$12 sps:$4 sm:$0xff]   ;;  %v17125_v22 = vld [vmem:[%s23162_s1 + $0xd38] ss:$12 sps:$4 sm:$0xff]   ;;  %v6414_v13 = vshll.u32 %v13424_v47, 16 }
 0x3cf   : > { %15044 = vmatprep.subr.bf16.mxu1 %v17291_v63  ;;  %v20611_v60 = vadd.f32 %v5798_v44, %v20361_v5  ;;  %v17107_v5 = vld [vmem:[%s23162_s1 + $0xdb4] ss:$12 sps:$4 sm:$0xff]   ;;  %v17123_v44 = vld [vmem:[%s23162_s1 + $0xd3c] ss:$12 sps:$4 sm:$0xff]  }
 0x3d0   : > { %v17126_v34 = vld [vmem:[%s23162_s1 + $0xd50] ss:$12 sps:$4 sm:$0xff]   ;;  %v20746_v61 = vld [vmem:[%s17452_s26 + $0x54] sm:$0x33] }
 0x3d1   : > { %6444 = vmatpush1.bf16.msra.mxu0 %v17105_v10  ;;  %v17128_v10 = vld [vmem:[%s23162_s1 + $0xd40] ss:$12 sps:$4 sm:$0xff]  }
 0x3d2   : > { %15045 = vmatpush3.bf16.msra.mxu1 %v17104_v42  ;;  %6445 = vmatprep.subr.bf16.mxu0 %v17106_v39  ;;  %v17127_v42 = vld [vmem:[%s23162_s1 + $0xd24] ss:$12 sps:$4 sm:$0xff]   ;;  %v17129_v39 = vld [vmem:[%s23162_s1 + $0xd20] ss:$12 sps:$4 sm:$0xff]  }
 0x3d3   : > { %6486 = vmatprep.subr.bf16.mxu1 %v17107_v5  ;;  %v17130_v5 = vld [vmem:[%s23162_s1 + $0xc80] ss:$12 sps:$4 sm:$0xff]  }
 0x3d5   : > { %15047 = vmatmul.mubr.msk.bf16.vlgmr.msra.gmra.mxu1 %vm864_vm0, %v20438_v46  ;;  %6446 = vmatpush1.bf16.msra.mxu0 %v17108_v24  ;;  %v17111_v46 = vld [vmem:[%s23162_s1 + $0xd9c] ss:$12 sps:$4 sm:$0xff]  }
 0x3d6   : > { %6487 = vmatpush1.bf16.msra.mxu1 %v17109_v20  ;;  %6447 = vmatprep.subr.bf16.mxu0 %v17110_v0  ;;  %v17132_v24 = vld [vmem:[%s23162_s1 + $0xd28] ss:$12 sps:$4 sm:$0xff]  }
 0x3d7   : > { %6488 = vmatprep.subr.bf16.mxu1 %v17111_v46  ;;  %6512 = vmatprep.mubr.bf16.mxu1 %v17290_v2  ;;  %v17133_v20 = vld [vmem:[%s23162_s1 + $0xd08] ss:$12 sps:$4 sm:$0xff]  }
 0x3d8   : > { %v17134_v0 = vld [vmem:[%s23162_s1 + $0xc68] ss:$12 sps:$4 sm:$0xff]  }
 0x3d9   : > { %6448 = vmatpush1.bf16.msra.mxu0 %v17113_v40  ;;  %v17138_v40 = vld [vmem:[%s23162_s1 + $0xc50] ss:$12 sps:$4 sm:$0xff]  }
 0x3da   : > { %6489 = vmatpush1.bf16.msra.mxu1 %v17114_v41  ;;  %6449 = vmatprep.subr.bf16.mxu0 %v17115_v7  ;;  %v17139_v7 = vld [vmem:[%s23162_s1 + $0xcdc] ss:$12 sps:$4 sm:$0xff]  }
 0x3db   : > { %6490 = vmatprep.subr.bf16.mxu1 %v17116_v19  ;;  %v17140_v19 = vld [vmem:[%s23162_s1 + $0xcf8] ss:$12 sps:$4 sm:$0xff]  }
 0x3dc   : > { %v5884_v46 = vpop.f32.mrf.mxu0 }
 0x3dd   : > { %6450 = vmatpush1.bf16.msra.mxu0 %v17117_v15  ;;  %v17141_v15 = vld [vmem:[%s23162_s1 + $0xcd8] ss:$12 sps:$4 sm:$0xff]  }
 0x3de   : > { %6491 = vmatpush1.bf16.msra.mxu1 %v17118_v35  ;;  %6451 = vmatprep.subr.bf16.mxu0 %v17119_v9  ;;  %v5886_v41 = vpop.f32.mrf.mxu0  ;;  %v17142_v35 = vld [vmem:[%s23162_s1 + $0xc38] ss:$12 sps:$4 sm:$0xff]  }
 0x3df   : > { %6492 = vmatprep.subr.bf16.mxu1 %v17120_v48  ;;  %v17143_v48 = vld [vmem:[%s23162_s1 + $0xcc4] ss:$12 sps:$4 sm:$0xff]  }
 0x3e0   : > { %v5888_v9 = vpop.f32.mrf.mxu0 }
 0x3e1   : > { %6452 = vmatpush1.bf16.msra.mxu0 %v17121_v16 }
 0x3e2   : > { %6493 = vmatpush1.bf16.msra.mxu1 %v17122_v49  ;;  %6453 = vmatprep.subr.bf16.mxu0 %v17123_v44  ;;  %v17145_v49 = vld [vmem:[%s23162_s1 + $0xcc0] ss:$12 sps:$4 sm:$0xff]  }
 0x3e3   : > { %6494 = vmatprep.subr.bf16.mxu1 %v17124_v4  ;;  %v17146_v44 = vld [vmem:[%s23162_s1 + $0xc20] ss:$12 sps:$4 sm:$0xff]   ;;  %v5890_v4 = vpop.f32.mrf.mxu0 }
 0x3e5   : > { %6454 = vmatpush2.bf16.msra.mxu0 %v17125_v22 }
 0x3e6   : > { %6495 = vmatpush1.bf16.msra.mxu1 %v17126_v34  ;;  %6455 = vmatprep.subr.bf16.mxu0 %v17127_v42  ;;  %v17147_v34 = vld [vmem:[%s23162_s1 + $0xcac] ss:$12 sps:$4 sm:$0xff]   ;;  %v17148_v42 = vld [vmem:[%s23162_s1 + $0xcc8] ss:$12 sps:$4 sm:$0xff]  }
 0x3e7   : > { %14668 = vmatprep.subr.bf16.mxu1 %v17128_v10 }
 0x3e9   : > { %13427 = vmatmul.mubr.msk.bf16.vlgmr.msra.gmra.mxu1 %vm864_vm0, %v20678_v27  ;;  %6456 = vmatpush2.bf16.msra.mxu0 %v17129_v39 }
 0x3ea   : > { %14669 = vmatpush3.bf16.msra.mxu1 %v17130_v5  ;;  %6457 = vmatprep.subr.bf16.mxu0 %v17131_v21  ;;  %v20764_v5 = vld [vmem:[%s17452_s26 + $0x48] sm:$0xff] }
 0x3eb   : > { %14670 = vmatprep.subr.bf16.mxu1 %v17132_v24  ;;  %6555 = vmatprep.mubr.bf16.mxu1 %v20574_v1  ;;  %v17136_v1 = vld [vmem:[%s23162_s1 + $0xd10] ss:$12 sps:$4 sm:$0xff]   ;;  %v13432_v21 = vcombine.high %v20764_v5, %v20746_v61 }
 0x3ed   : > { %6458 = vmatpush2.bf16.msra.mxu0 %v17133_v20 }
 0x3ee   : > { %14671 = vmatpush3.bf16.msra.mxu1 %v17134_v0  ;;  %6459 = vmatprep.subr.bf16.mxu0 %v17135_v45  ;;  %v6412_v0 = vshrl.u32 %v13424_v47, 16 }
 0x3ef   : > { %14672 = vmatprep.subr.bf16.mxu1 %v17136_v1 }
 0x3f1   : > { %6460 = vmatpush2.bf16.msra.mxu0 %v17137_v26  ;;  %v17150_v26 = vld [vmem:[%s23162_s1 + $0xca8] ss:$12 sps:$4 sm:$0xff]  }
 0x3f2   : > { %14673 = vmatpush3.bf16.msra.mxu1 %v17138_v40  ;;  %6461 = vmatprep.subr.bf16.mxu0 %v17139_v7 }
 0x3f3   : > { %14674 = vmatprep.subr.bf16.mxu1 %v17140_v19 }
 0x3f5   : > { %6462 = vmatpush2.bf16.msra.mxu0 %v17141_v15 }
 0x3f6   : > { %14675 = vmatpush3.bf16.msra.mxu1 %v17142_v35  ;;  %6463 = vmatprep.subr.bf16.mxu0 %v17143_v48  ;;  %v6631_v35 = vshll.u32 %v13432_v21, 16 }
 0x3f7   : > { %14676 = vmatprep.subr.bf16.mxu1 %v17144_v50  ;;  %v17154_v50 = vld [vmem:[%s23162_s1 + $0xc90] ss:$12 sps:$4 sm:$0xff]  }
 0x3f9   : > { %v5841_v58 = vpop.f32.mrf.mxu1  ;;  %6464 = vmatpush2.bf16.msra.mxu0 %v17145_v49  ;;  %v17158_v49 = vld [vmem:[%s23162_s1 + $0xdb8] ss:$12 sps:$4 sm:$0xff]  }
 0x3fa   : > { %v5885_v16 = vadd.f32 %v5884_v46, %v5841_v58  ;;  %14677 = vmatpush3.bf16.msra.mxu1 %v17146_v44  ;;  %6465 = vmatprep.subr.bf16.mxu0 %v17147_v34  ;;  %v6416_v46 = vrot.slane %v6414_v13, 1  ;;  %v17155_v58 = vld [vmem:[%s23162_s1 + $0xbf0] ss:$12 sps:$4 sm:$0xff]   ;;  %v6629_v13 = vshrl.u32 %v13432_v21, 16  ;;  %v17159_v44 = vld [vmem:[%s23162_s1 + $0xe74] ss:$12 sps:$4 sm:$0xff]  }
 0x3fb   : > { %v5843_v22 = vpop.f32.mrf.mxu1  ;;  %14678 = vmatprep.subr.bf16.mxu1 %v17148_v42  ;;  %v17160_v34 = vld [vmem:[%s23162_s1 + $0xda0] ss:$12 sps:$4 sm:$0xff]   ;;  %v17161_v42 = vld [vmem:[%s23162_s1 + $0xe70] ss:$12 sps:$4 sm:$0xff]  }
 0x3fc   : > { %v20761_v10 = vadd.f32 %v5885_v16, %v20524_v8  ;;  %v5887_v39 = vadd.f32 %v5886_v41, %v5843_v22  ;;  %v14600_v20 = vpop.f32.mrf.mxu0  ;;  %v17151_v8 = vld [vmem:[%s23162_s1 + $0xc08] ss:$12 sps:$4 sm:$0xff]   ;;  %v17157_v16 = vld [vmem:[%s23162_s1 + $0xbd8] ss:$12 sps:$4 sm:$0xff]  }
 0x3fd   : > { %v5845_v24 = vpop.f32.mrf.mxu1  ;;  %6466 = vmatpush2.bf16.msra.mxu0 %v17150_v26  ;;  %v17152_v41 = vld [vmem:[%s23162_s1 + $0xc94] ss:$12 sps:$4 sm:$0xff]   ;;  %v17165_v26 = vld [vmem:[%s23162_s1 + $0xe44] ss:$12 sps:$4 sm:$0xff]  }
 0x3fe   : > { %v20769_v45 = vadd.f32 %v5887_v39, %v20532_v57  ;;  %v5889_v1 = vadd.f32 %v5888_v9, %v5845_v24  ;;  %14679 = vmatpush3.bf16.msra.mxu1 %v17151_v8  ;;  %6467 = vmatprep.subr.bf16.mxu0 %v17152_v41  ;;  %v17153_v57 = vld [vmem:[%s23162_s1 + $0xcb0] ss:$12 sps:$4 sm:$0xff]   ;;  %v14601_v7 = vpop.f32.mrf.mxu0  ;;  %v6417_v9 = vor.u32 %v6416_v46, %v6412_v0  ;;  %v17163_v0 = vld [vmem:[%s23162_s1 + $0xd88] ss:$12 sps:$4 sm:$0xff]   ;;  %v17164_v46 = vld [vmem:[%s23162_s1 + $0xe58] ss:$12 sps:$4 sm:$0xff]  }
 0x3ff   : > { %v5847_v40 = vpop.f32.mrf.mxu1  ;;  %14680 = vmatprep.subr.bf16.mxu1 %v17153_v57  ;;  %v14602_v15 = vadd.f32 %v14601_v7, %v14600_v20  ;;  %v17162_v39 = vld [vmem:[%s23162_s1 + $0xe5c] ss:$12 sps:$4 sm:$0xff]  }
 0x400   : > { %v20784_v19 = vadd.f32 %v5889_v1, %v20548_v43  ;;  %v5891_v47 = vadd.f32 %v5890_v4, %v5847_v40  ;;  %v17156_v43 = vld [vmem:[%s23162_s1 + $0xc98] ss:$12 sps:$4 sm:$0xff]   ;;  %v14603_v22 = vpop.f32.mrf.mxu0  ;;  %v17166_v7 = vld [vmem:[%s23162_s1 + $0xd70] ss:$12 sps:$4 sm:$0xff]  }
 0x401   : > { %6468 = vmatpush2.bf16.msra.mxu0 %v17154_v50  ;;  %v17170_v50 = vld [vmem:[%s23162_s1 + $0xe28] ss:$12 sps:$4 sm:$0xff]  }
 0x402   : > { %v20787_v48 = vadd.f32 %v5891_v47, %v20550_v25  ;;  %14681 = vmatpush3.bf16.msra.mxu1 %v17155_v58  ;;  %15050 = vmatprep.subr.bf16.mxu0 %v17291_v63  ;;  %v6633_v25 = vrot.slane %v6631_v35, 1  ;;  %v14604_v21 = vpop.f32.mrf.mxu0  ;;  %v17167_v47 = vld [vmem:[%s23162_s1 + $0xe40] ss:$12 sps:$4 sm:$0xff]  }
 0x403   : > { %14682 = vmatprep.subr.bf16.mxu1 %v17156_v43  ;;  %v14605_v8 = vadd.f32 %v14604_v21, %v14603_v22  ;;  %v17171_v58 = vld [vmem:[%s23162_s1 + $0xe14] ss:$12 sps:$4 sm:$0xff]   ;;  %v13430_v43 = vld [vmem:[%s17452_s26 + $0x5c] sm:$0x3]  ;;  %v17178_v22 = vld [vmem:[%s23162_s1 + $0xdf8] ss:$12 sps:$4 sm:$0xff]  }
 0x404   : > { %6470 = vmatmul.mubr.bf16.vlgmr.msra.gmra.mxu0 %v6417_v9  ;;  %v20811_v4 = vor.u32 %v6633_v25, %v6629_v13  ;;  %v17173_v13 = vld [vmem:[%s23162_s1 + $0xe10] ss:$12 sps:$4 sm:$0xff]   ;;  %v17174_v25 = vld [vmem:[%s23162_s1 + $0xfa8] ss:$12 sps:$4 sm:$0xff]  }
 0x405   : > { %15051 = vmatpush3.bf16.msra.mxu0 %v17158_v49  ;;  %15060 = vmatprep.mubr.msk.bf16.mxu0 %vm17292_vm1, %v17291_v63  ;;  %v17177_v49 = vld [vmem:[%s17452_s26 + $0x50] sm:$0xf]  ;;  %s324_s26 = scalar_lea.vmem [#allocation2], %s323_s22 }
 0x406   : > { %14683 = vmatpush3.bf16.msra.mxu1 %v17157_v16  ;;  %15052 = vmatprep.subr.bf16.mxu0 %v17291_v63  ;;  %v17175_v16 = vld [vmem:[%s23162_s1 + $0xdfc] ss:$12 sps:$4 sm:$0xff]   ;;  %s12182_s28 = sshll.u32 %s324_s26, 4  ;;  %s12183_s28 = int_to_ptr.vmem [resolvable:$true] %s12182_s28 }
 0x407   : > { %6647 = vmatprep.subr.bf16.mxu1 %v17159_v44  ;;  %v13433_v44 = vcombine.low %v17177_v49, %v13430_v43  ;;  %v17196_v43 = vld [vmem:[%s23162_s1 + $0xf04] ss:$12 sps:$4 sm:$0xff]   ;;  %v17200_v49 = vld [vmem:[%s23162_s1 + $0xeec] ss:$12 sps:$4 sm:$0xff]   ;;  %s17228_s21 = scalar_lea.vmem %s12183_s28, 16  ;;  %p17235_p0 = scmp.lt.s32.totalorder %s12183_s28, %s17233_s27 }
 0x408   : > { %p17229_p11 = scmp.ne.s32.totalorder %s12183_s28, %s17228_s21  ;;  %p17236_p1 = scmp.lt.s32.totalorder %s17234_s23, %s17228_s21 }
 0x409   : > { %6556 = vmatmul.mubr.bf16.vlgmr.msra.gmra.mxu1 %v6417_v9  ;;  %15053 = vmatpush3.bf16.msra.mxu0 %v17160_v34  ;;  %v17169_v9 = vld [vmem:[%s23162_s1 + $0xd58] ss:$12 sps:$4 sm:$0xff]   ;;  %v17179_v34 = vld [vmem:[%s23162_s1 + $0xf90] ss:$12 sps:$4 sm:$0xff]   ;;  %v6638_v21 = vshll.u32 %v13433_v44, 16 }
 0x40a   : > { %6648 = vmatpush1.bf16.msra.mxu1 %v17161_v42  ;;  %15054 = vmatprep.subr.bf16.mxu0 %v17291_v63  ;;  %v17180_v42 = vld [vmem:[%s23162_s1 + $0xde4] ss:$12 sps:$4 sm:$0xff]   ;;  %p17230_p12 = pnand %p17229_p11, %p17382_p5  ;;  %p17237_p2 = por %p17236_p1, %p17235_p0 }
 0x40b   : > { %6649 = vmatprep.subr.bf16.mxu1 %v17162_v39  ;;  %6679 = vmatprep.mubr.bf16.mxu1 %v20811_v4  ;;  %v17181_v39 = vld [vmem:[%s23162_s1 + $0xf7c] ss:$12 sps:$4 sm:$0xff]  }
 0x40c   : > { %p17231_p13 = pneg %p17230_p12 }
 0x40d   : > { %v5968_v24 = vpop.f32.mrf.mxu1  ;;  %15055 = vmatpush3.bf16.msra.mxu0 %v17163_v0  ;;  %v17184_v0 = vld [vmem:[%s23162_s1 + $0xdcc] ss:$12 sps:$4 sm:$0xff]  }
 0x40e   : > { %v5969_v20 = vadd.f32 %v14602_v15, %v5968_v24  ;;  %6650 = vmatpush1.bf16.msra.mxu1 %v17164_v46  ;;  %15056 = vmatprep.subr.bf16.mxu0 %v17291_v63  ;;  %v17182_v24 = vld [vmem:[%s23162_s1 + $0xde0] ss:$12 sps:$4 sm:$0xff]   ;;  %v17185_v46 = vld [vmem:[%s23162_s1 + $0xf64] ss:$12 sps:$4 sm:$0xff]   ;;  %p17238_p3 = pnand %p17237_p2, %p17231_p13 }
 0x40f   : > { %v15020_v1 = vpop.f32.mrf.mxu1  ;;  %6651 = vmatprep.subr.bf16.mxu1 %v17165_v26  ;;  %v6640_v26 = vrot.slane %v6638_v21, 1  ;;  %v13431_v21 = vcombine.low %v20764_v5, %v20746_v61  ;;  %v17209_v61 = vld [vmem:[%s23162_s1 + $0xed8] ss:$12 sps:$4 sm:$0xff]  }
 0x410   : > { %v20835_v40 = vadd.f32 %v5969_v20, %v20598_v18  ;;  %v17168_v18 = vld [vmem:[%s23162_s1 + $0xe2c] ss:$12 sps:$4 sm:$0xff]   ;;  %v6636_v1 = vshrl.u32 %v13433_v44, 16  ;;  %v17202_v44 = vld [vmem:[%s23162_s1 + $0xee8] ss:$12 sps:$4 sm:$0xff]  }
 0x411   : > { %v5971_v41 = vpop.f32.mrf.mxu1  ;;  %15057 = vmatpush3.bf16.msra.mxu0 %v17166_v7  ;;  %v17183_v20 = vld [vmem:[%s23162_s1 + $0xf78] ss:$12 sps:$4 sm:$0xff]  }
 0x412   : > { %v5972_v57 = vadd.f32 %v14605_v8, %v5971_v41  ;;  %6652 = vmatpush1.bf16.msra.mxu1 %v17167_v47  ;;  %15058 = vmatprep.subr.bf16.mxu0 %v17291_v63  ;;  %v17186_v8 = vld [vmem:[%s23162_s1 + $0xdc8] ss:$12 sps:$4 sm:$0xff]   ;;  %v17187_v41 = vld [vmem:[%s23162_s1 + $0xf60] ss:$12 sps:$4 sm:$0xff]   ;;  %v20915_v47 = vor.u32 %v6640_v26, %v6636_v1  ;;  %v6624_v1 = vshll.u32 %v13431_v21, 16 }
 0x413   : > { %v15021_v15 = vpop.f32.mrf.mxu1  ;;  %6653 = vmatprep.subr.bf16.mxu1 %v17168_v18  ;;  %v17189_v7 = vld [vmem:[%s23162_s1 + $0xf4c] ss:$12 sps:$4 sm:$0xff]   ;;  %v17191_v18 = vld [vmem:[%s23162_s1 + $0xf48] ss:$12 sps:$4 sm:$0xff]  }
 0x414   : > { %v20848_v35 = vadd.f32 %v5972_v57, %v20611_v60  ;;  %v17172_v60 = vld [vmem:[%s23162_s1 + $0xfac] ss:$12 sps:$4 sm:$0xff]   ;;  %v17188_v57 = vld [vmem:[%s23162_s1 + $0xf34] ss:$12 sps:$4 sm:$0xff]   ;;  %v17190_v15 = vld [vmem:[%s23162_s1 + $0xf30] ss:$12 sps:$4 sm:$0xff]  }
 0x415   : > { %15059 = vmatpush3.bf16.msra.mxu0 %v17169_v9  ;;  %v17192_v9 = vld [vmem:[%s23162_s1 + $0xf1c] ss:$12 sps:$4 sm:$0xff]  }
 0x416   : > { %6654 = vmatpush1.bf16.msra.mxu1 %v17170_v50  ;;  %6696 = vmatprep.subr.bf16.mxu0 %v17172_v60  ;;  %v17193_v50 = vld [vmem:[%s23162_s1 + $0xf38] ss:$12 sps:$4 sm:$0xff]  }
 0x417   : > { %6655 = vmatprep.subr.bf16.mxu1 %v17171_v58  ;;  %v17194_v58 = vld [vmem:[%s23162_s1 + $0xf18] ss:$12 sps:$4 sm:$0xff]  }
 0x418   : > { %15061 = vmatmul.mubr.msk.bf16.vlgmr.msra.gmra.mxu0 %vm864_vm0, %v20678_v27  ;;  %v17176_v27 = vld [vmem:[%s23162_s1 + $0xf94] ss:$12 sps:$4 sm:$0xff]   ;;  %v17195_v60 = vld [vmem:[%s23162_s1 + $0xe78] ss:$12 sps:$4 sm:$0xff]  }
 0x419   : > { %6697 = vmatpush1.bf16.msra.mxu0 %v17174_v25  ;;  %6722 = vmatprep.mubr.bf16.mxu0 %v17290_v2  ;;  %v17198_v25 = vld [vmem:[%s23162_s1 + $0xf00] ss:$12 sps:$4 sm:$0xff]  }
 0x41a   : > { %6656 = vmatpush1.bf16.msra.mxu1 %v17173_v13  ;;  %6698 = vmatprep.subr.bf16.mxu0 %v17176_v27  ;;  %v17197_v13 = vld [vmem:[%s23162_s1 + $0xf20] ss:$12 sps:$4 sm:$0xff]  }
 0x41b   : > { %6657 = vmatprep.subr.bf16.mxu1 %v17175_v16  ;;  %v17199_v16 = vld [vmem:[%s23162_s1 + $0xe60] ss:$12 sps:$4 sm:$0xff]  }
 0x41d   : > { %6699 = vmatpush1.bf16.msra.mxu0 %v17179_v34 }
 0x41e   : > { %6658 = vmatpush1.bf16.msra.mxu1 %v17178_v22  ;;  %6700 = vmatprep.subr.bf16.mxu0 %v17181_v39  ;;  %v17203_v22 = vld [vmem:[%s23162_s1 + $0xe48] ss:$12 sps:$4 sm:$0xff]   ;;  %v17205_v39 = vld [vmem:[%s23162_s1 + $0xef0] ss:$12 sps:$4 sm:$0xff]  }
 0x41f   : > { %6659 = vmatprep.subr.bf16.mxu1 %v17180_v42  ;;  %v17204_v42 = vld [vmem:[%s23162_s1 + $0xed4] ss:$12 sps:$4 sm:$0xff]  }
 0x421   : > { %6701 = vmatpush1.bf16.msra.mxu0 %v17183_v20  ;;  %v6094_v27 = vpop.f32.mrf.mxu1  ;;  %v17207_v20 = vld [vmem:[%s23162_s1 + $0xe30] ss:$12 sps:$4 sm:$0xff]  }
 0x422   : > { %6660 = vmatpush1.bf16.msra.mxu1 %v17182_v24  ;;  %6702 = vmatprep.subr.bf16.mxu0 %v17185_v46  ;;  %v17206_v24 = vld [vmem:[%s23162_s1 + $0xed0] ss:$12 sps:$4 sm:$0xff]  }
 0x423   : > { %6661 = vmatprep.subr.bf16.mxu1 %v17184_v0  ;;  %v6096_v34 = vpop.f32.mrf.mxu1  ;;  %v17208_v46 = vld [vmem:[%s23162_s1 + $0xebc] ss:$12 sps:$4 sm:$0xff]  }
 0x425   : > { %6703 = vmatpush1.bf16.msra.mxu0 %v17187_v41  ;;  %v6098_v0 = vpop.f32.mrf.mxu1  ;;  %v17211_v41 = vld [vmem:[%s23162_s1 + $0xe18] ss:$12 sps:$4 sm:$0xff]  }
 0x426   : > { %6662 = vmatpush1.bf16.msra.mxu1 %v17186_v8  ;;  %6704 = vmatprep.subr.bf16.mxu0 %v17189_v7  ;;  %v17210_v8 = vld [vmem:[%s23162_s1 + $0xeb8] ss:$12 sps:$4 sm:$0xff]  }
 0x427   : > { %6663 = vmatprep.subr.bf16.mxu1 %v17188_v57  ;;  %v6100_v57 = vpop.f32.mrf.mxu1 }
 0x429   : > { %6705 = vmatpush1.bf16.msra.mxu0 %v17191_v18  ;;  %v17213_v18 = vld [vmem:[%s23162_s1 + $0xec0] ss:$12 sps:$4 sm:$0xff]  }
 0x42a   : > { %6664 = vmatpush2.bf16.msra.mxu1 %v17190_v15  ;;  %14696 = vmatprep.subr.bf16.mxu0 %v17193_v50  ;;  %v17212_v15 = vld [vmem:[%s23162_s1 + $0xea4] ss:$12 sps:$4 sm:$0xff]  }
 0x42b   : > { %6665 = vmatprep.subr.bf16.mxu1 %v17192_v9 }
 0x42c   : > { %13434 = vmatmul.mubr.msk.bf16.vlgmr.msra.gmra.mxu0 %vm864_vm0, %v20915_v47 }
 0x42d   : > { %14697 = vmatpush3.bf16.msra.mxu0 %v17195_v60  ;;  %6765 = vmatprep.mubr.bf16.mxu0 %v20811_v4  ;;  %v17201_v4 = vld [vmem:[%s23162_s1 + $0xf08] ss:$12 sps:$4 sm:$0xff]  }
 0x42e   : > { %6666 = vmatpush2.bf16.msra.mxu1 %v17194_v58  ;;  %14698 = vmatprep.subr.bf16.mxu0 %v17197_v13  ;;  %v6626_v13 = vrot.slane %v6624_v1, 1  ;;  %v17223_v1 = vld [vmem:[%s23162_s1 + $0xf98] ss:$12 sps:$4 sm:$0xff]  }
 0x42f   : > { %6667 = vmatprep.subr.bf16.mxu1 %v17196_v43  ;;  %v6622_v43 = vshrl.u32 %v13431_v21, 16 }
 0x431   : > { %14699 = vmatpush3.bf16.msra.mxu0 %v17199_v16  ;;  %v6627_v21 = vor.u32 %v6626_v13, %v6622_v43  ;;  %v15883_v43 = vld [vmem:[%s23164_s3 + $0x28c] ss:$12 sps:$4 sm:$0xff]   ;;  %v15881_v13 = vld [vmem:[%s23164_s3 + $0x288] ss:$12 sps:$4 sm:$0xff]  }
 0x432   : > { %6668 = vmatpush2.bf16.msra.mxu1 %v17198_v25  ;;  %14700 = vmatprep.subr.bf16.mxu0 %v17201_v4 }
 0x433   : > { %6669 = vmatprep.subr.bf16.mxu1 %v17200_v49  ;;  %v17215_v49 = vld [vmem:[%s23162_s1 + $0xe00] ss:$12 sps:$4 sm:$0xff]  }
 0x435   : > { %14701 = vmatpush3.bf16.msra.mxu0 %v17203_v22 }
 0x436   : > { %6670 = vmatpush2.bf16.msra.mxu1 %v17202_v44  ;;  %14702 = vmatprep.subr.bf16.mxu0 %v17205_v39  ;;  %v17216_v44 = vld [vmem:[%s23162_s1 + $0xe8c] ss:$12 sps:$4 sm:$0xff]  }
 0x437   : > { %6671 = vmatprep.subr.bf16.mxu1 %v17204_v42 }
 0x439   : > { %14703 = vmatpush3.bf16.msra.mxu0 %v17207_v20  ;;  %v17218_v20 = vld [vmem:[%s23162_s1 + $0xe88] ss:$12 sps:$4 sm:$0xff]  }
 0x43a   : > { %6672 = vmatpush2.bf16.msra.mxu1 %v17206_v24  ;;  %14704 = vmatprep.subr.bf16.mxu0 %v17209_v61  ;;  %v17221_v61 = vld [vmem:[%s23162_s1 + $0xfb0] ss:$12 sps:$4 sm:$0xff]  }
 0x43b   : > { %6673 = vmatprep.subr.bf16.mxu1 %v17208_v46 }
 0x43c   : > { %v6051_v5 = vpop.f32.mrf.mxu0 }
 0x43d   : > { %v6095_v26 = vadd.f32 %v6094_v27, %v6051_v5  ;;  %14705 = vmatpush3.bf16.msra.mxu0 %v17211_v41  ;;  %v17214_v27 = vld [vmem:[%s23162_s1 + $0xea0] ss:$12 sps:$4 sm:$0xff]   ;;  %v17222_v5 = vld [vmem:[%s23162_s1 + $0xdd0] ss:$12 sps:$4 sm:$0xff]  }
 0x43e   : > { %6674 = vmatpush2.bf16.msra.mxu1 %v17210_v8  ;;  %v6053_v7 = vpop.f32.mrf.mxu0  ;;  %14706 = vmatprep.subr.bf16.mxu0 %v17213_v18  ;;  %v17224_v41 = vld [vmem:[%s23162_s1 + $0xf80] ss:$12 sps:$4 sm:$0xff]  }
 0x43f   : > { %6675 = vmatprep.subr.bf16.mxu1 %v17212_v15  ;;  %v20995_v9 = vadd.f32 %v6095_v26, %v20761_v10  ;;  %v6097_v50 = vadd.f32 %v6096_v34, %v6053_v7 }
 0x440   : > { %v6055_v58 = vpop.f32.mrf.mxu0 }
 0x441   : > { %v14628_v60 = vpop.f32.mrf.mxu1  ;;  %v20998_v25 = vadd.f32 %v6097_v50, %v20769_v45  ;;  %v6099_v16 = vadd.f32 %v6098_v0, %v6055_v58  ;;  %14707 = vmatpush3.bf16.msra.mxu0 %v17215_v49  ;;  %v17217_v45 = vld [vmem:[%s23162_s1 + $0xea8] ss:$12 sps:$4 sm:$0xff]   ;;  %v15892_v49 = vld [vmem:[%s23164_s3 + $0x244] ss:$12 sps:$4 sm:$0xff]  }
 0x442   : > { %6676 = vmatpush2.bf16.msra.mxu1 %v17214_v27  ;;  %v6057_v10 = vpop.f32.mrf.mxu0  ;;  %14708 = vmatprep.subr.bf16.mxu0 %v17217_v45  ;;  %v17219_v0 = vld [vmem:[%s23162_s1 + $0xde8] ss:$12 sps:$4 sm:$0xff]   ;;  %v15887_v27 = vld [vmem:[%s23164_s3 + $0x258] ss:$12 sps:$4 sm:$0xff]  }
 0x443   : > { %v14629_v4 = vpop.f32.mrf.mxu1  ;;  %6677 = vmatprep.subr.bf16.mxu1 %v17216_v44  ;;  %v21013_v22 = vadd.f32 %v6099_v16, %v20784_v19  ;;  %v6101_v34 = vadd.f32 %v6100_v57, %v6057_v10  ;;  %v17220_v19 = vld [vmem:[%s23162_s1 + $0xe90] ss:$12 sps:$4 sm:$0xff]   ;;  %v17225_v50 = vld [vmem:[%s23162_s1 + $0xf68] ss:$12 sps:$4 sm:$0xff]   ;;  %v15890_v10 = vld [vmem:[%s23164_s3 + $0x240] ss:$12 sps:$4 sm:$0xff]  }
 0x444   : > { %v14630_v42 = vadd.f32 %v14629_v4, %v14628_v60  ;;  %v15884_v16 = vld [vmem:[%s23164_s3 + $0x270] ss:$12 sps:$4 sm:$0xff]   ;;  %v15895_v4 = vld [vmem:[%s23164_s3 + $0x22c] ss:$12 sps:$4 sm:$0xff]   ;;  %v15893_v44 = vld [vmem:[%s23164_s3 + $0x228] ss:$12 sps:$4 sm:$0xff]  }
 0x445   : > { %v14631_v39 = vpop.f32.mrf.mxu1  ;;  %v21016_v24 = vadd.f32 %v6101_v34, %v20787_v48  ;;  %14709 = vmatpush3.bf16.msra.mxu0 %v17219_v0  ;;  %v15898_v45 = vld [vmem:[%s23164_s3 + $0x214] ss:$12 sps:$4 sm:$0xff]   ;;  %v15896_v34 = vld [vmem:[%s23164_s3 + $0x210] ss:$12 sps:$4 sm:$0xff]   ;;  %v15907_v0 = vld [vmem:[%s23164_s3 + $0x34c] ss:$12 sps:$4 sm:$0xff]  }
 0x446   : > { %6678 = vmatpush2.bf16.msra.mxu1 %v17218_v20  ;;  %14710 = vmatprep.subr.bf16.mxu0 %v17220_v19  ;;  %v15902_v20 = vld [vmem:[%s23164_s3 + $0x1e0] ss:$12 sps:$4 sm:$0xff]   ;;  %v15905_v19 = vld [vmem:[%s23164_s3 + $0x348] ss:$12 sps:$4 sm:$0xff]  }
 0x447   : > { %v14632_v46 = vpop.f32.mrf.mxu1  ;;  %15064 = vmatprep.subr.bf16.mxu1 %v17291_v63 }
 0x448   : > { %v14633_v48 = vadd.f32 %v14632_v46, %v14631_v39  ;;  %v15899_v39 = vld [vmem:[%s23164_s3 + $0x1f8] ss:$12 sps:$4 sm:$0xff]  }
 0x449   : > { %6680 = vmatmul.mubr.bf16.vlgmr.msra.gmra.mxu1 %v6627_v21  ;;  %14711 = vmatpush3.bf16.msra.mxu0 %v17222_v5  ;;  %v15908_v5 = vld [vmem:[%s23164_s3 + $0x330] ss:$12 sps:$4 sm:$0xff]  }
 0x44a   : > { %15065 = vmatpush3.bf16.msra.mxu1 %v17221_v61  ;;  %15074 = vmatprep.mubr.msk.bf16.mxu1 %vm17292_vm1, %v17291_v63 }
 0x44b   : > { %15066 = vmatprep.subr.bf16.mxu1 %v17291_v63  ;;  %7321 = vmatprep.subr.bf16.mxu0 %v15883_v43 }
 0x44c   : > { %6766 = vmatmul.mubr.bf16.vlgmr.msra.gmra.mxu0 %v6627_v21  ;;  %v15904_v21 = vld [vmem:[%s23164_s3 + $0x1e4] ss:$12 sps:$4 sm:$0xff]  }
 0x44d   : > { %7322 = vmatpush1.bf16.msra.mxu0 %v15881_v13 }
 0x44e   : > { %15067 = vmatpush3.bf16.msra.mxu1 %v17223_v1  ;;  %v15913_v1 = vld [vmem:[%s23164_s3 + $0x31c] ss:$12 sps:$4 sm:$0xff]  }
 0x44f   : > { %15068 = vmatprep.subr.bf16.mxu1 %v17291_v63 }
 0x450   : > { %v6178_v26 = vpop.f32.mrf.mxu0 }
 0x451   : > { %v6179_v8 = vadd.f32 %v14630_v42, %v6178_v26  ;;  %v15901_v42 = vld [vmem:[%s23164_s3 + $0x1fc] ss:$12 sps:$4 sm:$0xff]  }
 0x452   : > { %15069 = vmatpush3.bf16.msra.mxu1 %v17224_v41  ;;  %v15034_v57 = vpop.f32.mrf.mxu0 }
 0x453   : > { %15070 = vmatprep.subr.bf16.mxu1 %v17291_v63  ;;  %v21046_v7 = vadd.f32 %v6179_v8, %v20835_v40  ;;  %v17226_v40 = vld [vmem:[%s23162_s1 + $0xf50] ss:$12 sps:$4 sm:$0xff]   ;;  %v15911_v8 = vld [vmem:[%s23164_s3 + $0x318] ss:$12 sps:$4 sm:$0xff]  }
 0x454   : > { %v6181_v15 = vpop.f32.mrf.mxu0  ;;  %v15916_v57 = vld [vmem:[%s23164_s3 + $0x304] ss:$12 sps:$4 sm:$0xff]  }
 0x455   : > { %v6182_v18 = vadd.f32 %v14633_v48, %v6181_v15  ;;  %v15910_v48 = vld [vmem:[%s23164_s3 + $0x334] ss:$12 sps:$4 sm:$0xff]  }
 0x456   : > { %15071 = vmatpush3.bf16.msra.mxu1 %v17225_v50  ;;  %v15035_v58 = vpop.f32.mrf.mxu0 }
 0x457   : > { %15072 = vmatprep.subr.bf16.mxu1 %v17291_v63  ;;  %v21053_v60 = vadd.f32 %v6182_v18, %v20848_v35  ;;  %v15886_v35 = vld [vmem:[%s23164_s3 + $0x274] ss:$12 sps:$4 sm:$0xff]  }
 0x458   : > { %7323 = vmatprep.subr.bf16.mxu0 %v15886_v35 }
 0x459   : > { %7324 = vmatpush1.bf16.msra.mxu0 %v15884_v16 }
 0x45a   : > { %15073 = vmatpush3.bf16.msra.mxu1 %v17226_v40  ;;  %v15914_v40 = vld [vmem:[%s23164_s3 + $0x300] ss:$12 sps:$4 sm:$0xff]  }
 0x45d   : > { %15075 = vmatmul.mubr.msk.bf16.vlgmr.msra.gmra.mxu1 %vm864_vm0, %v20915_v47  ;;  %v15889_v47 = vld [vmem:[%s23164_s3 + $0x25c] ss:$12 sps:$4 sm:$0xff]  }
 0x45e   : > { %7396 = vmatprep.mubr.bf16.mxu1 %v17290_v2  ;;  %7325 = vmatprep.subr.bf16.mxu0 %v15889_v47 }
 0x45f   : > { %7326 = vmatpush1.bf16.msra.mxu0 %v15887_v27 }
 0x460   : > { %7327 = vmatprep.subr.bf16.mxu0 %v15892_v49 }
 0x463   : > { %7328 = vmatpush1.bf16.msra.mxu0 %v15890_v10 }
 0x464   : > { %7329 = vmatprep.subr.bf16.mxu0 %v15895_v4  ;;  %v6304_v46 = vpop.f32.mrf.mxu0 }
 0x466   : > { %v6306_v61 = vpop.f32.mrf.mxu0 }
 0x467   : > { %7330 = vmatpush1.bf16.msra.mxu0 %v15893_v44 }
 0x468   : > { %7331 = vmatprep.subr.bf16.mxu0 %v15898_v45  ;;  %v6308_v26 = vpop.f32.mrf.mxu0  ;;  %v15919_v45 = vld [vmem:[%s23164_s3 + $0x2ec] ss:$12 sps:$4 sm:$0xff]  }
 0x46a   : > { %v6310_v18 = vpop.f32.mrf.mxu0 }
 0x46b   : > { %7332 = vmatpush1.bf16.msra.mxu0 %v15896_v34 }
 0x46c   : > { %7333 = vmatprep.subr.bf16.mxu0 %v15901_v42 }
 0x46f   : > { %7334 = vmatpush1.bf16.msra.mxu0 %v15899_v39 }
 0x470   : > { %7335 = vmatprep.subr.bf16.mxu0 %v15904_v21  ;;  %v15920_v21 = vld [vmem:[%s23164_s3 + $0x2d0] ss:$12 sps:$4 sm:$0xff]  }
 0x473   : > { %7336 = vmatpush1.bf16.msra.mxu0 %v15902_v20  ;;  %v15923_v20 = vld [vmem:[%s23164_s3 + $0x2b8] ss:$12 sps:$4 sm:$0xff]  }
 0x474   : > { %7337 = vmatprep.subr.bf16.mxu0 %v15907_v0 }
 0x477   : > { %7338 = vmatpush2.bf16.msra.mxu0 %v15905_v19 }
 0x478   : > { %7339 = vmatprep.subr.bf16.mxu0 %v15910_v48  ;;  %v15926_v48 = vld [vmem:[%s23164_s3 + $0x2a0] ss:$12 sps:$4 sm:$0xff]  }
 0x47b   : > { %7340 = vmatpush2.bf16.msra.mxu0 %v15908_v5 }
 0x47c   : > { %7341 = vmatprep.subr.bf16.mxu0 %v15913_v1 }
 0x47f   : > { %7342 = vmatpush2.bf16.msra.mxu0 %v15911_v8 }
 0x480   : > { %7343 = vmatprep.subr.bf16.mxu0 %v15916_v57 }
 0x481   : > { %v6261_v41 = vpop.f32.mrf.mxu1 }
 0x482   : > { %v6305_v15 = vadd.f32 %v6304_v46, %v6261_v41  ;;  %v15928_v46 = vld [vmem:[%s23164_s3 + $0x2a4] ss:$12 sps:$4 sm:$0xff]   ;;  %v15929_v41 = vld [vmem:[%s23164_s3 + $0x3a8] ss:$12 sps:$4 sm:$0xff]  }
 0x483   : > { %v6263_v50 = vpop.f32.mrf.mxu1  ;;  %7344 = vmatpush2.bf16.msra.mxu0 %v15914_v40  ;;  %v15941_v40 = vld [vmem:[%s23164_s3 + $0x360] ss:$12 sps:$4 sm:$0xff]  }
 0x484   : > { %v21131_v58 = vadd.f32 %v6305_v15, %v20995_v9  ;;  %v6307_v43 = vadd.f32 %v6306_v61, %v6263_v50  ;;  %v14656_v35 = vpop.f32.mrf.mxu0  ;;  %7345 = vmatprep.subr.bf16.mxu0 %v15919_v45  ;;  %v15939_v50 = vld [vmem:[%s23164_s3 + $0x37c] ss:$12 sps:$4 sm:$0xff]  }
 0x485   : > { %v6265_v13 = vpop.f32.mrf.mxu1 }
 0x486   : > { %v21137_v16 = vadd.f32 %v6307_v43, %v20998_v25  ;;  %v6309_v27 = vadd.f32 %v6308_v26, %v6265_v13  ;;  %v14657_v49 = vpop.f32.mrf.mxu0  ;;  %v15917_v25 = vld [vmem:[%s23164_s3 + $0x2e8] ss:$12 sps:$4 sm:$0xff]   ;;  %v15931_v26 = vld [vmem:[%s23164_s3 + $0x3ac] ss:$12 sps:$4 sm:$0xff]   ;;  %v15945_v13 = vld [vmem:[%s23164_s3 + $0x350] ss:$12 sps:$4 sm:$0xff]  }
 0x487   : > { %v6267_v47 = vpop.f32.mrf.mxu1  ;;  %v14658_v4 = vadd.f32 %v14657_v49, %v14656_v35  ;;  %7346 = vmatpush2.bf16.msra.mxu0 %v15917_v25  ;;  %7372 = vmatprep.subr.bf16.mxu1 %v15931_v26  ;;  %v15937_v43 = vld [vmem:[%s23164_s3 + $0x378] ss:$12 sps:$4 sm:$0xff]  }
 0x488   : > { %v21140_v10 = vadd.f32 %v6309_v27, %v21013_v22  ;;  %v6311_v9 = vadd.f32 %v6310_v18, %v6267_v47  ;;  %v14659_v44 = vpop.f32.mrf.mxu0  ;;  %v15922_v22 = vld [vmem:[%s23164_s3 + $0x2d4] ss:$12 sps:$4 sm:$0xff]   ;;  %7373 = vmatpush1.bf16.msra.mxu1 %v15929_v41  ;;  %v15933_v18 = vld [vmem:[%s23164_s3 + $0x390] ss:$12 sps:$4 sm:$0xff]  }
 0x489   : > { %7347 = vmatprep.subr.bf16.mxu0 %v15922_v22 }
 0x48a   : > { %v21146_v34 = vadd.f32 %v6311_v9, %v21016_v24  ;;  %v14660_v42 = vpop.f32.mrf.mxu0  ;;  %v15925_v24 = vld [vmem:[%s23164_s3 + $0x2bc] ss:$12 sps:$4 sm:$0xff]  }
 0x48b   : > { %v14661_v39 = vadd.f32 %v14660_v42, %v14659_v44  ;;  %7348 = vmatpush2.bf16.msra.mxu0 %v15920_v21 }
 0x48c   : > { %7349 = vmatprep.subr.bf16.mxu0 %v15925_v24 }
 0x48f   : > { %7350 = vmatpush2.bf16.msra.mxu0 %v15923_v20 }
 0x490   : > { %7351 = vmatprep.subr.bf16.mxu0 %v15928_v46 }
 0x493   : > { %7352 = vmatpush2.bf16.msra.mxu0 %v15926_v48 }
 0x494   : > { %15078 = vmatprep.subr.bf16.mxu0 %v17291_v63 }
 0x495   : > { %v6388_v0 = vpop.f32.mrf.mxu1 }
 0x496   : > { %v6389_v19 = vadd.f32 %v14658_v4, %v6388_v0 }
 0x497   : > { %v15048_v61 = vpop.f32.mrf.mxu1 }
 0x498   : > { %v6397_v5 = vadd.f32 %v6389_v19, %v21046_v7  ;;  %v15935_v7 = vld [vmem:[%s23164_s3 + $0x394] ss:$12 sps:$4 sm:$0xff]  }
 0x499   : > { %v6391_v1 = vpop.f32.mrf.mxu1  ;;  %7374 = vmatprep.subr.bf16.mxu1 %v15935_v7 }
 0x49a   : > { %v6392_v8 = vadd.f32 %v14661_v39, %v6391_v1  ;;  %7375 = vmatpush1.bf16.msra.mxu1 %v15933_v18 }
 0x49b   : > { %v15049_v57 = vpop.f32.mrf.mxu1  ;;  %7376 = vmatprep.subr.bf16.mxu1 %v15939_v50 }
 0x49c   : > { %v6400_v15 = vadd.f32 %v6392_v8, %v21053_v60  ;;  %v15943_v60 = vld [vmem:[%s23164_s3 + $0x364] ss:$12 sps:$4 sm:$0xff]  }
 0x49e   : > { %7377 = vmatpush1.bf16.msra.mxu1 %v15937_v43 }
 0x49f   : > { %7378 = vmatprep.subr.bf16.mxu1 %v15943_v60 }
 0x4a2   : > { %7379 = vmatpush1.bf16.msra.mxu1 %v15941_v40  ;;  %v21203_v40 = vsub.s32 1, %v19772_v53  ;;  %v16239_v53 = vld [vmem:[%s23166_s5 + $0x64] ss:$8 sps:$4 sm:$0xff]  }
 0x4a3   : > { %14724 = vmatprep.subr.bf16.mxu1 %v15945_v13 }
 0x4a9   : > { %v6514_v35 = vpop.f32.mrf.mxu1 }
 0x4ab   : > { %v6516_v27 = vpop.f32.mrf.mxu1 }
 0x4ad   : > { %v6518_v47 = vpop.f32.mrf.mxu1 }
 0x4af   : > { %v6520_v49 = vpop.f32.mrf.mxu1 }
 0x4c4   : > { %v6471_v9 = vpop.f32.mrf.mxu0 }
 0x4c5   : > { %v6515_v41 = vadd.f32 %v6514_v35, %v6471_v9 }
 0x4c6   : > { %v6473_v44 = vpop.f32.mrf.mxu0 }
 0x4c7   : > { %v6517_v7 = vadd.f32 %v6516_v27, %v6473_v44  ;;  %v6605_v50 = vadd.f32 %v6515_v41, %v21131_v58  ;;  %v17227_v58 = vld [vmem:[%s23163_s2] sm:$0x7] }
 0x4c8   : > { %v6475_v25 = vpop.f32.mrf.mxu0 }
 0x4c9   : > { %v14684_v4 = vpop.f32.mrf.mxu1  ;;  %v6519_v43 = vadd.f32 %v6518_v47, %v6475_v25  ;;  %v21211_v47 = vrot.slane %v17227_v58, %v21203_v40 }
 0x4ca   : > { %v6477_v39 = vpop.f32.mrf.mxu0 }
 0x4cb   : > { %v14685_v45 = vpop.f32.mrf.mxu1  ;;  %v6608_v35 = vadd.f32 %v6519_v43, %v21140_v10 }
 0x4cc   : > { %v14686_v22 = vadd.f32 %v14685_v45, %v14684_v4  ;;  %v6521_v45 = vadd.f32 %v6520_v49, %v6477_v39 }
 0x4cd   : > { %v14687_v42 = vpop.f32.mrf.mxu1 }
 0x4cf   : > { %v14688_v21 = vpop.f32.mrf.mxu1 }
 0x4d0   : > { %v14689_v46 = vadd.f32 %v14688_v21, %v14687_v42  ;;  %v6609_v21 = vadd.f32 %v6521_v45, %v21146_v34 }
 0x4d8   : > { %v6598_v24 = vpop.f32.mrf.mxu0 }
 0x4d9   : > { %v6599_v20 = vadd.f32 %v14686_v22, %v6598_v24 }
 0x4da   : > { %v15062_v0 = vpop.f32.mrf.mxu0 }
 0x4db   : > { %v6607_v19 = vadd.f32 %v6599_v20, %v6397_v5  ;;  %v6606_v5 = vadd.f32 %v6517_v7, %v21137_v16  ;;  %v15932_v7 = vld [vmem:[%s23164_s3 + $0x3b0] ss:$12 sps:$4 sm:$0xff]  }
 0x4dc   : > { %v6601_v48 = vpop.f32.mrf.mxu0 }
 0x4dd   : > { %v6602_v61 = vadd.f32 %v14689_v46, %v6601_v48 }
 0x4de   : > { %v15063_v1 = vpop.f32.mrf.mxu0 }
 0x4df   : > { %v21199_v26 = vadd.f32 %v6602_v61, %v6400_v15 }
 0x4ec   : > { %v6724_v8 = vpop.f32.mrf.mxu0 }
 0x4ee   : > { %v6726_v57 = vpop.f32.mrf.mxu0 }
 0x4f0   : > { %v6728_v13 = vpop.f32.mrf.mxu0 }
 0x4f2   : > { %v6730_v44 = vpop.f32.mrf.mxu0 }
 0x509   : > { %v6681_v18 = vpop.f32.mrf.mxu1 }
 0x50a   : > { %v6725_v60 = vadd.f32 %v6724_v8, %v6681_v18 }
 0x50b   : > { %v6683_v4 = vpop.f32.mrf.mxu1 }
 0x50c   : > { %v6815_v42 = vadd.f32 %v6725_v60, %v6605_v50  ;;  %v6727_v15 = vadd.f32 %v6726_v57, %v6683_v4  ;;  %v14712_v24 = vpop.f32.mrf.mxu0  ;;  %v15936_v50 = vld [vmem:[%s23164_s3 + $0x398] ss:$12 sps:$4 sm:$0xff]  }
 0x50d   : > { %v6685_v22 = vpop.f32.mrf.mxu1 }
 0x50e   : > { %v6816_v9 = vadd.f32 %v6727_v15, %v6606_v5  ;;  %v6729_v27 = vadd.f32 %v6728_v13, %v6685_v22  ;;  %v6821_v16 = vadd.f32 %v6815_v42, %v19811_v12  ;;  %v14713_v1 = vpop.f32.mrf.mxu0  ;;  %v952_v13 = vadd.f32 %v18182_v17, %v18431_v59  ;;  %v15940_v22 = vld [vmem:[%s23164_s3 + $0x380] ss:$12 sps:$4 sm:$0xff]  }
 0x50f   : > { %v6687_v25 = vpop.f32.mrf.mxu1  ;;  %v2704_v59 = vadd.f32 %v18892_v29, %v18947_v28 }
 0x510   : > { %v6818_v49 = vadd.f32 %v6729_v27, %v6608_v35  ;;  %v6731_v39 = vadd.f32 %v6730_v44, %v6687_v25  ;;  %v6822_v10 = vadd.f32 %v6816_v9, %v21211_v47  ;;  %v6827_v46 = vmax.f32 %v6821_v16, 0.0  ;;  %v14715_v18 = vpop.f32.mrf.mxu0  ;;  %v15944_v44 = vld [vmem:[%s23164_s3 + $0x368] ss:$12 sps:$4 sm:$0xff]  }
 0x511   : > { %v1431_v45 = vadd.f32 %v18643_v23, %v952_v13  ;;  %v2086_v9 = vadd.f32 %v18660_v36, %v18715_v3  ;;  %v15948_v36 = vld [vmem:[%s23164_s3 + $0x1cc] ss:$12 sps:$4 sm:$0xff]   ;;  %v15946_v16 = vld [vmem:[%s23164_s3 + $0x1c8] ss:$12 sps:$4 sm:$0xff]  }
 0x512   : > { %v6824_v20 = vadd.f32 %v6818_v49, %v19811_v12  ;;  %v6819_v0 = vadd.f32 %v6731_v39, %v6609_v21  ;;  %v6828_v8 = vmax.f32 %v6822_v10, 0.0  ;;  %v14714_v12 = vadd.f32 %v14713_v1, %v14712_v24  ;;  %v14716_v43 = vpop.f32.mrf.mxu0  ;;  %v15949_v49 = vld [vmem:[%s23164_s3 + $0x290] ss:$12 sps:$4 sm:$0xff]   ;;  %v15970_v13 = vld [vmem:[%s23164_s3 + $0x158] ss:$12 sps:$4 sm:$0xff]  }
 0x513   : > { %v14717_v42 = vadd.f32 %v14716_v43, %v14715_v18  ;;  %v1474_v17 = vadd.f32 %v18417_v52, %v1431_v45  ;;  %v3322_v52 = vadd.f32 %v19121_v38, %v19164_v33  ;;  %v4558_v33 = vadd.f32 %v19561_v55, %v19619_v37  ;;  %v15951_v55 = vld [vmem:[%s23164_s3 + $0x1b0] ss:$12 sps:$4 sm:$0xff]   ;;  %v15954_v37 = vld [vmem:[%s23164_s3 + $0x278] ss:$12 sps:$4 sm:$0xff]  }
 0x514   : > { %v6830_v48 = vmax.f32 %v6824_v20, 0.0  ;;  %v6825_v61 = vadd.f32 %v6819_v0, %v21211_v47  ;;  %v5176_v24 = vadd.f32 %v19800_v62, %v19862_v11  ;;  %v15955_v62 = vld [vmem:[%s23164_s3 + $0x320] ss:$12 sps:$4 sm:$0xff]   ;;  %v15958_v11 = vld [vmem:[%s23164_s3 + $0x19c] ss:$12 sps:$4 sm:$0xff]  }
 0x515   : > { %v2174_v3 = vadd.f32 %v2086_v9, %v1474_v17  ;;  %v15956_v0 = vld [vmem:[%s23164_s3 + $0x198] ss:$12 sps:$4 sm:$0xff]   ;;  %v15965_v18 = vld [vmem:[%s23164_s3 + $0x2f0] ss:$12 sps:$4 sm:$0xff]   ;;  %v15977_v9 = vld [vmem:[%s23164_s3 + $0x2a8] ss:$12 sps:$4 sm:$0xff]  }
 0x516   : > { %v21218_v41 = vpack.c.bf16 %v6830_v48, %v6827_v46  ;;  %v6831_v57 = vmax.f32 %v6825_v61, 0.0  ;;  %v15959_v46 = vld [vmem:[%s23164_s3 + $0x260] ss:$12 sps:$4 sm:$0xff]   ;;  %v15960_v48 = vld [vmem:[%s23164_s3 + $0x308] ss:$12 sps:$4 sm:$0xff]  }
 0x517   : > { %v2792_v28 = vadd.f32 %v2704_v59, %v2174_v3  ;;  %v15963_v61 = vld [vmem:[%s23164_s3 + $0x184] ss:$12 sps:$4 sm:$0xff]   ;;  %v15980_v17 = vld [vmem:[%s23164_s3 + $0x68] ss:$12 sps:$4 sm:$0xff]   ;;  %v15983_v59 = vld [vmem:[%s23164_s3 + $0xac] ss:$12 sps:$4 sm:$0xff]  }
 0x518   : > { %v21220_v34 = vpack.c.bf16 %v6831_v57, %v6828_v8  ;;  %v15961_v8 = vld [vmem:[%s23164_s3 + $0x180] ss:$12 sps:$4 sm:$0xff]   ;;  %v15964_v57 = vld [vmem:[%s23164_s3 + $0x248] ss:$12 sps:$4 sm:$0xff]   ;;  %v15967_v43 = vld [vmem:[%s23164_s3 + $0x230] ss:$12 sps:$4 sm:$0xff]  }
 0x519   : > { %v3410_v38 = vadd.f32 %v3322_v52, %v2792_v28  ;;  %v15972_v45 = vld [vmem:[%s23164_s3 + $0x98] ss:$12 sps:$4 sm:$0xff]   ;;  %v15986_v52 = vld [vmem:[%s23164_s3 + $0x90] ss:$12 sps:$4 sm:$0xff]  }
 0x51a   : > { %7353 = vmatprep.mubr.bf16.mxu0 %v21220_v34  ;;  %v15989_v3 = vld [vmem:[%s23164_s3 + $0xf8] ss:$12 sps:$4 sm:$0xff]   ;;  %v15993_v28 = vld [vmem:[%s23164_s3 + $0x7c] ss:$12 sps:$4 sm:$0xff]  }
 0x51b   : > { %7354 = vmatmul.mubr.bf16.vlgmr.msra.gmra.mxu0 %v21218_v41 }
 0x51c   : > { %15079 = vmatpush3.bf16.msra.mxu0 %v15932_v7  ;;  %15086 = vmatprep.mubr.msk.bf16.mxu0 %vm17292_vm1, %v17291_v63  ;;  %v5283_v7 = vadd.f32 %v21211_v47, %v19814_v14  ;;  %v15968_v14 = vld [vmem:[%s23164_s3 + $0xb0] ss:$12 sps:$4 sm:$0xff]  }
 0x51d   : > { %v6808_v60 = vpop.f32.mrf.mxu1  ;;  %15080 = vmatprep.subr.bf16.mxu0 %v17291_v63 }
 0x51e   : > { %v6809_v4 = vadd.f32 %v14714_v12, %v6808_v60  ;;  %v15966_v12 = vld [vmem:[%s23164_s3 + $0x170] ss:$12 sps:$4 sm:$0xff]   ;;  %v15969_v60 = vld [vmem:[%s23164_s3 + $0x2d8] ss:$12 sps:$4 sm:$0xff]  }
 0x51f   : > { %v15076_v5 = vpop.f32.mrf.mxu1 }
 0x520   : > { %v6817_v15 = vadd.f32 %v6809_v4, %v6607_v19  ;;  %15081 = vmatpush3.bf16.msra.mxu0 %v15936_v50  ;;  %v15971_v5 = vld [vmem:[%s23164_s3 + $0x218] ss:$12 sps:$4 sm:$0xff]  }
 0x521   : > { %v6811_v35 = vpop.f32.mrf.mxu1  ;;  %15082 = vmatprep.subr.bf16.mxu0 %v17291_v63 }
 0x522   : > { %v6812_v27 = vadd.f32 %v14717_v42, %v6811_v35  ;;  %v6823_v23 = vadd.f32 %v6817_v15, %v19887_v6  ;;  %v15973_v42 = vld [vmem:[%s23164_s3 + $0x2c0] ss:$12 sps:$4 sm:$0xff]  }
 0x523   : > { %v15077_v58 = vpop.f32.mrf.mxu1  ;;  %v15974_v15 = vld [vmem:[%s23164_s3 + $0x140] ss:$12 sps:$4 sm:$0xff]  }
 0x524   : > { %v6820_v19 = vadd.f32 %v6812_v27, %v21199_v26  ;;  %15083 = vmatpush3.bf16.msra.mxu0 %v15940_v22  ;;  %v3940_v26 = vadd.f32 %v19332_v56, %v19390_v32  ;;  %v6829_v25 = vmax.f32 %v6823_v23, 0.0  ;;  %v15950_v56 = vld [vmem:[%s23164_s3 + $0x338] ss:$12 sps:$4 sm:$0xff]   ;;  %v15953_v32 = vld [vmem:[%s23164_s3 + $0x1b4] ss:$12 sps:$4 sm:$0xff]  }
 0x525   : > { %15084 = vmatprep.subr.bf16.mxu0 %v17291_v63  ;;  %v15975_v22 = vld [vmem:[%s23164_s3 + $0x200] ss:$12 sps:$4 sm:$0xff]   ;;  %v15978_v27 = vld [vmem:[%s23164_s3 + $0x128] ss:$12 sps:$4 sm:$0xff]   ;;  %v15984_v23 = vld [vmem:[%s23164_s3 + $0x110] ss:$12 sps:$4 sm:$0xff]  }
 0x526   : > { %v6826_v29 = vadd.f32 %v6820_v19, %v19887_v6  ;;  %v4028_v39 = vadd.f32 %v3940_v26, %v3410_v38  ;;  %v15976_v35 = vld [vmem:[%s23164_s3 + $0x80] ss:$12 sps:$4 sm:$0xff]   ;;  %v15979_v58 = vld [vmem:[%s23164_s3 + $0x1e8] ss:$12 sps:$4 sm:$0xff]  }
 0x527   : > { %v15981_v19 = vld [vmem:[%s23164_s3 + $0xa8] ss:$12 sps:$4 sm:$0xff]   ;;  %v15994_v26 = vld [vmem:[%s23164_s3 + $0xe0] ss:$12 sps:$4 sm:$0xff]  }
 0x528   : > { %v6832_v21 = vmax.f32 %v6826_v29, 0.0  ;;  %15085 = vmatpush3.bf16.msra.mxu0 %v15944_v44  ;;  %v4646_v10 = vadd.f32 %v4558_v33, %v4028_v39  ;;  %v15985_v44 = vld [vmem:[%s23164_s3 + $0x50] ss:$12 sps:$4 sm:$0xff]   ;;  %v15990_v29 = vld [vmem:[%s23164_s3 + $0x38] ss:$12 sps:$4 sm:$0xff]  }
 0x529   : > { %7863 = vmatprep.subr.bf16.mxu0 %v15948_v36  ;;  %v15988_v36 = vld [vmem:[%s23164_s3 + $0x94] ss:$12 sps:$4 sm:$0xff]   ;;  %v16004_v39 = vld [vmem:[%s23164_s3 + $0x1d0] ss:$12 sps:$4 sm:$0xff]  }
 0x52a   : > { %v21267_v6 = vpack.c.bf16 %v6832_v21, %v6829_v25  ;;  %v5264_v20 = vadd.f32 %v5176_v24, %v4646_v10  ;;  %v15991_v25 = vld [vmem:[%s23164_s3 + $0x78] ss:$12 sps:$4 sm:$0xff]   ;;  %v15995_v21 = vld [vmem:[%s23164_s3 + $0x20] ss:$12 sps:$4 sm:$0xff]   ;;  %v16000_v33 = vld [vmem:[%s23164_s3 + $0x8] ss:$12 sps:$4 sm:$0xff]  }
 0x52b   : > { %v15996_v38 = vld [vmem:[%s23164_s3 + $0x60] ss:$12 sps:$4 sm:$0xff]   ;;  %v16011_v10 = vld [vmem:[%s23164_s3 + $0x1c] ss:$12 sps:$4 sm:$0xff]  }
 0x52c   : > { %13576 = vmatmul.mubr.msk.bf16.vlgmr.msra.gmra.mxu1 %vm7317_vm2, %v21267_v6  ;;  %15087 = vmatmul.mubr.msk.bf16.vlgmr.msra.gmra.mxu0 %vm7317_vm2, %v21267_v6  ;;  %v5286_v1 = vadd.f32 %v21211_v47, %v5264_v20  ;;  %v5289_v47 = vmax.f32 %v5283_v7, 0.0  ;;  %v16007_v24 = vld [vmem:[%s23164_s3 + $0x34] ss:$12 sps:$4 sm:$0xff]   ;;  %v16015_v20 = vld [vmem:[%s23164_s3 + $0x4] ss:$12 sps:$4 sm:$0xff]  }
 0x52d   : > { %14725 = vmatpush3.bf16.msra.mxu1 %v15949_v49  ;;  %7864 = vmatpush1.bf16.msra.mxu0 %v15946_v16  ;;  %v15998_v16 = vld [vmem:[%s23164_s3 + $0x64] ss:$12 sps:$4 sm:$0xff]   ;;  %v15999_v49 = vld [vmem:[%s23164_s3 + $0xc8] ss:$12 sps:$4 sm:$0xff]  }
 0x52e   : > { %7439 = vmatprep.mubr.bf16.mxu1 %v21220_v34  ;;  %14726 = vmatprep.subr.bf16.mxu1 %v15950_v56  ;;  %v5292_v50 = vmax.f32 %v5286_v1, 0.0  ;;  %v16003_v56 = vld [vmem:[%s23164_s3 + $0x4c] ss:$12 sps:$4 sm:$0xff]   ;;  %v16017_v1 = vld [vmem:[%s23164_s3 + $0x168] ss:$12 sps:$4 sm:$0xff]  }
 0x52f   : > { %7865 = vmatprep.subr.bf16.mxu0 %v15953_v32  ;;  %7887 = vmatprep.mubr.bf16.mxu0 %v17290_v2  ;;  %v16001_v32 = vld [vmem:[%s23164_s3 + $0x48] ss:$12 sps:$4 sm:$0xff]  }
 0x530   : > { %v21336_v4 = vpack.c.bf16 %v5292_v50, %v5289_v47  ;;  %v16028_v7 = vld [vmem:[%s23164_s3 + $0x574] ss:$12 sps:$4 sm:$0xff]   ;;  %v16031_v50 = vld [vmem:[%s23164_s3 + $0x13c] ss:$12 sps:$4 sm:$0xff]   ;;  %v16032_v47 = vld [vmem:[%s23164_s3 + $0x558] ss:$12 sps:$4 sm:$0xff]  }
 0x531   : > { %14727 = vmatpush3.bf16.msra.mxu1 %v15954_v37  ;;  %7866 = vmatpush1.bf16.msra.mxu0 %v15951_v55  ;;  %v16005_v55 = vld [vmem:[%s23164_s3 + $0x30] ss:$12 sps:$4 sm:$0xff]   ;;  %v16008_v37 = vld [vmem:[%s23164_s3 + $0x1b8] ss:$12 sps:$4 sm:$0xff]  }
 0x532   : > { %14728 = vmatprep.subr.bf16.mxu1 %v15955_v62  ;;  %7867 = vmatprep.subr.bf16.mxu0 %v15958_v11  ;;  %v16009_v62 = vld [vmem:[%s23164_s3 + $0x18] ss:$12 sps:$4 sm:$0xff]   ;;  %v16012_v11 = vld [vmem:[%s23164_s3 + $0x1a0] ss:$12 sps:$4 sm:$0xff]  }
 0x535   : > { %14729 = vmatpush3.bf16.msra.mxu1 %v15959_v46  ;;  %7868 = vmatpush1.bf16.msra.mxu0 %v15956_v0  ;;  %v16013_v0 = vld [vmem:[%s23164_s3] ss:$12 sps:$4 sm:$0xff]   ;;  %v16016_v46 = vld [vmem:[%s23164_s3 + $0x188] ss:$12 sps:$4 sm:$0xff]  }
 0x536   : > { %14730 = vmatprep.subr.bf16.mxu1 %v15960_v48  ;;  %7869 = vmatprep.subr.bf16.mxu0 %v15963_v61  ;;  %v16019_v48 = vld [vmem:[%s23164_s3 + $0x16c] ss:$12 sps:$4 sm:$0xff]  }
 0x537   : > { %v16022_v61 = vld [vmem:[%s23164_s3 + $0x58c] ss:$12 sps:$4 sm:$0xff]  }
 0x539   : > { %14731 = vmatpush3.bf16.msra.mxu1 %v15964_v57  ;;  %7870 = vmatpush1.bf16.msra.mxu0 %v15961_v8  ;;  %v16020_v8 = vld [vmem:[%s23164_s3 + $0x588] ss:$12 sps:$4 sm:$0xff]  }
 0x53a   : > { %14732 = vmatprep.subr.bf16.mxu1 %v15965_v18  ;;  %14751 = vmatprep.subr.bf16.mxu0 %v15966_v12  ;;  %v16025_v57 = vld [vmem:[%s23164_s3 + $0x154] ss:$12 sps:$4 sm:$0xff]   ;;  %v16023_v18 = vld [vmem:[%s23164_s3 + $0x150] ss:$12 sps:$4 sm:$0xff]  }
 0x53b   : > { %v16026_v12 = vld [vmem:[%s23164_s3 + $0x570] ss:$12 sps:$4 sm:$0xff]  }
 0x53c   : > { %13638 = vmatmul.mubr.msk.bf16.vlgmr.msra.gmra.mxu0 %vm7317_vm2, %v19916_v31 }
 0x53d   : > { %14733 = vmatpush3.bf16.msra.mxu1 %v15967_v43  ;;  %14752 = vmatpush3.bf16.msra.mxu0 %v15968_v14  ;;  %v16034_v43 = vld [vmem:[%s23164_s3 + $0x55c] ss:$12 sps:$4 sm:$0xff]   ;;  %v16029_v14 = vld [vmem:[%s23164_s3 + $0x138] ss:$12 sps:$4 sm:$0xff]  }
 0x53e   : > { %7930 = vmatprep.mubr.bf16.mxu0 %v21336_v4  ;;  %14734 = vmatprep.subr.bf16.mxu1 %v15969_v60  ;;  %v16037_v60 = vld [vmem:[%s23164_s3 + $0x124] ss:$12 sps:$4 sm:$0xff]  }
 0x53f   : > { %14753 = vmatprep.subr.bf16.mxu0 %v15970_v13  ;;  %v8077_v13 = vshll.u32 %v19916_v31, 16 }
 0x541   : > { %14735 = vmatpush3.bf16.msra.mxu1 %v15971_v5  ;;  %14754 = vmatpush3.bf16.msra.mxu0 %v15972_v45  ;;  %v16040_v5 = vld [vmem:[%s23164_s3 + $0x544] ss:$12 sps:$4 sm:$0xff]   ;;  %v8071_v45 = vshll.u32 %v21336_v4, 16 }
 0x542   : > { %14736 = vmatprep.subr.bf16.mxu1 %v15973_v42  ;;  %14755 = vmatprep.subr.bf16.mxu0 %v15974_v15  ;;  %v16035_v42 = vld [vmem:[%s23164_s3 + $0x120] ss:$12 sps:$4 sm:$0xff]  }
 0x543   : > { %v16038_v15 = vld [vmem:[%s23164_s3 + $0x540] ss:$12 sps:$4 sm:$0xff]  }
 0x545   : > { %14737 = vmatpush3.bf16.msra.mxu1 %v15975_v22  ;;  %14756 = vmatpush3.bf16.msra.mxu0 %v15976_v35  ;;  %v16043_v22 = vld [vmem:[%s23164_s3 + $0x10c] ss:$12 sps:$4 sm:$0xff]   ;;  %v8079_v35 = vrot.slane %v8077_v13, 1 }
 0x546   : > { %14738 = vmatprep.subr.bf16.mxu1 %v15977_v9  ;;  %14757 = vmatprep.subr.bf16.mxu0 %v15978_v27  ;;  %v16044_v9 = vld [vmem:[%s23164_s3 + $0x530] ss:$12 sps:$4 sm:$0xff]   ;;  %v8073_v27 = vrot.slane %v8071_v45, 1  ;;  %v16092_v13 = vld [vmem:[%s23164_s3 + $0x560] ss:$12 sps:$4 sm:$0xff]  }
 0x547   : > { %v16093_v45 = vld [vmem:[%s23164_s3 + $0x3c0] ss:$12 sps:$4 sm:$0xff]  }
 0x549   : > { %14739 = vmatpush3.bf16.msra.mxu1 %v15979_v58  ;;  %14758 = vmatpush3.bf16.msra.mxu0 %v15980_v17  ;;  %v8075_v58 = vshrl.u32 %v19916_v31, 16  ;;  %v16041_v17 = vld [vmem:[%s23164_s3 + $0x108] ss:$12 sps:$4 sm:$0xff]  }
 0x54a   : > { %7812 = vmatprep.subr.bf16.mxu1 %v15983_v59  ;;  %14759 = vmatprep.subr.bf16.mxu0 %v15984_v23  ;;  %v16045_v59 = vld [vmem:[%s23164_s3 + $0x470] ss:$12 sps:$4 sm:$0xff]   ;;  %v8069_v23 = vshrl.u32 %v21336_v4, 16 }
 0x54c   : > { %7440 = vmatmul.mubr.bf16.vlgmr.msra.gmra.mxu1 %v21218_v41 }
 0x54d   : > { %7813 = vmatpush1.bf16.msra.mxu1 %v15981_v19  ;;  %7844 = vmatprep.mubr.bf16.mxu1 %v21336_v4  ;;  %v21529_v19 = vor.u32 %v8079_v35, %v8075_v58  ;;  %v16046_v4 = vld [vmem:[%s23164_s3 + $0xf0] ss:$12 sps:$4 sm:$0xff]   ;;  %v16097_v35 = vld [vmem:[%s23164_s3 + $0x528] ss:$12 sps:$4 sm:$0xff]  }
 0x54e   : > { %14760 = vmatpush3.bf16.msra.mxu0 %v15985_v44  ;;  %7814 = vmatprep.subr.bf16.mxu1 %v15988_v36  ;;  %v16049_v44 = vld [vmem:[%s23164_s3 + $0x518] ss:$12 sps:$4 sm:$0xff]   ;;  %v8074_v36 = vor.u32 %v8073_v27, %v8069_v23  ;;  %v16105_v27 = vld [vmem:[%s23164_s3 + $0x514] ss:$12 sps:$4 sm:$0xff]   ;;  %v16111_v23 = vld [vmem:[%s23164_s3 + $0x4fc] ss:$12 sps:$4 sm:$0xff]  }
 0x54f   : > { %14761 = vmatprep.subr.bf16.mxu0 %v15989_v3  ;;  %v16050_v3 = vld [vmem:[%s23164_s3 + $0x458] ss:$12 sps:$4 sm:$0xff]   ;;  %v16108_v58 = vld [vmem:[%s23164_s3 + $0x754] ss:$12 sps:$4 sm:$0xff]  }
 0x551   : > { %7815 = vmatpush1.bf16.msra.mxu1 %v15986_v52  ;;  %v16053_v52 = vld [vmem:[%s23164_s3 + $0xdc] ss:$12 sps:$4 sm:$0xff]  }
 0x552   : > { %14762 = vmatpush3.bf16.msra.mxu0 %v15990_v29  ;;  %7816 = vmatprep.subr.bf16.mxu1 %v15993_v28  ;;  %v16054_v29 = vld [vmem:[%s23164_s3 + $0x500] ss:$12 sps:$4 sm:$0xff]   ;;  %v16051_v28 = vld [vmem:[%s23164_s3 + $0xd8] ss:$12 sps:$4 sm:$0xff]  }
 0x553   : > { %14763 = vmatprep.subr.bf16.mxu0 %v15994_v26  ;;  %v16055_v26 = vld [vmem:[%s23164_s3 + $0x440] ss:$12 sps:$4 sm:$0xff]  }
 0x555   : > { %7817 = vmatpush1.bf16.msra.mxu1 %v15991_v25  ;;  %v16058_v25 = vld [vmem:[%s23164_s3 + $0xc4] ss:$12 sps:$4 sm:$0xff]  }
 0x556   : > { %14764 = vmatpush3.bf16.msra.mxu0 %v15995_v21  ;;  %7818 = vmatprep.subr.bf16.mxu1 %v15998_v16  ;;  %v16059_v21 = vld [vmem:[%s23164_s3 + $0x4e8] ss:$12 sps:$4 sm:$0xff]   ;;  %v16056_v16 = vld [vmem:[%s23164_s3 + $0xc0] ss:$12 sps:$4 sm:$0xff]  }
 0x557   : > { %14765 = vmatprep.subr.bf16.mxu0 %v15999_v49  ;;  %v16060_v49 = vld [vmem:[%s23164_s3 + $0x428] ss:$12 sps:$4 sm:$0xff]  }
 0x559   : > { %7819 = vmatpush1.bf16.msra.mxu1 %v15996_v38  ;;  %v16063_v38 = vld [vmem:[%s23164_s3 + $0x46c] ss:$12 sps:$4 sm:$0xff]  }
 0x55a   : > { %14766 = vmatpush3.bf16.msra.mxu0 %v16000_v33  ;;  %7820 = vmatprep.subr.bf16.mxu1 %v16003_v56  ;;  %v16064_v33 = vld [vmem:[%s23164_s3 + $0x4d0] ss:$12 sps:$4 sm:$0xff]   ;;  %v16061_v56 = vld [vmem:[%s23164_s3 + $0x468] ss:$12 sps:$4 sm:$0xff]  }
 0x55b   : > { %15090 = vmatprep.subr.bf16.mxu0 %v17291_v63 }
 0x55d   : > { %7931 = vmatmul.mubr.bf16.vlgmr.msra.gmra.mxu0 %v19842_v30  ;;  %7821 = vmatpush1.bf16.msra.mxu1 %v16001_v32  ;;  %v16065_v32 = vld [vmem:[%s23164_s3 + $0x410] ss:$12 sps:$4 sm:$0xff]  }
 0x55e   : > { %15091 = vmatpush3.bf16.msra.mxu0 %v16004_v39  ;;  %7822 = vmatprep.subr.bf16.mxu1 %v16007_v24  ;;  %v16068_v39 = vld [vmem:[%s23164_s3 + $0x454] ss:$12 sps:$4 sm:$0xff]   ;;  %v16069_v24 = vld [vmem:[%s23164_s3 + $0x4b8] ss:$12 sps:$4 sm:$0xff]  }
 0x55f   : > { %15092 = vmatprep.subr.bf16.mxu0 %v17291_v63  ;;  %15098 = vmatprep.mubr.msk.bf16.mxu0 %vm17292_vm1, %v17291_v63 }
 0x561   : > { %7823 = vmatpush1.bf16.msra.mxu1 %v16005_v55  ;;  %v16066_v55 = vld [vmem:[%s23164_s3 + $0x450] ss:$12 sps:$4 sm:$0xff]  }
 0x562   : > { %15093 = vmatpush3.bf16.msra.mxu0 %v16008_v37  ;;  %7824 = vmatprep.subr.bf16.mxu1 %v16011_v10  ;;  %v16070_v37 = vld [vmem:[%s23164_s3 + $0x3f8] ss:$12 sps:$4 sm:$0xff]   ;;  %v16073_v10 = vld [vmem:[%s23164_s3 + $0x43c] ss:$12 sps:$4 sm:$0xff]  }
 0x563   : > { %15094 = vmatprep.subr.bf16.mxu0 %v17291_v63 }
 0x565   : > { %7825 = vmatpush1.bf16.msra.mxu1 %v16009_v62  ;;  %v16074_v62 = vld [vmem:[%s23164_s3 + $0x4a0] ss:$12 sps:$4 sm:$0xff]  }
 0x566   : > { %15095 = vmatpush3.bf16.msra.mxu0 %v16012_v11  ;;  %7826 = vmatprep.subr.bf16.mxu1 %v16015_v20  ;;  %v16071_v11 = vld [vmem:[%s23164_s3 + $0x438] ss:$12 sps:$4 sm:$0xff]   ;;  %v16075_v20 = vld [vmem:[%s23164_s3 + $0x3e0] ss:$12 sps:$4 sm:$0xff]  }
 0x567   : > { %15096 = vmatprep.subr.bf16.mxu0 %v17291_v63 }
 0x569   : > { %7827 = vmatpush1.bf16.msra.mxu1 %v16013_v0  ;;  %v16078_v0 = vld [vmem:[%s23164_s3 + $0x424] ss:$12 sps:$4 sm:$0xff]  }
 0x56a   : > { %15097 = vmatpush3.bf16.msra.mxu0 %v16016_v46  ;;  %7828 = vmatprep.subr.bf16.mxu1 %v16019_v48  ;;  %v16079_v46 = vld [vmem:[%s23164_s3 + $0x488] ss:$12 sps:$4 sm:$0xff]   ;;  %v8064_v48 = vshll.u32 %v19842_v30, 16 }
 0x56b   : > { %8457 = vmatprep.subr.bf16.mxu0 %v16022_v61  ;;  %v16076_v61 = vld [vmem:[%s23164_s3 + $0x420] ss:$12 sps:$4 sm:$0xff]  }
 0x56d   : > { %15099 = vmatmul.mubr.msk.bf16.vlgmr.msra.gmra.mxu0 %vm7317_vm2, %v19916_v31  ;;  %7829 = vmatpush2.bf16.msra.mxu1 %v16017_v1  ;;  %v16048_v31 = vld [vmem:[%s23164_s3 + $0xf4] ss:$12 sps:$4 sm:$0xff]  }
 0x56e   : > { %8458 = vmatpush1.bf16.msra.mxu0 %v16020_v8  ;;  %7830 = vmatprep.subr.bf16.mxu1 %v16025_v57  ;;  %v16080_v1 = vld [vmem:[%s23164_s3 + $0x3c8] ss:$12 sps:$4 sm:$0xff]   ;;  %v16083_v8 = vld [vmem:[%s23164_s3 + $0x40c] ss:$12 sps:$4 sm:$0xff]   ;;  %v8066_v57 = vrot.slane %v8064_v48, 1 }
 0x56f   : > { %8459 = vmatprep.subr.bf16.mxu0 %v16028_v7  ;;  %8481 = vmatprep.mubr.bf16.mxu0 %v17290_v2  ;;  %v16081_v7 = vld [vmem:[%s23164_s3 + $0x408] ss:$12 sps:$4 sm:$0xff]  }
 0x570   : > { %v16140_v48 = vld [vmem:[%s23164_s3 + $0x608] ss:$12 sps:$4 sm:$0xff]  }
 0x571   : > { %7831 = vmatpush2.bf16.msra.mxu1 %v16023_v18  ;;  %v8062_v18 = vshrl.u32 %v19842_v30, 16 }
 0x572   : > { %8460 = vmatpush1.bf16.msra.mxu0 %v16026_v12  ;;  %7832 = vmatprep.subr.bf16.mxu1 %v16031_v50  ;;  %v16084_v12 = vld [vmem:[%s23164_s3 + $0x590] ss:$12 sps:$4 sm:$0xff]   ;;  %v16087_v50 = vld [vmem:[%s23164_s3 + $0x3f4] ss:$12 sps:$4 sm:$0xff]  }
 0x573   : > { %8461 = vmatprep.subr.bf16.mxu0 %v16034_v43  ;;  %v21632_v43 = vor.u32 %v8066_v57, %v8062_v18  ;;  %v16145_v57 = vld [vmem:[%s23164_s3 + $0x5f0] ss:$12 sps:$4 sm:$0xff]   ;;  %v16149_v18 = vld [vmem:[%s23164_s3 + $0x698] ss:$12 sps:$4 sm:$0xff]  }
 0x575   : > { %7833 = vmatpush2.bf16.msra.mxu1 %v16029_v14  ;;  %v16088_v14 = vld [vmem:[%s23164_s3 + $0x578] ss:$12 sps:$4 sm:$0xff]  }
 0x576   : > { %8462 = vmatpush1.bf16.msra.mxu0 %v16032_v47  ;;  %7834 = vmatprep.subr.bf16.mxu1 %v16037_v60  ;;  %v16091_v47 = vld [vmem:[%s23164_s3 + $0x3dc] ss:$12 sps:$4 sm:$0xff]   ;;  %v16089_v60 = vld [vmem:[%s23164_s3 + $0x3d8] ss:$12 sps:$4 sm:$0xff]  }
 0x577   : > { %8463 = vmatprep.subr.bf16.mxu0 %v16040_v5  ;;  %v16095_v5 = vld [vmem:[%s23164_s3 + $0x3c4] ss:$12 sps:$4 sm:$0xff]  }
 0x579   : > { %7835 = vmatpush2.bf16.msra.mxu1 %v16035_v42  ;;  %v16096_v42 = vld [vmem:[%s23164_s3 + $0x548] ss:$12 sps:$4 sm:$0xff]  }
 0x57a   : > { %8464 = vmatpush1.bf16.msra.mxu0 %v16038_v15  ;;  %7836 = vmatprep.subr.bf16.mxu1 %v16043_v22  ;;  %v16099_v15 = vld [vmem:[%s23164_s3 + $0x52c] ss:$12 sps:$4 sm:$0xff]  }
 0x57b   : > { %14778 = vmatprep.subr.bf16.mxu0 %v16044_v9  ;;  %v16102_v22 = vld [vmem:[%s23164_s3 + $0x76c] ss:$12 sps:$4 sm:$0xff]   ;;  %v16100_v9 = vld [vmem:[%s23164_s3 + $0x768] ss:$12 sps:$4 sm:$0xff]  }
 0x57d   : > { %13780 = vmatmul.mubr.msk.bf16.vlgmr.msra.gmra.mxu0 %vm7317_vm2, %v21529_v19  ;;  %7837 = vmatpush2.bf16.msra.mxu1 %v16041_v17  ;;  %v16103_v17 = vld [vmem:[%s23164_s3 + $0x510] ss:$12 sps:$4 sm:$0xff]  }
 0x57e   : > { %14779 = vmatpush3.bf16.msra.mxu0 %v16045_v59  ;;  %8524 = vmatprep.mubr.bf16.mxu0 %v8074_v36  ;;  %v16106_v59 = vld [vmem:[%s23164_s3 + $0x750] ss:$12 sps:$4 sm:$0xff]  }
 0x57f   : > { %7838 = vmatprep.subr.bf16.mxu1 %v16048_v31  ;;  %14780 = vmatprep.subr.bf16.mxu0 %v16049_v44  ;;  %v16109_v31 = vld [vmem:[%s23164_s3 + $0x4f8] ss:$12 sps:$4 sm:$0xff]  }
 0x580   : > { %v16112_v44 = vld [vmem:[%s23164_s3 + $0x738] ss:$12 sps:$4 sm:$0xff]  }
 0x581   : > { %7839 = vmatpush2.bf16.msra.mxu1 %v16046_v4  ;;  %v8677_v4 = vshll.u32 %v21267_v6, 16 }
 0x582   : > { %14781 = vmatpush3.bf16.msra.mxu0 %v16050_v3  ;;  %7840 = vmatprep.subr.bf16.mxu1 %v16053_v52  ;;  %v16120_v3 = vld [vmem:[%s23164_s3 + $0x724] ss:$12 sps:$4 sm:$0xff]   ;;  %v8671_v52 = vshll.u32 %v21220_v34, 16 }
 0x583   : > { %14782 = vmatprep.subr.bf16.mxu0 %v16054_v29  ;;  %v16115_v29 = vld [vmem:[%s23164_s3 + $0x4e0] ss:$12 sps:$4 sm:$0xff]  }
 0x585   : > { %7841 = vmatpush2.bf16.msra.mxu1 %v16051_v28  ;;  %v16118_v28 = vld [vmem:[%s23164_s3 + $0x720] ss:$12 sps:$4 sm:$0xff]  }
 0x586   : > { %14783 = vmatpush3.bf16.msra.mxu0 %v16055_v26  ;;  %7842 = vmatprep.subr.bf16.mxu1 %v16058_v25  ;;  %v16123_v26 = vld [vmem:[%s23164_s3 + $0x4cc] ss:$12 sps:$4 sm:$0xff]   ;;  %v8679_v25 = vrot.slane %v8677_v4, 1  ;;  %v16175_v4 = vld [vmem:[%s23164_s3 + $0x5a4] ss:$12 sps:$4 sm:$0xff]  }
 0x587   : > { %14784 = vmatprep.subr.bf16.mxu0 %v16059_v21  ;;  %v16124_v21 = vld [vmem:[%s23164_s3 + $0x710] ss:$12 sps:$4 sm:$0xff]  }
 0x589   : > { %7843 = vmatpush2.bf16.msra.mxu1 %v16056_v16  ;;  %v8673_v16 = vrot.slane %v8671_v52, 1 }
 0x58a   : > { %14785 = vmatpush3.bf16.msra.mxu0 %v16060_v49  ;;  %8406 = vmatprep.subr.bf16.mxu1 %v16063_v38  ;;  %v8675_v49 = vshrl.u32 %v21267_v6, 16  ;;  %v16121_v38 = vld [vmem:[%s23164_s3 + $0x4c8] ss:$12 sps:$4 sm:$0xff]  }
 0x58b   : > { %14786 = vmatprep.subr.bf16.mxu0 %v16064_v33  ;;  %v16125_v33 = vld [vmem:[%s23164_s3 + $0x650] ss:$12 sps:$4 sm:$0xff]   ;;  %v16128_v6 = vld [vmem:[%s23164_s3 + $0x4b4] ss:$12 sps:$4 sm:$0xff]  }
 0x58c   : > { %7845 = vmatmul.mubr.bf16.vlgmr.msra.gmra.mxu1 %v19842_v30  ;;  %v16085_v30 = vld [vmem:[%s23164_s3 + $0x3f0] ss:$12 sps:$4 sm:$0xff]  }
 0x58d   : > { %8407 = vmatpush1.bf16.msra.mxu1 %v16061_v56  ;;  %8438 = vmatprep.mubr.bf16.mxu1 %v8074_v36  ;;  %v16117_v36 = vld [vmem:[%s23164_s3 + $0x4e4] ss:$12 sps:$4 sm:$0xff]   ;;  %v8669_v56 = vshrl.u32 %v21220_v34, 16 }
 0x58e   : > { %14787 = vmatpush3.bf16.msra.mxu0 %v16065_v32  ;;  %8408 = vmatprep.subr.bf16.mxu1 %v16068_v39  ;;  %v21732_v32 = vor.u32 %v8679_v25, %v8675_v49  ;;  %v16129_v39 = vld [vmem:[%s23164_s3 + $0x6f8] ss:$12 sps:$4 sm:$0xff]   ;;  %v16126_v34 = vld [vmem:[%s23164_s3 + $0x4b0] ss:$12 sps:$4 sm:$0xff]  }
 0x58f   : > { %14788 = vmatprep.subr.bf16.mxu0 %v16069_v24  ;;  %v8674_v24 = vor.u32 %v8673_v16, %v8669_v56  ;;  %v16183_v56 = vld [vmem:[%s23164_s3 + $0x6d8] ss:$12 sps:$4 sm:$0xff]  }
 0x591   : > { %8409 = vmatpush1.bf16.msra.mxu1 %v16066_v55  ;;  %v16130_v55 = vld [vmem:[%s23164_s3 + $0x638] ss:$12 sps:$4 sm:$0xff]  }
 0x592   : > { %14789 = vmatpush3.bf16.msra.mxu0 %v16070_v37  ;;  %8410 = vmatprep.subr.bf16.mxu1 %v16073_v10  ;;  %v16133_v37 = vld [vmem:[%s23164_s3 + $0x49c] ss:$12 sps:$4 sm:$0xff]   ;;  %v16134_v10 = vld [vmem:[%s23164_s3 + $0x6e0] ss:$12 sps:$4 sm:$0xff]  }
 0x593   : > { %14790 = vmatprep.subr.bf16.mxu0 %v16074_v62  ;;  %v16131_v62 = vld [vmem:[%s23164_s3 + $0x498] ss:$12 sps:$4 sm:$0xff]  }
 0x595   : > { %8411 = vmatpush1.bf16.msra.mxu1 %v16071_v11  ;;  %v16135_v11 = vld [vmem:[%s23164_s3 + $0x620] ss:$12 sps:$4 sm:$0xff]  }
 0x596   : > { %14791 = vmatpush3.bf16.msra.mxu0 %v16075_v20  ;;  %8412 = vmatprep.subr.bf16.mxu1 %v16078_v0  ;;  %v16138_v20 = vld [vmem:[%s23164_s3 + $0x484] ss:$12 sps:$4 sm:$0xff]   ;;  %v16139_v0 = vld [vmem:[%s23164_s3 + $0x6c8] ss:$12 sps:$4 sm:$0xff]  }
 0x597   : > { %14792 = vmatprep.subr.bf16.mxu0 %v16079_v46  ;;  %v16136_v46 = vld [vmem:[%s23164_s3 + $0x480] ss:$12 sps:$4 sm:$0xff]  }
 0x599   : > { %8413 = vmatpush1.bf16.msra.mxu1 %v16076_v61  ;;  %v16143_v61 = vld [vmem:[%s23164_s3 + $0x64c] ss:$12 sps:$4 sm:$0xff]  }
 0x59a   : > { %14793 = vmatpush3.bf16.msra.mxu0 %v16080_v1  ;;  %8414 = vmatprep.subr.bf16.mxu1 %v16083_v8  ;;  %v16144_v1 = vld [vmem:[%s23164_s3 + $0x6b0] ss:$12 sps:$4 sm:$0xff]   ;;  %v16141_v8 = vld [vmem:[%s23164_s3 + $0x648] ss:$12 sps:$4 sm:$0xff]  }
 0x59b   : > { %15102 = vmatprep.subr.bf16.mxu0 %v17291_v63 }
 0x59d   : > { %8525 = vmatmul.mubr.bf16.vlgmr.msra.gmra.mxu0 %v21632_v43  ;;  %8415 = vmatpush1.bf16.msra.mxu1 %v16081_v7  ;;  %v16148_v7 = vld [vmem:[%s23164_s3 + $0x634] ss:$12 sps:$4 sm:$0xff]  }
 0x59e   : > { %15103 = vmatpush3.bf16.msra.mxu0 %v16084_v12  ;;  %8416 = vmatprep.subr.bf16.mxu1 %v16087_v50  ;;  %v16146_v12 = vld [vmem:[%s23164_s3 + $0x630] ss:$12 sps:$4 sm:$0xff]   ;;  %v16150_v50 = vld [vmem:[%s23164_s3 + $0x5d8] ss:$12 sps:$4 sm:$0xff]  }
 0x59f   : > { %15104 = vmatprep.subr.bf16.mxu0 %v17291_v63  ;;  %15110 = vmatprep.mubr.msk.bf16.mxu0 %vm17292_vm1, %v17291_v63 }
 0x5a1   : > { %8417 = vmatpush1.bf16.msra.mxu1 %v16085_v30  ;;  %v16153_v30 = vld [vmem:[%s23164_s3 + $0x61c] ss:$12 sps:$4 sm:$0xff]  }
 0x5a2   : > { %15105 = vmatpush3.bf16.msra.mxu0 %v16088_v14  ;;  %8418 = vmatprep.subr.bf16.mxu1 %v16091_v47  ;;  %v16151_v14 = vld [vmem:[%s23164_s3 + $0x618] ss:$12 sps:$4 sm:$0xff]   ;;  %v16155_v47 = vld [vmem:[%s23164_s3 + $0x5c0] ss:$12 sps:$4 sm:$0xff]  }
 0x5a3   : > { %15106 = vmatprep.subr.bf16.mxu0 %v17291_v63 }
 0x5a5   : > { %8419 = vmatpush1.bf16.msra.mxu1 %v16089_v60  ;;  %v16158_v60 = vld [vmem:[%s23164_s3 + $0x604] ss:$12 sps:$4 sm:$0xff]  }
 0x5a6   : > { %15107 = vmatpush3.bf16.msra.mxu0 %v16092_v13  ;;  %8420 = vmatprep.subr.bf16.mxu1 %v16095_v5  ;;  %v16159_v13 = vld [vmem:[%s23164_s3 + $0x668] ss:$12 sps:$4 sm:$0xff]   ;;  %v8664_v5 = vshll.u32 %v21218_v41, 16 }
 0x5a7   : > { %15108 = vmatprep.subr.bf16.mxu0 %v17291_v63 }
 0x5a9   : > { %8421 = vmatpush1.bf16.msra.mxu1 %v16093_v45  ;;  %v16156_v45 = vld [vmem:[%s23164_s3 + $0x600] ss:$12 sps:$4 sm:$0xff]  }
 0x5aa   : > { %15109 = vmatpush3.bf16.msra.mxu0 %v16096_v42  ;;  %8422 = vmatprep.subr.bf16.mxu1 %v16099_v15  ;;  %v16160_v42 = vld [vmem:[%s23164_s3 + $0x5a8] ss:$12 sps:$4 sm:$0xff]   ;;  %v16163_v15 = vld [vmem:[%s23164_s3 + $0x5ec] ss:$12 sps:$4 sm:$0xff]  }
 0x5ab   : > { %9057 = vmatprep.subr.bf16.mxu0 %v16102_v22  ;;  %v8666_v22 = vrot.slane %v8664_v5, 1 }
 0x5ad   : > { %15111 = vmatmul.mubr.msk.bf16.vlgmr.msra.gmra.mxu0 %vm7317_vm2, %v21529_v19  ;;  %8423 = vmatpush2.bf16.msra.mxu1 %v16097_v35  ;;  %v16114_v19 = vld [vmem:[%s23164_s3 + $0x73c] ss:$12 sps:$4 sm:$0xff]  }
 0x5ae   : > { %9058 = vmatpush1.bf16.msra.mxu0 %v16100_v9  ;;  %8424 = vmatprep.subr.bf16.mxu1 %v16105_v27  ;;  %v16161_v35 = vld [vmem:[%s23164_s3 + $0x5e8] ss:$12 sps:$4 sm:$0xff]   ;;  %v8662_v9 = vshrl.u32 %v21218_v41, 16  ;;  %v16164_v27 = vld [vmem:[%s23164_s3 + $0x770] ss:$12 sps:$4 sm:$0xff]  }
 0x5af   : > { %9059 = vmatprep.subr.bf16.mxu0 %v16108_v58  ;;  %9081 = vmatprep.mubr.bf16.mxu0 %v17290_v2  ;;  %v16167_v58 = vld [vmem:[%s23164_s3 + $0x5d4] ss:$12 sps:$4 sm:$0xff]   ;;  %v16165_v41 = vld [vmem:[%s23164_s3 + $0x5d0] ss:$12 sps:$4 sm:$0xff]  }
 0x5b1   : > { %8425 = vmatpush2.bf16.msra.mxu1 %v16103_v17  ;;  %v21835_v17 = vor.u32 %v8666_v22, %v8662_v9 }
 0x5b2   : > { %9060 = vmatpush1.bf16.msra.mxu0 %v16106_v59  ;;  %8426 = vmatprep.subr.bf16.mxu1 %v16111_v23  ;;  %v16168_v23 = vld [vmem:[%s23164_s3 + $0x758] ss:$12 sps:$4 sm:$0xff]  }
 0x5b3   : > { %9061 = vmatprep.subr.bf16.mxu0 %v16114_v19  ;;  %v16171_v19 = vld [vmem:[%s23164_s3 + $0x5bc] ss:$12 sps:$4 sm:$0xff]  }
 0x5b5   : > { %8427 = vmatpush2.bf16.msra.mxu1 %v16109_v31  ;;  %v16169_v31 = vld [vmem:[%s23164_s3 + $0x5b8] ss:$12 sps:$4 sm:$0xff]  }
 0x5b6   : > { %9062 = vmatpush1.bf16.msra.mxu0 %v16112_v44  ;;  %8428 = vmatprep.subr.bf16.mxu1 %v16117_v36  ;;  %v16172_v36 = vld [vmem:[%s23164_s3 + $0x740] ss:$12 sps:$4 sm:$0xff]  }
 0x5b7   : > { %9063 = vmatprep.subr.bf16.mxu0 %v16120_v3  ;;  %v16173_v3 = vld [vmem:[%s23164_s3 + $0x5a0] ss:$12 sps:$4 sm:$0xff]  }
 0x5b9   : > { %8429 = vmatpush2.bf16.msra.mxu1 %v16115_v29  ;;  %v16176_v29 = vld [vmem:[%s23164_s3 + $0x728] ss:$12 sps:$4 sm:$0xff]  }
 0x5ba   : > { %9064 = vmatpush1.bf16.msra.mxu0 %v16118_v28  ;;  %8430 = vmatprep.subr.bf16.mxu1 %v16123_v26  ;;  %v16179_v28 = vld [vmem:[%s23164_s3 + $0x70c] ss:$12 sps:$4 sm:$0xff]   ;;  %v16177_v26 = vld [vmem:[%s23164_s3 + $0x708] ss:$12 sps:$4 sm:$0xff]  }
 0x5bb   : > { %14805 = vmatprep.subr.bf16.mxu0 %v16124_v21  ;;  %v16182_v21 = vld [vmem:[%s23164_s3 + $0x6f4] ss:$12 sps:$4 sm:$0xff]  }
 0x5bd   : > { %13922 = vmatmul.mubr.msk.bf16.vlgmr.msra.gmra.mxu0 %vm7317_vm2, %v21732_v32  ;;  %8431 = vmatpush2.bf16.msra.mxu1 %v16121_v38  ;;  %v16185_v38 = vld [vmem:[%s23164_s3 + $0x6dc] ss:$12 sps:$4 sm:$0xff]  }
 0x5be   : > { %14806 = vmatpush3.bf16.msra.mxu0 %v16125_v33  ;;  %9124 = vmatprep.mubr.bf16.mxu0 %v8674_v24 }
 0x5bf   : > { %8432 = vmatprep.subr.bf16.mxu1 %v16128_v6  ;;  %14807 = vmatprep.subr.bf16.mxu0 %v16129_v39  ;;  %v16188_v6 = vld [vmem:[%s23164_s3 + $0x6c4] ss:$12 sps:$4 sm:$0xff]   ;;  %v16186_v39 = vld [vmem:[%s23164_s3 + $0x6c0] ss:$12 sps:$4 sm:$0xff]  }
 0x5c1   : > { %8433 = vmatpush2.bf16.msra.mxu1 %v16126_v34  ;;  %v16189_v34 = vld [vmem:[%s23164_s3 + $0x6a8] ss:$12 sps:$4 sm:$0xff]  }
 0x5c2   : > { %14808 = vmatpush3.bf16.msra.mxu0 %v16130_v55  ;;  %8434 = vmatprep.subr.bf16.mxu1 %v16133_v37  ;;  %v16194_v55 = vld [vmem:[%s23164_s3 + $0x694] ss:$12 sps:$4 sm:$0xff]   ;;  %v16192_v37 = vld [vmem:[%s23164_s3 + $0x690] ss:$12 sps:$4 sm:$0xff]  }
 0x5c3   : > { %14809 = vmatprep.subr.bf16.mxu0 %v16134_v10  ;;  %v16197_v10 = vld [vmem:[%s23164_s3 + $0x67c] ss:$12 sps:$4 sm:$0xff]  }
 0x5c5   : > { %8435 = vmatpush2.bf16.msra.mxu1 %v16131_v62  ;;  %v16195_v62 = vld [vmem:[%s23164_s3 + $0x678] ss:$12 sps:$4 sm:$0xff]  }
 0x5c6   : > { %14810 = vmatpush3.bf16.msra.mxu0 %v16135_v11  ;;  %8436 = vmatprep.subr.bf16.mxu1 %v16138_v20  ;;  %v16200_v11 = vld [vmem:[%s23164_s3 + $0x664] ss:$12 sps:$4 sm:$0xff]  }
 0x5c7   : > { %14811 = vmatprep.subr.bf16.mxu0 %v16139_v0  ;;  %v16198_v0 = vld [vmem:[%s23164_s3 + $0x660] ss:$12 sps:$4 sm:$0xff]  }
 0x5c9   : > { %8437 = vmatpush2.bf16.msra.mxu1 %v16136_v46 }
 0x5ca   : > { %14812 = vmatpush3.bf16.msra.mxu0 %v16140_v48  ;;  %9006 = vmatprep.subr.bf16.mxu1 %v16143_v61 }
 0x5cb   : > { %14813 = vmatprep.subr.bf16.mxu0 %v16144_v1 }
 0x5cc   : > { %8439 = vmatmul.mubr.bf16.vlgmr.msra.gmra.mxu1 %v21632_v43  ;;  %v16154_v43 = vld [vmem:[%s23164_s3 + $0x680] ss:$12 sps:$4 sm:$0xff]  }
 0x5cd   : > { %9007 = vmatpush1.bf16.msra.mxu1 %v16141_v8  ;;  %9038 = vmatprep.mubr.bf16.mxu1 %v8674_v24  ;;  %v16191_v24 = vld [vmem:[%s23164_s3 + $0x6ac] ss:$12 sps:$4 sm:$0xff]  }
 0x5ce   : > { %14814 = vmatpush3.bf16.msra.mxu0 %v16145_v57  ;;  %9008 = vmatprep.subr.bf16.mxu1 %v16148_v7 }
 0x5cf   : > { %14815 = vmatprep.subr.bf16.mxu0 %v16149_v18 }
 0x5d1   : > { %9009 = vmatpush1.bf16.msra.mxu1 %v16146_v12 }
 0x5d2   : > { %14816 = vmatpush3.bf16.msra.mxu0 %v16150_v50  ;;  %9010 = vmatprep.subr.bf16.mxu1 %v16153_v30 }
 0x5d3   : > { %14817 = vmatprep.subr.bf16.mxu0 %v16154_v43 }
 0x5d5   : > { %9011 = vmatpush1.bf16.msra.mxu1 %v16151_v14 }
 0x5d6   : > { %14818 = vmatpush3.bf16.msra.mxu0 %v16155_v47  ;;  %9012 = vmatprep.subr.bf16.mxu1 %v16158_v60  ;;  %v16203_v47 = vld [vmem:[%s23166_s5 + $0x194] ss:$8 sps:$4 sm:$0xff]  }
 0x5d7   : > { %14819 = vmatprep.subr.bf16.mxu0 %v16159_v13  ;;  %v16201_v13 = vld [vmem:[%s23166_s5 + $0x190] ss:$8 sps:$4 sm:$0xff]  }
 0x5d9   : > { %9013 = vmatpush1.bf16.msra.mxu1 %v16156_v45 }
 0x5da   : > { %14820 = vmatpush3.bf16.msra.mxu0 %v16160_v42  ;;  %9014 = vmatprep.subr.bf16.mxu1 %v16163_v15 }
 0x5db   : > { %15114 = vmatprep.subr.bf16.mxu0 %v17291_v63  ;;  %v21842_v59 = vpop.f32.mrf.mxu0 }
 0x5dd   : > { %9125 = vmatmul.mubr.bf16.vlgmr.msra.gmra.mxu0 %v21835_v17  ;;  %9015 = vmatpush1.bf16.msra.mxu1 %v16161_v35  ;;  %v21856_v44 = vpop.f32.mrf.mxu0  ;;  %v16206_v35 = vld [vmem:[%s23166_s5 + $0x184] ss:$8 sps:$4 sm:$0xff]  }
 0x5de   : > { %15115 = vmatpush3.bf16.msra.mxu0 %v16164_v27  ;;  %9016 = vmatprep.subr.bf16.mxu1 %v16167_v58  ;;  %v16204_v27 = vld [vmem:[%s23166_s5 + $0x180] ss:$8 sps:$4 sm:$0xff]  }
 0x5df   : > { %15116 = vmatprep.subr.bf16.mxu0 %v17291_v63  ;;  %15122 = vmatprep.mubr.msk.bf16.mxu0 %vm17292_vm1, %v17291_v63  ;;  %v21868_v52 = vpop.f32.mrf.mxu0 }
 0x5e1   : > { %9017 = vmatpush1.bf16.msra.mxu1 %v16165_v41  ;;  %v21880_v25 = vpop.f32.mrf.mxu0  ;;  %v16209_v41 = vld [vmem:[%s23166_s5 + $0x174] ss:$8 sps:$4 sm:$0xff]  }
 0x5e2   : > { %15117 = vmatpush3.bf16.msra.mxu0 %v16168_v23  ;;  %9018 = vmatprep.subr.bf16.mxu1 %v16171_v19  ;;  %v16207_v23 = vld [vmem:[%s23166_s5 + $0x170] ss:$8 sps:$4 sm:$0xff]  }
 0x5e3   : > { %15118 = vmatprep.subr.bf16.mxu0 %v17291_v63 }
 0x5e5   : > { %9019 = vmatpush1.bf16.msra.mxu1 %v16169_v31  ;;  %v16212_v31 = vld [vmem:[%s23166_s5 + $0x164] ss:$8 sps:$4 sm:$0xff]  }
 0x5e6   : > { %15119 = vmatpush3.bf16.msra.mxu0 %v16172_v36  ;;  %9020 = vmatprep.subr.bf16.mxu1 %v16175_v4  ;;  %v16210_v36 = vld [vmem:[%s23166_s5 + $0x160] ss:$8 sps:$4 sm:$0xff]  }
 0x5e7   : > { %15120 = vmatprep.subr.bf16.mxu0 %v17291_v63  ;;  %v16180_v63 = vld [vmem:[%s23164_s3 + $0x6f0] ss:$12 sps:$4 sm:$0xff]  }
 0x5e9   : > { %9021 = vmatpush1.bf16.msra.mxu1 %v16173_v3 }
 0x5ea   : > { %15121 = vmatpush3.bf16.msra.mxu0 %v16176_v29  ;;  %9022 = vmatprep.subr.bf16.mxu1 %v16179_v28  ;;  %v16215_v29 = vld [vmem:[%s23166_s5 + $0x154] ss:$8 sps:$4 sm:$0xff]  }
 0x5ec   : > { %v7482_v16 = vpop.f32.mrf.mxu0  ;;  %v21924_v20 = vpop.f32.mrf.mxu1 }
 0x5ed   : > { %15123 = vmatmul.mubr.msk.bf16.vlgmr.msra.gmra.mxu0 %vm7317_vm2, %v21732_v32  ;;  %9023 = vmatpush2.bf16.msra.mxu1 %v16177_v26  ;;  %v16213_v26 = vld [vmem:[%s23166_s5 + $0x150] ss:$8 sps:$4 sm:$0xff]  }
 0x5ee   : > { %v15088_v49 = vpop.f32.mrf.mxu0  ;;  %9024 = vmatprep.subr.bf16.mxu1 %v16182_v21  ;;  %9551 = vmatprep.mubr.bf16.mxu0 %v17290_v2  ;;  %v21929_v46 = vpop.f32.mrf.mxu1 }
 0x5f0   : > { %v7485_v33 = vpop.f32.mrf.mxu0  ;;  %v21931_v48 = vpop.f32.mrf.mxu1 }
 0x5f1   : > { %9025 = vmatpush2.bf16.msra.mxu1 %v16180_v63  ;;  %v16218_v63 = vld [vmem:[%s23166_s5 + $0x144] ss:$8 sps:$4 sm:$0xff]  }
 0x5f2   : > { %v15089_v32 = vpop.f32.mrf.mxu0  ;;  %9026 = vmatprep.subr.bf16.mxu1 %v16185_v38  ;;  %v21934_v61 = vpop.f32.mrf.mxu1  ;;  %v16216_v38 = vld [vmem:[%s23166_s5 + $0x140] ss:$8 sps:$4 sm:$0xff]  }
 0x5f3   : > { %v16224_v32 = vld [vmem:[%s23166_s5 + $0x134] ss:$8 sps:$4 sm:$0xff]  }
 0x5f5   : > { %9027 = vmatpush2.bf16.msra.mxu1 %v16183_v56  ;;  %v16219_v56 = vld [vmem:[%s23166_s5 + $0x230] ss:$8 sps:$4 sm:$0xff]  }
 0x5f6   : > { %9028 = vmatprep.subr.bf16.mxu1 %v16188_v6  ;;  %v16222_v6 = vld [vmem:[%s23166_s5 + $0x130] ss:$8 sps:$4 sm:$0xff]  }
 0x5f9   : > { %9029 = vmatpush2.bf16.msra.mxu1 %v16186_v39  ;;  %v16227_v39 = vld [vmem:[%s23166_s5 + $0x224] ss:$8 sps:$4 sm:$0xff]  }
 0x5fa   : > { %9030 = vmatprep.subr.bf16.mxu1 %v16191_v24  ;;  %v16225_v24 = vld [vmem:[%s23166_s5 + $0x220] ss:$8 sps:$4 sm:$0xff]  }
 0x5fc   : > { %v21936_v1 = vpop.f32.mrf.mxu0 }
 0x5fd   : > { %9031 = vmatpush2.bf16.msra.mxu1 %v16189_v34  ;;  %v16228_v34 = vld [vmem:[%s23166_s5 + $0x120] ss:$8 sps:$4 sm:$0xff]  }
 0x5fe   : > { %9032 = vmatprep.subr.bf16.mxu1 %v16194_v55  ;;  %v21938_v57 = vpop.f32.mrf.mxu0  ;;  %v16230_v55 = vld [vmem:[%s23166_s5 + $0x124] ss:$8 sps:$4 sm:$0xff]  }
 0x600   : > { %v21940_v18 = vpop.f32.mrf.mxu0 }
 0x601   : > { %9033 = vmatpush2.bf16.msra.mxu1 %v16192_v37  ;;  %v16233_v37 = vld [vmem:[%s23166_s5 + $0x74] ss:$8 sps:$4 sm:$0xff]  }
 0x602   : > { %9034 = vmatprep.subr.bf16.mxu1 %v16197_v10  ;;  %v21942_v50 = vpop.f32.mrf.mxu0  ;;  %v16234_v10 = vld [vmem:[%s23166_s5 + $0x210] ss:$8 sps:$4 sm:$0xff]  }
 0x605   : > { %9035 = vmatpush2.bf16.msra.mxu1 %v16195_v62  ;;  %v16236_v62 = vld [vmem:[%s23166_s5 + $0x214] ss:$8 sps:$4 sm:$0xff]  }
 0x606   : > { %9036 = vmatprep.subr.bf16.mxu1 %v16200_v11  ;;  %v16240_v11 = vld [vmem:[%s23166_s5 + $0x200] ss:$8 sps:$4 sm:$0xff]  }
 0x609   : > { %9037 = vmatpush2.bf16.msra.mxu1 %v16198_v0  ;;  %v16242_v0 = vld [vmem:[%s23166_s5 + $0x204] ss:$8 sps:$4 sm:$0xff]  }
 0x60a   : > { %9478 = vmatprep.subr.bf16.mxu1 %v16203_v47 }
 0x60c   : > { %9039 = vmatmul.mubr.bf16.vlgmr.msra.gmra.mxu1 %v21835_v17  ;;  %v14740_v8 = vpop.f32.mrf.mxu1 }
 0x60d   : > { %9479 = vmatpush1.bf16.msra.mxu1 %v16201_v13 }
 0x60e   : > { %v14741_v7 = vpop.f32.mrf.mxu1  ;;  %9480 = vmatprep.subr.bf16.mxu1 %v16206_v35  ;;  %v16266_v35 = vld [vmem:[%s23166_s5 + $0x1c4] ss:$8 sps:$4 sm:$0xff]  }
 0x60f   : > { %v14742_v30 = vadd.f32 %v14741_v7, %v14740_v8  ;;  %v16246_v8 = vld [vmem:[%s23166_s5 + $0x1f0] ss:$8 sps:$4 sm:$0xff]   ;;  %v16248_v7 = vld [vmem:[%s23166_s5 + $0x1f4] ss:$8 sps:$4 sm:$0xff]  }
 0x610   : > { %v14743_v12 = vpop.f32.mrf.mxu1 }
 0x611   : > { %v7483_v5 = vadd.f32 %v14742_v30, %v7482_v16  ;;  %9481 = vmatpush1.bf16.msra.mxu1 %v16204_v27  ;;  %v16254_v30 = vld [vmem:[%s23166_s5 + $0x1e4] ss:$8 sps:$4 sm:$0xff]  }
 0x612   : > { %v14744_v43 = vpop.f32.mrf.mxu1  ;;  %9482 = vmatprep.subr.bf16.mxu1 %v16209_v41  ;;  %v16276_v41 = vld [vmem:[%s23166_s5 + $0x1a0] ss:$8 sps:$4 sm:$0xff]  }
 0x613   : > { %v14745_v45 = vadd.f32 %v14744_v43, %v14743_v12  ;;  %v16252_v12 = vld [vmem:[%s23166_s5 + $0x1e0] ss:$8 sps:$4 sm:$0xff]  }
 0x615   : > { %v7486_v58 = vadd.f32 %v14745_v45, %v7485_v33  ;;  %9483 = vmatpush1.bf16.msra.mxu1 %v16207_v23  ;;  %v16221_v33 = vld [vmem:[%s23166_s5 + $0x234] ss:$8 sps:$4 sm:$0xff]   ;;  %v7405_v45 = vadd.f32 %v21934_v61, %v21880_v25  ;;  %v16270_v61 = vld [vmem:[%s23166_s5 + $0x1b0] ss:$8 sps:$4 sm:$0xff]  }
 0x616   : > { %9484 = vmatprep.subr.bf16.mxu1 %v16212_v31  ;;  %9531 = vmatprep.subr.bf16.mxu0 %v16221_v33  ;;  %v16272_v25 = vld [vmem:[%s23166_s5 + $0x1b4] ss:$8 sps:$4 sm:$0xff]  }
 0x617   : > { %9532 = vmatpush1.bf16.msra.mxu0 %v16219_v56  ;;  %v16284_v31 = vld [vmem:[%s23166_s5 + $0x114] ss:$8 sps:$4 sm:$0xff]  }
 0x618   : > { %9533 = vmatprep.subr.bf16.mxu0 %v16227_v39 }
 0x619   : > { %9485 = vmatpush1.bf16.msra.mxu1 %v16210_v36 }
 0x61a   : > { %9486 = vmatprep.subr.bf16.mxu1 %v16215_v29 }
 0x61b   : > { %9534 = vmatpush1.bf16.msra.mxu0 %v16225_v24 }
 0x61c   : > { %9742 = vmatprep.subr.bf16.mxu0 %v16233_v37 }
 0x61d   : > { %v14767_v14 = vpop.f32.mrf.mxu0  ;;  %9487 = vmatpush1.bf16.msra.mxu1 %v16213_v26 }
 0x61e   : > { %9488 = vmatprep.subr.bf16.mxu1 %v16218_v63 }
 0x61f   : > { %v14768_v60 = vpop.f32.mrf.mxu0 }
 0x620   : > { %v14769_v42 = vadd.f32 %v14768_v60, %v14767_v14  ;;  %v16260_v60 = vld [vmem:[%s23166_s5 + $0x1d4] ss:$8 sps:$4 sm:$0xff]  }
 0x621   : > { %v14770_v15 = vpop.f32.mrf.mxu0  ;;  %9489 = vmatpush1.bf16.msra.mxu1 %v16216_v38 }
 0x622   : > { %v7933_v22 = vadd.f32 %v14769_v42, %v7483_v5  ;;  %9490 = vmatprep.subr.bf16.mxu1 %v16224_v32  ;;  %v16258_v5 = vld [vmem:[%s23166_s5 + $0x1d0] ss:$8 sps:$4 sm:$0xff]  }
 0x623   : > { %v14771_v9 = vpop.f32.mrf.mxu0 }
 0x624   : > { %v14772_v17 = vadd.f32 %v14771_v9, %v14770_v15  ;;  %v16264_v9 = vld [vmem:[%s23166_s5 + $0x1c0] ss:$8 sps:$4 sm:$0xff]  }
 0x625   : > { %9491 = vmatpush1.bf16.msra.mxu1 %v16222_v6 }
 0x626   : > { %v7936_v19 = vadd.f32 %v14772_v17, %v7486_v58  ;;  %9492 = vmatprep.subr.bf16.mxu1 %v16230_v55 }
 0x629   : > { %9493 = vmatpush1.bf16.msra.mxu1 %v16228_v34 }
 0x62a   : > { %9494 = vmatprep.subr.bf16.mxu1 %v16236_v62 }
 0x62d   : > { %v7973_v4 = vpop.f32.mrf.mxu0  ;;  %9495 = vmatpush2.bf16.msra.mxu1 %v16234_v10 }
 0x62e   : > { %v21968_v3 = vadd.f32 %v7973_v4, %v7933_v22  ;;  %9496 = vmatprep.subr.bf16.mxu1 %v16242_v0 }
 0x62f   : > { %v15100_v28 = vpop.f32.mrf.mxu0 }
 0x631   : > { %v7976_v21 = vpop.f32.mrf.mxu0  ;;  %9497 = vmatpush2.bf16.msra.mxu1 %v16240_v11 }
 0x632   : > { %v21976_v16 = vadd.f32 %v7976_v21, %v7936_v19  ;;  %9498 = vmatprep.subr.bf16.mxu1 %v16248_v7 }
 0x633   : > { %v15101_v49 = vpop.f32.mrf.mxu0 }
 0x635   : > { %9499 = vmatpush2.bf16.msra.mxu1 %v16246_v8 }
 0x636   : > { %9500 = vmatprep.subr.bf16.mxu1 %v16254_v30 }
 0x639   : > { %9501 = vmatpush2.bf16.msra.mxu1 %v16252_v12 }
 0x63a   : > { %9502 = vmatprep.subr.bf16.mxu1 %v16260_v60 }
 0x63d   : > { %v22039_v47 = vpop.f32.mrf.mxu0  ;;  %9503 = vmatpush2.bf16.msra.mxu1 %v16258_v5 }
 0x63e   : > { %9504 = vmatprep.subr.bf16.mxu1 %v16266_v35 }
 0x63f   : > { %v22051_v15 = vpop.f32.mrf.mxu0 }
 0x641   : > { %9505 = vmatpush2.bf16.msra.mxu1 %v16264_v9  ;;  %v22060_v58 = vpop.f32.mrf.mxu0 }
 0x642   : > { %9506 = vmatprep.subr.bf16.mxu1 %v16272_v25 }
 0x643   : > { %v8489_v17 = vpop.f32.mrf.mxu0 }
 0x645   : > { %9507 = vmatpush2.bf16.msra.mxu1 %v16270_v61 }
 0x64c   : > { %v22035_v43 = vpop.f32.mrf.mxu1 }
 0x64e   : > { %v22037_v14 = vpop.f32.mrf.mxu1 }
 0x650   : > { %v22044_v13 = vpop.f32.mrf.mxu1 }
 0x652   : > { %v7852_v42 = vpop.f32.mrf.mxu1 }
 0x653   : > { %v7853_v22 = vadd.f32 %v7852_v42, %v7405_v45 }
 0x655   : > { %v7896_v27 = vadd.f32 %v21942_v50, %v7853_v22  ;;  %v16278_v50 = vld [vmem:[%s23166_s5 + $0x1a4] ss:$8 sps:$4 sm:$0xff]  }
 0x656   : > { %9508 = vmatprep.subr.bf16.mxu1 %v16278_v50 }
 0x657   : > { %9509 = vmatpush2.bf16.msra.mxu1 %v16276_v41 }
 0x658   : > { %9795 = vmatprep.subr.bf16.mxu1 %v16284_v31  ;;  %v16231_v31 = vld [vmem:[%s23166_s5 + $0x70] ss:$8 sps:$4 sm:$0xff]  }
 0x65d   : > { %v14794_v23 = vpop.f32.mrf.mxu0 }
 0x65f   : > { %v14795_v19 = vpop.f32.mrf.mxu0 }
 0x660   : > { %v14796_v36 = vadd.f32 %v14795_v19, %v14794_v23 }
 0x661   : > { %v14797_v4 = vpop.f32.mrf.mxu0 }
 0x663   : > { %v14798_v29 = vpop.f32.mrf.mxu0 }
 0x664   : > { %v14799_v28 = vadd.f32 %v14798_v29, %v14797_v4  ;;  %v16245_v4 = vld [vmem:[%s23166_s5 + $0x54] ss:$8 sps:$4 sm:$0xff]   ;;  %v16243_v29 = vld [vmem:[%s23166_s5 + $0x50] ss:$8 sps:$4 sm:$0xff]  }
 0x66d   : > { %v8567_v26 = vpop.f32.mrf.mxu0 }
 0x66e   : > { %v8568_v21 = vadd.f32 %v14796_v36, %v8567_v26  ;;  %v7399_v26 = vadd.f32 %v21924_v20, %v21842_v59 }
 0x66f   : > { %v15112_v63 = vpop.f32.mrf.mxu0 }
 0x670   : > { %v8576_v49 = vadd.f32 %v8568_v21, %v21968_v3  ;;  %v7401_v21 = vadd.f32 %v21929_v46, %v21856_v44  ;;  %v7847_v63 = vadd.f32 %v22035_v43, %v7399_v26  ;;  %v16291_v26 = vld [vmem:[%s23166_s5 + $0xd0] ss:$8 sps:$4 sm:$0xff]  }
 0x671   : > { %v8570_v38 = vpop.f32.mrf.mxu0 }
 0x672   : > { %v8571_v33 = vadd.f32 %v14799_v28, %v8570_v38  ;;  %v16251_v28 = vld [vmem:[%s23166_s5 + $0x44] ss:$8 sps:$4 sm:$0xff]   ;;  %v16257_v38 = vld [vmem:[%s23166_s5 + $0x34] ss:$8 sps:$4 sm:$0xff]   ;;  %v7849_v59 = vadd.f32 %v22037_v14, %v7401_v21  ;;  %v7890_v44 = vadd.f32 %v21936_v1, %v7847_v63  ;;  %v16294_v63 = vld [vmem:[%s23166_s5 + $0x2b0] ss:$8 sps:$4 sm:$0xff]  }
 0x673   : > { %v15113_v56 = vpop.f32.mrf.mxu0  ;;  %v16299_v21 = vld [vmem:[%s23166_s5 + $0xc4] ss:$8 sps:$4 sm:$0xff]  }
 0x674   : > { %v8579_v32 = vadd.f32 %v8571_v33, %v21976_v16  ;;  %v22090_v16 = vld [vmem:[%s23165_s4] sm:$0x7]  ;;  %v7403_v33 = vadd.f32 %v21931_v48, %v21868_v52  ;;  %v16255_v56 = vld [vmem:[%s23166_s5 + $0x30] ss:$8 sps:$4 sm:$0xff]   ;;  %v16263_v52 = vld [vmem:[%s23166_s5 + $0x24] ss:$8 sps:$4 sm:$0xff]   ;;  %v7892_v48 = vadd.f32 %v21938_v57, %v7849_v59 }
 0x675   : > { %v9192_v35 = vrot.slane %v22090_v16, %v5277_v54  ;;  %v16237_v54 = vld [vmem:[%s23166_s5 + $0x60] ss:$8 sps:$4 sm:$0xff]   ;;  %v16305_v59 = vld [vmem:[%s23166_s5 + $0xb4] ss:$8 sps:$4 sm:$0xff]  }
 0x676   : > { %v7851_v46 = vadd.f32 %v22044_v13, %v7403_v33  ;;  %v9184_v13 = vrot.slane %v22090_v16, %v19787_v51 }
 0x67d   : > { %v9083_v34 = vpop.f32.mrf.mxu0 }
 0x67f   : > { %v22079_v10 = vpop.f32.mrf.mxu0 }
 0x681   : > { %v22083_v11 = vpop.f32.mrf.mxu0 }
 0x683   : > { %v22085_v0 = vpop.f32.mrf.mxu0 }
 0x68c   : > { %v8440_v6 = vpop.f32.mrf.mxu1 }
 0x68d   : > { %v8484_v20 = vadd.f32 %v22039_v47, %v8440_v6  ;;  %v7894_v6 = vadd.f32 %v21940_v18, %v7851_v46  ;;  %v9188_v18 = vrot.slane %v22090_v16, %v21203_v40  ;;  %v16303_v46 = vld [vmem:[%s23166_s5 + $0xb0] ss:$8 sps:$4 sm:$0xff]  }
 0x68e   : > { %v8442_v39 = vpop.f32.mrf.mxu1 }
 0x68f   : > { %v8486_v43 = vadd.f32 %v22051_v15, %v8442_v39  ;;  %v8574_v14 = vadd.f32 %v8484_v20, %v7890_v44  ;;  %v16300_v20 = vld [vmem:[%s23166_s5 + $0x2a0] ss:$8 sps:$4 sm:$0xff]   ;;  %v16308_v44 = vld [vmem:[%s23166_s5 + $0x294] ss:$8 sps:$4 sm:$0xff]  }
 0x690   : > { %v8444_v24 = vpop.f32.mrf.mxu1 }
 0x691   : > { %v8488_v1 = vadd.f32 %v22060_v58, %v8444_v24  ;;  %v8575_v39 = vadd.f32 %v8486_v43, %v7892_v48  ;;  %v16269_v58 = vld [vmem:[%s23166_s5 + $0x14] ss:$8 sps:$4 sm:$0xff]   ;;  %v16311_v43 = vld [vmem:[%s23166_s5 + $0xa4] ss:$8 sps:$4 sm:$0xff]  }
 0x692   : > { %v8446_v55 = vpop.f32.mrf.mxu1  ;;  %v16317_v48 = vld [vmem:[%s23166_s5 + $0x94] ss:$8 sps:$4 sm:$0xff]  }
 0x693   : > { %v8490_v37 = vadd.f32 %v8489_v17, %v8446_v55  ;;  %v8577_v24 = vadd.f32 %v8488_v1, %v7894_v6  ;;  %v16320_v1 = vld [vmem:[%s23166_s5 + $0x274] ss:$8 sps:$4 sm:$0xff]   ;;  %v16326_v6 = vld [vmem:[%s23166_s5 + $0x264] ss:$8 sps:$4 sm:$0xff]  }
 0x695   : > { %v22081_v62 = vadd.f32 %v8490_v37, %v7896_v27 }
 0x69d   : > { %v14821_v3 = vpop.f32.mrf.mxu0 }
 0x69f   : > { %v14822_v8 = vpop.f32.mrf.mxu0 }
 0x6a0   : > { %v14823_v30 = vadd.f32 %v14822_v8, %v14821_v3  ;;  %v16261_v3 = vld [vmem:[%s23166_s5 + $0x20] ss:$8 sps:$4 sm:$0xff]  }
 0x6a1   : > { %v14824_v7 = vpop.f32.mrf.mxu0 }
 0x6a3   : > { %v14825_v12 = vpop.f32.mrf.mxu0 }
 0x6a4   : > { %v14826_v42 = vadd.f32 %v14825_v12, %v14824_v7 }
 0x6ad   : > { %v9167_v60 = vpop.f32.mrf.mxu0 }
 0x6ae   : > { %v9168_v5 = vadd.f32 %v14823_v30, %v9167_v60  ;;  %v16267_v60 = vld [vmem:[%s23166_s5 + $0x10] ss:$8 sps:$4 sm:$0xff]  }
 0x6af   : > { %v15124_v45 = vpop.f32.mrf.mxu0 }
 0x6b0   : > { %v9176_v22 = vadd.f32 %v9168_v5, %v8576_v49  ;;  %v16249_v49 = vld [vmem:[%s23166_s5 + $0x40] ss:$8 sps:$4 sm:$0xff]   ;;  %v16275_v5 = vld [vmem:[%s23166_s5 + $0x4] ss:$8 sps:$4 sm:$0xff]  }
 0x6b1   : > { %v9170_v9 = vpop.f32.mrf.mxu0 }
 0x6b2   : > { %v9171_v27 = vadd.f32 %v14826_v42, %v9170_v9  ;;  %v9198_v61 = vadd.f32 %v9192_v35, %v9176_v22  ;;  %v16281_v9 = vld [vmem:[%s23166_s5 + $0xf4] ss:$8 sps:$4 sm:$0xff]  }
 0x6b3   : > { %v15125_v25 = vpop.f32.mrf.mxu0 }
 0x6b4   : > { %v9179_v17 = vadd.f32 %v9171_v27, %v8579_v32  ;;  %v9204_v50 = vmax.f32 %v9198_v61, 0.0 }
 0x6b6   : > { %v9201_v41 = vadd.f32 %v9192_v35, %v9179_v17 }
 0x6b8   : > { %v9207_v23 = vmax.f32 %v9201_v41, 0.0  ;;  %v16287_v41 = vld [vmem:[%s23166_s5 + $0xe4] ss:$8 sps:$4 sm:$0xff]  }
 0x6ba   : > { %v22095_v19 = vpack.c.bf16 %v9207_v23, %v9204_v50  ;;  %v16282_v23 = vld [vmem:[%s23166_s5 + $0x110] ss:$8 sps:$4 sm:$0xff]  }
 0x6bc   : > { %v22101_v36 = vshrl.u32 %v22095_v19, 16 }
 0x6be   : > { %13960 = vmatmul.mubr.msk.bf16.vlgmr.msra.gmra.mxu0 %vm9474_vm3, %v22101_v36 }
 0x6bf   : > { %9743 = vmatpush1.bf16.msra.mxu0 %v16231_v31 }
 0x6c0   : > { %9744 = vmatprep.subr.bf16.mxu0 %v16239_v53  ;;  %v16290_v53 = vld [vmem:[%s23166_s5 + $0x104] ss:$8 sps:$4 sm:$0xff]  }
 0x6c3   : > { %9745 = vmatpush1.bf16.msra.mxu0 %v16237_v54  ;;  %v16285_v54 = vld [vmem:[%s23166_s5 + $0xe0] ss:$8 sps:$4 sm:$0xff]  }
 0x6c4   : > { %9746 = vmatprep.subr.bf16.mxu0 %v16245_v4  ;;  %v16293_v4 = vld [vmem:[%s23166_s5 + $0xd4] ss:$8 sps:$4 sm:$0xff]  }
 0x6c7   : > { %9747 = vmatpush1.bf16.msra.mxu0 %v16243_v29  ;;  %v16288_v29 = vld [vmem:[%s23166_s5 + $0x100] ss:$8 sps:$4 sm:$0xff]  }
 0x6c8   : > { %9748 = vmatprep.subr.bf16.mxu0 %v16251_v28  ;;  %v16296_v28 = vld [vmem:[%s23166_s5 + $0x2b4] ss:$8 sps:$4 sm:$0xff]  }
 0x6cb   : > { %9749 = vmatpush1.bf16.msra.mxu0 %v16249_v49  ;;  %v16302_v49 = vld [vmem:[%s23166_s5 + $0x2a4] ss:$8 sps:$4 sm:$0xff]  }
 0x6cc   : > { %v9040_v32 = vpop.f32.mrf.mxu1  ;;  %9750 = vmatprep.subr.bf16.mxu0 %v16257_v38  ;;  %v16297_v38 = vld [vmem:[%s23166_s5 + $0xc0] ss:$8 sps:$4 sm:$0xff]  }
 0x6cd   : > { %v9084_v47 = vadd.f32 %v9083_v34, %v9040_v32  ;;  %v16314_v32 = vld [vmem:[%s23166_s5 + $0x284] ss:$8 sps:$4 sm:$0xff]  }
 0x6ce   : > { %v9042_v15 = vpop.f32.mrf.mxu1 }
 0x6cf   : > { %v9174_v55 = vadd.f32 %v9084_v47, %v8574_v14  ;;  %9751 = vmatpush1.bf16.msra.mxu0 %v16255_v56  ;;  %v9086_v37 = vadd.f32 %v22079_v10, %v9042_v15  ;;  %v16306_v56 = vld [vmem:[%s23166_s5 + $0x290] ss:$8 sps:$4 sm:$0xff]   ;;  %v16312_v14 = vld [vmem:[%s23166_s5 + $0x280] ss:$8 sps:$4 sm:$0xff]  }
 0x6d0   : > { %v9044_v57 = vpop.f32.mrf.mxu1  ;;  %9752 = vmatprep.subr.bf16.mxu0 %v16263_v52  ;;  %v16309_v52 = vld [vmem:[%s23166_s5 + $0xa0] ss:$8 sps:$4 sm:$0xff]   ;;  %v16315_v47 = vld [vmem:[%s23166_s5 + $0x90] ss:$8 sps:$4 sm:$0xff]  }
 0x6d1   : > { %v9175_v34 = vadd.f32 %v9086_v37, %v8575_v39  ;;  %v9088_v8 = vadd.f32 %v22083_v11, %v9044_v57  ;;  %v9196_v12 = vadd.f32 %v9184_v13, %v9174_v55  ;;  %v16318_v15 = vld [vmem:[%s23166_s5 + $0x270] ss:$8 sps:$4 sm:$0xff]   ;;  %v16321_v39 = vld [vmem:[%s23166_s5 + $0x80] ss:$8 sps:$4 sm:$0xff]   ;;  %v16329_v55 = vld [vmem:[%s23166_s5 + $0x354] ss:$8 sps:$4 sm:$0xff]  }
 0x6d2   : > { %v9046_v7 = vpop.f32.mrf.mxu1  ;;  %v16324_v37 = vld [vmem:[%s23166_s5 + $0x260] ss:$8 sps:$4 sm:$0xff]   ;;  %v16327_v57 = vld [vmem:[%s23166_s5 + $0x350] ss:$8 sps:$4 sm:$0xff]  }
 0x6d3   : > { %v9177_v10 = vadd.f32 %v9088_v8, %v8577_v24  ;;  %9753 = vmatpush1.bf16.msra.mxu0 %v16261_v3  ;;  %v9090_v30 = vadd.f32 %v22085_v0, %v9046_v7  ;;  %v9197_v45 = vadd.f32 %v9188_v18, %v9175_v34  ;;  %v9202_v11 = vmax.f32 %v9196_v12, 0.0  ;;  %v16273_v0 = vld [vmem:[%s23166_s5] ss:$8 sps:$4 sm:$0xff]   ;;  %v16332_v3 = vld [vmem:[%s23166_s5 + $0x254] ss:$8 sps:$4 sm:$0xff]  }
 0x6d4   : > { %9754 = vmatprep.subr.bf16.mxu0 %v16269_v58  ;;  %v16335_v58 = vld [vmem:[%s23166_s5 + $0x344] ss:$8 sps:$4 sm:$0xff]   ;;  %v16330_v24 = vld [vmem:[%s23166_s5 + $0x250] ss:$8 sps:$4 sm:$0xff]   ;;  %v16341_v8 = vld [vmem:[%s23166_s5 + $0x3d4] ss:$8 sps:$4 sm:$0xff]  }
 0x6d5   : > { %v9199_v42 = vadd.f32 %v9184_v13, %v9177_v10  ;;  %v9178_v16 = vadd.f32 %v9090_v30, %v22081_v62  ;;  %v9203_v27 = vmax.f32 %v9197_v45, 0.0  ;;  %v16279_v62 = vld [vmem:[%s23166_s5 + $0xf0] ss:$8 sps:$4 sm:$0xff]   ;;  %v16323_v13 = vld [vmem:[%s23166_s5 + $0x84] ss:$8 sps:$4 sm:$0xff]   ;;  %v9865_v30 = vrot.slane %v22095_v19, 1 }
 0x6d6   : > { %v16338_v34 = vld [vmem:[%s23166_s5 + $0x244] ss:$8 sps:$4 sm:$0xff]   ;;  %v16336_v7 = vld [vmem:[%s23166_s5 + $0x240] ss:$8 sps:$4 sm:$0xff]   ;;  %v16344_v12 = vld [vmem:[%s23166_s5 + $0x334] ss:$8 sps:$4 sm:$0xff]  }
 0x6d7   : > { %v9205_v22 = vmax.f32 %v9199_v42, 0.0  ;;  %v9200_v35 = vadd.f32 %v9188_v18, %v9178_v16  ;;  %9755 = vmatpush1.bf16.msra.mxu0 %v16267_v60  ;;  %v16333_v18 = vld [vmem:[%s23166_s5 + $0x340] ss:$8 sps:$4 sm:$0xff]   ;;  %v16339_v10 = vld [vmem:[%s23166_s5 + $0x3d0] ss:$8 sps:$4 sm:$0xff]  }
 0x6d8   : > { %9756 = vmatprep.subr.bf16.mxu0 %v16275_v5  ;;  %v16347_v60 = vld [vmem:[%s23166_s5 + $0x3c4] ss:$8 sps:$4 sm:$0xff]   ;;  %v16342_v45 = vld [vmem:[%s23166_s5 + $0x330] ss:$8 sps:$4 sm:$0xff]   ;;  %v16345_v16 = vld [vmem:[%s23166_s5 + $0x3c0] ss:$8 sps:$4 sm:$0xff]  }
 0x6d9   : > { %v22173_v25 = vpack.c.bf16 %v9205_v22, %v9202_v11  ;;  %v9206_v61 = vmax.f32 %v9200_v35, 0.0  ;;  %v16350_v42 = vld [vmem:[%s23166_s5 + $0x324] ss:$8 sps:$4 sm:$0xff]   ;;  %v16353_v11 = vld [vmem:[%s23166_s5 + $0x3b4] ss:$8 sps:$4 sm:$0xff]  }
 0x6da   : > { %v16348_v22 = vld [vmem:[%s23166_s5 + $0x320] ss:$8 sps:$4 sm:$0xff]   ;;  %v16356_v35 = vld [vmem:[%s23166_s5 + $0x314] ss:$8 sps:$4 sm:$0xff]  }
 0x6db   : > { %v22175_v17 = vpack.c.bf16 %v9206_v61, %v9203_v27  ;;  %9757 = vmatpush1.bf16.msra.mxu0 %v16273_v0  ;;  %v22191_v31 = vshrl.u32 %v22173_v25, 16  ;;  %v16351_v0 = vld [vmem:[%s23166_s5 + $0x3b0] ss:$8 sps:$4 sm:$0xff]   ;;  %v16362_v61 = vld [vmem:[%s23166_s5 + $0x304] ss:$8 sps:$4 sm:$0xff]  }
 0x6dc   : > { %9758 = vmatprep.subr.bf16.mxu0 %v16281_v9  ;;  %v16359_v9 = vld [vmem:[%s23166_s5 + $0x3a4] ss:$8 sps:$4 sm:$0xff]   ;;  %v16354_v27 = vld [vmem:[%s23166_s5 + $0x310] ss:$8 sps:$4 sm:$0xff]  }
 0x6dd   : > { %9774 = vmatprep.mubr.bf16.mxu0 %v22175_v17  ;;  %v22185_v50 = vshrl.u32 %v22175_v17, 16  ;;  %v9864_v33 = vrot.slane %v22175_v17, 1 }
 0x6df   : > { %9759 = vmatpush2.bf16.msra.mxu0 %v16279_v62  ;;  %9510 = vmatprep.mubr.bf16.mxu1 %v22185_v50  ;;  %v10172_v5 = vrot.slane %v22185_v50, 1  ;;  %v16357_v62 = vld [vmem:[%s23166_s5 + $0x3a0] ss:$8 sps:$4 sm:$0xff]  }
 0x6e0   : > { %9511 = vmatmul.mubr.bf16.vlgmr.msra.gmra.mxu1 %v22191_v31  ;;  %9760 = vmatprep.subr.bf16.mxu0 %v16287_v41  ;;  %v16365_v41 = vld [vmem:[%s23166_s5 + $0x394] ss:$8 sps:$4 sm:$0xff]  }
 0x6e1   : > { %9796 = vmatpush1.bf16.msra.mxu1 %v16282_v23  ;;  %9815 = vmatprep.mubr.bf16.mxu1 %v17290_v2  ;;  %v16360_v23 = vld [vmem:[%s23166_s5 + $0x300] ss:$8 sps:$4 sm:$0xff]  }
 0x6e2   : > { %9797 = vmatprep.subr.bf16.mxu1 %v16290_v53  ;;  %v16368_v53 = vld [vmem:[%s23166_s5 + $0x2f4] ss:$8 sps:$4 sm:$0xff]  }
 0x6e3   : > { %9761 = vmatpush2.bf16.msra.mxu0 %v16285_v54  ;;  %v16363_v54 = vld [vmem:[%s23166_s5 + $0x390] ss:$8 sps:$4 sm:$0xff]  }
 0x6e4   : > { %9762 = vmatprep.subr.bf16.mxu0 %v16293_v4  ;;  %v16371_v4 = vld [vmem:[%s23166_s5 + $0x384] ss:$8 sps:$4 sm:$0xff]  }
 0x6e5   : > { %9798 = vmatpush1.bf16.msra.mxu1 %v16288_v29  ;;  %v16366_v29 = vld [vmem:[%s23166_s5 + $0x2f0] ss:$8 sps:$4 sm:$0xff]  }
 0x6e6   : > { %10051 = vmatprep.subr.bf16.mxu1 %v16296_v28  ;;  %v16374_v28 = vld [vmem:[%s23166_s5 + $0x2e4] ss:$8 sps:$4 sm:$0xff]  }
 0x6e7   : > { %9763 = vmatpush2.bf16.msra.mxu0 %v16291_v26  ;;  %v16369_v26 = vld [vmem:[%s23166_s5 + $0x380] ss:$8 sps:$4 sm:$0xff]  }
 0x6e8   : > { %9764 = vmatprep.subr.bf16.mxu0 %v16299_v21  ;;  %13997 = vmatmul.mubr.msk.bf16.vlgmr.msra.gmra.mxu1 %vm9474_vm3, %v22095_v19  ;;  %v16377_v21 = vld [vmem:[%s23166_s5 + $0x374] ss:$8 sps:$4 sm:$0xff]  }
 0x6e9   : > { %10052 = vmatpush1.bf16.msra.mxu1 %v16294_v63  ;;  %10083 = vmatprep.mubr.bf16.mxu1 %v9864_v33  ;;  %v16372_v63 = vld [vmem:[%s23166_s5 + $0x2e0] ss:$8 sps:$4 sm:$0xff]   ;;  %v16383_v33 = vld [vmem:[%s23166_s5 + $0x364] ss:$8 sps:$4 sm:$0xff]  }
 0x6ea   : > { %10053 = vmatprep.subr.bf16.mxu1 %v16302_v49  ;;  %v16380_v49 = vld [vmem:[%s23166_s5 + $0x2d4] ss:$8 sps:$4 sm:$0xff]  }
 0x6eb   : > { %9765 = vmatpush2.bf16.msra.mxu0 %v16297_v38  ;;  %v16375_v38 = vld [vmem:[%s23166_s5 + $0x370] ss:$8 sps:$4 sm:$0xff]  }
 0x6ec   : > { %9766 = vmatprep.subr.bf16.mxu0 %v16305_v59  ;;  %v16378_v59 = vld [vmem:[%s23166_s5 + $0x2d0] ss:$8 sps:$4 sm:$0xff]  }
 0x6ed   : > { %10054 = vmatpush1.bf16.msra.mxu1 %v16300_v20  ;;  %v16386_v20 = vld [vmem:[%s23166_s5 + $0x2c4] ss:$8 sps:$4 sm:$0xff]  }
 0x6ee   : > { %10055 = vmatprep.subr.bf16.mxu1 %v16308_v44  ;;  %v16381_v44 = vld [vmem:[%s23166_s5 + $0x360] ss:$8 sps:$4 sm:$0xff]  }
 0x6ef   : > { %9767 = vmatpush2.bf16.msra.mxu0 %v16303_v46  ;;  %v16389_v46 = vld [vmem:[%s23166_s5 + $0x454] ss:$8 sps:$4 sm:$0xff]  }
 0x6f0   : > { %9768 = vmatprep.subr.bf16.mxu0 %v16311_v43  ;;  %v16384_v43 = vld [vmem:[%s23166_s5 + $0x2c0] ss:$8 sps:$4 sm:$0xff]  }
 0x6f1   : > { %10056 = vmatpush1.bf16.msra.mxu1 %v16306_v56  ;;  %v16392_v56 = vld [vmem:[%s23166_s5 + $0x474] ss:$8 sps:$4 sm:$0xff]  }
 0x6f2   : > { %10057 = vmatprep.subr.bf16.mxu1 %v16314_v32  ;;  %v16387_v32 = vld [vmem:[%s23166_s5 + $0x450] ss:$8 sps:$4 sm:$0xff]  }
 0x6f3   : > { %9769 = vmatpush2.bf16.msra.mxu0 %v16309_v52  ;;  %v16395_v52 = vld [vmem:[%s23166_s5 + $0x444] ss:$8 sps:$4 sm:$0xff]  }
 0x6f4   : > { %9770 = vmatprep.subr.bf16.mxu0 %v16317_v48  ;;  %v16390_v48 = vld [vmem:[%s23166_s5 + $0x470] ss:$8 sps:$4 sm:$0xff]  }
 0x6f5   : > { %10058 = vmatpush1.bf16.msra.mxu1 %v16312_v14  ;;  %v9863_v14 = vrot.slane %v22173_v25, 1 }
 0x6f6   : > { %10059 = vmatprep.subr.bf16.mxu1 %v16320_v1  ;;  %v16398_v1 = vld [vmem:[%s23166_s5 + $0x464] ss:$8 sps:$4 sm:$0xff]  }
 0x6f7   : > { %9771 = vmatpush2.bf16.msra.mxu0 %v16315_v47  ;;  %v16393_v47 = vld [vmem:[%s23166_s5 + $0x440] ss:$8 sps:$4 sm:$0xff]  }
 0x6f8   : > { %9772 = vmatprep.subr.bf16.mxu0 %v16323_v13  ;;  %v16401_v13 = vld [vmem:[%s23166_s5 + $0x434] ss:$8 sps:$4 sm:$0xff]  }
 0x6f9   : > { %10060 = vmatpush1.bf16.msra.mxu1 %v16318_v15  ;;  %v16396_v15 = vld [vmem:[%s23166_s5 + $0x460] ss:$8 sps:$4 sm:$0xff]  }
 0x6fa   : > { %10061 = vmatprep.subr.bf16.mxu1 %v16326_v6  ;;  %v16404_v6 = vld [vmem:[%s23166_s5 + $0x4f4] ss:$8 sps:$4 sm:$0xff]  }
 0x6fb   : > { %9773 = vmatpush2.bf16.msra.mxu0 %v16321_v39  ;;  %v16399_v39 = vld [vmem:[%s23166_s5 + $0x430] ss:$8 sps:$4 sm:$0xff]  }
 0x6fc   : > { %10104 = vmatprep.subr.bf16.mxu0 %v16329_v55  ;;  %v16407_v55 = vld [vmem:[%s23166_s5 + $0x424] ss:$8 sps:$4 sm:$0xff]  }
 0x6fd   : > { %10062 = vmatpush1.bf16.msra.mxu1 %v16324_v37  ;;  %v16402_v37 = vld [vmem:[%s23166_s5 + $0x4f0] ss:$8 sps:$4 sm:$0xff]  }
 0x6fe   : > { %9775 = vmatmul.mubr.bf16.vlgmr.msra.gmra.mxu0 %v22173_v25  ;;  %10063 = vmatprep.subr.bf16.mxu1 %v16332_v3  ;;  %v10173_v3 = vrot.slane %v22101_v36, 1 }
 0x6ff   : > { %10105 = vmatpush1.bf16.msra.mxu0 %v16327_v57  ;;  %10124 = vmatprep.mubr.bf16.mxu0 %v17290_v2  ;;  %v16410_v57 = vld [vmem:[%s23166_s5 + $0x4e4] ss:$8 sps:$4 sm:$0xff]  }
 0x700   : > { %10106 = vmatprep.subr.bf16.mxu0 %v16335_v58  ;;  %v16405_v58 = vld [vmem:[%s23166_s5 + $0x420] ss:$8 sps:$4 sm:$0xff]  }
 0x701   : > { %10064 = vmatpush1.bf16.msra.mxu1 %v16330_v24  ;;  %v10480_v24 = vrot.slane %v22175_v17, 2 }
 0x702   : > { %10065 = vmatprep.subr.bf16.mxu1 %v16338_v34  ;;  %v16413_v34 = vld [vmem:[%s23166_s5 + $0x414] ss:$8 sps:$4 sm:$0xff]  }
 0x703   : > { %10107 = vmatpush1.bf16.msra.mxu0 %v16333_v18  ;;  %v16408_v18 = vld [vmem:[%s23166_s5 + $0x4e0] ss:$8 sps:$4 sm:$0xff]  }
 0x704   : > { %10359 = vmatprep.subr.bf16.mxu0 %v16341_v8  ;;  %v16416_v8 = vld [vmem:[%s23166_s5 + $0x4d4] ss:$8 sps:$4 sm:$0xff]  }
 0x705   : > { %10066 = vmatpush1.bf16.msra.mxu1 %v16336_v7  ;;  %v16411_v7 = vld [vmem:[%s23166_s5 + $0x410] ss:$8 sps:$4 sm:$0xff]  }
 0x706   : > { %14034 = vmatmul.mubr.msk.bf16.vlgmr.msra.gmra.mxu0 %vm9474_vm3, %v9865_v30  ;;  %10067 = vmatprep.subr.bf16.mxu1 %v16344_v12  ;;  %v16419_v12 = vld [vmem:[%s23166_s5 + $0x404] ss:$8 sps:$4 sm:$0xff]  }
 0x707   : > { %10360 = vmatpush1.bf16.msra.mxu0 %v16339_v10  ;;  %10391 = vmatprep.mubr.bf16.mxu0 %v10172_v5  ;;  %v16414_v10 = vld [vmem:[%s23166_s5 + $0x4d0] ss:$8 sps:$4 sm:$0xff]   ;;  %v16422_v30 = vld [vmem:[%s23166_s5 + $0x4c4] ss:$8 sps:$4 sm:$0xff]   ;;  %v16425_v5 = vld [vmem:[%s23166_s5 + $0x3f4] ss:$8 sps:$4 sm:$0xff]  }
 0x708   : > { %10361 = vmatprep.subr.bf16.mxu0 %v16347_v60  ;;  %v16417_v60 = vld [vmem:[%s23166_s5 + $0x400] ss:$8 sps:$4 sm:$0xff]  }
 0x709   : > { %10068 = vmatpush2.bf16.msra.mxu1 %v16342_v45  ;;  %v16420_v45 = vld [vmem:[%s23166_s5 + $0x4c0] ss:$8 sps:$4 sm:$0xff]  }
 0x70a   : > { %10069 = vmatprep.subr.bf16.mxu1 %v16350_v42  ;;  %v16428_v42 = vld [vmem:[%s23166_s5 + $0x4b4] ss:$8 sps:$4 sm:$0xff]  }
 0x70b   : > { %10362 = vmatpush1.bf16.msra.mxu0 %v16345_v16  ;;  %v16423_v16 = vld [vmem:[%s23166_s5 + $0x3f0] ss:$8 sps:$4 sm:$0xff]  }
 0x70c   : > { %10363 = vmatprep.subr.bf16.mxu0 %v16353_v11  ;;  %v16431_v11 = vld [vmem:[%s23166_s5 + $0x3e4] ss:$8 sps:$4 sm:$0xff]  }
 0x70d   : > { %10070 = vmatpush2.bf16.msra.mxu1 %v16348_v22  ;;  %v16426_v22 = vld [vmem:[%s23166_s5 + $0x4b0] ss:$8 sps:$4 sm:$0xff]  }
 0x70e   : > { %10071 = vmatprep.subr.bf16.mxu1 %v16356_v35  ;;  %v16434_v35 = vld [vmem:[%s23166_s5 + $0x4a4] ss:$8 sps:$4 sm:$0xff]  }
 0x70f   : > { %10364 = vmatpush1.bf16.msra.mxu0 %v16351_v0  ;;  %v16429_v0 = vld [vmem:[%s23166_s5 + $0x3e0] ss:$8 sps:$4 sm:$0xff]  }
 0x710   : > { %10365 = vmatprep.subr.bf16.mxu0 %v16359_v9  ;;  %v16437_v9 = vld [vmem:[%s23166_s5 + $0x594] ss:$8 sps:$4 sm:$0xff]  }
 0x711   : > { %10072 = vmatpush2.bf16.msra.mxu1 %v16354_v27  ;;  %v16432_v27 = vld [vmem:[%s23166_s5 + $0x4a0] ss:$8 sps:$4 sm:$0xff]  }
 0x712   : > { %10073 = vmatprep.subr.bf16.mxu1 %v16362_v61  ;;  %v16440_v61 = vld [vmem:[%s23166_s5 + $0x494] ss:$8 sps:$4 sm:$0xff]  }
 0x713   : > { %10366 = vmatpush1.bf16.msra.mxu0 %v16357_v62  ;;  %v16435_v62 = vld [vmem:[%s23166_s5 + $0x590] ss:$8 sps:$4 sm:$0xff]  }
 0x714   : > { %10367 = vmatprep.subr.bf16.mxu0 %v16365_v41  ;;  %v10171_v41 = vrot.slane %v22191_v31, 1 }
 0x715   : > { %10074 = vmatpush2.bf16.msra.mxu1 %v16360_v23  ;;  %v16443_v23 = vld [vmem:[%s23166_s5 + $0x584] ss:$8 sps:$4 sm:$0xff]  }
 0x716   : > { %10075 = vmatprep.subr.bf16.mxu1 %v16368_v53  ;;  %v16438_v53 = vld [vmem:[%s23166_s5 + $0x490] ss:$8 sps:$4 sm:$0xff]  }
 0x717   : > { %10368 = vmatpush1.bf16.msra.mxu0 %v16363_v54  ;;  %v16446_v54 = vld [vmem:[%s23166_s5 + $0x484] ss:$8 sps:$4 sm:$0xff]  }
 0x718   : > { %10369 = vmatprep.subr.bf16.mxu0 %v16371_v4  ;;  %v16441_v4 = vld [vmem:[%s23166_s5 + $0x580] ss:$8 sps:$4 sm:$0xff]  }
 0x719   : > { %10076 = vmatpush2.bf16.msra.mxu1 %v16366_v29  ;;  %v16449_v29 = vld [vmem:[%s23166_s5 + $0x614] ss:$8 sps:$4 sm:$0xff]  }
 0x71a   : > { %10077 = vmatprep.subr.bf16.mxu1 %v16374_v28  ;;  %v16444_v28 = vld [vmem:[%s23166_s5 + $0x480] ss:$8 sps:$4 sm:$0xff]  }
 0x71b   : > { %10370 = vmatpush1.bf16.msra.mxu0 %v16369_v26  ;;  %v16452_v26 = vld [vmem:[%s23166_s5 + $0x574] ss:$8 sps:$4 sm:$0xff]  }
 0x71c   : > { %10371 = vmatprep.subr.bf16.mxu0 %v16377_v21  ;;  %v16447_v21 = vld [vmem:[%s23166_s5 + $0x610] ss:$8 sps:$4 sm:$0xff]  }
 0x71d   : > { %10078 = vmatpush2.bf16.msra.mxu1 %v16372_v63  ;;  %v10481_v63 = vrot.slane %v22095_v19, 2 }
 0x71e   : > { %10079 = vmatprep.subr.bf16.mxu1 %v16380_v49  ;;  %v16455_v49 = vld [vmem:[%s23166_s5 + $0x604] ss:$8 sps:$4 sm:$0xff]  }
 0x71f   : > { %10372 = vmatpush1.bf16.msra.mxu0 %v16375_v38  ;;  %v10788_v38 = vrot.slane %v22185_v50, 2 }
 0x720   : > { %10373 = vmatprep.subr.bf16.mxu0 %v16383_v33  ;;  %v16450_v33 = vld [vmem:[%s23166_s5 + $0x570] ss:$8 sps:$4 sm:$0xff]  }
 0x721   : > { %10080 = vmatpush2.bf16.msra.mxu1 %v16378_v59  ;;  %v16458_v59 = vld [vmem:[%s23166_s5 + $0x564] ss:$8 sps:$4 sm:$0xff]  }
 0x722   : > { %10081 = vmatprep.subr.bf16.mxu1 %v16386_v20  ;;  %v16453_v20 = vld [vmem:[%s23166_s5 + $0x600] ss:$8 sps:$4 sm:$0xff]  }
 0x723   : > { %10374 = vmatpush1.bf16.msra.mxu0 %v16381_v44  ;;  %v16461_v44 = vld [vmem:[%s23166_s5 + $0x5f4] ss:$8 sps:$4 sm:$0xff]  }
 0x724   : > { %10375 = vmatprep.subr.bf16.mxu0 %v16389_v46  ;;  %v16456_v46 = vld [vmem:[%s23166_s5 + $0x560] ss:$8 sps:$4 sm:$0xff]  }
 0x725   : > { %10082 = vmatpush2.bf16.msra.mxu1 %v16384_v43  ;;  %v16464_v43 = vld [vmem:[%s23166_s5 + $0x554] ss:$8 sps:$4 sm:$0xff]  }
 0x726   : > { %10412 = vmatprep.subr.bf16.mxu1 %v16392_v56  ;;  %v16459_v56 = vld [vmem:[%s23166_s5 + $0x5f0] ss:$8 sps:$4 sm:$0xff]  }
 0x727   : > { %10376 = vmatpush2.bf16.msra.mxu0 %v16387_v32  ;;  %v16467_v32 = vld [vmem:[%s23166_s5 + $0x5e4] ss:$8 sps:$4 sm:$0xff]  }
 0x728   : > { %10084 = vmatmul.mubr.bf16.vlgmr.msra.gmra.mxu1 %v9863_v14  ;;  %10377 = vmatprep.subr.bf16.mxu0 %v16395_v52  ;;  %v16462_v52 = vld [vmem:[%s23166_s5 + $0x550] ss:$8 sps:$4 sm:$0xff]   ;;  %v16465_v14 = vld [vmem:[%s23166_s5 + $0x5e0] ss:$8 sps:$4 sm:$0xff]  }
 0x729   : > { %10413 = vmatpush1.bf16.msra.mxu1 %v16390_v48  ;;  %10432 = vmatprep.mubr.bf16.mxu1 %v17290_v2  ;;  %v16470_v48 = vld [vmem:[%s23166_s5 + $0x544] ss:$8 sps:$4 sm:$0xff]  }
 0x72a   : > { %10414 = vmatprep.subr.bf16.mxu1 %v16398_v1  ;;  %v16473_v1 = vld [vmem:[%s23166_s5 + $0x5d4] ss:$8 sps:$4 sm:$0xff]  }
 0x72b   : > { %10378 = vmatpush2.bf16.msra.mxu0 %v16393_v47  ;;  %v16468_v47 = vld [vmem:[%s23166_s5 + $0x540] ss:$8 sps:$4 sm:$0xff]  }
 0x72c   : > { %10379 = vmatprep.subr.bf16.mxu0 %v16401_v13  ;;  %v16476_v13 = vld [vmem:[%s23166_s5 + $0x534] ss:$8 sps:$4 sm:$0xff]  }
 0x72d   : > { %10415 = vmatpush1.bf16.msra.mxu1 %v16396_v15  ;;  %v16471_v15 = vld [vmem:[%s23166_s5 + $0x5d0] ss:$8 sps:$4 sm:$0xff]  }
 0x72e   : > { %10667 = vmatprep.subr.bf16.mxu1 %v16404_v6  ;;  %v16479_v6 = vld [vmem:[%s23166_s5 + $0x5c4] ss:$8 sps:$4 sm:$0xff]  }
 0x72f   : > { %10380 = vmatpush2.bf16.msra.mxu0 %v16399_v39  ;;  %v16474_v39 = vld [vmem:[%s23166_s5 + $0x530] ss:$8 sps:$4 sm:$0xff]  }
 0x730   : > { %14071 = vmatmul.mubr.msk.bf16.vlgmr.msra.gmra.mxu1 %vm9474_vm3, %v10173_v3  ;;  %10381 = vmatprep.subr.bf16.mxu0 %v16407_v55  ;;  %v16482_v55 = vld [vmem:[%s23166_s5 + $0x524] ss:$8 sps:$4 sm:$0xff]   ;;  %v16485_v3 = vld [vmem:[%s23166_s5 + $0x5b4] ss:$8 sps:$4 sm:$0xff]  }
 0x731   : > { %10668 = vmatpush1.bf16.msra.mxu1 %v16402_v37  ;;  %10699 = vmatprep.mubr.bf16.mxu1 %v10480_v24  ;;  %v16477_v37 = vld [vmem:[%s23166_s5 + $0x5c0] ss:$8 sps:$4 sm:$0xff]   ;;  %v16483_v24 = vld [vmem:[%s23166_s5 + $0x5b0] ss:$8 sps:$4 sm:$0xff]  }
 0x732   : > { %10669 = vmatprep.subr.bf16.mxu1 %v16410_v57  ;;  %v16480_v57 = vld [vmem:[%s23166_s5 + $0x520] ss:$8 sps:$4 sm:$0xff]  }
 0x733   : > { %10382 = vmatpush2.bf16.msra.mxu0 %v16405_v58  ;;  %v16488_v58 = vld [vmem:[%s23166_s5 + $0x514] ss:$8 sps:$4 sm:$0xff]  }
 0x734   : > { %10383 = vmatprep.subr.bf16.mxu0 %v16413_v34  ;;  %v16491_v34 = vld [vmem:[%s23166_s5 + $0x5a4] ss:$8 sps:$4 sm:$0xff]  }
 0x735   : > { %10670 = vmatpush1.bf16.msra.mxu1 %v16408_v18  ;;  %v16486_v18 = vld [vmem:[%s23166_s5 + $0x510] ss:$8 sps:$4 sm:$0xff]  }
 0x736   : > { %10671 = vmatprep.subr.bf16.mxu1 %v16416_v8  ;;  %v16494_v8 = vld [vmem:[%s23166_s5 + $0x504] ss:$8 sps:$4 sm:$0xff]  }
 0x737   : > { %10384 = vmatpush2.bf16.msra.mxu0 %v16411_v7  ;;  %v16489_v7 = vld [vmem:[%s23166_s5 + $0x5a0] ss:$8 sps:$4 sm:$0xff]  }
 0x738   : > { %10385 = vmatprep.subr.bf16.mxu0 %v16419_v12  ;;  %v16497_v12 = vld [vmem:[%s23166_s5 + $0x694] ss:$8 sps:$4 sm:$0xff]  }
 0x739   : > { %10672 = vmatpush1.bf16.msra.mxu1 %v16414_v10  ;;  %v16492_v10 = vld [vmem:[%s23166_s5 + $0x500] ss:$8 sps:$4 sm:$0xff]  }
 0x73a   : > { %10673 = vmatprep.subr.bf16.mxu1 %v16422_v30  ;;  %v16500_v30 = vld [vmem:[%s23166_s5 + $0x6b4] ss:$8 sps:$4 sm:$0xff]  }
 0x73b   : > { %10386 = vmatpush2.bf16.msra.mxu0 %v16417_v60  ;;  %v16495_v60 = vld [vmem:[%s23166_s5 + $0x690] ss:$8 sps:$4 sm:$0xff]  }
 0x73c   : > { %10387 = vmatprep.subr.bf16.mxu0 %v16425_v5  ;;  %v16503_v5 = vld [vmem:[%s23166_s5 + $0x684] ss:$8 sps:$4 sm:$0xff]  }
 0x73d   : > { %10674 = vmatpush1.bf16.msra.mxu1 %v16420_v45  ;;  %v16498_v45 = vld [vmem:[%s23166_s5 + $0x6b0] ss:$8 sps:$4 sm:$0xff]  }
 0x73e   : > { %10675 = vmatprep.subr.bf16.mxu1 %v16428_v42  ;;  %v10479_v42 = vrot.slane %v22173_v25, 2 }
 0x73f   : > { %10388 = vmatpush2.bf16.msra.mxu0 %v16423_v16  ;;  %v16506_v16 = vld [vmem:[%s23166_s5 + $0x6a4] ss:$8 sps:$4 sm:$0xff]  }
 0x740   : > { %10389 = vmatprep.subr.bf16.mxu0 %v16431_v11  ;;  %v16501_v11 = vld [vmem:[%s23166_s5 + $0x680] ss:$8 sps:$4 sm:$0xff]  }
 0x741   : > { %10676 = vmatpush1.bf16.msra.mxu1 %v16426_v22  ;;  %v16509_v22 = vld [vmem:[%s23166_s5 + $0x674] ss:$8 sps:$4 sm:$0xff]  }
 0x742   : > { %10677 = vmatprep.subr.bf16.mxu1 %v16434_v35  ;;  %v16504_v35 = vld [vmem:[%s23166_s5 + $0x6a0] ss:$8 sps:$4 sm:$0xff]  }
 0x743   : > { %10390 = vmatpush2.bf16.msra.mxu0 %v16429_v0  ;;  %v16512_v0 = vld [vmem:[%s23166_s5 + $0x734] ss:$8 sps:$4 sm:$0xff]  }
 0x744   : > { %10720 = vmatprep.subr.bf16.mxu0 %v16437_v9  ;;  %v16507_v9 = vld [vmem:[%s23166_s5 + $0x670] ss:$8 sps:$4 sm:$0xff]  }
 0x745   : > { %10678 = vmatpush1.bf16.msra.mxu1 %v16432_v27  ;;  %v16515_v27 = vld [vmem:[%s23166_s5 + $0x664] ss:$8 sps:$4 sm:$0xff]  }
 0x746   : > { %10392 = vmatmul.mubr.bf16.vlgmr.msra.gmra.mxu0 %v10171_v41  ;;  %10679 = vmatprep.subr.bf16.mxu1 %v16440_v61  ;;  %v16510_v61 = vld [vmem:[%s23166_s5 + $0x730] ss:$8 sps:$4 sm:$0xff]   ;;  %v16518_v41 = vld [vmem:[%s23166_s5 + $0x724] ss:$8 sps:$4 sm:$0xff]  }
 0x747   : > { %10721 = vmatpush1.bf16.msra.mxu0 %v16435_v62  ;;  %10740 = vmatprep.mubr.bf16.mxu0 %v17290_v2  ;;  %v10789_v62 = vrot.slane %v22101_v36, 2 }
 0x748   : > { %10722 = vmatprep.subr.bf16.mxu0 %v16443_v23  ;;  %v16513_v23 = vld [vmem:[%s23166_s5 + $0x660] ss:$8 sps:$4 sm:$0xff]  }
 0x749   : > { %10680 = vmatpush1.bf16.msra.mxu1 %v16438_v53  ;;  %v11096_v53 = vrot.slane %v22175_v17, 3 }
 0x74a   : > { %10681 = vmatprep.subr.bf16.mxu1 %v16446_v54  ;;  %v16521_v54 = vld [vmem:[%s23166_s5 + $0x654] ss:$8 sps:$4 sm:$0xff]  }
 0x74b   : > { %10723 = vmatpush1.bf16.msra.mxu0 %v16441_v4  ;;  %v16516_v4 = vld [vmem:[%s23166_s5 + $0x720] ss:$8 sps:$4 sm:$0xff]  }
 0x74c   : > { %10975 = vmatprep.subr.bf16.mxu0 %v16449_v29  ;;  %v16524_v29 = vld [vmem:[%s23166_s5 + $0x714] ss:$8 sps:$4 sm:$0xff]  }
 0x74d   : > { %10682 = vmatpush1.bf16.msra.mxu1 %v16444_v28  ;;  %v16519_v28 = vld [vmem:[%s23166_s5 + $0x650] ss:$8 sps:$4 sm:$0xff]  }
 0x74e   : > { %14108 = vmatmul.mubr.msk.bf16.vlgmr.msra.gmra.mxu0 %vm9474_vm3, %v10481_v63  ;;  %10683 = vmatprep.subr.bf16.mxu1 %v16452_v26  ;;  %v16527_v26 = vld [vmem:[%s23166_s5 + $0x644] ss:$8 sps:$4 sm:$0xff]  }
 0x74f   : > { %10976 = vmatpush1.bf16.msra.mxu0 %v16447_v21  ;;  %11007 = vmatprep.mubr.bf16.mxu0 %v10788_v38  ;;  %v16522_v21 = vld [vmem:[%s23166_s5 + $0x710] ss:$8 sps:$4 sm:$0xff]   ;;  %v16525_v38 = vld [vmem:[%s23166_s5 + $0x640] ss:$8 sps:$4 sm:$0xff]  }
 0x750   : > { %10977 = vmatprep.subr.bf16.mxu0 %v16455_v49  ;;  %v16530_v49 = vld [vmem:[%s23166_s5 + $0x704] ss:$8 sps:$4 sm:$0xff]  }
 0x751   : > { %10684 = vmatpush2.bf16.msra.mxu1 %v16450_v33 }
 0x752   : > { %10685 = vmatprep.subr.bf16.mxu1 %v16458_v59  ;;  %v16533_v59 = vld [vmem:[%s23166_s5 + $0x634] ss:$8 sps:$4 sm:$0xff]  }
 0x753   : > { %10978 = vmatpush1.bf16.msra.mxu0 %v16453_v20  ;;  %v16528_v20 = vld [vmem:[%s23166_s5 + $0x700] ss:$8 sps:$4 sm:$0xff]  }
 0x754   : > { %10979 = vmatprep.subr.bf16.mxu0 %v16461_v44 }
 0x755   : > { %10686 = vmatpush2.bf16.msra.mxu1 %v16456_v46  ;;  %v16536_v46 = vld [vmem:[%s23166_s5 + $0x6f4] ss:$8 sps:$4 sm:$0xff]  }
 0x756   : > { %10687 = vmatprep.subr.bf16.mxu1 %v16464_v43  ;;  %v16531_v43 = vld [vmem:[%s23166_s5 + $0x630] ss:$8 sps:$4 sm:$0xff]  }
 0x757   : > { %10980 = vmatpush1.bf16.msra.mxu0 %v16459_v56 }
 0x758   : > { %10981 = vmatprep.subr.bf16.mxu0 %v16467_v32  ;;  %v16539_v32 = vld [vmem:[%s23166_s5 + $0x624] ss:$8 sps:$4 sm:$0xff]  }
 0x759   : > { %10688 = vmatpush2.bf16.msra.mxu1 %v16462_v52  ;;  %v16534_v52 = vld [vmem:[%s23166_s5 + $0x6f0] ss:$8 sps:$4 sm:$0xff]  }
 0x75a   : > { %10689 = vmatprep.subr.bf16.mxu1 %v16470_v48  ;;  %v16542_v48 = vld [vmem:[%s23166_s5 + $0x6e4] ss:$8 sps:$4 sm:$0xff]  }
 0x75b   : > { %10982 = vmatpush1.bf16.msra.mxu0 %v16465_v14  ;;  %v16537_v14 = vld [vmem:[%s23166_s5 + $0x620] ss:$8 sps:$4 sm:$0xff]  }
 0x75c   : > { %10983 = vmatprep.subr.bf16.mxu0 %v16473_v1  ;;  %v16545_v1 = vld [vmem:[%s23166_s5 + $0x7d4] ss:$8 sps:$4 sm:$0xff]  }
 0x75d   : > { %10690 = vmatpush2.bf16.msra.mxu1 %v16468_v47  ;;  %v16540_v47 = vld [vmem:[%s23166_s5 + $0x6e0] ss:$8 sps:$4 sm:$0xff]  }
 0x75e   : > { %10691 = vmatprep.subr.bf16.mxu1 %v16476_v13  ;;  %v16548_v13 = vld [vmem:[%s23166_s5 + $0x6d4] ss:$8 sps:$4 sm:$0xff]  }
 0x75f   : > { %10984 = vmatpush1.bf16.msra.mxu0 %v16471_v15  ;;  %v16543_v15 = vld [vmem:[%s23166_s5 + $0x7d0] ss:$8 sps:$4 sm:$0xff]  }
 0x760   : > { %10985 = vmatprep.subr.bf16.mxu0 %v16479_v6  ;;  %v10787_v6 = vrot.slane %v22191_v31, 2 }
 0x761   : > { %10692 = vmatpush2.bf16.msra.mxu1 %v16474_v39  ;;  %v16551_v39 = vld [vmem:[%s23166_s5 + $0x7c4] ss:$8 sps:$4 sm:$0xff]  }
 0x762   : > { %10693 = vmatprep.subr.bf16.mxu1 %v16482_v55  ;;  %v16546_v55 = vld [vmem:[%s23166_s5 + $0x6d0] ss:$8 sps:$4 sm:$0xff]  }
 0x763   : > { %10986 = vmatpush1.bf16.msra.mxu0 %v16477_v37  ;;  %v16554_v37 = vld [vmem:[%s23166_s5 + $0x6c4] ss:$8 sps:$4 sm:$0xff]  }
 0x764   : > { %10987 = vmatprep.subr.bf16.mxu0 %v16485_v3  ;;  %v16549_v3 = vld [vmem:[%s23166_s5 + $0x7c0] ss:$8 sps:$4 sm:$0xff]  }
 0x765   : > { %10694 = vmatpush2.bf16.msra.mxu1 %v16480_v57  ;;  %v16557_v57 = vld [vmem:[%s23166_s5 + $0x854] ss:$8 sps:$4 sm:$0xff]  }
 0x766   : > { %10695 = vmatprep.subr.bf16.mxu1 %v16488_v58  ;;  %v16552_v58 = vld [vmem:[%s23166_s5 + $0x6c0] ss:$8 sps:$4 sm:$0xff]  }
 0x767   : > { %10988 = vmatpush1.bf16.msra.mxu0 %v16483_v24  ;;  %v16560_v24 = vld [vmem:[%s23166_s5 + $0x7b4] ss:$8 sps:$4 sm:$0xff]  }
 0x768   : > { %10989 = vmatprep.subr.bf16.mxu0 %v16491_v34  ;;  %v16555_v34 = vld [vmem:[%s23166_s5 + $0x850] ss:$8 sps:$4 sm:$0xff]  }
 0x769   : > { %10696 = vmatpush2.bf16.msra.mxu1 %v16486_v18  ;;  %v11097_v18 = vrot.slane %v22095_v19, 3 }
 0x76a   : > { %10697 = vmatprep.subr.bf16.mxu1 %v16494_v8  ;;  %v16563_v8 = vld [vmem:[%s23166_s5 + $0x844] ss:$8 sps:$4 sm:$0xff]  }
 0x76b   : > { %10990 = vmatpush1.bf16.msra.mxu0 %v16489_v7  ;;  %v11404_v7 = vrot.slane %v22185_v50, 3  ;;  %v16569_v50 = vld [vmem:[%s23166_s5 + $0x834] ss:$8 sps:$4 sm:$0xff]  }
 0x76c   : > { %10991 = vmatprep.subr.bf16.mxu0 %v16497_v12  ;;  %v16558_v12 = vld [vmem:[%s23166_s5 + $0x7b0] ss:$8 sps:$4 sm:$0xff]  }
 0x76d   : > { %10698 = vmatpush2.bf16.msra.mxu1 %v16492_v10  ;;  %v16566_v10 = vld [vmem:[%s23166_s5 + $0x7a4] ss:$8 sps:$4 sm:$0xff]  }
 0x76e   : > { %11028 = vmatprep.subr.bf16.mxu1 %v16500_v30  ;;  %v16561_v30 = vld [vmem:[%s23166_s5 + $0x840] ss:$8 sps:$4 sm:$0xff]  }
 0x76f   : > { %10992 = vmatpush2.bf16.msra.mxu0 %v16495_v60  ;;  %v16564_v60 = vld [vmem:[%s23166_s5 + $0x7a0] ss:$8 sps:$4 sm:$0xff]  }
 0x770   : > { %10700 = vmatmul.mubr.bf16.vlgmr.msra.gmra.mxu1 %v10479_v42  ;;  %10993 = vmatprep.subr.bf16.mxu0 %v16503_v5  ;;  %v16572_v5 = vld [vmem:[%s23166_s5 + $0x794] ss:$8 sps:$4 sm:$0xff]   ;;  %v16575_v42 = vld [vmem:[%s23166_s5 + $0x824] ss:$8 sps:$4 sm:$0xff]  }
 0x771   : > { %11029 = vmatpush1.bf16.msra.mxu1 %v16498_v45  ;;  %11048 = vmatprep.mubr.bf16.mxu1 %v17290_v2  ;;  %v16567_v45 = vld [vmem:[%s23166_s5 + $0x830] ss:$8 sps:$4 sm:$0xff]  }
 0x772   : > { %11030 = vmatprep.subr.bf16.mxu1 %v16506_v16  ;;  %v16570_v16 = vld [vmem:[%s23166_s5 + $0x790] ss:$8 sps:$4 sm:$0xff]  }
 0x773   : > { %10994 = vmatpush2.bf16.msra.mxu0 %v16501_v11  ;;  %v16578_v11 = vld [vmem:[%s23166_s5 + $0x784] ss:$8 sps:$4 sm:$0xff]  }
 0x774   : > { %10995 = vmatprep.subr.bf16.mxu0 %v16509_v22  ;;  %v16573_v22 = vld [vmem:[%s23166_s5 + $0x820] ss:$8 sps:$4 sm:$0xff]  }
 0x775   : > { %11031 = vmatpush1.bf16.msra.mxu1 %v16504_v35 }
 0x776   : > { %11283 = vmatprep.subr.bf16.mxu1 %v16512_v0  ;;  %v16581_v0 = vld [vmem:[%s23166_s5 + $0x814] ss:$8 sps:$4 sm:$0xff]  }
 0x777   : > { %10996 = vmatpush2.bf16.msra.mxu0 %v16507_v9 }
 0x778   : > { %14145 = vmatmul.mubr.msk.bf16.vlgmr.msra.gmra.mxu1 %vm9474_vm3, %v10789_v62  ;;  %10997 = vmatprep.subr.bf16.mxu0 %v16515_v27  ;;  %v16576_v27 = vld [vmem:[%s23166_s5 + $0x780] ss:$8 sps:$4 sm:$0xff]   ;;  %v16584_v62 = vld [vmem:[%s23166_s5 + $0x774] ss:$8 sps:$4 sm:$0xff]  }
 0x779   : > { %11284 = vmatpush1.bf16.msra.mxu1 %v16510_v61  ;;  %11315 = vmatprep.mubr.bf16.mxu1 %v11096_v53 }
 0x77a   : > { %11285 = vmatprep.subr.bf16.mxu1 %v16518_v41 }
 0x77b   : > { %10998 = vmatpush2.bf16.msra.mxu0 %v16513_v23  ;;  %v16579_v23 = vld [vmem:[%s23166_s5 + $0x810] ss:$8 sps:$4 sm:$0xff]  }
 0x77c   : > { %10999 = vmatprep.subr.bf16.mxu0 %v16521_v54  ;;  %v16587_v54 = vld [vmem:[%s23166_s5 + $0x804] ss:$8 sps:$4 sm:$0xff]  }
 0x77d   : > { %11286 = vmatpush1.bf16.msra.mxu1 %v16516_v4  ;;  %v16582_v4 = vld [vmem:[%s23166_s5 + $0x770] ss:$8 sps:$4 sm:$0xff]  }
 0x77e   : > { %v22699_v63 = vpop.f32.mrf.mxu0  ;;  %11287 = vmatprep.subr.bf16.mxu1 %v16524_v29 }
 0x77f   : > { %11000 = vmatpush2.bf16.msra.mxu0 %v16519_v28  ;;  %v16590_v28 = vld [vmem:[%s23166_s5 + $0x764] ss:$8 sps:$4 sm:$0xff]  }
 0x780   : > { %v22707_v33 = vpop.f32.mrf.mxu0  ;;  %11001 = vmatprep.subr.bf16.mxu0 %v16527_v26  ;;  %v16585_v26 = vld [vmem:[%s23166_s5 + $0x800] ss:$8 sps:$4 sm:$0xff]  }
 0x781   : > { %11288 = vmatpush1.bf16.msra.mxu1 %v16522_v21 }
 0x782   : > { %v9557_v44 = vpop.f32.mrf.mxu0  ;;  %11289 = vmatprep.subr.bf16.mxu1 %v16530_v49  ;;  %v16588_v49 = vld [vmem:[%s23166_s5 + $0x760] ss:$8 sps:$4 sm:$0xff]  }
 0x783   : > { %11002 = vmatpush2.bf16.msra.mxu0 %v16525_v38  ;;  %v16599_v44 = vld [vmem:[%s23166_s5 + $0x7e4] ss:$8 sps:$4 sm:$0xff]  }
 0x784   : > { %v9558_v56 = vpop.f32.mrf.mxu0  ;;  %11003 = vmatprep.subr.bf16.mxu0 %v16533_v59  ;;  %v16591_v59 = vld [vmem:[%s23166_s5 + $0x7f0] ss:$8 sps:$4 sm:$0xff]  }
 0x785   : > { %11290 = vmatpush1.bf16.msra.mxu1 %v16528_v20  ;;  %v16602_v56 = vld [vmem:[%s23166_s5 + $0x744] ss:$8 sps:$4 sm:$0xff]  }
 0x786   : > { %11291 = vmatprep.subr.bf16.mxu1 %v16536_v46  ;;  %v16594_v46 = vld [vmem:[%s23166_s5 + $0x750] ss:$8 sps:$4 sm:$0xff]  }
 0x787   : > { %11004 = vmatpush2.bf16.msra.mxu0 %v16531_v43 }
 0x788   : > { %11005 = vmatprep.subr.bf16.mxu0 %v16539_v32  ;;  %v16597_v32 = vld [vmem:[%s23166_s5 + $0x7e0] ss:$8 sps:$4 sm:$0xff]  }
 0x789   : > { %11292 = vmatpush1.bf16.msra.mxu1 %v16534_v52  ;;  %v16605_v52 = vld [vmem:[%s23166_s5 + $0x8d4] ss:$8 sps:$4 sm:$0xff]  }
 0x78a   : > { %11293 = vmatprep.subr.bf16.mxu1 %v16542_v48  ;;  %v16600_v48 = vld [vmem:[%s23166_s5 + $0x740] ss:$8 sps:$4 sm:$0xff]  }
 0x78b   : > { %11006 = vmatpush2.bf16.msra.mxu0 %v16537_v14  ;;  %v16608_v14 = vld [vmem:[%s23166_s5 + $0x8f4] ss:$8 sps:$4 sm:$0xff]  }
 0x78c   : > { %11336 = vmatprep.subr.bf16.mxu0 %v16545_v1  ;;  %v16603_v1 = vld [vmem:[%s23166_s5 + $0x8d0] ss:$8 sps:$4 sm:$0xff]  }
 0x78d   : > { %11294 = vmatpush1.bf16.msra.mxu1 %v16540_v47  ;;  %v16611_v47 = vld [vmem:[%s23166_s5 + $0x8c4] ss:$8 sps:$4 sm:$0xff]  }
 0x78e   : > { %11008 = vmatmul.mubr.bf16.vlgmr.msra.gmra.mxu0 %v10787_v6  ;;  %11295 = vmatprep.subr.bf16.mxu1 %v16548_v13  ;;  %v16606_v13 = vld [vmem:[%s23166_s5 + $0x8f0] ss:$8 sps:$4 sm:$0xff]   ;;  %v16614_v6 = vld [vmem:[%s23166_s5 + $0x8e4] ss:$8 sps:$4 sm:$0xff]  }
 0x78f   : > { %11337 = vmatpush1.bf16.msra.mxu0 %v16543_v15  ;;  %11356 = vmatprep.mubr.bf16.mxu0 %v17290_v2  ;;  %v11095_v15 = vrot.slane %v22173_v25, 3 }
 0x790   : > { %11338 = vmatprep.subr.bf16.mxu0 %v16551_v39  ;;  %v16609_v39 = vld [vmem:[%s23166_s5 + $0x8c0] ss:$8 sps:$4 sm:$0xff]  }
 0x791   : > { %11296 = vmatpush1.bf16.msra.mxu1 %v16546_v55  ;;  %v16617_v55 = vld [vmem:[%s23166_s5 + $0x8b4] ss:$8 sps:$4 sm:$0xff]  }
 0x792   : > { %11297 = vmatprep.subr.bf16.mxu1 %v16554_v37  ;;  %v16612_v37 = vld [vmem:[%s23166_s5 + $0x8e0] ss:$8 sps:$4 sm:$0xff]  }
 0x793   : > { %11339 = vmatpush1.bf16.msra.mxu0 %v16549_v3  ;;  %v16620_v3 = vld [vmem:[%s23166_s5 + $0x974] ss:$8 sps:$4 sm:$0xff]  }
 0x794   : > { %11591 = vmatprep.subr.bf16.mxu0 %v16557_v57  ;;  %v16615_v57 = vld [vmem:[%s23166_s5 + $0x8b0] ss:$8 sps:$4 sm:$0xff]  }
 0x795   : > { %11298 = vmatpush1.bf16.msra.mxu1 %v16552_v58  ;;  %v16623_v58 = vld [vmem:[%s23166_s5 + $0x8a4] ss:$8 sps:$4 sm:$0xff]  }
 0x796   : > { %14182 = vmatmul.mubr.msk.bf16.vlgmr.msra.gmra.mxu0 %vm9474_vm3, %v11097_v18  ;;  %11299 = vmatprep.subr.bf16.mxu1 %v16560_v24  ;;  %v16618_v24 = vld [vmem:[%s23166_s5 + $0x970] ss:$8 sps:$4 sm:$0xff]   ;;  %v11405_v18 = vrot.slane %v22101_v36, 3  ;;  %v16629_v36 = vld [vmem:[%s23166_s5 + $0x894] ss:$8 sps:$4 sm:$0xff]  }
 0x797   : > { %11592 = vmatpush1.bf16.msra.mxu0 %v16555_v34  ;;  %11623 = vmatprep.mubr.bf16.mxu0 %v11404_v7 }
 0x798   : > { %11593 = vmatprep.subr.bf16.mxu0 %v16563_v8  ;;  %v16626_v8 = vld [vmem:[%s23166_s5 + $0x964] ss:$8 sps:$4 sm:$0xff]  }
 0x799   : > { %11300 = vmatpush2.bf16.msra.mxu1 %v16558_v12  ;;  %v16621_v12 = vld [vmem:[%s23166_s5 + $0x8a0] ss:$8 sps:$4 sm:$0xff]  }
 0x79a   : > { %11301 = vmatprep.subr.bf16.mxu1 %v16566_v10  ;;  %v11712_v10 = vrot.slane %v22175_v17, 4 }
 0x79b   : > { %11594 = vmatpush1.bf16.msra.mxu0 %v16561_v30 }
 0x79c   : > { %11595 = vmatprep.subr.bf16.mxu0 %v16569_v50 }
 0x79d   : > { %11302 = vmatpush2.bf16.msra.mxu1 %v16564_v60 }
 0x79e   : > { %11303 = vmatprep.subr.bf16.mxu1 %v16572_v5  ;;  %v16624_v5 = vld [vmem:[%s23166_s5 + $0x960] ss:$8 sps:$4 sm:$0xff]  }
 0x79f   : > { %11596 = vmatpush1.bf16.msra.mxu0 %v16567_v45  ;;  %v16632_v45 = vld [vmem:[%s23166_s5 + $0x954] ss:$8 sps:$4 sm:$0xff]  }
 0x7a0   : > { %v9512_v35 = vpop.f32.mrf.mxu1  ;;  %11597 = vmatprep.subr.bf16.mxu0 %v16575_v42 }
 0x7a1   : > { %v22814_v9 = vadd.f32 %v22699_v63, %v9512_v35  ;;  %11304 = vmatpush2.bf16.msra.mxu1 %v16570_v16  ;;  %v16593_v63 = vld [vmem:[%s23166_s5 + $0x7f4] ss:$8 sps:$4 sm:$0xff]   ;;  %v16627_v16 = vld [vmem:[%s23166_s5 + $0x890] ss:$8 sps:$4 sm:$0xff]  }
 0x7a2   : > { %v9514_v61 = vpop.f32.mrf.mxu1  ;;  %11305 = vmatprep.subr.bf16.mxu1 %v16578_v11  ;;  %v16630_v35 = vld [vmem:[%s23166_s5 + $0x950] ss:$8 sps:$4 sm:$0xff]  }
 0x7a3   : > { %11598 = vmatpush1.bf16.msra.mxu0 %v16573_v22  ;;  %v22823_v41 = vadd.f32 %v22707_v33, %v9514_v61  ;;  %v16596_v33 = vld [vmem:[%s23166_s5 + $0x754] ss:$8 sps:$4 sm:$0xff]   ;;  %v16635_v22 = vld [vmem:[%s23166_s5 + $0x884] ss:$8 sps:$4 sm:$0xff]  }
 0x7a4   : > { %v9516_v53 = vpop.f32.mrf.mxu1  ;;  %11599 = vmatprep.subr.bf16.mxu0 %v16581_v0 }
 0x7a5   : > { %11306 = vmatpush2.bf16.msra.mxu1 %v16576_v27  ;;  %v16633_v27 = vld [vmem:[%s23166_s5 + $0x880] ss:$8 sps:$4 sm:$0xff]   ;;  %v16644_v53 = vld [vmem:[%s23166_s5 + $0x934] ss:$8 sps:$4 sm:$0xff]  }
 0x7a6   : > { %v9517_v29 = vpop.f32.mrf.mxu1  ;;  %11307 = vmatprep.subr.bf16.mxu1 %v16584_v62  ;;  %v16641_v62 = vld [vmem:[%s23166_s5 + $0x874] ss:$8 sps:$4 sm:$0xff]  }
 0x7a7   : > { %11600 = vmatpush1.bf16.msra.mxu0 %v16579_v23  ;;  %v16647_v29 = vld [vmem:[%s23166_s5 + $0x864] ss:$8 sps:$4 sm:$0xff]  }
 0x7a8   : > { %v22840_v21 = vpop.f32.mrf.mxu1  ;;  %11601 = vmatprep.subr.bf16.mxu0 %v16587_v54  ;;  %v16639_v54 = vld [vmem:[%s23166_s5 + $0x870] ss:$8 sps:$4 sm:$0xff]  }
 0x7a9   : > { %11308 = vmatpush2.bf16.msra.mxu1 %v16582_v4 }
 0x7aa   : > { %v22848_v38 = vpop.f32.mrf.mxu1  ;;  %11309 = vmatprep.subr.bf16.mxu1 %v16590_v28  ;;  %v16642_v28 = vld [vmem:[%s23166_s5 + $0x930] ss:$8 sps:$4 sm:$0xff]  }
 0x7ab   : > { %11602 = vmatpush1.bf16.msra.mxu0 %v16585_v26  ;;  %v16650_v26 = vld [vmem:[%s23166_s5 + $0x924] ss:$8 sps:$4 sm:$0xff]  }
 0x7ac   : > { %v9821_v20 = vpop.f32.mrf.mxu1  ;;  %11603 = vmatprep.subr.bf16.mxu0 %v16593_v63  ;;  %v16653_v63 = vld [vmem:[%s23166_s5 + $0xa14] ss:$8 sps:$4 sm:$0xff]  }
 0x7ad   : > { %11310 = vmatpush2.bf16.msra.mxu1 %v16588_v49  ;;  %v16648_v49 = vld [vmem:[%s23166_s5 + $0x920] ss:$8 sps:$4 sm:$0xff]   ;;  %v16659_v20 = vld [vmem:[%s23166_s5 + $0xa04] ss:$8 sps:$4 sm:$0xff]  }
 0x7ae   : > { %v9822_v43 = vpop.f32.mrf.mxu1  ;;  %11311 = vmatprep.subr.bf16.mxu1 %v16596_v33  ;;  %v16651_v33 = vld [vmem:[%s23166_s5 + $0xa10] ss:$8 sps:$4 sm:$0xff]  }
 0x7af   : > { %11604 = vmatpush1.bf16.msra.mxu0 %v16591_v59  ;;  %v11403_v59 = vrot.slane %v22191_v31, 3  ;;  %v16657_v31 = vld [vmem:[%s23166_s5 + $0xa00] ss:$8 sps:$4 sm:$0xff]  }
 0x7b0   : > { %11605 = vmatprep.subr.bf16.mxu0 %v16599_v44  ;;  %v16654_v44 = vld [vmem:[%s23166_s5 + $0x910] ss:$8 sps:$4 sm:$0xff]   ;;  %v16660_v43 = vld [vmem:[%s23166_s5 + $0x900] ss:$8 sps:$4 sm:$0xff]  }
 0x7b1   : > { %11312 = vmatpush2.bf16.msra.mxu1 %v16594_v46  ;;  %v16662_v46 = vld [vmem:[%s23166_s5 + $0x904] ss:$8 sps:$4 sm:$0xff]  }
 0x7b2   : > { %11313 = vmatprep.subr.bf16.mxu1 %v16602_v56  ;;  %v16665_v56 = vld [vmem:[%s23166_s5 + $0x9f4] ss:$8 sps:$4 sm:$0xff]  }
 0x7b3   : > { %11606 = vmatpush1.bf16.msra.mxu0 %v16597_v32  ;;  %v11713_v32 = vrot.slane %v22095_v19, 4  ;;  %v16671_v19 = vld [vmem:[%s23166_s5 + $0x9d4] ss:$8 sps:$4 sm:$0xff]  }
 0x7b4   : > { %11607 = vmatprep.subr.bf16.mxu0 %v16605_v52  ;;  %v16663_v52 = vld [vmem:[%s23166_s5 + $0x9f0] ss:$8 sps:$4 sm:$0xff]  }
 0x7b5   : > { %11314 = vmatpush2.bf16.msra.mxu1 %v16600_v48  ;;  %v16666_v48 = vld [vmem:[%s23166_s5 + $0x9e0] ss:$8 sps:$4 sm:$0xff]  }
 0x7b6   : > { %11644 = vmatprep.subr.bf16.mxu1 %v16608_v14  ;;  %v16669_v14 = vld [vmem:[%s23166_s5 + $0x9d0] ss:$8 sps:$4 sm:$0xff]  }
 0x7b7   : > { %11608 = vmatpush2.bf16.msra.mxu0 %v16603_v1  ;;  %v16674_v1 = vld [vmem:[%s23166_s5 + $0x9c4] ss:$8 sps:$4 sm:$0xff]  }
 0x7b8   : > { %11316 = vmatmul.mubr.bf16.vlgmr.msra.gmra.mxu1 %v11095_v15  ;;  %11609 = vmatprep.subr.bf16.mxu0 %v16611_v47  ;;  %v16672_v15 = vld [vmem:[%s23166_s5 + $0x9c0] ss:$8 sps:$4 sm:$0xff]  }
 0x7b9   : > { %11645 = vmatpush1.bf16.msra.mxu1 %v16606_v13  ;;  %11664 = vmatprep.mubr.bf16.mxu1 %v17290_v2 }
 0x7ba   : > { %11646 = vmatprep.subr.bf16.mxu1 %v16614_v6 }
 0x7bb   : > { %11610 = vmatpush2.bf16.msra.mxu0 %v16609_v39  ;;  %v16677_v39 = vld [vmem:[%s23166_s5 + $0x9b4] ss:$8 sps:$4 sm:$0xff]  }
 0x7bc   : > { %11611 = vmatprep.subr.bf16.mxu0 %v16617_v55 }
 0x7bd   : > { %11647 = vmatpush1.bf16.msra.mxu1 %v16612_v37 }
 0x7be   : > { %v9776_v34 = vpop.f32.mrf.mxu0  ;;  %11899 = vmatprep.subr.bf16.mxu1 %v16620_v3 }
 0x7bf   : > { %v9777_v7 = vadd.f32 %v9776_v34, %v22814_v9  ;;  %11612 = vmatpush2.bf16.msra.mxu0 %v16615_v57  ;;  %v16638_v9 = vld [vmem:[%s23166_s5 + $0x944] ss:$8 sps:$4 sm:$0xff]  }
 0x7c0   : > { %v9778_v30 = vpop.f32.mrf.mxu0  ;;  %14219 = vmatmul.mubr.msk.bf16.vlgmr.msra.gmra.mxu1 %vm9474_vm3, %v11405_v18  ;;  %11613 = vmatprep.subr.bf16.mxu0 %v16623_v58  ;;  %v16675_v58 = vld [vmem:[%s23166_s5 + $0x9b0] ss:$8 sps:$4 sm:$0xff]   ;;  %v16680_v34 = vld [vmem:[%s23166_s5 + $0x9a4] ss:$8 sps:$4 sm:$0xff]  }
 0x7c1   : > { %v22926_v50 = vadd.f32 %v22840_v21, %v9777_v7  ;;  %v9779_v60 = vadd.f32 %v9778_v30, %v22823_v41  ;;  %11900 = vmatpush1.bf16.msra.mxu1 %v16618_v24  ;;  %11931 = vmatprep.mubr.bf16.mxu1 %v11712_v10  ;;  %v16636_v41 = vld [vmem:[%s23166_s5 + $0x940] ss:$8 sps:$4 sm:$0xff]   ;;  %v16681_v30 = vld [vmem:[%s23166_s5 + $0x990] ss:$8 sps:$4 sm:$0xff]  }
 0x7c2   : > { %v9780_v17 = vpop.f32.mrf.mxu0  ;;  %11901 = vmatprep.subr.bf16.mxu1 %v16626_v8  ;;  %v16645_v21 = vld [vmem:[%s23166_s5 + $0x860] ss:$8 sps:$4 sm:$0xff]  }
 0x7c3   : > { %v22936_v42 = vadd.f32 %v22848_v38, %v9779_v60  ;;  %11614 = vmatpush2.bf16.msra.mxu0 %v16621_v12  ;;  %v16656_v38 = vld [vmem:[%s23166_s5 + $0x914] ss:$8 sps:$4 sm:$0xff]   ;;  %v16678_v8 = vld [vmem:[%s23166_s5 + $0x9a0] ss:$8 sps:$4 sm:$0xff]  }
 0x7c4   : > { %v9781_v11 = vpop.f32.mrf.mxu0  ;;  %11615 = vmatprep.subr.bf16.mxu0 %v16629_v36  ;;  %v16683_v12 = vld [vmem:[%s23166_s5 + $0x994] ss:$8 sps:$4 sm:$0xff]   ;;  %v16684_v60 = vld [vmem:[%s23166_s5 + $0x980] ss:$8 sps:$4 sm:$0xff]  }
 0x7c5   : > { %11902 = vmatpush1.bf16.msra.mxu1 %v16624_v5  ;;  %v11711_v5 = vrot.slane %v22173_v25, 4  ;;  %v16688_v25 = vld [vmem:[%s23168_s7 + $0x38] sm:$0xff]  }
 0x7c6   : > { %v22947_v0 = vpop.f32.mrf.mxu0  ;;  %11903 = vmatprep.subr.bf16.mxu1 %v16632_v45 }
 0x7c7   : > { %11616 = vmatpush2.bf16.msra.mxu0 %v16627_v16 }
 0x7c8   : > { %v22955_v61 = vpop.f32.mrf.mxu0  ;;  %11617 = vmatprep.subr.bf16.mxu0 %v16635_v22 }
 0x7c9   : > { %11904 = vmatpush1.bf16.msra.mxu1 %v16630_v35 }
 0x7ca   : > { %v10130_v23 = vpop.f32.mrf.mxu0  ;;  %11905 = vmatprep.subr.bf16.mxu1 %v16638_v9 }
 0x7cb   : > { %11618 = vmatpush2.bf16.msra.mxu0 %v16633_v27  ;;  %v16689_v23 = vld [vmem:[%s23168_s7 + $0x70] sm:$0xff]  }
 0x7cc   : > { %v10131_v4 = vpop.f32.mrf.mxu0  ;;  %11619 = vmatprep.subr.bf16.mxu0 %v16641_v62 }
 0x7cd   : > { %11906 = vmatpush1.bf16.msra.mxu1 %v16636_v41  ;;  %v16687_v41 = vld [vmem:[%s23168_s7 + $0x78] sm:$0xff]   ;;  %v16692_v4 = vld [vmem:[%s23168_s7 + $0x28] sm:$0xff]  }
 0x7ce   : > { %11907 = vmatprep.subr.bf16.mxu1 %v16644_v53  ;;  %v16690_v53 = vld [vmem:[%s23168_s7 + $0x30] sm:$0xff]  }
 0x7cf   : > { %11620 = vmatpush2.bf16.msra.mxu0 %v16639_v54  ;;  %v16691_v54 = vld [vmem:[%s23168_s7 + $0x68] sm:$0xff]  }
 0x7d0   : > { %11621 = vmatprep.subr.bf16.mxu0 %v16647_v29  ;;  %v16693_v29 = vld [vmem:[%s23168_s7 + $0x60] sm:$0xff]  }
 0x7d1   : > { %11908 = vmatpush1.bf16.msra.mxu1 %v16642_v28  ;;  %v16694_v28 = vld [vmem:[%s23168_s7 + $0x20] sm:$0xff]  }
 0x7d2   : > { %11909 = vmatprep.subr.bf16.mxu1 %v16650_v26 }
 0x7d3   : > { %11622 = vmatpush2.bf16.msra.mxu0 %v16645_v21  ;;  %v16695_v21 = vld [vmem:[%s23168_s7 + $0x58] sm:$0xff]  }
 0x7d4   : > { %11952 = vmatprep.subr.bf16.mxu0 %v16653_v63 }
 0x7d5   : > { %11910 = vmatpush1.bf16.msra.mxu1 %v16648_v49 }
 0x7d6   : > { %11624 = vmatmul.mubr.bf16.vlgmr.msra.gmra.mxu0 %v11403_v59  ;;  %11911 = vmatprep.subr.bf16.mxu1 %v16656_v38  ;;  %v16696_v59 = vld [vmem:[%s23168_s7 + $0x18] sm:$0xff]  }
 0x7d7   : > { %11953 = vmatpush1.bf16.msra.mxu0 %v16651_v33  ;;  %11972 = vmatprep.mubr.bf16.mxu0 %v17290_v2  ;;  %v16668_v2 = vld [vmem:[%s23166_s5 + $0x9e4] ss:$8 sps:$4 sm:$0xff]  }
 0x7d8   : > { %11954 = vmatprep.subr.bf16.mxu0 %v16659_v20 }
 0x7d9   : > { %11912 = vmatpush1.bf16.msra.mxu1 %v16654_v44 }
 0x7da   : > { %11913 = vmatprep.subr.bf16.mxu1 %v16662_v46 }
 0x7db   : > { %11955 = vmatpush1.bf16.msra.mxu0 %v16657_v31 }
 0x7dc   : > { %14832 = vmatprep.subr.bf16.mxu0 %v16687_v41  ;;  %v333_v41 = vld [vmem:[%s23167_s6] sm:$0x3] }
 0x7dd   : > { %11914 = vmatpush1.bf16.msra.mxu1 %v16660_v43 }
 0x7de   : > { %14256 = vmatmul.mubr.msk.bf16.vlgmr.msra.gmra.mxu0 %vm9474_vm3, %v11713_v32  ;;  %11915 = vmatprep.subr.bf16.mxu1 %v16665_v56 }
 0x7df   : > { %14833 = vmatpush3.bf16.msra.mxu0 %v16688_v25 }
 0x7e0   : > { %14834 = vmatprep.subr.bf16.mxu0 %v16689_v23 }
 0x7e1   : > { %11916 = vmatpush2.bf16.msra.mxu1 %v16663_v52  ;;  %v16697_v52 = vld [vmem:[%s23168_s7 + $0x50] sm:$0xff]  }
 0x7e2   : > { %11917 = vmatprep.subr.bf16.mxu1 %v16668_v2  ;;  %v16698_v2 = vld [vmem:[%s23168_s7 + $0x10] sm:$0xff]  }
 0x7e3   : > { %14835 = vmatpush3.bf16.msra.mxu0 %v16690_v53 }
 0x7e4   : > { %14836 = vmatprep.subr.bf16.mxu0 %v16691_v54  ;;  %v11987_v54 = vrot.slane %v333_v41, %v19787_v51 }
 0x7e5   : > { %11918 = vmatpush2.bf16.msra.mxu1 %v16666_v48  ;;  %v16699_v48 = vld [vmem:[%s23168_s7 + $0x48] sm:$0xff]  }
 0x7e6   : > { %11919 = vmatprep.subr.bf16.mxu1 %v16671_v19  ;;  %v16700_v19 = vld [vmem:[%s23168_s7 + $0x8] sm:$0xff]  }
 0x7e7   : > { %14837 = vmatpush3.bf16.msra.mxu0 %v16692_v4 }
 0x7e8   : > { %v10085_v47 = vpop.f32.mrf.mxu1  ;;  %14838 = vmatprep.subr.bf16.mxu0 %v16693_v29 }
 0x7e9   : > { %v10127_v13 = vadd.f32 %v22947_v0, %v10085_v47  ;;  %11920 = vmatpush2.bf16.msra.mxu1 %v16669_v14  ;;  %v16701_v14 = vld [vmem:[%s23168_s7 + $0x40] sm:$0xff]  }
 0x7ea   : > { %v10087_v6 = vpop.f32.mrf.mxu1  ;;  %11921 = vmatprep.subr.bf16.mxu1 %v16674_v1  ;;  %v16702_v1 = vld [vmem:[%s23168_s7] sm:$0xff]  }
 0x7eb   : > { %v10133_v55 = vadd.f32 %v10127_v13, %v22926_v50  ;;  %v10129_v37 = vadd.f32 %v22955_v61, %v10087_v6  ;;  %v16686_v50 = vld [vmem:[%s23166_s5 + $0x984] ss:$8 sps:$4 sm:$0xff]   ;;  %14839 = vmatpush3.bf16.msra.mxu0 %v16694_v28 }
 0x7ec   : > { %v10089_v3 = vpop.f32.mrf.mxu1  ;;  %14840 = vmatprep.subr.bf16.mxu0 %v16695_v21  ;;  %v11991_v21 = vrot.slane %v333_v41, %v21203_v40 }
 0x7ed   : > { %v10134_v57 = vadd.f32 %v10129_v37, %v22936_v42  ;;  %11922 = vmatpush2.bf16.msra.mxu1 %v16672_v15 }
 0x7ee   : > { %v10090_v24 = vpop.f32.mrf.mxu1  ;;  %11923 = vmatprep.subr.bf16.mxu1 %v16677_v39 }
 0x7ef   : > { %14841 = vmatpush3.bf16.msra.mxu0 %v16696_v59 }
 0x7f0   : > { %v10434_v18 = vpop.f32.mrf.mxu1  ;;  %14842 = vmatprep.subr.bf16.mxu0 %v16697_v52 }
 0x7f1   : > { %11924 = vmatpush2.bf16.msra.mxu1 %v16675_v58 }
 0x7f2   : > { %v10436_v7 = vpop.f32.mrf.mxu1  ;;  %11925 = vmatprep.subr.bf16.mxu1 %v16680_v34 }
 0x7f3   : > { %14843 = vmatpush3.bf16.msra.mxu0 %v16698_v2 }
 0x7f4   : > { %v10438_v10 = vpop.f32.mrf.mxu1  ;;  %14844 = vmatprep.subr.bf16.mxu0 %v16699_v48 }
 0x7f5   : > { %11926 = vmatpush2.bf16.msra.mxu1 %v16678_v8 }
 0x7f6   : > { %v10439_v36 = vpop.f32.mrf.mxu1  ;;  %11927 = vmatprep.subr.bf16.mxu1 %v16683_v12 }
 0x7f7   : > { %14845 = vmatpush3.bf16.msra.mxu0 %v16700_v19 }
 0x7f8   : > { %14846 = vmatprep.subr.bf16.mxu0 %v16701_v14 }
 0x7f9   : > { %11928 = vmatpush2.bf16.msra.mxu1 %v16681_v30 }
 0x7fa   : > { %11929 = vmatprep.subr.bf16.mxu1 %v16686_v50 }
 0x7fb   : > { %14847 = vmatpush3.bf16.msra.mxu0 %v16702_v1 }
 0x7fd   : > { %11930 = vmatpush2.bf16.msra.mxu1 %v16684_v60 }
 0x800   : > { %11932 = vmatmul.mubr.bf16.vlgmr.msra.gmra.mxu1 %v11711_v5 }
 0x806   : > { %v10393_v17 = vpop.f32.mrf.mxu0 }
 0x807   : > { %v10435_v45 = vadd.f32 %v10434_v18, %v10393_v17 }
 0x808   : > { %v10395_v42 = vpop.f32.mrf.mxu0 }
 0x809   : > { %v10441_v16 = vadd.f32 %v10435_v45, %v10133_v55  ;;  %v10437_v11 = vadd.f32 %v10436_v7, %v10395_v42 }
 0x80a   : > { %v10397_v22 = vpop.f32.mrf.mxu0 }
 0x80b   : > { %v10442_v35 = vadd.f32 %v10437_v11, %v10134_v57 }
 0x80c   : > { %v10398_v0 = vpop.f32.mrf.mxu0 }
 0x80e   : > { %v10742_v9 = vpop.f32.mrf.mxu0 }
 0x810   : > { %v10744_v27 = vpop.f32.mrf.mxu0 }
 0x812   : > { %v10746_v61 = vpop.f32.mrf.mxu0 }
 0x814   : > { %v10747_v62 = vpop.f32.mrf.mxu0 }
 0x830   : > { %v10701_v26 = vpop.f32.mrf.mxu1 }
 0x831   : > { %v10743_v63 = vadd.f32 %v10742_v9, %v10701_v26 }
 0x832   : > { %v10703_v49 = vpop.f32.mrf.mxu1 }
 0x833   : > { %v10749_v38 = vadd.f32 %v10743_v63, %v10441_v16  ;;  %v10745_v33 = vadd.f32 %v10744_v27, %v10703_v49 }
 0x834   : > { %v10705_v20 = vpop.f32.mrf.mxu1 }
 0x835   : > { %v10750_v44 = vadd.f32 %v10745_v33, %v10442_v35 }
 0x836   : > { %v10706_v46 = vpop.f32.mrf.mxu1 }
 0x838   : > { %v11050_v31 = vpop.f32.mrf.mxu1 }
 0x83a   : > { %v11052_v43 = vpop.f32.mrf.mxu1 }
 0x83c   : > { %v11054_v56 = vpop.f32.mrf.mxu1 }
 0x83e   : > { %v11055_v32 = vpop.f32.mrf.mxu1 }
 0x84e   : > { %v11009_v47 = vpop.f32.mrf.mxu0 }
 0x84f   : > { %v11051_v13 = vadd.f32 %v11050_v31, %v11009_v47 }
 0x850   : > { %v11011_v15 = vpop.f32.mrf.mxu0 }
 0x851   : > { %v11057_v6 = vadd.f32 %v11051_v13, %v10749_v38  ;;  %v11053_v39 = vadd.f32 %v11052_v43, %v11011_v15  ;;  %v334_v43 = vld [vmem:[%s23169_s8] sm:$0x1] }
 0x852   : > { %v11013_v55 = vpop.f32.mrf.mxu0 }
 0x853   : > { %v11058_v37 = vadd.f32 %v11053_v39, %v10750_v44 }
 0x854   : > { %v11014_v3 = vpop.f32.mrf.mxu0 }
 0x856   : > { %v11358_v57 = vpop.f32.mrf.mxu0 }
 0x858   : > { %v11360_v58 = vpop.f32.mrf.mxu0 }
 0x85a   : > { %v11362_v24 = vpop.f32.mrf.mxu0 }
 0x85c   : > { %v11363_v34 = vpop.f32.mrf.mxu0 }
 0x878   : > { %v11317_v18 = vpop.f32.mrf.mxu1 }
 0x879   : > { %v11359_v8 = vadd.f32 %v11358_v57, %v11317_v18 }
 0x87a   : > { %v11319_v7 = vpop.f32.mrf.mxu1 }
 0x87b   : > { %v11365_v12 = vadd.f32 %v11359_v8, %v11057_v6  ;;  %v11361_v10 = vadd.f32 %v11360_v58, %v11319_v7 }
 0x87c   : > { %v11321_v30 = vpop.f32.mrf.mxu1 }
 0x87d   : > { %v11366_v36 = vadd.f32 %v11361_v10, %v11058_v37 }
 0x87e   : > { %v11322_v50 = vpop.f32.mrf.mxu1 }
 0x880   : > { %v11666_v60 = vpop.f32.mrf.mxu1 }
 0x882   : > { %v11668_v5 = vpop.f32.mrf.mxu1 }
 0x884   : > { %v11670_v17 = vpop.f32.mrf.mxu1 }
 0x886   : > { %v11671_v45 = vpop.f32.mrf.mxu1 }
 0x896   : > { %v11625_v42 = vpop.f32.mrf.mxu0 }
 0x897   : > { %v11667_v16 = vadd.f32 %v11666_v60, %v11625_v42 }
 0x898   : > { %v11627_v11 = vpop.f32.mrf.mxu0 }
 0x899   : > { %v11673_v22 = vadd.f32 %v11667_v16, %v11365_v12  ;;  %v11669_v25 = vadd.f32 %v11668_v5, %v11627_v11 }
 0x89a   : > { %v11629_v35 = vpop.f32.mrf.mxu0 }
 0x89b   : > { %v11674_v29 = vadd.f32 %v11669_v25, %v11366_v36 }
 0x89c   : > { %v11630_v0 = vpop.f32.mrf.mxu0 }
 0x89e   : > { %v11974_v9 = vpop.f32.mrf.mxu0 }
 0x8a0   : > { %v11976_v27 = vpop.f32.mrf.mxu0 }
 0x8a2   : > { %v11978_v61 = vpop.f32.mrf.mxu0 }
 0x8a4   : > { %v11979_v62 = vpop.f32.mrf.mxu0 }
 0x8c0   : > { %v11933_v23 = vpop.f32.mrf.mxu1 }
 0x8c1   : > { %v11975_v53 = vadd.f32 %v11974_v9, %v11933_v23 }
 0x8c2   : > { %v11935_v4 = vpop.f32.mrf.mxu1 }
 0x8c3   : > { %v11981_v28 = vadd.f32 %v11975_v53, %v11673_v22  ;;  %v11977_v26 = vadd.f32 %v11976_v27, %v11935_v4 }
 0x8c4   : > { %v11937_v63 = vpop.f32.mrf.mxu1 }
 0x8c5   : > { %v11994_v49 = vadd.f32 %v11987_v54, %v11981_v28  ;;  %v11982_v38 = vadd.f32 %v11977_v26, %v11674_v29 }
 0x8c6   : > { %v11938_v33 = vpop.f32.mrf.mxu1 }
 0x8c7   : > { %v11995_v59 = vadd.f32 %v11991_v21, %v11982_v38  ;;  %v11996_v20 = vmax.f32 %v11994_v49, 0.0 }
 0x8c9   : > { %v11997_v44 = vmax.f32 %v11995_v59, 0.0  ;;  %v11998_v31 = vpack.c.bf16 %v11996_v20, %v11996_v20 }
 0x8cb   : > { %v11999_v46 = vpack.c.bf16 %v11997_v44, %v11997_v44 }
 0x8cd   : > { %12160 = vmatprep.mubr.bf16.mxu0 %v11999_v46 }
 0x8ce   : > { %12161 = vmatmul.mubr.bf16.vlgmr.msra.gmra.mxu0 %v11998_v31 }
 0x98e   : > { %v14848_v51 = vpop.f32.mrf.mxu0 }
 0x990   : > { %v14849_v40 = vpop.f32.mrf.mxu0 }
 0x991   : > { %v14850_v56 = vadd.f32 %v14849_v40, %v14848_v51 }
 0x992   : > { %v14851_v32 = vpop.f32.mrf.mxu0 }
 0x993   : > { %v12163_v52 = vadd.f32 %v14850_v56, %v334_v43 }
 0x994   : > { %v14852_v2 = vpop.f32.mrf.mxu0 }
 0x995   : > { %12168 = vst [vmem:[%s324_s26] sm:$0x1] %v12163_v52 }
 0x996   : > { %17241 = shalt.err (!%p17238_p3)
}
 0x997   : > { %s17242_s25 = scalar_lea.hbm %s23126_s16, 16  ;;  %s17246_s26 = scalar_lea.hbm %s23170_s9, 32 }
 0x998   : > { %p17243_p4 = scmp.ne.s32.totalorder %s23126_s16, %s17242_s25  ;;  %p17247_p9 = scmp.lt.s32.totalorder %s23126_s16, %s23170_s9 }
 0x999   : > { %p17248_p10 = scmp.lt.s32.totalorder %s17246_s26, %s17242_s25 }
 0x99a   : > { %p17244_p7 = pnand %p17243_p4, %p17382_p5 }
 0x99b   : > { %p17249_p11 = por %p17248_p10, %p17247_p9 }
 0x99c   : > { %p17245_p8 = pneg %p17244_p7 }
 0x99e   : > { %p17250_p12 = pnand %p17249_p11, %p17245_p8 }
 0x9a0   : > { %17253 = shalt.err (!%p17250_p12)
}
 0x9a1   : > { %15127 = dma.vmem_to_hbm [thread:$0]  (%p17382_p5), %s12183_s28, 16, %s23126_s16, %s12170_s17  }
 0x9a2 PF: > { %p15133_p13 = scmp.ge.s32.totalorder %s17288_s12, 2  ;;  %s12194_s21 = sand.u32 1, %s17276_s30  }
 0x9a3   : > { %s12195_s13 = scalar_lea.sflag [#allocation3], %s12194_s21 }
 0x9a4   : > { %p15130_p0 = pnand %p15133_p13, %p17386_p6 }
 0x9a6   : > { %p15131_p1 = pneg %p15130_p0 }
 0x9a8   : > { %17271 = dma.done.wait (%p15131_p1), %s12195_s13, 16  }
 0x9a9   : > { %17273 = vsyncadd (%p15131_p1), %s12195_s13, 4294967280  ;;  %p19_p2 = scmp.ge.s32.totalorder %s17369_s15, 4   ;;  %s23173_s30 = smov %s17280_s10 }
 0x9aa   : > { %s23174_s10 = smov %s17284_s11  ;;  %s23175_s11 = smov %s17380_s18 }
 0x9ab   : > { %s23176_s12 = smov %s17369_s15  ;;  %21 = sbr.rel (!%p19_p2) target bundleno = 3 (0x3), region = 108 }
 0x9b0   :  { %12199 = vsyncpa [#allocation3], 1 }
 0x9b1   :  { %12201 = vsyncpa [#allocation3 + $0x1], 1 }

</bundles_post_ra>
